<compile_context>
chip_gen: v5e
topology: v5e:2x2
jax: 0.10.0
libtpu: 0.0.40
codegen_flags: <defaults>
</compile_context>

<pallas_src>
import jax
import jax.numpy as jnp
from jax.experimental import pallas as pl
from jax.experimental.pallas import tpu as pltpu


# ---------------------------------------------------------------------------
# Pallas kernels
# ---------------------------------------------------------------------------

def conv_matmul_kernel(x_ref, w_ref, b_ref, o_ref, acc_ref):
  """K-pipelined tile of the flattened conv:
     acc(f32) += (Mp, tk)bf16 @ (tk, 128)bf16 ; bias+ReLU epilogue at k==last."""
  k = pl.program_id(1)

  @pl.when(k == 0)
  def _():
    acc_ref[...] = jnp.zeros_like(acc_ref)

  acc_ref[...] += jnp.dot(x_ref[...], w_ref[...],
                          preferred_element_type=jnp.float32)

  @pl.when(k == pl.num_programs(1) - 1)
  def _():
    o_ref[...] = jnp.maximum(acc_ref[...] + b_ref[...], 0.0)


def make_tail_kernel(hw0, hw1):
  """Fused tail: top_smooth + all three cls heads + boxes_to_classes + final classifier.

  hw0 / hw1 : static H*W of the smooth2 / smooth3 feature maps (bias is added
              at every spatial position in the PyTorch conv, so the spatial sum
              contributes H*W * bias).
  """

  def kernel(s2_ref, s3_ref, xt_ref,
             w_t1_ref, b_t1_ref, w_t2_ref, b_t2_ref,
             w_c0_ref, b_c0_ref, w_c1_ref, b_c1_ref, w_c2_ref, b_c2_ref,
             w_box_ref, b_box_ref, w_fin_ref, b_fin_ref, o_ref):

    def shifted_sums(m):
      """m: (B, H, W, Cin) -> (B, 9*Cin): spatial sums of the 9 3x3-shifted windows
      of the zero-padded map (tap order (dy, dx), channel-minor — matches the
      (3,3,Cin,C) -> (9*Cin, C) weight reshape)."""
      H, W = m.shape[1], m.shape[2]
      rows = (jnp.sum(m[:, :H - 1], axis=1),   # dy = 0
              jnp.sum(m, axis=1),              # dy = 1
              jnp.sum(m[:, 1:], axis=1))       # dy = 2   -> each (B, W, Cin)
      parts = []
      for dy in range(3):
        a = rows[dy]
        parts.append(jnp.sum(a[:, :W - 1], axis=1))   # dx = 0
        parts.append(jnp.sum(a, axis=1))              # dx = 1
        parts.append(jnp.sum(a[:, 1:], axis=1))       # dx = 2
      return jnp.concatenate(parts, axis=-1)          # (B, 9*Cin)

    # top_smooth: 1x1 conv(1536->256)+ReLU, 1x1 conv(256->256)+ReLU on the 1x1 map
    h = jnp.dot(xt_ref[...], w_t1_ref[...], preferred_element_type=jnp.float32)
    h = jnp.maximum(h + b_t1_ref[...], 0.0)
    st = jnp.dot(h, w_t2_ref[...], preferred_element_type=jnp.float32)
    st = jnp.maximum(st + b_t2_ref[...], 0.0)

    # cls level 2: 3x3 conv on a 1x1 zero-padded map, spatially summed
    #   -> only the center tap contributes: (B,256) @ w[1,1] + bias.
    p2 = jnp.dot(st, w_c2_ref[...], preferred_element_type=jnp.float32) + b_c2_ref[...]

    # cls levels 0/1: the spatial sum commutes with the (linear, relu=False) conv,
    # so one small matmul per level replaces the full 3x3 conv over the map.
    # (weights are streamed as bf16; the dot accumulates in f32.)
    ss0 = shifted_sums(s2_ref[...]).astype(jnp.bfloat16)
    ss1 = shifted_sums(s3_ref[...]).astype(jnp.bfloat16)
    p0 = jnp.dot(ss0, w_c0_ref[...],
                 preferred_element_type=jnp.float32) + hw0 * b_c0_ref[...]
    p1 = jnp.dot(ss1, w_c1_ref[...],
                 preferred_element_type=jnp.float32) + hw1 * b_c1_ref[...]

    # boxes_to_classes: per-class Linear(3, 1) across the three levels
    wb = w_box_ref[...]                                   # (3, C)
    merged = (p0 * wb[0:1, :] + p1 * wb[1:2, :] + p2 * wb[2:3, :] + b_box_ref[...])
    merged = jnp.maximum(merged, 0.0)
    # TODO(synk): nn.Dropout(p=0.4) is identity in eval mode; training-mode
    #             stochastic masking is not implemented.
    o_ref[...] = jnp.dot(merged, w_fin_ref[...],
                         preferred_element_type=jnp.float32) + b_fin_ref[...]

  return kernel


# ---------------------------------------------------------------------------
# Wrappers (glue): im2col layout plumbing + pallas_call plumbing
# ---------------------------------------------------------------------------

def _round_up(x, m):
  return ((x + m - 1) // m) * m


def conv3x3_relu_flat(x_nhwc, w, b, *, tn=128, tk_target=2048):
  """3x3 / stride 1 / padding 1 conv + ReLU as one K-pipelined flattened matmul.

  Batch and spatial dims are folded into a single M block (weights are streamed
  exactly once); the 9 taps fold into K which is tiled into ~2K-wide 128-aligned
  chunks (arbitrary axis, f32 accumulator); Cout is tiled into 128-wide lanes
  (leading parallel axis -> both v7x TensorCores get work).
  """
  B, H, W, Cin = x_nhwc.shape
  Cout = w.shape[-1]
  K = 9 * Cin
  M = B * H * W

  # im2col (pure layout plumbing; the matmul runs in Pallas). bf16 halves DMA.
  xp = jnp.pad(x_nhwc, ((0, 0), (1, 1), (1, 1), (0, 0))).astype(jnp.bfloat16)
  taps = [xp[:, dy:dy + H, dx:dx + W, :] for dy in range(3) for dx in range(3)]
  patches = jnp.concatenate(taps, axis=-1).reshape(M, K)

  # Padding: M -> one whole block; K -> nk * tk (128-aligned reduction tiles);
  # Cout -> multiple of 128 (unmasked lane-dense stores, clean N tiles).
  Mp = _round_up(max(M, 8), 32)
  Kp128 = _round_up(K, 128)
  nk = max(1, -(-Kp128 // tk_target))
  tk = _round_up(-(-Kp128 // nk), 128)
  Kp = nk * tk
  Coutp = _round_up(Cout, tn)
  nn = Coutp // tn

  patches = jnp.pad(patches, ((0, Mp - M), (0, Kp - K)))
  wflat = jnp.pad(w.reshape(K, Cout).astype(jnp.bfloat16),
                  ((0, Kp - K), (0, Coutp - Cout)))          # tap-major, ch-minor
  b2 = jnp.pad(b.astype(jnp.float32).reshape(1, Cout),
               ((0, 0), (0, Coutp - Cout)))

  out = pl.pallas_call(
      conv_matmul_kernel,
      out_shape=jax.ShapeDtypeStruct((Mp, Coutp), jnp.float32),
      grid_spec=pltpu.PrefetchScalarGridSpec(
          num_scalar_prefetch=0,
          grid=(nn, nk),                                      # (N parallel, K arbitrary)
          in_specs=[
              pl.BlockSpec((Mp, tk), lambda n, k: (0, k)),    # patches: stream over K
              pl.BlockSpec((tk, tn), lambda n, k: (k, n)),    # weight:  stream over (K, N)
              pl.BlockSpec((1, tn), lambda n, k: (0, n)),     # bias
          ],
          out_specs=pl.BlockSpec((Mp, tn), lambda n, k: (0, n)),
          scratch_shapes=[pltpu.VMEM((Mp, tn), jnp.float32)]),
      compiler_params=pltpu.CompilerParams(
          dimension_semantics=("parallel", "arbitrary"),
          # K-tiled buffers are ~0.5-3.5 MB each; 32 MiB leaves ample headroom
          # and stays well inside v7x's 64 MiB per-TC VMEM.
          vmem_limit_bytes=32 * 1024 * 1024),
  )(patches, wflat, b2)

  return out[:M, :Cout].reshape(B, H, W, Cout)


def furniture_forward(params, feat_a_nchw, feat_b_nchw, feat_top_nchw):
  """Forward pass from the three backbone features to the class logits."""
  # NCHW -> NHWC (layout plumbing)
  fa = jnp.transpose(feat_a_nchw, (0, 2, 3, 1))      # (B, Ha, Wa, 1088)
  fb = jnp.transpose(feat_b_nchw, (0, 2, 3, 1))      # (B, Hb, Wb, 2080)
  B = fa.shape[0]
  C = params["fin_b"].shape[0]

  # smooth2 / smooth3: Conv3x3 + ReLU (K-pipelined im2col matmuls on the MXU)
  s2 = conv3x3_relu_flat(fa, params["smooth2_w"], params["smooth2_b"])   # (B,Ha,Wa,256)
  s3 = conv3x3_relu_flat(fb, params["smooth3_w"], params["smooth3_b"])   # (B,Hb,Wb,320)

  xt = feat_top_nchw.reshape(B, -1)                  # (B, 1536), top map is 1x1

  # cls weights reshaped for the fused tail kernel (large ones stream as bf16)
  w_c0 = params["cls_w"][0].reshape(-1, C).astype(jnp.bfloat16)   # (9*256, C)
  w_c1 = params["cls_w"][1].reshape(-1, C).astype(jnp.bfloat16)   # (9*320, C)
  w_c2 = params["cls_w"][2][1, 1]                                 # (256, C) center tap

  H2, W2 = s2.shape[1], s2.shape[2]
  H3, W3 = s3.shape[1], s3.shape[2]

  out = pl.pallas_call(
      make_tail_kernel(float(H2 * W2), float(H3 * W3)),
      out_shape=jax.ShapeDtypeStruct((B, C), jnp.float32),
  )(s2, s3, xt,
    params["top1_w"], params["top1_b"].reshape(1, -1),
    params["top2_w"], params["top2_b"].reshape(1, -1),
    w_c0, params["cls_b"][0].reshape(1, -1),
    w_c1, params["cls_b"][1].reshape(1, -1),
    w_c2, params["cls_b"][2].reshape(1, -1),
    params["box_wT"], params["box_b"].reshape(1, -1),
    params["fin_wT"], params["fin_b"].reshape(1, -1))
  return out


# ---------------------------------------------------------------------------
# Deterministic parameter initialization (synthetic, no checkpoint)
# ---------------------------------------------------------------------------

def init_params(key, num_classes):
  ks = iter(jax.random.split(key, 32))

  def conv_w(cin, cout, kh=3, kw=3):
    fan_in = kh * kw * cin
    return jax.random.normal(next(ks), (kh, kw, cin, cout),
                             jnp.float32) / jnp.sqrt(fan_in)

  def vec(n, scale=0.01):
    return jax.random.normal(next(ks), (n,), jnp.float32) * scale

  def lin_wT(cin, cout):
    return jax.random.normal(next(ks), (cin, cout),
                             jnp.float32) / jnp.sqrt(cin)

  params = {
      # smooth2: Conv2d(1088, 256, 3, padding=1) + ReLU
      "smooth2_w": conv_w(1088, 256), "smooth2_b": vec(256),
      # smooth3: Conv2d(2080, 320, 3, padding=1) + ReLU
      "smooth3_w": conv_w(2080, 320), "smooth3_b": vec(320),
      # top_smooth: Conv2d(1536, 256, 1) + ReLU, Conv2d(256, 256, 1) + ReLU
      "top1_w": lin_wT(1536, 256), "top1_b": vec(256),
      "top2_w": lin_wT(256, 256), "top2_b": vec(256),
      # cls_layers: Conv2d(in_ch, num_anchors*num_classes, 3, padding=1)
      "cls_w": (conv_w(256, num_classes),
                conv_w(320, num_classes),
                conv_w(256, num_classes)),
      "cls_b": (vec(num_classes), vec(num_classes), vec(num_classes)),
      # boxes_to_classes: num_classes x Linear(3, 1)  -> wT shape (3, C)
      "box_wT": lin_wT(3, num_classes), "box_b": vec(num_classes),
      # final_classifier: Linear(num_classes, num_classes) (stored transposed)
      "fin_wT": lin_wT(num_classes, num_classes), "fin_b": vec(num_classes),
  }
  return params


# ---------------------------------------------------------------------------
# Main
# ---------------------------------------------------------------------------

if __name__ == "__main__":
  NUM_CLASSES = 128      # iMaterialist furniture: 128 classes
  B = 2
  # Small stand-ins for the real featuremap sizes (20, 9, 1):
  HA = WA = 8            # feature after low_features_b   -> 1088 channels
  HB = WB = 4            # feature after mid_features     -> 2080 channels
  # top_features output is 1x1 (after conv2d_7b + ReLU + avgpool) -> 1536 ch

  key = jax.random.PRNGKey(0)
  k_a, k_b, k_t, k_p = jax.random.split(key, 4)

  # Backbone intermediate features, NCHW like PyTorch (transposed in glue).
  feat_a = jax.random.normal(k_a, (B, 1088, HA, WA), jnp.float32)
  feat_b = jax.random.normal(k_b, (B, 2080, HB, WB), jnp.float32)
  feat_top = jax.random.normal(k_t, (B, 1536, 1, 1), jnp.float32)

  params = init_params(k_p, NUM_CLASSES)

  fwd = jax.jit(furniture_forward)
  out = fwd(params, feat_a, feat_b, feat_top)
  out = jax.block_until_ready(out)
  assert out.shape == (B, NUM_CLASSES), out.shape
  assert out.dtype == jnp.float32
  assert bool(jnp.all(jnp.isfinite(out)))
  print("KERNEL_OK")
</pallas_src>

<mosaic_0001>
module attributes {stable_mosaic.version = 11 : i64} {
  func.func @conv_matmul_kernel(%arg0: i32, %arg1: i32, %arg2: memref<32x1920xbf16, #tpu.memory_space<vmem>>, %arg3: memref<1920x128xbf16, #tpu.memory_space<vmem>>, %arg4: memref<1x128xf32, #tpu.memory_space<vmem>>, %arg5: memref<32x128xf32, #tpu.memory_space<vmem>>, %arg6: memref<32x128xf32, #tpu.memory_space<vmem>>) attributes {dimension_semantics = [#tpu.dimension_semantics<parallel>, #tpu.dimension_semantics<arbitrary>], iteration_bounds = array<i64: 3, 10>, scalar_prefetch = 0 : i64, scratch_operands = 1 : i64, tpu.core_type = #tpu.core_type<tc>, window_params = [{transform_indices = @transform_0, window_bounds = array<i64: 32, 1920>}, {transform_indices = @transform_1, window_bounds = array<i64: 1920, 128>}, {transform_indices = @transform_2, window_bounds = array<i64: 1, 128>}, {transform_indices = @transform_3, window_bounds = array<i64: 32, 128>}]} {
    %c0_i32 = arith.constant 0 : i32
    %0 = arith.cmpi eq, %arg1, %c0_i32 : i32
    %1 = arith.extui %0 : i1 to i32
    %c0_i32_0 = arith.constant 0 : i32
    %2 = arith.cmpi ne, %1, %c0_i32_0 : i32
    scf.if %2 {
      %cst_9 = arith.constant 0.000000e+00 : f32
      %12 = vector.broadcast %cst_9 : f32 to vector<32x128xf32>
      %c0_10 = arith.constant 0 : index
      %c0_11 = arith.constant 0 : index
      %13 = vector.load %arg6[%c0_10, %c0_11] : memref<32x128xf32, #tpu.memory_space<vmem>>, vector<32x128xf32>
      tpu.vector_store %arg6[%c0_10, %c0_11], %12 {strides = array<i32>} : memref<32x128xf32, #tpu.memory_space<vmem>>, vector<32x128xf32>,
    } else {
    }
    %c0 = arith.constant 0 : index
    %c0_1 = arith.constant 0 : index
    %3 = vector.load %arg6[%c0, %c0_1] : memref<32x128xf32, #tpu.memory_space<vmem>>, vector<32x128xf32>
    %c0_2 = arith.constant 0 : index
    %c0_3 = arith.constant 0 : index
    %4 = vector.load %arg2[%c0_2, %c0_3] : memref<32x1920xbf16, #tpu.memory_space<vmem>>, vector<32x1920xbf16>
    %c0_4 = arith.constant 0 : index
    %c0_5 = arith.constant 0 : index
    %5 = vector.load %arg3[%c0_4, %c0_5] : memref<1920x128xbf16, #tpu.memory_space<vmem>>, vector<1920x128xbf16>
    %cst = arith.constant dense<0.000000e+00> : vector<32x128xf32>
    %6 = tpu.matmul %4, %5, %cst {dimension_numbers = #tpu.dot_dimension_numbers<[1], [0], [0], [1], [0, 0, 1, 1], [], []>} : vector<32x1920xbf16>, vector<1920x128xbf16>, vector<32x128xf32> -> vector<32x128xf32>
    %7 = arith.addf %3, %6 : vector<32x128xf32>
    %c0_6 = arith.constant 0 : index
    %c0_7 = arith.constant 0 : index
    %8 = vector.load %arg6[%c0_6, %c0_7] : memref<32x128xf32, #tpu.memory_space<vmem>>, vector<32x128xf32>
    tpu.vector_store %arg6[%c0_6, %c0_7], %7 {strides = array<i32>} : memref<32x128xf32, #tpu.memory_space<vmem>>, vector<32x128xf32>,
    %c9_i32 = arith.constant 9 : i32
    %9 = arith.cmpi eq, %arg1, %c9_i32 : i32
    %10 = arith.extui %9 : i1 to i32
    %c0_i32_8 = arith.constant 0 : i32
    %11 = arith.cmpi ne, %10, %c0_i32_8 : i32
    scf.if %11 {
      %c0_9 = arith.constant 0 : index
      %c0_10 = arith.constant 0 : index
      %12 = vector.load %arg6[%c0_9, %c0_10] : memref<32x128xf32, #tpu.memory_space<vmem>>, vector<32x128xf32>
      %c0_11 = arith.constant 0 : index
      %c0_12 = arith.constant 0 : index
      %13 = vector.load %arg4[%c0_11, %c0_12] : memref<1x128xf32, #tpu.memory_space<vmem>>, vector<1x128xf32>
      %14 = vector.broadcast %13 : vector<1x128xf32> to vector<32x128xf32>
      %15 = arith.addf %12, %14 : vector<32x128xf32>
      %cst_13 = arith.constant 0.000000e+00 : f32
      %16 = vector.broadcast %cst_13 : f32 to vector<32x128xf32>
      %17 = arith.maximumf %15, %16 : vector<32x128xf32>
      %c0_14 = arith.constant 0 : index
      %c0_15 = arith.constant 0 : index
      %18 = vector.load %arg5[%c0_14, %c0_15] : memref<32x128xf32, #tpu.memory_space<vmem>>, vector<32x128xf32>
      tpu.vector_store %arg5[%c0_14, %c0_15], %17 {strides = array<i32>} : memref<32x128xf32, #tpu.memory_space<vmem>>, vector<32x128xf32>,
    } else {
    }
    return
  }
  func.func @transform_0(%arg0: i32, %arg1: i32) -> (i32, i32) {
    %c0_i32 = arith.constant 0 : i32
    %c0_i32_0 = arith.constant 0 : i32
    return %c0_i32, %arg1 : i32, i32
  }
  func.func @transform_1(%arg0: i32, %arg1: i32) -> (i32, i32) {
    %c0_i32 = arith.constant 0 : i32
    return %arg1, %arg0 : i32, i32
  }
  func.func @transform_2(%arg0: i32, %arg1: i32) -> (i32, i32) {
    %c0_i32 = arith.constant 0 : i32
    %c0_i32_0 = arith.constant 0 : i32
    return %c0_i32, %arg0 : i32, i32
  }
  func.func @transform_3(%arg0: i32, %arg1: i32) -> (i32, i32) {
    %c0_i32 = arith.constant 0 : i32
    %c0_i32_0 = arith.constant 0 : i32
    return %c0_i32, %arg0 : i32, i32
  }
}

module attributes {stable_mosaic.version = 11 : i64} {
  func.func @conv_matmul_kernel(%arg0: i32, %arg1: i32, %arg2: memref<128x2048xbf16, #tpu.memory_space<vmem>>, %arg3: memref<2048x128xbf16, #tpu.memory_space<vmem>>, %arg4: memref<1x128xf32, #tpu.memory_space<vmem>>, %arg5: memref<128x128xf32, #tpu.memory_space<vmem>>, %arg6: memref<128x128xf32, #tpu.memory_space<vmem>>) attributes {dimension_semantics = [#tpu.dimension_semantics<parallel>, #tpu.dimension_semantics<arbitrary>], iteration_bounds = array<i64: 2, 5>, scalar_prefetch = 0 : i64, scratch_operands = 1 : i64, tpu.core_type = #tpu.core_type<tc>, window_params = [{transform_indices = @transform_0, window_bounds = array<i64: 128, 2048>}, {transform_indices = @transform_1, window_bounds = array<i64: 2048, 128>}, {transform_indices = @transform_2, window_bounds = array<i64: 1, 128>}, {transform_indices = @transform_3, window_bounds = array<i64: 128, 128>}]} {
    %c0_i32 = arith.constant 0 : i32
    %0 = arith.cmpi eq, %arg1, %c0_i32 : i32
    %1 = arith.extui %0 : i1 to i32
    %c0_i32_0 = arith.constant 0 : i32
    %2 = arith.cmpi ne, %1, %c0_i32_0 : i32
    scf.if %2 {
      %cst_9 = arith.constant 0.000000e+00 : f32
      %12 = vector.broadcast %cst_9 : f32 to vector<128x128xf32>
      %c0_10 = arith.constant 0 : index
      %c0_11 = arith.constant 0 : index
      %13 = vector.load %arg6[%c0_10, %c0_11] : memref<128x128xf32, #tpu.memory_space<vmem>>, vector<128x128xf32>
      tpu.vector_store %arg6[%c0_10, %c0_11], %12 {strides = array<i32>} : memref<128x128xf32, #tpu.memory_space<vmem>>, vector<128x128xf32>,
    } else {
    }
    %c0 = arith.constant 0 : index
    %c0_1 = arith.constant 0 : index
    %3 = vector.load %arg6[%c0, %c0_1] : memref<128x128xf32, #tpu.memory_space<vmem>>, vector<128x128xf32>
    %c0_2 = arith.constant 0 : index
    %c0_3 = arith.constant 0 : index
    %4 = vector.load %arg2[%c0_2, %c0_3] : memref<128x2048xbf16, #tpu.memory_space<vmem>>, vector<128x2048xbf16>
    %c0_4 = arith.constant 0 : index
    %c0_5 = arith.constant 0 : index
    %5 = vector.load %arg3[%c0_4, %c0_5] : memref<2048x128xbf16, #tpu.memory_space<vmem>>, vector<2048x128xbf16>
    %cst = arith.constant dense<0.000000e+00> : vector<128x128xf32>
    %6 = tpu.matmul %4, %5, %cst {dimension_numbers = #tpu.dot_dimension_numbers<[1], [0], [0], [1], [0, 0, 1, 1], [], []>} : vector<128x2048xbf16>, vector<2048x128xbf16>, vector<128x128xf32> -> vector<128x128xf32>
    %7 = arith.addf %3, %6 : vector<128x128xf32>
    %c0_6 = arith.constant 0 : index
    %c0_7 = arith.constant 0 : index
    %8 = vector.load %arg6[%c0_6, %c0_7] : memref<128x128xf32, #tpu.memory_space<vmem>>, vector<128x128xf32>
    tpu.vector_store %arg6[%c0_6, %c0_7], %7 {strides = array<i32>} : memref<128x128xf32, #tpu.memory_space<vmem>>, vector<128x128xf32>,
    %c4_i32 = arith.constant 4 : i32
    %9 = arith.cmpi eq, %arg1, %c4_i32 : i32
    %10 = arith.extui %9 : i1 to i32
    %c0_i32_8 = arith.constant 0 : i32
    %11 = arith.cmpi ne, %10, %c0_i32_8 : i32
    scf.if %11 {
      %c0_9 = arith.constant 0 : index
      %c0_10 = arith.constant 0 : index
      %12 = vector.load %arg6[%c0_9, %c0_10] : memref<128x128xf32, #tpu.memory_space<vmem>>, vector<128x128xf32>
      %c0_11 = arith.constant 0 : index
      %c0_12 = arith.constant 0 : index
      %13 = vector.load %arg4[%c0_11, %c0_12] : memref<1x128xf32, #tpu.memory_space<vmem>>, vector<1x128xf32>
      %14 = vector.broadcast %13 : vector<1x128xf32> to vector<128x128xf32>
      %15 = arith.addf %12, %14 : vector<128x128xf32>
      %cst_13 = arith.constant 0.000000e+00 : f32
      %16 = vector.broadcast %cst_13 : f32 to vector<128x128xf32>
      %17 = arith.maximumf %15, %16 : vector<128x128xf32>
      %c0_14 = arith.constant 0 : index
      %c0_15 = arith.constant 0 : index
      %18 = vector.load %arg5[%c0_14, %c0_15] : memref<128x128xf32, #tpu.memory_space<vmem>>, vector<128x128xf32>
      tpu.vector_store %arg5[%c0_14, %c0_15], %17 {strides = array<i32>} : memref<128x128xf32, #tpu.memory_space<vmem>>, vector<128x128xf32>,
    } else {
    }
    return
  }
  func.func @transform_0(%arg0: i32, %arg1: i32) -> (i32, i32) {
    %c0_i32 = arith.constant 0 : i32
    %c0_i32_0 = arith.constant 0 : i32
    return %c0_i32, %arg1 : i32, i32
  }
  func.func @transform_1(%arg0: i32, %arg1: i32) -> (i32, i32) {
    %c0_i32 = arith.constant 0 : i32
    return %arg1, %arg0 : i32, i32
  }
  func.func @transform_2(%arg0: i32, %arg1: i32) -> (i32, i32) {
    %c0_i32 = arith.constant 0 : i32
    %c0_i32_0 = arith.constant 0 : i32
    return %c0_i32, %arg0 : i32, i32
  }
  func.func @transform_3(%arg0: i32, %arg1: i32) -> (i32, i32) {
    %c0_i32 = arith.constant 0 : i32
    %c0_i32_0 = arith.constant 0 : i32
    return %c0_i32, %arg0 : i32, i32
  }
}

module attributes {stable_mosaic.version = 11 : i64} {
  func.func @kernel(%arg0: memref<2x8x8x256xf32, #tpu.memory_space<vmem>>, %arg1: memref<2x4x4x320xf32, #tpu.memory_space<vmem>>, %arg2: memref<2x1536xf32, #tpu.memory_space<vmem>>, %arg3: memref<1536x256xf32, #tpu.memory_space<vmem>>, %arg4: memref<1x256xf32, #tpu.memory_space<vmem>>, %arg5: memref<256x256xf32, #tpu.memory_space<vmem>>, %arg6: memref<1x256xf32, #tpu.memory_space<vmem>>, %arg7: memref<2304x128xbf16, #tpu.memory_space<vmem>>, %arg8: memref<1x128xf32, #tpu.memory_space<vmem>>, %arg9: memref<2880x128xbf16, #tpu.memory_space<vmem>>, %arg10: memref<1x128xf32, #tpu.memory_space<vmem>>, %arg11: memref<256x128xf32, #tpu.memory_space<vmem>>, %arg12: memref<1x128xf32, #tpu.memory_space<vmem>>, %arg13: memref<3x128xf32, #tpu.memory_space<vmem>>, %arg14: memref<1x128xf32, #tpu.memory_space<vmem>>, %arg15: memref<128x128xf32, #tpu.memory_space<vmem>>, %arg16: memref<1x128xf32, #tpu.memory_space<vmem>>, %arg17: memref<2x128xf32, #tpu.memory_space<vmem>>) attributes {dimension_semantics = [], scalar_prefetch = 0 : i64, scratch_operands = 0 : i64, tpu.core_type = #tpu.core_type<tc>} {
    %c0 = arith.constant 0 : index
    %c0_0 = arith.constant 0 : index
    %0 = vector.load %arg2[%c0, %c0_0] : memref<2x1536xf32, #tpu.memory_space<vmem>>, vector<2x1536xf32>
    %c0_1 = arith.constant 0 : index
    %c0_2 = arith.constant 0 : index
    %1 = vector.load %arg3[%c0_1, %c0_2] : memref<1536x256xf32, #tpu.memory_space<vmem>>, vector<1536x256xf32>
    %cst = arith.constant dense<0.000000e+00> : vector<2x256xf32>
    %2 = tpu.matmul %0, %1, %cst {dimension_numbers = #tpu.dot_dimension_numbers<[1], [0], [0], [1], [0, 0, 1, 1], [], []>} : vector<2x1536xf32>, vector<1536x256xf32>, vector<2x256xf32> -> vector<2x256xf32>
    %c0_3 = arith.constant 0 : index
    %c0_4 = arith.constant 0 : index
    %3 = vector.load %arg4[%c0_3, %c0_4] : memref<1x256xf32, #tpu.memory_space<vmem>>, vector<1x256xf32>
    %4 = vector.broadcast %3 : vector<1x256xf32> to vector<2x256xf32>
    %5 = arith.addf %2, %4 : vector<2x256xf32>
    %cst_5 = arith.constant 0.000000e+00 : f32
    %6 = vector.broadcast %cst_5 : f32 to vector<2x256xf32>
    %7 = arith.maximumf %5, %6 : vector<2x256xf32>
    %c0_6 = arith.constant 0 : index
    %c0_7 = arith.constant 0 : index
    %8 = vector.load %arg5[%c0_6, %c0_7] : memref<256x256xf32, #tpu.memory_space<vmem>>, vector<256x256xf32>
    %cst_8 = arith.constant dense<0.000000e+00> : vector<2x256xf32>
    %9 = tpu.matmul %7, %8, %cst_8 {dimension_numbers = #tpu.dot_dimension_numbers<[1], [0], [0], [1], [0, 0, 1, 1], [], []>} : vector<2x256xf32>, vector<256x256xf32>, vector<2x256xf32> -> vector<2x256xf32>
    %c0_9 = arith.constant 0 : index
    %c0_10 = arith.constant 0 : index
    %10 = vector.load %arg6[%c0_9, %c0_10] : memref<1x256xf32, #tpu.memory_space<vmem>>, vector<1x256xf32>
    %11 = vector.broadcast %10 : vector<1x256xf32> to vector<2x256xf32>
    %12 = arith.addf %9, %11 : vector<2x256xf32>
    %cst_11 = arith.constant 0.000000e+00 : f32
    %13 = vector.broadcast %cst_11 : f32 to vector<2x256xf32>
    %14 = arith.maximumf %12, %13 : vector<2x256xf32>
    %c0_12 = arith.constant 0 : index
    %c0_13 = arith.constant 0 : index
    %15 = vector.load %arg11[%c0_12, %c0_13] : memref<256x128xf32, #tpu.memory_space<vmem>>, vector<256x128xf32>
    %cst_14 = arith.constant dense<0.000000e+00> : vector<2x128xf32>
    %16 = tpu.matmul %14, %15, %cst_14 {dimension_numbers = #tpu.dot_dimension_numbers<[1], [0], [0], [1], [0, 0, 1, 1], [], []>} : vector<2x256xf32>, vector<256x128xf32>, vector<2x128xf32> -> vector<2x128xf32>
    %c0_15 = arith.constant 0 : index
    %c0_16 = arith.constant 0 : index
    %17 = vector.load %arg12[%c0_15, %c0_16] : memref<1x128xf32, #tpu.memory_space<vmem>>, vector<1x128xf32>
    %18 = vector.broadcast %17 : vector<1x128xf32> to vector<2x128xf32>
    %19 = arith.addf %16, %18 : vector<2x128xf32>
    %c0_17 = arith.constant 0 : index
    %c0_18 = arith.constant 0 : index
    %c0_19 = arith.constant 0 : index
    %c0_20 = arith.constant 0 : index
    %20 = vector.load %arg0[%c0_17, %c0_18, %c0_19, %c0_20] : memref<2x8x8x256xf32, #tpu.memory_space<vmem>>, vector<2x8x8x256xf32>
    %21 = vector.extract_strided_slice %20 {offsets = [0, 0, 0, 0], sizes = [2, 7, 8, 256], strides = [1, 1, 1, 1]} : vector<2x8x8x256xf32> to vector<2x7x8x256xf32>
    %cst_21 = arith.constant dense<0.000000e+00> : vector<2x8x256xf32>
    %22 = vector.multi_reduction <add>, %21, %cst_21 [1] : vector<2x7x8x256xf32> to vector<2x8x256xf32>
    %cst_22 = arith.constant dense<0.000000e+00> : vector<2x8x256xf32>
    %23 = vector.multi_reduction <add>, %20, %cst_22 [1] : vector<2x8x8x256xf32> to vector<2x8x256xf32>
    %24 = vector.extract_strided_slice %20 {offsets = [0, 1, 0, 0], sizes = [2, 7, 8, 256], strides = [1, 1, 1, 1]} : vector<2x8x8x256xf32> to vector<2x7x8x256xf32>
    %cst_23 = arith.constant dense<0.000000e+00> : vector<2x8x256xf32>
    %25 = vector.multi_reduction <add>, %24, %cst_23 [1] : vector<2x7x8x256xf32> to vector<2x8x256xf32>
    %26 = vector.extract_strided_slice %22 {offsets = [0, 0, 0], sizes = [2, 7, 256], strides = [1, 1, 1]} : vector<2x8x256xf32> to vector<2x7x256xf32>
    %cst_24 = arith.constant dense<0.000000e+00> : vector<2x256xf32>
    %27 = vector.multi_reduction <add>, %26, %cst_24 [1] : vector<2x7x256xf32> to vector<2x256xf32>
    %cst_25 = arith.constant dense<0.000000e+00> : vector<2x256xf32>
    %28 = vector.multi_reduction <add>, %22, %cst_25 [1] : vector<2x8x256xf32> to vector<2x256xf32>
    %29 = vector.extract_strided_slice %22 {offsets = [0, 1, 0], sizes = [2, 7, 256], strides = [1, 1, 1]} : vector<2x8x256xf32> to vector<2x7x256xf32>
    %cst_26 = arith.constant dense<0.000000e+00> : vector<2x256xf32>
    %30 = vector.multi_reduction <add>, %29, %cst_26 [1] : vector<2x7x256xf32> to vector<2x256xf32>
    %31 = vector.extract_strided_slice %23 {offsets = [0, 0, 0], sizes = [2, 7, 256], strides = [1, 1, 1]} : vector<2x8x256xf32> to vector<2x7x256xf32>
    %cst_27 = arith.constant dense<0.000000e+00> : vector<2x256xf32>
    %32 = vector.multi_reduction <add>, %31, %cst_27 [1] : vector<2x7x256xf32> to vector<2x256xf32>
    %cst_28 = arith.constant dense<0.000000e+00> : vector<2x256xf32>
    %33 = vector.multi_reduction <add>, %23, %cst_28 [1] : vector<2x8x256xf32> to vector<2x256xf32>
    %34 = vector.extract_strided_slice %23 {offsets = [0, 1, 0], sizes = [2, 7, 256], strides = [1, 1, 1]} : vector<2x8x256xf32> to vector<2x7x256xf32>
    %cst_29 = arith.constant dense<0.000000e+00> : vector<2x256xf32>
    %35 = vector.multi_reduction <add>, %34, %cst_29 [1] : vector<2x7x256xf32> to vector<2x256xf32>
    %36 = vector.extract_strided_slice %25 {offsets = [0, 0, 0], sizes = [2, 7, 256], strides = [1, 1, 1]} : vector<2x8x256xf32> to vector<2x7x256xf32>
    %cst_30 = arith.constant dense<0.000000e+00> : vector<2x256xf32>
    %37 = vector.multi_reduction <add>, %36, %cst_30 [1] : vector<2x7x256xf32> to vector<2x256xf32>
    %cst_31 = arith.constant dense<0.000000e+00> : vector<2x256xf32>
    %38 = vector.multi_reduction <add>, %25, %cst_31 [1] : vector<2x8x256xf32> to vector<2x256xf32>
    %39 = vector.extract_strided_slice %25 {offsets = [0, 1, 0], sizes = [2, 7, 256], strides = [1, 1, 1]} : vector<2x8x256xf32> to vector<2x7x256xf32>
    %cst_32 = arith.constant dense<0.000000e+00> : vector<2x256xf32>
    %40 = vector.multi_reduction <add>, %39, %cst_32 [1] : vector<2x7x256xf32> to vector<2x256xf32>
    %41 = tpu.concatenate %27, %28, %30, %32, %33, %35, %37, %38, %40 in 1 : vector<2x256xf32>, vector<2x256xf32>, vector<2x256xf32>, vector<2x256xf32>, vector<2x256xf32>, vector<2x256xf32>, vector<2x256xf32>, vector<2x256xf32>, vector<2x256xf32> -> vector<2x2304xf32>
    %42 = arith.truncf %41 : vector<2x2304xf32> to vector<2x2304xbf16>
    %c0_33 = arith.constant 0 : index
    %c0_34 = arith.constant 0 : index
    %c0_35 = arith.constant 0 : index
    %c0_36 = arith.constant 0 : index
    %43 = vector.load %arg1[%c0_33, %c0_34, %c0_35, %c0_36] : memref<2x4x4x320xf32, #tpu.memory_space<vmem>>, vector<2x4x4x320xf32>
    %44 = vector.extract_strided_slice %43 {offsets = [0, 0, 0, 0], sizes = [2, 3, 4, 320], strides = [1, 1, 1, 1]} : vector<2x4x4x320xf32> to vector<2x3x4x320xf32>
    %cst_37 = arith.constant dense<0.000000e+00> : vector<2x4x320xf32>
    %45 = vector.multi_reduction <add>, %44, %cst_37 [1] : vector<2x3x4x320xf32> to vector<2x4x320xf32>
    %cst_38 = arith.constant dense<0.000000e+00> : vector<2x4x320xf32>
    %46 = vector.multi_reduction <add>, %43, %cst_38 [1] : vector<2x4x4x320xf32> to vector<2x4x320xf32>
    %47 = vector.extract_strided_slice %43 {offsets = [0, 1, 0, 0], sizes = [2, 3, 4, 320], strides = [1, 1, 1, 1]} : vector<2x4x4x320xf32> to vector<2x3x4x320xf32>
    %cst_39 = arith.constant dense<0.000000e+00> : vector<2x4x320xf32>
    %48 = vector.multi_reduction <add>, %47, %cst_39 [1] : vector<2x3x4x320xf32> to vector<2x4x320xf32>
    %49 = vector.extract_strided_slice %45 {offsets = [0, 0, 0], sizes = [2, 3, 320], strides = [1, 1, 1]} : vector<2x4x320xf32> to vector<2x3x320xf32>
    %cst_40 = arith.constant dense<0.000000e+00> : vector<2x320xf32>
    %50 = vector.multi_reduction <add>, %49, %cst_40 [1] : vector<2x3x320xf32> to vector<2x320xf32>
    %cst_41 = arith.constant dense<0.000000e+00> : vector<2x320xf32>
    %51 = vector.multi_reduction <add>, %45, %cst_41 [1] : vector<2x4x320xf32> to vector<2x320xf32>
    %52 = vector.extract_strided_slice %45 {offsets = [0, 1, 0], sizes = [2, 3, 320], strides = [1, 1, 1]} : vector<2x4x320xf32> to vector<2x3x320xf32>
    %cst_42 = arith.constant dense<0.000000e+00> : vector<2x320xf32>
    %53 = vector.multi_reduction <add>, %52, %cst_42 [1] : vector<2x3x320xf32> to vector<2x320xf32>
    %54 = vector.extract_strided_slice %46 {offsets = [0, 0, 0], sizes = [2, 3, 320], strides = [1, 1, 1]} : vector<2x4x320xf32> to vector<2x3x320xf32>
    %cst_43 = arith.constant dense<0.000000e+00> : vector<2x320xf32>
    %55 = vector.multi_reduction <add>, %54, %cst_43 [1] : vector<2x3x320xf32> to vector<2x320xf32>
    %cst_44 = arith.constant dense<0.000000e+00> : vector<2x320xf32>
    %56 = vector.multi_reduction <add>, %46, %cst_44 [1] : vector<2x4x320xf32> to vector<2x320xf32>
    %57 = vector.extract_strided_slice %46 {offsets = [0, 1, 0], sizes = [2, 3, 320], strides = [1, 1, 1]} : vector<2x4x320xf32> to vector<2x3x320xf32>
    %cst_45 = arith.constant dense<0.000000e+00> : vector<2x320xf32>
    %58 = vector.multi_reduction <add>, %57, %cst_45 [1] : vector<2x3x320xf32> to vector<2x320xf32>
    %59 = vector.extract_strided_slice %48 {offsets = [0, 0, 0], sizes = [2, 3, 320], strides = [1, 1, 1]} : vector<2x4x320xf32> to vector<2x3x320xf32>
    %cst_46 = arith.constant dense<0.000000e+00> : vector<2x320xf32>
    %60 = vector.multi_reduction <add>, %59, %cst_46 [1] : vector<2x3x320xf32> to vector<2x320xf32>
    %cst_47 = arith.constant dense<0.000000e+00> : vector<2x320xf32>
    %61 = vector.multi_reduction <add>, %48, %cst_47 [1] : vector<2x4x320xf32> to vector<2x320xf32>
    %62 = vector.extract_strided_slice %48 {offsets = [0, 1, 0], sizes = [2, 3, 320], strides = [1, 1, 1]} : vector<2x4x320xf32> to vector<2x3x320xf32>
    %cst_48 = arith.constant dense<0.000000e+00> : vector<2x320xf32>
    %63 = vector.multi_reduction <add>, %62, %cst_48 [1] : vector<2x3x320xf32> to vector<2x320xf32>
    %64 = tpu.concatenate %50, %51, %53, %55, %56, %58, %60, %61, %63 in 1 : vector<2x320xf32>, vector<2x320xf32>, vector<2x320xf32>, vector<2x320xf32>, vector<2x320xf32>, vector<2x320xf32>, vector<2x320xf32>, vector<2x320xf32>, vector<2x320xf32> -> vector<2x2880xf32>
    %65 = arith.truncf %64 : vector<2x2880xf32> to vector<2x2880xbf16>
    %c0_49 = arith.constant 0 : index
    %c0_50 = arith.constant 0 : index
    %66 = vector.load %arg7[%c0_49, %c0_50] : memref<2304x128xbf16, #tpu.memory_space<vmem>>, vector<2304x128xbf16>
    %cst_51 = arith.constant dense<0.000000e+00> : vector<2x128xf32>
    %67 = tpu.matmul %42, %66, %cst_51 {dimension_numbers = #tpu.dot_dimension_numbers<[1], [0], [0], [1], [0, 0, 1, 1], [], []>} : vector<2x2304xbf16>, vector<2304x128xbf16>, vector<2x128xf32> -> vector<2x128xf32>
    %c0_52 = arith.constant 0 : index
    %c0_53 = arith.constant 0 : index
    %68 = vector.load %arg8[%c0_52, %c0_53] : memref<1x128xf32, #tpu.memory_space<vmem>>, vector<1x128xf32>
    %cst_54 = arith.constant 6.400000e+01 : f32
    %69 = vector.broadcast %cst_54 : f32 to vector<1x128xf32>
    %70 = arith.mulf %69, %68 : vector<1x128xf32>
    %71 = vector.broadcast %70 : vector<1x128xf32> to vector<2x128xf32>
    %72 = arith.addf %67, %71 : vector<2x128xf32>
    %c0_55 = arith.constant 0 : index
    %c0_56 = arith.constant 0 : index
    %73 = vector.load %arg9[%c0_55, %c0_56] : memref<2880x128xbf16, #tpu.memory_space<vmem>>, vector<2880x128xbf16>
    %cst_57 = arith.constant dense<0.000000e+00> : vector<2x128xf32>
    %74 = tpu.matmul %65, %73, %cst_57 {dimension_numbers = #tpu.dot_dimension_numbers<[1], [0], [0], [1], [0, 0, 1, 1], [], []>} : vector<2x2880xbf16>, vector<2880x128xbf16>, vector<2x128xf32> -> vector<2x128xf32>
    %c0_58 = arith.constant 0 : index
    %c0_59 = arith.constant 0 : index
    %75 = vector.load %arg10[%c0_58, %c0_59] : memref<1x128xf32, #tpu.memory_space<vmem>>, vector<1x128xf32>
    %cst_60 = arith.constant 1.600000e+01 : f32
    %76 = vector.broadcast %cst_60 : f32 to vector<1x128xf32>
    %77 = arith.mulf %76, %75 : vector<1x128xf32>
    %78 = vector.broadcast %77 : vector<1x128xf32> to vector<2x128xf32>
    %79 = arith.addf %74, %78 : vector<2x128xf32>
    %c0_61 = arith.constant 0 : index
    %c0_62 = arith.constant 0 : index
    %80 = vector.load %arg13[%c0_61, %c0_62] : memref<3x128xf32, #tpu.memory_space<vmem>>, vector<3x128xf32>
    %81 = vector.extract_strided_slice %80 {offsets = [0, 0], sizes = [1, 128], strides = [1, 1]} : vector<3x128xf32> to vector<1x128xf32>
    %82 = vector.broadcast %81 : vector<1x128xf32> to vector<2x128xf32>
    %83 = arith.mulf %72, %82 : vector<2x128xf32>
    %84 = vector.extract_strided_slice %80 {offsets = [1, 0], sizes = [1, 128], strides = [1, 1]} : vector<3x128xf32> to vector<1x128xf32>
    %85 = vector.broadcast %84 : vector<1x128xf32> to vector<2x128xf32>
    %86 = arith.mulf %79, %85 : vector<2x128xf32>
    %87 = arith.addf %83, %86 : vector<2x128xf32>
    %88 = vector.extract_strided_slice %80 {offsets = [2, 0], sizes = [1, 128], strides = [1, 1]} : vector<3x128xf32> to vector<1x128xf32>
    %89 = vector.broadcast %88 : vector<1x128xf32> to vector<2x128xf32>
    %90 = arith.mulf %19, %89 : vector<2x128xf32>
    %91 = arith.addf %87, %90 : vector<2x128xf32>
    %c0_63 = arith.constant 0 : index
    %c0_64 = arith.constant 0 : index
    %92 = vector.load %arg14[%c0_63, %c0_64] : memref<1x128xf32, #tpu.memory_space<vmem>>, vector<1x128xf32>
    %93 = vector.broadcast %92 : vector<1x128xf32> to vector<2x128xf32>
    %94 = arith.addf %91, %93 : vector<2x128xf32>
    %cst_65 = arith.constant 0.000000e+00 : f32
    %95 = vector.broadcast %cst_65 : f32 to vector<2x128xf32>
    %96 = arith.maximumf %94, %95 : vector<2x128xf32>
    %c0_66 = arith.constant 0 : index
    %c0_67 = arith.constant 0 : index
    %97 = vector.load %arg15[%c0_66, %c0_67] : memref<128x128xf32, #tpu.memory_space<vmem>>, vector<128x128xf32>
    %cst_68 = arith.constant dense<0.000000e+00> : vector<2x128xf32>
    %98 = tpu.matmul %96, %97, %cst_68 {dimension_numbers = #tpu.dot_dimension_numbers<[1], [0], [0], [1], [0, 0, 1, 1], [], []>} : vector<2x128xf32>, vector<128x128xf32>, vector<2x128xf32> -> vector<2x128xf32>
    %c0_69 = arith.constant 0 : index
    %c0_70 = arith.constant 0 : index
    %99 = vector.load %arg16[%c0_69, %c0_70] : memref<1x128xf32, #tpu.memory_space<vmem>>, vector<1x128xf32>
    %100 = vector.broadcast %99 : vector<1x128xf32> to vector<2x128xf32>
    %101 = arith.addf %98, %100 : vector<2x128xf32>
    %c0_71 = arith.constant 0 : index
    %c0_72 = arith.constant 0 : index
    %102 = vector.load %arg17[%c0_71, %c0_72] : memref<2x128xf32, #tpu.memory_space<vmem>>, vector<2x128xf32>
    tpu.vector_store %arg17[%c0_71, %c0_72], %101 {strides = array<i32>} : memref<2x128xf32, #tpu.memory_space<vmem>>, vector<2x128xf32>,
    return
  }
}

</mosaic_0001>

<bundles_post_ra>
// kernel: furniture_forward.4
= control target key start
LH: loop header
LB: loop body
LE: loop exit
PB: predicated region body
PF: predicated region fallthrough
CT: control target
= control target key end

     0   :  { %s4842_s0 = inlined_call_operand.vmem [shape: bf16[32,19200], index: 0, kind: input, shape index: {}]   ;;  %s4843_s1 = inlined_call_operand.vmem [shape: bf16[19200,384], index: 1, kind: input, shape index: {}]   ;;  %s4844_s2 = inlined_call_operand.vmem [shape: f32[1,384], index: 2, kind: input, shape index: {}]   ;;  %s4845_s3 = inlined_call_operand.vmem [shape: f32[32,384], index: 3, kind: output, shape index: {}]  }
   0x1   :  { %4847 = sst [smem:[#allocation7_spill]] %s4842_s0 }
   0x2   :  { %4848 = sst [smem:[#allocation8_spill]] %s4843_s1 }
   0x3   :  { %s3923_s12 = smov 0   ;;  %s3925_s13 = smov 0  }
   0x4   :  { %s3927_s14 = smov 0   ;;  %s3929_s15 = smov 0  }
   0x5   :  { %s3931_s16 = smov 0   ;;  %s3933_s17 = smov 0  }
   0x6   :  { %s3935_s18 = smov 0   ;;  %s3937_s19 = smov 0  }
   0x7   :  { %s3939_s20 = smov 0   ;;  %s3941_s21 = smov 0  }
   0x8   :  { %s3943_s22 = smov 0  }
   0x9 LB: > { %s2937_s23 = sadd.s32 4294967295, %s3900_s22   ;;  %s22_s24 = sadd.s32 1, %s3892_s20  ;;  %s3900_s22 = sphi %s3943_s22, %s13_s22   ;;  %s3896_s21 = sphi %s3941_s21, %s4865_s21   ;;  %s3892_s20 = sphi %s3939_s20, %s4864_s20   ;;  %s3888_s19 = sphi %s3937_s19, %s4863_s19   ;;  %s3884_s18 = sphi %s3935_s18, %s4862_s18   ;;  %s3880_s17 = sphi %s3933_s17, %s4861_s17   ;;  %s3876_s16 = sphi %s3931_s16, %s4860_s16   ;;  %s3872_s15 = sphi %s3929_s15, %s4859_s15   ;;  %s3868_s14 = sphi %s3927_s14, %s4858_s14   ;;  %s3864_s13 = sphi %s3925_s13, %s4857_s13   ;;  %s3860_s12 = sphi %s3923_s12, %s4856_s12  }
   0xa   : > { %p23_p0 = scmp.ge.s32.totalorder %s22_s24, 10  ;;  %s25_s25 = sadd.s32 1, %s3896_s21 }
   0xb   : > { %s32_s26 = sadd.s32 1, %s3880_s17  ;;  %p39_p1 = scmp.ne.s32.totalorder %s3880_s17, %s3876_s16 }
   0xc   : > { %s4867_s24 = smov (%p23_p0, %s22_s24), 0  ;;  %s4869_s25 = smov (!%p23_p0, %s25_s25), %s3896_s21 }
   0xd   : > { %s29_s27 = ssub.s32 %s3892_s20, %s4867_s24  ;;  %p40_p2 = scmp.eq.s32.totalorder %s3900_s22, 0 }
   0xe   : > { %p27_p3 = scmp.ge.s32.totalorder %s4869_s25, 3  ;;  %p30_p4 = scmp.eq.s32.totalorder %s29_s27, 0 }
   0xf   : > { %p3990_p5 = por %p40_p2, %p39_p1  ;;  %s60_s29 = sadd.s32 1, %s3872_s15 }
  0x10   : > { %s4871_s25 = smov (%p27_p3, %s4869_s25), 0  ;;  %p67_p6 = scmp.ne.s32.totalorder %s3872_s15, %s3868_s14 }
  0x11   : > { %4850 = sst [smem:[#allocation6_spill]] %s4871_s25  ;;  %s56_s4 = ssub.s32 %s3896_s21, %s4871_s25 }
  0x12   : > { %s3998_s30 = scalar_select %p30_p4, %s3880_s17, %s32_s26  }
  0x13   : > { %s57_s5 = sor.u32 %s56_s4, %s29_s27  ;;  %p110_p7 = scmp.eq.s32.totalorder %s56_s4, 0 }
  0x14   : > { %p58_p8 = scmp.eq.s32.totalorder %s57_s5, 0  ;;  %p4004_p9 = por %p67_p6, %p40_p2 }
  0x15   : > { %s112_s7 = sadd.s32 1, %s3864_s13  ;;  %p122_p10 = scmp.ne.s32.totalorder %s3864_s13, %s3860_s12 }
  0x16   : > { %s4012_s8 = scalar_select %p58_p8, %s3872_s15, %s60_s29  }
  0x17   : > { %s4015_s9 = scalar_select %p110_p7, %s3864_s13, %s112_s7  }
  0x18   : > { %p123_p11 = scmp.eq.s32.totalorder %s2937_s23, 29  ;;  %p2940_p13 = scmp.ge.s32.totalorder %s3900_s22, 30 }
  0x1a   : > { %p4017_p12 = por %p123_p11, %p122_p10  ;;  %145 = sbr.rel (%p2940_p13) target bundleno = 321 (0x141), region = 16 }
  0x1f   : > { %148 = sbr.rel (!%p3990_p5) target bundleno = 72 (0x48), region = 20  ;;  %s150_s11 = sand.u32 (%p3990_p5), 1, %s3880_s17  }
  0x20   : > { %s3559_s26 = smul.u32 (%p3990_p5), 60, %s3892_s20  ;;  %s4853_s0 = sld [smem:[#allocation7_spill]] (%p3990_p5) }
  0x21   : > { %s3718_s27 = smul.u32 (%p3990_p5), 240, %s150_s11 }
  0x23   : > { %s4034_s23 = scalar_lea.vmem (%p3990_p5), [#allocation3], %s3718_s27 }
  0x26   : > { %s4029_s5 = scalar_lea.vmem %s4853_s0, %s3559_s26 }
  0x27   : > { %v170_v0 = vld [vmem:[%s4029_s5] sm:$0xff]  ;;  %v172_v1 = vld [vmem:[%s4029_s5 + $0x8] sm:$0xff]  ;;  %v174_v2 = vld [vmem:[%s4029_s5 + $0x10] sm:$0xff] }
  0x28   : > { %171 = vst [vmem:[%s4034_s23] sm:$0xff] %v170_v0  ;;  %v176_v3 = vld [vmem:[%s4029_s5 + $0x18] sm:$0xff]  ;;  %v178_v4 = vld [vmem:[%s4029_s5 + $0x20] sm:$0xff]  ;;  %v180_v5 = vld [vmem:[%s4029_s5 + $0x28] sm:$0xff] }
  0x29   : > { %173 = vst [vmem:[%s4034_s23 + $0x8] sm:$0xff] %v172_v1  ;;  %v182_v6 = vld [vmem:[%s4029_s5 + $0x30] sm:$0xff]  ;;  %v184_v7 = vld [vmem:[%s4029_s5 + $0x258] sm:$0xff]  ;;  %v186_v8 = vld [vmem:[%s4029_s5 + $0x260] sm:$0xff] }
  0x2a   : > { %175 = vst [vmem:[%s4034_s23 + $0x10] sm:$0xff] %v174_v2  ;;  %v188_v9 = vld [vmem:[%s4029_s5 + $0x268] sm:$0xff]  ;;  %v190_v10 = vld [vmem:[%s4029_s5 + $0x270] sm:$0xff]  ;;  %v192_v11 = vld [vmem:[%s4029_s5 + $0x278] sm:$0xff] }
  0x2b   : > { %177 = vst [vmem:[%s4034_s23 + $0x18] sm:$0xff] %v176_v3  ;;  %v194_v12 = vld [vmem:[%s4029_s5 + $0x280] sm:$0xff]  ;;  %v196_v13 = vld [vmem:[%s4029_s5 + $0x288] sm:$0xff]  ;;  %v198_v14 = vld [vmem:[%s4029_s5 + $0x4b0] sm:$0xff] }
  0x2c   : > { %179 = vst [vmem:[%s4034_s23 + $0x20] sm:$0xff] %v178_v4  ;;  %v200_v15 = vld [vmem:[%s4029_s5 + $0x4b8] sm:$0xff]  ;;  %v202_v16 = vld [vmem:[%s4029_s5 + $0x4c0] sm:$0xff]  ;;  %v204_v17 = vld [vmem:[%s4029_s5 + $0x4c8] sm:$0xff] }
  0x2d   : > { %181 = vst [vmem:[%s4034_s23 + $0x28] sm:$0xff] %v180_v5  ;;  %v206_v18 = vld [vmem:[%s4029_s5 + $0x4d0] sm:$0xff]  ;;  %v208_v19 = vld [vmem:[%s4029_s5 + $0x4d8] sm:$0xff]  ;;  %v210_v20 = vld [vmem:[%s4029_s5 + $0x4e0] sm:$0xff] }
  0x2e   : > { %183 = vst [vmem:[%s4034_s23 + $0x30] sm:$0xff] %v182_v6  ;;  %v212_v21 = vld [vmem:[%s4029_s5 + $0x708] sm:$0xff]  ;;  %v214_v22 = vld [vmem:[%s4029_s5 + $0x710] sm:$0xff]  ;;  %v216_v23 = vld [vmem:[%s4029_s5 + $0x718] sm:$0xff] }
  0x2f   : > { %185 = vst [vmem:[%s4034_s23 + $0x3c] sm:$0xff] %v184_v7  ;;  %v218_v24 = vld [vmem:[%s4029_s5 + $0x720] sm:$0xff]  ;;  %v220_v25 = vld [vmem:[%s4029_s5 + $0x728] sm:$0xff]  ;;  %v222_v26 = vld [vmem:[%s4029_s5 + $0x730] sm:$0xff] }
  0x30   : > { %187 = vst [vmem:[%s4034_s23 + $0x44] sm:$0xff] %v186_v8  ;;  %v224_v27 = vld [vmem:[%s4029_s5 + $0x738] sm:$0xff]  ;;  %v2944_v29 = vld [vmem:[%s4029_s5 + $0x290] sm:$0xf]  ;;  %v2946_v30 = vld [vmem:[%s4029_s5 + $0x4e8] sm:$0xf] }
  0x31   : > { %189 = vst [vmem:[%s4034_s23 + $0x4c] sm:$0xff] %v188_v9  ;;  %v2942_v28 = vld [vmem:[%s4029_s5 + $0x38] sm:$0xf]  ;;  %v2948_v31 = vld [vmem:[%s4029_s5 + $0x740] sm:$0xf] }
  0x32   : > { %191 = vst [vmem:[%s4034_s23 + $0x54] sm:$0xff] %v190_v10 }
  0x33   : > { %193 = vst [vmem:[%s4034_s23 + $0x5c] sm:$0xff] %v192_v11 }
  0x34   : > { %195 = vst [vmem:[%s4034_s23 + $0x64] sm:$0xff] %v194_v12 }
  0x35   : > { %197 = vst [vmem:[%s4034_s23 + $0x6c] sm:$0xff] %v196_v13 }
  0x36   : > { %199 = vst [vmem:[%s4034_s23 + $0x78] sm:$0xff] %v198_v14 }
  0x37   : > { %201 = vst [vmem:[%s4034_s23 + $0x80] sm:$0xff] %v200_v15 }
  0x38   : > { %203 = vst [vmem:[%s4034_s23 + $0x88] sm:$0xff] %v202_v16 }
  0x39   : > { %205 = vst [vmem:[%s4034_s23 + $0x90] sm:$0xff] %v204_v17 }
  0x3a   : > { %207 = vst [vmem:[%s4034_s23 + $0x98] sm:$0xff] %v206_v18 }
  0x3b   : > { %209 = vst [vmem:[%s4034_s23 + $0xa0] sm:$0xff] %v208_v19 }
  0x3c   : > { %211 = vst [vmem:[%s4034_s23 + $0xa8] sm:$0xff] %v210_v20 }
  0x3d   : > { %213 = vst [vmem:[%s4034_s23 + $0xb4] sm:$0xff] %v212_v21 }
  0x3e   : > { %215 = vst [vmem:[%s4034_s23 + $0xbc] sm:$0xff] %v214_v22 }
  0x3f   : > { %217 = vst [vmem:[%s4034_s23 + $0xc4] sm:$0xff] %v216_v23 }
  0x40   : > { %219 = vst [vmem:[%s4034_s23 + $0xcc] sm:$0xff] %v218_v24 }
  0x41   : > { %221 = vst [vmem:[%s4034_s23 + $0xd4] sm:$0xff] %v220_v25 }
  0x42   : > { %223 = vst [vmem:[%s4034_s23 + $0xdc] sm:$0xff] %v222_v26 }
  0x43   : > { %225 = vst [vmem:[%s4034_s23 + $0xe4] sm:$0xff] %v224_v27 }
  0x44   : > { %2943 = vst [vmem:[%s4034_s23 + $0x38] sm:$0xf] %v2942_v28 }
  0x45   : > { %2945 = vst [vmem:[%s4034_s23 + $0x74] sm:$0xf] %v2944_v29 }
  0x46   : > { %2947 = vst [vmem:[%s4034_s23 + $0xb0] sm:$0xf] %v2946_v30 }
  0x47   : > { %2949 = vst [vmem:[%s4034_s23 + $0xec] sm:$0xf] %v2948_v31 }
  0x48 PF: > { %247 = sbr.rel (!%p4004_p9) target bundleno = 321 (0x141), region = 46  ;;  %s249_s28 = sand.u32 (%p4004_p9), 1, %s3872_s15  }
  0x49   : > { %s3719_s7 = smul.u32 (%p4004_p9), 960, %s249_s28  ;;  %s4854_s1 = sld [smem:[#allocation8_spill]] (%p4004_p9) }
  0x4a   : > { %s3723_s11 = smul.u32 (%p4004_p9), 720, %s3892_s20 }
  0x4b   : > { %s4110_s6 = scalar_lea.vmem (%p4004_p9), [#allocation4], %s3719_s7 }
  0x4c   : > { %s254_s26 = sadd.s32 (%p4004_p9), %s3896_s21, %s3723_s11 }
  0x4d   : > { %s2950_s27 = sshll.u32 %s254_s26, 2 }
  0x4f   : > { %s4105_s0 = scalar_lea.vmem %s4854_s1, %s2950_s27 }
  0x50   : > { %v273_v32 = vld [vmem:[%s4105_s0] sm:$0xf]  ;;  %v275_v33 = vld [vmem:[%s4105_s0 + $0xc] sm:$0xf]  ;;  %v277_v34 = vld [vmem:[%s4105_s0 + $0x18] sm:$0xf] }
  0x51   : > { %274 = vst [vmem:[%s4110_s6] sm:$0xf] %v273_v32  ;;  %v279_v35 = vld [vmem:[%s4105_s0 + $0x24] sm:$0xf]  ;;  %v281_v36 = vld [vmem:[%s4105_s0 + $0x30] sm:$0xf] }
  0x52   : > { %276 = vst [vmem:[%s4110_s6 + $0x4] sm:$0xf] %v275_v33  ;;  %v283_v37 = vld [vmem:[%s4105_s0 + $0x3c] sm:$0xf]  ;;  %v285_v38 = vld [vmem:[%s4105_s0 + $0x48] sm:$0xf] }
  0x53   : > { %278 = vst [vmem:[%s4110_s6 + $0x8] sm:$0xf] %v277_v34  ;;  %v287_v39 = vld [vmem:[%s4105_s0 + $0x54] sm:$0xf]  ;;  %v289_v40 = vld [vmem:[%s4105_s0 + $0x60] sm:$0xf] }
  0x54   : > { %280 = vst [vmem:[%s4110_s6 + $0xc] sm:$0xf] %v279_v35  ;;  %v291_v41 = vld [vmem:[%s4105_s0 + $0x6c] sm:$0xf]  ;;  %v293_v42 = vld [vmem:[%s4105_s0 + $0x78] sm:$0xf] }
  0x55   : > { %282 = vst [vmem:[%s4110_s6 + $0x10] sm:$0xf] %v281_v36  ;;  %v295_v43 = vld [vmem:[%s4105_s0 + $0x84] sm:$0xf]  ;;  %v297_v44 = vld [vmem:[%s4105_s0 + $0x90] sm:$0xf] }
  0x56   : > { %284 = vst [vmem:[%s4110_s6 + $0x14] sm:$0xf] %v283_v37  ;;  %v299_v45 = vld [vmem:[%s4105_s0 + $0x9c] sm:$0xf]  ;;  %v301_v46 = vld [vmem:[%s4105_s0 + $0xa8] sm:$0xf] }
  0x57   : > { %286 = vst [vmem:[%s4110_s6 + $0x18] sm:$0xf] %v285_v38  ;;  %v303_v47 = vld [vmem:[%s4105_s0 + $0xb4] sm:$0xf]  ;;  %v305_v48 = vld [vmem:[%s4105_s0 + $0xc0] sm:$0xf] }
  0x58   : > { %288 = vst [vmem:[%s4110_s6 + $0x1c] sm:$0xf] %v287_v39  ;;  %v307_v49 = vld [vmem:[%s4105_s0 + $0xcc] sm:$0xf]  ;;  %v309_v50 = vld [vmem:[%s4105_s0 + $0xd8] sm:$0xf] }
  0x59   : > { %290 = vst [vmem:[%s4110_s6 + $0x20] sm:$0xf] %v289_v40  ;;  %v311_v51 = vld [vmem:[%s4105_s0 + $0xe4] sm:$0xf]  ;;  %v313_v52 = vld [vmem:[%s4105_s0 + $0xf0] sm:$0xf] }
  0x5a   : > { %292 = vst [vmem:[%s4110_s6 + $0x24] sm:$0xf] %v291_v41  ;;  %v315_v53 = vld [vmem:[%s4105_s0 + $0xfc] sm:$0xf]  ;;  %v317_v54 = vld [vmem:[%s4105_s0 + $0x108] sm:$0xf] }
  0x5b   : > { %294 = vst [vmem:[%s4110_s6 + $0x28] sm:$0xf] %v293_v42  ;;  %v319_v55 = vld [vmem:[%s4105_s0 + $0x114] sm:$0xf]  ;;  %v321_v56 = vld [vmem:[%s4105_s0 + $0x120] sm:$0xf] }
  0x5c   : > { %296 = vst [vmem:[%s4110_s6 + $0x2c] sm:$0xf] %v295_v43  ;;  %v323_v57 = vld [vmem:[%s4105_s0 + $0x12c] sm:$0xf]  ;;  %v325_v58 = vld [vmem:[%s4105_s0 + $0x138] sm:$0xf] }
  0x5d   : > { %298 = vst [vmem:[%s4110_s6 + $0x30] sm:$0xf] %v297_v44  ;;  %v327_v59 = vld [vmem:[%s4105_s0 + $0x144] sm:$0xf]  ;;  %v329_v60 = vld [vmem:[%s4105_s0 + $0x150] sm:$0xf] }
  0x5e   : > { %300 = vst [vmem:[%s4110_s6 + $0x34] sm:$0xf] %v299_v45  ;;  %v331_v61 = vld [vmem:[%s4105_s0 + $0x15c] sm:$0xf]  ;;  %v333_v62 = vld [vmem:[%s4105_s0 + $0x168] sm:$0xf] }
  0x5f   : > { %302 = vst [vmem:[%s4110_s6 + $0x38] sm:$0xf] %v301_v46  ;;  %v335_v63 = vld [vmem:[%s4105_s0 + $0x174] sm:$0xf]  ;;  %v337_v0 = vld [vmem:[%s4105_s0 + $0x180] sm:$0xf] }
  0x60   : > { %304 = vst [vmem:[%s4110_s6 + $0x3c] sm:$0xf] %v303_v47  ;;  %v339_v1 = vld [vmem:[%s4105_s0 + $0x18c] sm:$0xf]  ;;  %v341_v2 = vld [vmem:[%s4105_s0 + $0x198] sm:$0xf] }
  0x61   : > { %306 = vst [vmem:[%s4110_s6 + $0x40] sm:$0xf] %v305_v48  ;;  %v343_v3 = vld [vmem:[%s4105_s0 + $0x1a4] sm:$0xf]  ;;  %v345_v4 = vld [vmem:[%s4105_s0 + $0x1b0] sm:$0xf] }
  0x62   : > { %308 = vst [vmem:[%s4110_s6 + $0x44] sm:$0xf] %v307_v49  ;;  %v347_v5 = vld [vmem:[%s4105_s0 + $0x1bc] sm:$0xf]  ;;  %v349_v6 = vld [vmem:[%s4105_s0 + $0x1c8] sm:$0xf] }
  0x63   : > { %310 = vst [vmem:[%s4110_s6 + $0x48] sm:$0xf] %v309_v50  ;;  %v351_v7 = vld [vmem:[%s4105_s0 + $0x1d4] sm:$0xf]  ;;  %v353_v8 = vld [vmem:[%s4105_s0 + $0x1e0] sm:$0xf] }
  0x64   : > { %312 = vst [vmem:[%s4110_s6 + $0x4c] sm:$0xf] %v311_v51  ;;  %v355_v9 = vld [vmem:[%s4105_s0 + $0x1ec] sm:$0xf]  ;;  %v357_v10 = vld [vmem:[%s4105_s0 + $0x1f8] sm:$0xf] }
  0x65   : > { %314 = vst [vmem:[%s4110_s6 + $0x50] sm:$0xf] %v313_v52  ;;  %v359_v11 = vld [vmem:[%s4105_s0 + $0x204] sm:$0xf]  ;;  %v361_v12 = vld [vmem:[%s4105_s0 + $0x210] sm:$0xf] }
  0x66   : > { %316 = vst [vmem:[%s4110_s6 + $0x54] sm:$0xf] %v315_v53  ;;  %v363_v13 = vld [vmem:[%s4105_s0 + $0x21c] sm:$0xf]  ;;  %v365_v14 = vld [vmem:[%s4105_s0 + $0x228] sm:$0xf] }
  0x67   : > { %318 = vst [vmem:[%s4110_s6 + $0x58] sm:$0xf] %v317_v54  ;;  %v367_v15 = vld [vmem:[%s4105_s0 + $0x234] sm:$0xf]  ;;  %v369_v16 = vld [vmem:[%s4105_s0 + $0x240] sm:$0xf] }
  0x68   : > { %320 = vst [vmem:[%s4110_s6 + $0x5c] sm:$0xf] %v319_v55  ;;  %v371_v17 = vld [vmem:[%s4105_s0 + $0x24c] sm:$0xf]  ;;  %v373_v18 = vld [vmem:[%s4105_s0 + $0x258] sm:$0xf] }
  0x69   : > { %322 = vst [vmem:[%s4110_s6 + $0x60] sm:$0xf] %v321_v56  ;;  %v375_v19 = vld [vmem:[%s4105_s0 + $0x264] sm:$0xf]  ;;  %v377_v20 = vld [vmem:[%s4105_s0 + $0x270] sm:$0xf] }
  0x6a   : > { %324 = vst [vmem:[%s4110_s6 + $0x64] sm:$0xf] %v323_v57  ;;  %v379_v21 = vld [vmem:[%s4105_s0 + $0x27c] sm:$0xf]  ;;  %v381_v22 = vld [vmem:[%s4105_s0 + $0x288] sm:$0xf] }
  0x6b   : > { %326 = vst [vmem:[%s4110_s6 + $0x68] sm:$0xf] %v325_v58  ;;  %v383_v23 = vld [vmem:[%s4105_s0 + $0x294] sm:$0xf]  ;;  %v385_v24 = vld [vmem:[%s4105_s0 + $0x2a0] sm:$0xf] }
  0x6c   : > { %328 = vst [vmem:[%s4110_s6 + $0x6c] sm:$0xf] %v327_v59  ;;  %v387_v25 = vld [vmem:[%s4105_s0 + $0x2ac] sm:$0xf]  ;;  %v389_v26 = vld [vmem:[%s4105_s0 + $0x2b8] sm:$0xf] }
  0x6d   : > { %330 = vst [vmem:[%s4110_s6 + $0x70] sm:$0xf] %v329_v60  ;;  %v391_v27 = vld [vmem:[%s4105_s0 + $0x2c4] sm:$0xf]  ;;  %v393_v28 = vld [vmem:[%s4105_s0 + $0x2d0] sm:$0xf] }
  0x6e   : > { %332 = vst [vmem:[%s4110_s6 + $0x74] sm:$0xf] %v331_v61  ;;  %v395_v29 = vld [vmem:[%s4105_s0 + $0x2dc] sm:$0xf]  ;;  %v397_v30 = vld [vmem:[%s4105_s0 + $0x2e8] sm:$0xf] }
  0x6f   : > { %334 = vst [vmem:[%s4110_s6 + $0x78] sm:$0xf] %v333_v62  ;;  %v399_v31 = vld [vmem:[%s4105_s0 + $0x2f4] sm:$0xf]  ;;  %v401_v32 = vld [vmem:[%s4105_s0 + $0x300] sm:$0xf] }
  0x70   : > { %336 = vst [vmem:[%s4110_s6 + $0x7c] sm:$0xf] %v335_v63  ;;  %v403_v33 = vld [vmem:[%s4105_s0 + $0x30c] sm:$0xf]  ;;  %v405_v34 = vld [vmem:[%s4105_s0 + $0x318] sm:$0xf] }
  0x71   : > { %338 = vst [vmem:[%s4110_s6 + $0x80] sm:$0xf] %v337_v0  ;;  %v407_v35 = vld [vmem:[%s4105_s0 + $0x324] sm:$0xf]  ;;  %v409_v36 = vld [vmem:[%s4105_s0 + $0x330] sm:$0xf] }
  0x72   : > { %340 = vst [vmem:[%s4110_s6 + $0x84] sm:$0xf] %v339_v1  ;;  %v411_v37 = vld [vmem:[%s4105_s0 + $0x33c] sm:$0xf]  ;;  %v413_v38 = vld [vmem:[%s4105_s0 + $0x348] sm:$0xf] }
  0x73   : > { %342 = vst [vmem:[%s4110_s6 + $0x88] sm:$0xf] %v341_v2  ;;  %v415_v39 = vld [vmem:[%s4105_s0 + $0x354] sm:$0xf]  ;;  %v417_v40 = vld [vmem:[%s4105_s0 + $0x360] sm:$0xf] }
  0x74   : > { %344 = vst [vmem:[%s4110_s6 + $0x8c] sm:$0xf] %v343_v3  ;;  %v419_v41 = vld [vmem:[%s4105_s0 + $0x36c] sm:$0xf]  ;;  %v421_v42 = vld [vmem:[%s4105_s0 + $0x378] sm:$0xf] }
  0x75   : > { %346 = vst [vmem:[%s4110_s6 + $0x90] sm:$0xf] %v345_v4  ;;  %v423_v43 = vld [vmem:[%s4105_s0 + $0x384] sm:$0xf]  ;;  %v425_v44 = vld [vmem:[%s4105_s0 + $0x390] sm:$0xf] }
  0x76   : > { %348 = vst [vmem:[%s4110_s6 + $0x94] sm:$0xf] %v347_v5  ;;  %v427_v45 = vld [vmem:[%s4105_s0 + $0x39c] sm:$0xf]  ;;  %v429_v46 = vld [vmem:[%s4105_s0 + $0x3a8] sm:$0xf] }
  0x77   : > { %350 = vst [vmem:[%s4110_s6 + $0x98] sm:$0xf] %v349_v6  ;;  %v431_v47 = vld [vmem:[%s4105_s0 + $0x3b4] sm:$0xf]  ;;  %v433_v48 = vld [vmem:[%s4105_s0 + $0x3c0] sm:$0xf] }
  0x78   : > { %352 = vst [vmem:[%s4110_s6 + $0x9c] sm:$0xf] %v351_v7  ;;  %v435_v49 = vld [vmem:[%s4105_s0 + $0x3cc] sm:$0xf]  ;;  %v437_v50 = vld [vmem:[%s4105_s0 + $0x3d8] sm:$0xf] }
  0x79   : > { %354 = vst [vmem:[%s4110_s6 + $0xa0] sm:$0xf] %v353_v8  ;;  %v439_v51 = vld [vmem:[%s4105_s0 + $0x3e4] sm:$0xf]  ;;  %v441_v52 = vld [vmem:[%s4105_s0 + $0x3f0] sm:$0xf] }
  0x7a   : > { %356 = vst [vmem:[%s4110_s6 + $0xa4] sm:$0xf] %v355_v9  ;;  %v443_v53 = vld [vmem:[%s4105_s0 + $0x3fc] sm:$0xf]  ;;  %v445_v54 = vld [vmem:[%s4105_s0 + $0x408] sm:$0xf] }
  0x7b   : > { %358 = vst [vmem:[%s4110_s6 + $0xa8] sm:$0xf] %v357_v10  ;;  %v447_v55 = vld [vmem:[%s4105_s0 + $0x414] sm:$0xf]  ;;  %v449_v56 = vld [vmem:[%s4105_s0 + $0x420] sm:$0xf] }
  0x7c   : > { %360 = vst [vmem:[%s4110_s6 + $0xac] sm:$0xf] %v359_v11  ;;  %v451_v57 = vld [vmem:[%s4105_s0 + $0x42c] sm:$0xf]  ;;  %v453_v58 = vld [vmem:[%s4105_s0 + $0x438] sm:$0xf] }
  0x7d   : > { %362 = vst [vmem:[%s4110_s6 + $0xb0] sm:$0xf] %v361_v12  ;;  %v455_v59 = vld [vmem:[%s4105_s0 + $0x444] sm:$0xf]  ;;  %v457_v60 = vld [vmem:[%s4105_s0 + $0x450] sm:$0xf] }
  0x7e   : > { %364 = vst [vmem:[%s4110_s6 + $0xb4] sm:$0xf] %v363_v13  ;;  %v459_v61 = vld [vmem:[%s4105_s0 + $0x45c] sm:$0xf]  ;;  %v461_v62 = vld [vmem:[%s4105_s0 + $0x468] sm:$0xf] }
  0x7f   : > { %366 = vst [vmem:[%s4110_s6 + $0xb8] sm:$0xf] %v365_v14  ;;  %v463_v63 = vld [vmem:[%s4105_s0 + $0x474] sm:$0xf]  ;;  %v465_v0 = vld [vmem:[%s4105_s0 + $0x480] sm:$0xf] }
  0x80   : > { %368 = vst [vmem:[%s4110_s6 + $0xbc] sm:$0xf] %v367_v15  ;;  %v467_v1 = vld [vmem:[%s4105_s0 + $0x48c] sm:$0xf]  ;;  %v469_v2 = vld [vmem:[%s4105_s0 + $0x498] sm:$0xf] }
  0x81   : > { %370 = vst [vmem:[%s4110_s6 + $0xc0] sm:$0xf] %v369_v16  ;;  %v471_v3 = vld [vmem:[%s4105_s0 + $0x4a4] sm:$0xf]  ;;  %v473_v4 = vld [vmem:[%s4105_s0 + $0x4b0] sm:$0xf] }
  0x82   : > { %372 = vst [vmem:[%s4110_s6 + $0xc4] sm:$0xf] %v371_v17  ;;  %v475_v5 = vld [vmem:[%s4105_s0 + $0x4bc] sm:$0xf]  ;;  %v477_v6 = vld [vmem:[%s4105_s0 + $0x4c8] sm:$0xf] }
  0x83   : > { %374 = vst [vmem:[%s4110_s6 + $0xc8] sm:$0xf] %v373_v18  ;;  %v479_v7 = vld [vmem:[%s4105_s0 + $0x4d4] sm:$0xf]  ;;  %v481_v8 = vld [vmem:[%s4105_s0 + $0x4e0] sm:$0xf] }
  0x84   : > { %376 = vst [vmem:[%s4110_s6 + $0xcc] sm:$0xf] %v375_v19  ;;  %v483_v9 = vld [vmem:[%s4105_s0 + $0x4ec] sm:$0xf]  ;;  %v485_v10 = vld [vmem:[%s4105_s0 + $0x4f8] sm:$0xf] }
  0x85   : > { %378 = vst [vmem:[%s4110_s6 + $0xd0] sm:$0xf] %v377_v20  ;;  %v487_v11 = vld [vmem:[%s4105_s0 + $0x504] sm:$0xf]  ;;  %v489_v12 = vld [vmem:[%s4105_s0 + $0x510] sm:$0xf] }
  0x86   : > { %380 = vst [vmem:[%s4110_s6 + $0xd4] sm:$0xf] %v379_v21  ;;  %v491_v13 = vld [vmem:[%s4105_s0 + $0x51c] sm:$0xf]  ;;  %v493_v14 = vld [vmem:[%s4105_s0 + $0x528] sm:$0xf] }
  0x87   : > { %382 = vst [vmem:[%s4110_s6 + $0xd8] sm:$0xf] %v381_v22  ;;  %v495_v15 = vld [vmem:[%s4105_s0 + $0x534] sm:$0xf]  ;;  %v497_v16 = vld [vmem:[%s4105_s0 + $0x540] sm:$0xf] }
  0x88   : > { %384 = vst [vmem:[%s4110_s6 + $0xdc] sm:$0xf] %v383_v23  ;;  %v499_v17 = vld [vmem:[%s4105_s0 + $0x54c] sm:$0xf]  ;;  %v501_v18 = vld [vmem:[%s4105_s0 + $0x558] sm:$0xf] }
  0x89   : > { %386 = vst [vmem:[%s4110_s6 + $0xe0] sm:$0xf] %v385_v24  ;;  %v503_v19 = vld [vmem:[%s4105_s0 + $0x564] sm:$0xf]  ;;  %v505_v20 = vld [vmem:[%s4105_s0 + $0x570] sm:$0xf] }
  0x8a   : > { %388 = vst [vmem:[%s4110_s6 + $0xe4] sm:$0xf] %v387_v25  ;;  %v507_v21 = vld [vmem:[%s4105_s0 + $0x57c] sm:$0xf]  ;;  %v509_v22 = vld [vmem:[%s4105_s0 + $0x588] sm:$0xf] }
  0x8b   : > { %390 = vst [vmem:[%s4110_s6 + $0xe8] sm:$0xf] %v389_v26  ;;  %v511_v23 = vld [vmem:[%s4105_s0 + $0x594] sm:$0xf]  ;;  %v513_v24 = vld [vmem:[%s4105_s0 + $0x5a0] sm:$0xf] }
  0x8c   : > { %392 = vst [vmem:[%s4110_s6 + $0xec] sm:$0xf] %v391_v27  ;;  %v515_v25 = vld [vmem:[%s4105_s0 + $0x5ac] sm:$0xf]  ;;  %v517_v26 = vld [vmem:[%s4105_s0 + $0x5b8] sm:$0xf] }
  0x8d   : > { %394 = vst [vmem:[%s4110_s6 + $0xf0] sm:$0xf] %v393_v28  ;;  %v519_v27 = vld [vmem:[%s4105_s0 + $0x5c4] sm:$0xf]  ;;  %v521_v28 = vld [vmem:[%s4105_s0 + $0x5d0] sm:$0xf] }
  0x8e   : > { %396 = vst [vmem:[%s4110_s6 + $0xf4] sm:$0xf] %v395_v29  ;;  %v523_v29 = vld [vmem:[%s4105_s0 + $0x5dc] sm:$0xf] }
  0x8f   : > { %398 = vst [vmem:[%s4110_s6 + $0xf8] sm:$0xf] %v397_v30  ;;  %v525_v30 = vld [vmem:[%s4105_s0 + $0x5e8] sm:$0xf] }
  0x90   : > { %400 = vst [vmem:[%s4110_s6 + $0xfc] sm:$0xf] %v399_v31  ;;  %v527_v31 = vld [vmem:[%s4105_s0 + $0x5f4] sm:$0xf] }
  0x91   : > { %402 = vst [vmem:[%s4110_s6 + $0x100] sm:$0xf] %v401_v32  ;;  %v529_v32 = vld [vmem:[%s4105_s0 + $0x600] sm:$0xf] }
  0x92   : > { %404 = vst [vmem:[%s4110_s6 + $0x104] sm:$0xf] %v403_v33  ;;  %v531_v33 = vld [vmem:[%s4105_s0 + $0x60c] sm:$0xf] }
  0x93   : > { %406 = vst [vmem:[%s4110_s6 + $0x108] sm:$0xf] %v405_v34  ;;  %v533_v34 = vld [vmem:[%s4105_s0 + $0x618] sm:$0xf] }
  0x94   : > { %408 = vst [vmem:[%s4110_s6 + $0x10c] sm:$0xf] %v407_v35  ;;  %v535_v35 = vld [vmem:[%s4105_s0 + $0x624] sm:$0xf] }
  0x95   : > { %410 = vst [vmem:[%s4110_s6 + $0x110] sm:$0xf] %v409_v36  ;;  %v537_v36 = vld [vmem:[%s4105_s0 + $0x630] sm:$0xf] }
  0x96   : > { %412 = vst [vmem:[%s4110_s6 + $0x114] sm:$0xf] %v411_v37  ;;  %v539_v37 = vld [vmem:[%s4105_s0 + $0x63c] sm:$0xf] }
  0x97   : > { %414 = vst [vmem:[%s4110_s6 + $0x118] sm:$0xf] %v413_v38  ;;  %v541_v38 = vld [vmem:[%s4105_s0 + $0x648] sm:$0xf] }
  0x98   : > { %416 = vst [vmem:[%s4110_s6 + $0x11c] sm:$0xf] %v415_v39  ;;  %v543_v39 = vld [vmem:[%s4105_s0 + $0x654] sm:$0xf] }
  0x99   : > { %418 = vst [vmem:[%s4110_s6 + $0x120] sm:$0xf] %v417_v40  ;;  %v545_v40 = vld [vmem:[%s4105_s0 + $0x660] sm:$0xf] }
  0x9a   : > { %420 = vst [vmem:[%s4110_s6 + $0x124] sm:$0xf] %v419_v41  ;;  %v547_v41 = vld [vmem:[%s4105_s0 + $0x66c] sm:$0xf] }
  0x9b   : > { %422 = vst [vmem:[%s4110_s6 + $0x128] sm:$0xf] %v421_v42  ;;  %v549_v42 = vld [vmem:[%s4105_s0 + $0x678] sm:$0xf] }
  0x9c   : > { %424 = vst [vmem:[%s4110_s6 + $0x12c] sm:$0xf] %v423_v43  ;;  %v551_v43 = vld [vmem:[%s4105_s0 + $0x684] sm:$0xf] }
  0x9d   : > { %426 = vst [vmem:[%s4110_s6 + $0x130] sm:$0xf] %v425_v44  ;;  %v553_v44 = vld [vmem:[%s4105_s0 + $0x690] sm:$0xf] }
  0x9e   : > { %428 = vst [vmem:[%s4110_s6 + $0x134] sm:$0xf] %v427_v45  ;;  %v555_v45 = vld [vmem:[%s4105_s0 + $0x69c] sm:$0xf] }
  0x9f   : > { %430 = vst [vmem:[%s4110_s6 + $0x138] sm:$0xf] %v429_v46  ;;  %v557_v46 = vld [vmem:[%s4105_s0 + $0x6a8] sm:$0xf] }
  0xa0   : > { %432 = vst [vmem:[%s4110_s6 + $0x13c] sm:$0xf] %v431_v47  ;;  %v559_v47 = vld [vmem:[%s4105_s0 + $0x6b4] sm:$0xf] }
  0xa1   : > { %434 = vst [vmem:[%s4110_s6 + $0x140] sm:$0xf] %v433_v48  ;;  %v561_v48 = vld [vmem:[%s4105_s0 + $0x6c0] sm:$0xf] }
  0xa2   : > { %436 = vst [vmem:[%s4110_s6 + $0x144] sm:$0xf] %v435_v49  ;;  %v563_v49 = vld [vmem:[%s4105_s0 + $0x6cc] sm:$0xf] }
  0xa3   : > { %438 = vst [vmem:[%s4110_s6 + $0x148] sm:$0xf] %v437_v50  ;;  %v565_v50 = vld [vmem:[%s4105_s0 + $0x6d8] sm:$0xf] }
  0xa4   : > { %440 = vst [vmem:[%s4110_s6 + $0x14c] sm:$0xf] %v439_v51  ;;  %v567_v51 = vld [vmem:[%s4105_s0 + $0x6e4] sm:$0xf] }
  0xa5   : > { %442 = vst [vmem:[%s4110_s6 + $0x150] sm:$0xf] %v441_v52  ;;  %v569_v52 = vld [vmem:[%s4105_s0 + $0x6f0] sm:$0xf] }
  0xa6   : > { %444 = vst [vmem:[%s4110_s6 + $0x154] sm:$0xf] %v443_v53  ;;  %v571_v53 = vld [vmem:[%s4105_s0 + $0x6fc] sm:$0xf] }
  0xa7   : > { %446 = vst [vmem:[%s4110_s6 + $0x158] sm:$0xf] %v445_v54  ;;  %v573_v54 = vld [vmem:[%s4105_s0 + $0x708] sm:$0xf] }
  0xa8   : > { %448 = vst [vmem:[%s4110_s6 + $0x15c] sm:$0xf] %v447_v55  ;;  %v575_v55 = vld [vmem:[%s4105_s0 + $0x714] sm:$0xf] }
  0xa9   : > { %450 = vst [vmem:[%s4110_s6 + $0x160] sm:$0xf] %v449_v56  ;;  %v577_v56 = vld [vmem:[%s4105_s0 + $0x720] sm:$0xf] }
  0xaa   : > { %452 = vst [vmem:[%s4110_s6 + $0x164] sm:$0xf] %v451_v57  ;;  %v579_v57 = vld [vmem:[%s4105_s0 + $0x72c] sm:$0xf] }
  0xab   : > { %454 = vst [vmem:[%s4110_s6 + $0x168] sm:$0xf] %v453_v58  ;;  %v581_v58 = vld [vmem:[%s4105_s0 + $0x738] sm:$0xf] }
  0xac   : > { %456 = vst [vmem:[%s4110_s6 + $0x16c] sm:$0xf] %v455_v59  ;;  %v583_v59 = vld [vmem:[%s4105_s0 + $0x744] sm:$0xf] }
  0xad   : > { %458 = vst [vmem:[%s4110_s6 + $0x170] sm:$0xf] %v457_v60  ;;  %v585_v60 = vld [vmem:[%s4105_s0 + $0x750] sm:$0xf] }
  0xae   : > { %460 = vst [vmem:[%s4110_s6 + $0x174] sm:$0xf] %v459_v61  ;;  %v587_v61 = vld [vmem:[%s4105_s0 + $0x75c] sm:$0xf] }
  0xaf   : > { %462 = vst [vmem:[%s4110_s6 + $0x178] sm:$0xf] %v461_v62  ;;  %v589_v62 = vld [vmem:[%s4105_s0 + $0x768] sm:$0xf] }
  0xb0   : > { %464 = vst [vmem:[%s4110_s6 + $0x17c] sm:$0xf] %v463_v63  ;;  %v591_v63 = vld [vmem:[%s4105_s0 + $0x774] sm:$0xf] }
  0xb1   : > { %466 = vst [vmem:[%s4110_s6 + $0x180] sm:$0xf] %v465_v0  ;;  %v593_v0 = vld [vmem:[%s4105_s0 + $0x780] sm:$0xf] }
  0xb2   : > { %468 = vst [vmem:[%s4110_s6 + $0x184] sm:$0xf] %v467_v1  ;;  %v595_v1 = vld [vmem:[%s4105_s0 + $0x78c] sm:$0xf] }
  0xb3   : > { %470 = vst [vmem:[%s4110_s6 + $0x188] sm:$0xf] %v469_v2  ;;  %v597_v2 = vld [vmem:[%s4105_s0 + $0x798] sm:$0xf] }
  0xb4   : > { %472 = vst [vmem:[%s4110_s6 + $0x18c] sm:$0xf] %v471_v3  ;;  %v599_v3 = vld [vmem:[%s4105_s0 + $0x7a4] sm:$0xf] }
  0xb5   : > { %474 = vst [vmem:[%s4110_s6 + $0x190] sm:$0xf] %v473_v4  ;;  %v601_v4 = vld [vmem:[%s4105_s0 + $0x7b0] sm:$0xf] }
  0xb6   : > { %476 = vst [vmem:[%s4110_s6 + $0x194] sm:$0xf] %v475_v5  ;;  %v603_v5 = vld [vmem:[%s4105_s0 + $0x7bc] sm:$0xf] }
  0xb7   : > { %478 = vst [vmem:[%s4110_s6 + $0x198] sm:$0xf] %v477_v6  ;;  %v605_v6 = vld [vmem:[%s4105_s0 + $0x7c8] sm:$0xf] }
  0xb8   : > { %480 = vst [vmem:[%s4110_s6 + $0x19c] sm:$0xf] %v479_v7  ;;  %v607_v7 = vld [vmem:[%s4105_s0 + $0x7d4] sm:$0xf] }
  0xb9   : > { %482 = vst [vmem:[%s4110_s6 + $0x1a0] sm:$0xf] %v481_v8  ;;  %v609_v8 = vld [vmem:[%s4105_s0 + $0x7e0] sm:$0xf] }
  0xba   : > { %484 = vst [vmem:[%s4110_s6 + $0x1a4] sm:$0xf] %v483_v9  ;;  %v611_v9 = vld [vmem:[%s4105_s0 + $0x7ec] sm:$0xf] }
  0xbb   : > { %486 = vst [vmem:[%s4110_s6 + $0x1a8] sm:$0xf] %v485_v10  ;;  %v613_v10 = vld [vmem:[%s4105_s0 + $0x7f8] sm:$0xf] }
  0xbc   : > { %488 = vst [vmem:[%s4110_s6 + $0x1ac] sm:$0xf] %v487_v11  ;;  %v615_v11 = vld [vmem:[%s4105_s0 + $0x804] sm:$0xf] }
  0xbd   : > { %490 = vst [vmem:[%s4110_s6 + $0x1b0] sm:$0xf] %v489_v12  ;;  %v617_v12 = vld [vmem:[%s4105_s0 + $0x810] sm:$0xf] }
  0xbe   : > { %492 = vst [vmem:[%s4110_s6 + $0x1b4] sm:$0xf] %v491_v13  ;;  %v619_v13 = vld [vmem:[%s4105_s0 + $0x81c] sm:$0xf] }
  0xbf   : > { %494 = vst [vmem:[%s4110_s6 + $0x1b8] sm:$0xf] %v493_v14  ;;  %v621_v14 = vld [vmem:[%s4105_s0 + $0x828] sm:$0xf] }
  0xc0   : > { %496 = vst [vmem:[%s4110_s6 + $0x1bc] sm:$0xf] %v495_v15  ;;  %v623_v15 = vld [vmem:[%s4105_s0 + $0x834] sm:$0xf] }
  0xc1   : > { %498 = vst [vmem:[%s4110_s6 + $0x1c0] sm:$0xf] %v497_v16  ;;  %v625_v16 = vld [vmem:[%s4105_s0 + $0x840] sm:$0xf] }
  0xc2   : > { %500 = vst [vmem:[%s4110_s6 + $0x1c4] sm:$0xf] %v499_v17  ;;  %v627_v17 = vld [vmem:[%s4105_s0 + $0x84c] sm:$0xf] }
  0xc3   : > { %502 = vst [vmem:[%s4110_s6 + $0x1c8] sm:$0xf] %v501_v18  ;;  %v629_v18 = vld [vmem:[%s4105_s0 + $0x858] sm:$0xf] }
  0xc4   : > { %504 = vst [vmem:[%s4110_s6 + $0x1cc] sm:$0xf] %v503_v19  ;;  %v631_v19 = vld [vmem:[%s4105_s0 + $0x864] sm:$0xf] }
  0xc5   : > { %506 = vst [vmem:[%s4110_s6 + $0x1d0] sm:$0xf] %v505_v20  ;;  %v633_v20 = vld [vmem:[%s4105_s0 + $0x870] sm:$0xf] }
  0xc6   : > { %508 = vst [vmem:[%s4110_s6 + $0x1d4] sm:$0xf] %v507_v21  ;;  %v635_v21 = vld [vmem:[%s4105_s0 + $0x87c] sm:$0xf] }
  0xc7   : > { %510 = vst [vmem:[%s4110_s6 + $0x1d8] sm:$0xf] %v509_v22  ;;  %v637_v22 = vld [vmem:[%s4105_s0 + $0x888] sm:$0xf] }
  0xc8   : > { %512 = vst [vmem:[%s4110_s6 + $0x1dc] sm:$0xf] %v511_v23  ;;  %v639_v23 = vld [vmem:[%s4105_s0 + $0x894] sm:$0xf] }
  0xc9   : > { %514 = vst [vmem:[%s4110_s6 + $0x1e0] sm:$0xf] %v513_v24  ;;  %v641_v24 = vld [vmem:[%s4105_s0 + $0x8a0] sm:$0xf] }
  0xca   : > { %516 = vst [vmem:[%s4110_s6 + $0x1e4] sm:$0xf] %v515_v25  ;;  %v643_v25 = vld [vmem:[%s4105_s0 + $0x8ac] sm:$0xf] }
  0xcb   : > { %518 = vst [vmem:[%s4110_s6 + $0x1e8] sm:$0xf] %v517_v26  ;;  %v645_v26 = vld [vmem:[%s4105_s0 + $0x8b8] sm:$0xf] }
  0xcc   : > { %520 = vst [vmem:[%s4110_s6 + $0x1ec] sm:$0xf] %v519_v27  ;;  %v647_v27 = vld [vmem:[%s4105_s0 + $0x8c4] sm:$0xf] }
  0xcd   : > { %522 = vst [vmem:[%s4110_s6 + $0x1f0] sm:$0xf] %v521_v28  ;;  %v649_v28 = vld [vmem:[%s4105_s0 + $0x8d0] sm:$0xf] }
  0xce   : > { %524 = vst [vmem:[%s4110_s6 + $0x1f4] sm:$0xf] %v523_v29  ;;  %v651_v29 = vld [vmem:[%s4105_s0 + $0x8dc] sm:$0xf] }
  0xcf   : > { %526 = vst [vmem:[%s4110_s6 + $0x1f8] sm:$0xf] %v525_v30  ;;  %v653_v30 = vld [vmem:[%s4105_s0 + $0x8e8] sm:$0xf] }
  0xd0   : > { %528 = vst [vmem:[%s4110_s6 + $0x1fc] sm:$0xf] %v527_v31  ;;  %v655_v31 = vld [vmem:[%s4105_s0 + $0x8f4] sm:$0xf] }
  0xd1   : > { %530 = vst [vmem:[%s4110_s6 + $0x200] sm:$0xf] %v529_v32  ;;  %v657_v32 = vld [vmem:[%s4105_s0 + $0x900] sm:$0xf] }
  0xd2   : > { %532 = vst [vmem:[%s4110_s6 + $0x204] sm:$0xf] %v531_v33  ;;  %v659_v33 = vld [vmem:[%s4105_s0 + $0x90c] sm:$0xf] }
  0xd3   : > { %534 = vst [vmem:[%s4110_s6 + $0x208] sm:$0xf] %v533_v34  ;;  %v661_v34 = vld [vmem:[%s4105_s0 + $0x918] sm:$0xf] }
  0xd4   : > { %536 = vst [vmem:[%s4110_s6 + $0x20c] sm:$0xf] %v535_v35  ;;  %v663_v35 = vld [vmem:[%s4105_s0 + $0x924] sm:$0xf] }
  0xd5   : > { %538 = vst [vmem:[%s4110_s6 + $0x210] sm:$0xf] %v537_v36  ;;  %v665_v36 = vld [vmem:[%s4105_s0 + $0x930] sm:$0xf] }
  0xd6   : > { %540 = vst [vmem:[%s4110_s6 + $0x214] sm:$0xf] %v539_v37  ;;  %v667_v37 = vld [vmem:[%s4105_s0 + $0x93c] sm:$0xf] }
  0xd7   : > { %542 = vst [vmem:[%s4110_s6 + $0x218] sm:$0xf] %v541_v38  ;;  %v669_v38 = vld [vmem:[%s4105_s0 + $0x948] sm:$0xf] }
  0xd8   : > { %544 = vst [vmem:[%s4110_s6 + $0x21c] sm:$0xf] %v543_v39  ;;  %v671_v39 = vld [vmem:[%s4105_s0 + $0x954] sm:$0xf] }
  0xd9   : > { %546 = vst [vmem:[%s4110_s6 + $0x220] sm:$0xf] %v545_v40  ;;  %v673_v40 = vld [vmem:[%s4105_s0 + $0x960] sm:$0xf] }
  0xda   : > { %548 = vst [vmem:[%s4110_s6 + $0x224] sm:$0xf] %v547_v41  ;;  %v675_v41 = vld [vmem:[%s4105_s0 + $0x96c] sm:$0xf] }
  0xdb   : > { %550 = vst [vmem:[%s4110_s6 + $0x228] sm:$0xf] %v549_v42  ;;  %v677_v42 = vld [vmem:[%s4105_s0 + $0x978] sm:$0xf] }
  0xdc   : > { %552 = vst [vmem:[%s4110_s6 + $0x22c] sm:$0xf] %v551_v43  ;;  %v679_v43 = vld [vmem:[%s4105_s0 + $0x984] sm:$0xf] }
  0xdd   : > { %554 = vst [vmem:[%s4110_s6 + $0x230] sm:$0xf] %v553_v44  ;;  %v681_v44 = vld [vmem:[%s4105_s0 + $0x990] sm:$0xf] }
  0xde   : > { %556 = vst [vmem:[%s4110_s6 + $0x234] sm:$0xf] %v555_v45  ;;  %v683_v45 = vld [vmem:[%s4105_s0 + $0x99c] sm:$0xf] }
  0xdf   : > { %558 = vst [vmem:[%s4110_s6 + $0x238] sm:$0xf] %v557_v46  ;;  %v685_v46 = vld [vmem:[%s4105_s0 + $0x9a8] sm:$0xf] }
  0xe0   : > { %560 = vst [vmem:[%s4110_s6 + $0x23c] sm:$0xf] %v559_v47  ;;  %v687_v47 = vld [vmem:[%s4105_s0 + $0x9b4] sm:$0xf] }
  0xe1   : > { %562 = vst [vmem:[%s4110_s6 + $0x240] sm:$0xf] %v561_v48  ;;  %v689_v48 = vld [vmem:[%s4105_s0 + $0x9c0] sm:$0xf] }
  0xe2   : > { %564 = vst [vmem:[%s4110_s6 + $0x244] sm:$0xf] %v563_v49  ;;  %v691_v49 = vld [vmem:[%s4105_s0 + $0x9cc] sm:$0xf] }
  0xe3   : > { %566 = vst [vmem:[%s4110_s6 + $0x248] sm:$0xf] %v565_v50  ;;  %v693_v50 = vld [vmem:[%s4105_s0 + $0x9d8] sm:$0xf] }
  0xe4   : > { %568 = vst [vmem:[%s4110_s6 + $0x24c] sm:$0xf] %v567_v51  ;;  %v695_v51 = vld [vmem:[%s4105_s0 + $0x9e4] sm:$0xf] }
  0xe5   : > { %570 = vst [vmem:[%s4110_s6 + $0x250] sm:$0xf] %v569_v52  ;;  %v697_v52 = vld [vmem:[%s4105_s0 + $0x9f0] sm:$0xf] }
  0xe6   : > { %572 = vst [vmem:[%s4110_s6 + $0x254] sm:$0xf] %v571_v53  ;;  %v699_v53 = vld [vmem:[%s4105_s0 + $0x9fc] sm:$0xf] }
  0xe7   : > { %574 = vst [vmem:[%s4110_s6 + $0x258] sm:$0xf] %v573_v54  ;;  %v701_v54 = vld [vmem:[%s4105_s0 + $0xa08] sm:$0xf] }
  0xe8   : > { %576 = vst [vmem:[%s4110_s6 + $0x25c] sm:$0xf] %v575_v55  ;;  %v703_v55 = vld [vmem:[%s4105_s0 + $0xa14] sm:$0xf] }
  0xe9   : > { %578 = vst [vmem:[%s4110_s6 + $0x260] sm:$0xf] %v577_v56  ;;  %v705_v56 = vld [vmem:[%s4105_s0 + $0xa20] sm:$0xf] }
  0xea   : > { %580 = vst [vmem:[%s4110_s6 + $0x264] sm:$0xf] %v579_v57  ;;  %v707_v57 = vld [vmem:[%s4105_s0 + $0xa2c] sm:$0xf] }
  0xeb   : > { %582 = vst [vmem:[%s4110_s6 + $0x268] sm:$0xf] %v581_v58  ;;  %v709_v58 = vld [vmem:[%s4105_s0 + $0xa38] sm:$0xf] }
  0xec   : > { %584 = vst [vmem:[%s4110_s6 + $0x26c] sm:$0xf] %v583_v59  ;;  %v711_v59 = vld [vmem:[%s4105_s0 + $0xa44] sm:$0xf] }
  0xed   : > { %586 = vst [vmem:[%s4110_s6 + $0x270] sm:$0xf] %v585_v60  ;;  %v713_v60 = vld [vmem:[%s4105_s0 + $0xa50] sm:$0xf] }
  0xee   : > { %588 = vst [vmem:[%s4110_s6 + $0x274] sm:$0xf] %v587_v61  ;;  %v715_v61 = vld [vmem:[%s4105_s0 + $0xa5c] sm:$0xf] }
  0xef   : > { %590 = vst [vmem:[%s4110_s6 + $0x278] sm:$0xf] %v589_v62  ;;  %v717_v62 = vld [vmem:[%s4105_s0 + $0xa68] sm:$0xf] }
  0xf0   : > { %592 = vst [vmem:[%s4110_s6 + $0x27c] sm:$0xf] %v591_v63  ;;  %v719_v63 = vld [vmem:[%s4105_s0 + $0xa74] sm:$0xf] }
  0xf1   : > { %594 = vst [vmem:[%s4110_s6 + $0x280] sm:$0xf] %v593_v0  ;;  %v721_v0 = vld [vmem:[%s4105_s0 + $0xa80] sm:$0xf] }
  0xf2   : > { %596 = vst [vmem:[%s4110_s6 + $0x284] sm:$0xf] %v595_v1  ;;  %v723_v1 = vld [vmem:[%s4105_s0 + $0xa8c] sm:$0xf] }
  0xf3   : > { %598 = vst [vmem:[%s4110_s6 + $0x288] sm:$0xf] %v597_v2  ;;  %v725_v2 = vld [vmem:[%s4105_s0 + $0xa98] sm:$0xf] }
  0xf4   : > { %600 = vst [vmem:[%s4110_s6 + $0x28c] sm:$0xf] %v599_v3  ;;  %v727_v3 = vld [vmem:[%s4105_s0 + $0xaa4] sm:$0xf] }
  0xf5   : > { %602 = vst [vmem:[%s4110_s6 + $0x290] sm:$0xf] %v601_v4  ;;  %v729_v4 = vld [vmem:[%s4105_s0 + $0xab0] sm:$0xf] }
  0xf6   : > { %604 = vst [vmem:[%s4110_s6 + $0x294] sm:$0xf] %v603_v5  ;;  %v731_v5 = vld [vmem:[%s4105_s0 + $0xabc] sm:$0xf] }
  0xf7   : > { %606 = vst [vmem:[%s4110_s6 + $0x298] sm:$0xf] %v605_v6  ;;  %v733_v6 = vld [vmem:[%s4105_s0 + $0xac8] sm:$0xf] }
  0xf8   : > { %608 = vst [vmem:[%s4110_s6 + $0x29c] sm:$0xf] %v607_v7  ;;  %v735_v7 = vld [vmem:[%s4105_s0 + $0xad4] sm:$0xf] }
  0xf9   : > { %610 = vst [vmem:[%s4110_s6 + $0x2a0] sm:$0xf] %v609_v8  ;;  %v737_v8 = vld [vmem:[%s4105_s0 + $0xae0] sm:$0xf] }
  0xfa   : > { %612 = vst [vmem:[%s4110_s6 + $0x2a4] sm:$0xf] %v611_v9  ;;  %v739_v9 = vld [vmem:[%s4105_s0 + $0xaec] sm:$0xf] }
  0xfb   : > { %614 = vst [vmem:[%s4110_s6 + $0x2a8] sm:$0xf] %v613_v10  ;;  %v741_v10 = vld [vmem:[%s4105_s0 + $0xaf8] sm:$0xf] }
  0xfc   : > { %616 = vst [vmem:[%s4110_s6 + $0x2ac] sm:$0xf] %v615_v11  ;;  %v743_v11 = vld [vmem:[%s4105_s0 + $0xb04] sm:$0xf] }
  0xfd   : > { %618 = vst [vmem:[%s4110_s6 + $0x2b0] sm:$0xf] %v617_v12  ;;  %v745_v12 = vld [vmem:[%s4105_s0 + $0xb10] sm:$0xf] }
  0xfe   : > { %620 = vst [vmem:[%s4110_s6 + $0x2b4] sm:$0xf] %v619_v13  ;;  %v747_v13 = vld [vmem:[%s4105_s0 + $0xb1c] sm:$0xf] }
  0xff   : > { %622 = vst [vmem:[%s4110_s6 + $0x2b8] sm:$0xf] %v621_v14  ;;  %v749_v14 = vld [vmem:[%s4105_s0 + $0xb28] sm:$0xf] }
 0x100   : > { %624 = vst [vmem:[%s4110_s6 + $0x2bc] sm:$0xf] %v623_v15  ;;  %v751_v15 = vld [vmem:[%s4105_s0 + $0xb34] sm:$0xf] }
 0x101   : > { %626 = vst [vmem:[%s4110_s6 + $0x2c0] sm:$0xf] %v625_v16 }
 0x102   : > { %628 = vst [vmem:[%s4110_s6 + $0x2c4] sm:$0xf] %v627_v17 }
 0x103   : > { %630 = vst [vmem:[%s4110_s6 + $0x2c8] sm:$0xf] %v629_v18 }
 0x104   : > { %632 = vst [vmem:[%s4110_s6 + $0x2cc] sm:$0xf] %v631_v19 }
 0x105   : > { %634 = vst [vmem:[%s4110_s6 + $0x2d0] sm:$0xf] %v633_v20 }
 0x106   : > { %636 = vst [vmem:[%s4110_s6 + $0x2d4] sm:$0xf] %v635_v21 }
 0x107   : > { %638 = vst [vmem:[%s4110_s6 + $0x2d8] sm:$0xf] %v637_v22 }
 0x108   : > { %640 = vst [vmem:[%s4110_s6 + $0x2dc] sm:$0xf] %v639_v23 }
 0x109   : > { %642 = vst [vmem:[%s4110_s6 + $0x2e0] sm:$0xf] %v641_v24 }
 0x10a   : > { %644 = vst [vmem:[%s4110_s6 + $0x2e4] sm:$0xf] %v643_v25 }
 0x10b   : > { %646 = vst [vmem:[%s4110_s6 + $0x2e8] sm:$0xf] %v645_v26 }
 0x10c   : > { %648 = vst [vmem:[%s4110_s6 + $0x2ec] sm:$0xf] %v647_v27 }
 0x10d   : > { %650 = vst [vmem:[%s4110_s6 + $0x2f0] sm:$0xf] %v649_v28 }
 0x10e   : > { %652 = vst [vmem:[%s4110_s6 + $0x2f4] sm:$0xf] %v651_v29 }
 0x10f   : > { %654 = vst [vmem:[%s4110_s6 + $0x2f8] sm:$0xf] %v653_v30 }
 0x110   : > { %656 = vst [vmem:[%s4110_s6 + $0x2fc] sm:$0xf] %v655_v31 }
 0x111   : > { %658 = vst [vmem:[%s4110_s6 + $0x300] sm:$0xf] %v657_v32 }
 0x112   : > { %660 = vst [vmem:[%s4110_s6 + $0x304] sm:$0xf] %v659_v33 }
 0x113   : > { %662 = vst [vmem:[%s4110_s6 + $0x308] sm:$0xf] %v661_v34 }
 0x114   : > { %664 = vst [vmem:[%s4110_s6 + $0x30c] sm:$0xf] %v663_v35 }
 0x115   : > { %666 = vst [vmem:[%s4110_s6 + $0x310] sm:$0xf] %v665_v36 }
 0x116   : > { %668 = vst [vmem:[%s4110_s6 + $0x314] sm:$0xf] %v667_v37 }
 0x117   : > { %670 = vst [vmem:[%s4110_s6 + $0x318] sm:$0xf] %v669_v38 }
 0x118   : > { %672 = vst [vmem:[%s4110_s6 + $0x31c] sm:$0xf] %v671_v39 }
 0x119   : > { %674 = vst [vmem:[%s4110_s6 + $0x320] sm:$0xf] %v673_v40 }
 0x11a   : > { %676 = vst [vmem:[%s4110_s6 + $0x324] sm:$0xf] %v675_v41 }
 0x11b   : > { %678 = vst [vmem:[%s4110_s6 + $0x328] sm:$0xf] %v677_v42 }
 0x11c   : > { %680 = vst [vmem:[%s4110_s6 + $0x32c] sm:$0xf] %v679_v43 }
 0x11d   : > { %682 = vst [vmem:[%s4110_s6 + $0x330] sm:$0xf] %v681_v44 }
 0x11e   : > { %684 = vst [vmem:[%s4110_s6 + $0x334] sm:$0xf] %v683_v45 }
 0x11f   : > { %686 = vst [vmem:[%s4110_s6 + $0x338] sm:$0xf] %v685_v46 }
 0x120   : > { %688 = vst [vmem:[%s4110_s6 + $0x33c] sm:$0xf] %v687_v47 }
 0x121   : > { %690 = vst [vmem:[%s4110_s6 + $0x340] sm:$0xf] %v689_v48 }
 0x122   : > { %692 = vst [vmem:[%s4110_s6 + $0x344] sm:$0xf] %v691_v49 }
 0x123   : > { %694 = vst [vmem:[%s4110_s6 + $0x348] sm:$0xf] %v693_v50 }
 0x124   : > { %696 = vst [vmem:[%s4110_s6 + $0x34c] sm:$0xf] %v695_v51 }
 0x125   : > { %698 = vst [vmem:[%s4110_s6 + $0x350] sm:$0xf] %v697_v52 }
 0x126   : > { %700 = vst [vmem:[%s4110_s6 + $0x354] sm:$0xf] %v699_v53 }
 0x127   : > { %702 = vst [vmem:[%s4110_s6 + $0x358] sm:$0xf] %v701_v54 }
 0x128   : > { %704 = vst [vmem:[%s4110_s6 + $0x35c] sm:$0xf] %v703_v55 }
 0x129   : > { %706 = vst [vmem:[%s4110_s6 + $0x360] sm:$0xf] %v705_v56 }
 0x12a   : > { %708 = vst [vmem:[%s4110_s6 + $0x364] sm:$0xf] %v707_v57 }
 0x12b   : > { %710 = vst [vmem:[%s4110_s6 + $0x368] sm:$0xf] %v709_v58 }
 0x12c   : > { %712 = vst [vmem:[%s4110_s6 + $0x36c] sm:$0xf] %v711_v59 }
 0x12d   : > { %714 = vst [vmem:[%s4110_s6 + $0x370] sm:$0xf] %v713_v60 }
 0x12e   : > { %716 = vst [vmem:[%s4110_s6 + $0x374] sm:$0xf] %v715_v61 }
 0x12f   : > { %718 = vst [vmem:[%s4110_s6 + $0x378] sm:$0xf] %v717_v62 }
 0x130   : > { %720 = vst [vmem:[%s4110_s6 + $0x37c] sm:$0xf] %v719_v63 }
 0x131   : > { %722 = vst [vmem:[%s4110_s6 + $0x380] sm:$0xf] %v721_v0 }
 0x132   : > { %724 = vst [vmem:[%s4110_s6 + $0x384] sm:$0xf] %v723_v1 }
 0x133   : > { %726 = vst [vmem:[%s4110_s6 + $0x388] sm:$0xf] %v725_v2 }
 0x134   : > { %728 = vst [vmem:[%s4110_s6 + $0x38c] sm:$0xf] %v727_v3 }
 0x135   : > { %730 = vst [vmem:[%s4110_s6 + $0x390] sm:$0xf] %v729_v4 }
 0x136   : > { %732 = vst [vmem:[%s4110_s6 + $0x394] sm:$0xf] %v731_v5 }
 0x137   : > { %734 = vst [vmem:[%s4110_s6 + $0x398] sm:$0xf] %v733_v6 }
 0x138   : > { %736 = vst [vmem:[%s4110_s6 + $0x39c] sm:$0xf] %v735_v7 }
 0x139   : > { %738 = vst [vmem:[%s4110_s6 + $0x3a0] sm:$0xf] %v737_v8 }
 0x13a   : > { %740 = vst [vmem:[%s4110_s6 + $0x3a4] sm:$0xf] %v739_v9 }
 0x13b   : > { %742 = vst [vmem:[%s4110_s6 + $0x3a8] sm:$0xf] %v741_v10 }
 0x13c   : > { %744 = vst [vmem:[%s4110_s6 + $0x3ac] sm:$0xf] %v743_v11 }
 0x13d   : > { %746 = vst [vmem:[%s4110_s6 + $0x3b0] sm:$0xf] %v745_v12 }
 0x13e   : > { %748 = vst [vmem:[%s4110_s6 + $0x3b4] sm:$0xf] %v747_v13 }
 0x13f   : > { %750 = vst [vmem:[%s4110_s6 + $0x3b8] sm:$0xf] %v749_v14 }
 0x140   : > { %752 = vst [vmem:[%s4110_s6 + $0x3bc] sm:$0xf] %v751_v15 }
 0x141 PF: > { %p2951_p0 = scmp.ge.s32.totalorder %s3900_s22, 1  ;;  %p1261_p1 = scmp.lt.s32.totalorder %s3900_s22, 31 }
 0x143   : > { %p1262_p2 = pnand %p2951_p0, %p1261_p1 }
 0x144   : > { %s1268_s5 = sand.u32 (!%p1262_p2), 1, %s3876_s16   ;;  %s1275_s23 = sand.u32 (!%p1262_p2), 1, %s3868_s14  }
 0x145   : > { %1265 = sbr.rel (%p1262_p2) target bundleno = 652 (0x28c), region = 91  ;;  %s1301_s0 = sand.u32 (!%p1262_p2), 1, %s3860_s12  }
 0x146   : > { %s3721_s28 = smul.u32 (!%p1262_p2), 240, %s1268_s5  ;;  %s2952_s11 = sshll.u32 (!%p1262_p2), %s1301_s0, 5 }
 0x147   : > { %s3722_s7 = smul.u32 (!%p1262_p2), 960, %s1275_s23  ;;  %p1306_p3 = scmp.lt.s32.totalorder (!%p1262_p2), %s3888_s19, 2 }
 0x148   : > { %s4602_s6 = scalar_lea.vmem (!%p1262_p2), [#allocation3], %s3721_s28  ;;  %s4606_s25 = scalar_lea.vmem (!%p1262_p2), [#allocation5], %s2952_s11 }
 0x149   : > { %s4604_s1 = scalar_lea.vmem (!%p1262_p2), [#allocation4], %s3722_s7  ;;  %p2953_p4 = scmp.ne.s32.totalorder (!%p1262_p2), %s3884_s18, 0 }
 0x14a   : > { %s4596_s26 = scalar_select %p1306_p3, %s3888_s19, 2 }
 0x14b   : > { %1312 = sbr.rel (%p2953_p4) target bundleno = 341 (0x155), region = 103 }
 0x14c   : > { %s1308_s4 = scalar_lea.vmem %s4844_s2, %s4596_s26 }
 0x150   : > { %v3902_v16 = vmov 0.0  }
 0x151   : > { %1313 = vst [vmem:[#allocation2 + $0x10] sm:$0xff] %v3902_v16 }
 0x152   : > { %1314 = vst [vmem:[#allocation2] sm:$0xff] %v3902_v16 }
 0x153   : > { %1315 = vst [vmem:[#allocation2 + $0x18] sm:$0xff] %v3902_v16 }
 0x154   : > { %1316 = vst [vmem:[#allocation2 + $0x8] sm:$0xff] %v3902_v16 }
 0x155 PF: > { %v3597_v17 = vld [vmem:[%s4604_s1 + $0x38] sm:$0xff]  ;;  %v3596_v21 = vld [vmem:[%s4604_s1 + $0x30] sm:$0xff]  ;;  %v3595_v25 = vld [vmem:[%s4604_s1 + $0x28] sm:$0xff]  ;;  %p3554_p5 = scmp.ne.s32.totalorder %s3884_s18, 9 }
 0x156   : > { %v3605_v18 = vld [vmem:[%s4604_s1 + $0x78] sm:$0xff]  ;;  %2465 = vmatpush.bf16.msra.mxu0 %v3597_v17  ;;  %v3604_v22 = vld [vmem:[%s4604_s1 + $0x70] sm:$0xff]  ;;  %v3603_v26 = vld [vmem:[%s4604_s1 + $0x68] sm:$0xff] }
 0x157   : > { %v3613_v19 = vld [vmem:[%s4604_s1 + $0xb8] sm:$0xff]  ;;  %2484 = vmatpush.bf16.msra.mxu1 %v3605_v18  ;;  %v3612_v23 = vld [vmem:[%s4604_s1 + $0xb0] sm:$0xff]  ;;  %v3611_v27 = vld [vmem:[%s4604_s1 + $0xa8] sm:$0xff] }
 0x158   : > { %v3621_v20 = vld [vmem:[%s4604_s1 + $0xf8] sm:$0xff]  ;;  %2503 = vmatpush.bf16.msra.mxu2 %v3613_v19  ;;  %v3620_v24 = vld [vmem:[%s4604_s1 + $0xf0] sm:$0xff]  ;;  %v3619_v28 = vld [vmem:[%s4604_s1 + $0xe8] sm:$0xff] }
 0x159   : > { %2522 = vmatpush.bf16.msra.mxu3 %v3621_v20  ;;  %v3594_v29 = vld [vmem:[%s4604_s1 + $0x20] sm:$0xff]  ;;  %v3593_v33 = vld [vmem:[%s4604_s1 + $0x18] sm:$0xff]  ;;  %v3592_v37 = vld [vmem:[%s4604_s1 + $0x10] sm:$0xff] }
 0x15a   : > { %2466 = vmatpush.bf16.msra.mxu0 %v3596_v21  ;;  %v3602_v30 = vld [vmem:[%s4604_s1 + $0x60] sm:$0xff]  ;;  %v3601_v34 = vld [vmem:[%s4604_s1 + $0x58] sm:$0xff]  ;;  %v3600_v38 = vld [vmem:[%s4604_s1 + $0x50] sm:$0xff] }
 0x15b   : > { %2485 = vmatpush.bf16.msra.mxu1 %v3604_v22  ;;  %v3610_v31 = vld [vmem:[%s4604_s1 + $0xa0] sm:$0xff]  ;;  %v3609_v35 = vld [vmem:[%s4604_s1 + $0x98] sm:$0xff]  ;;  %v3608_v39 = vld [vmem:[%s4604_s1 + $0x90] sm:$0xff] }
 0x15c   : > { %2504 = vmatpush.bf16.msra.mxu2 %v3612_v23  ;;  %v3618_v32 = vld [vmem:[%s4604_s1 + $0xe0] sm:$0xff]  ;;  %v3617_v36 = vld [vmem:[%s4604_s1 + $0xd8] sm:$0xff]  ;;  %v3616_v40 = vld [vmem:[%s4604_s1 + $0xd0] sm:$0xff] }
 0x15d   : > { %2523 = vmatpush.bf16.msra.mxu3 %v3620_v24  ;;  %v3591_v41 = vld [vmem:[%s4604_s1 + $0x8] sm:$0xff]  ;;  %v3590_v45 = vld [vmem:[%s4604_s1] sm:$0xff]  ;;  %v3645_v57 = vld [vmem:[%s4604_s1 + $0x1b8] sm:$0xff] }
 0x15e   : > { %2467 = vmatpush.bf16.msra.mxu0 %v3595_v25  ;;  %v3599_v42 = vld [vmem:[%s4604_s1 + $0x48] sm:$0xff]  ;;  %v3598_v46 = vld [vmem:[%s4604_s1 + $0x40] sm:$0xff]  ;;  %v3629_v58 = vld [vmem:[%s4604_s1 + $0x138] sm:$0xff] }
 0x15f   : > { %2486 = vmatpush.bf16.msra.mxu1 %v3603_v26  ;;  %v3607_v43 = vld [vmem:[%s4604_s1 + $0x88] sm:$0xff]  ;;  %v3606_v47 = vld [vmem:[%s4604_s1 + $0x80] sm:$0xff]  ;;  %v3637_v63 = vld [vmem:[%s4604_s1 + $0x178] sm:$0xff] }
 0x160   : > { %2505 = vmatpush.bf16.msra.mxu2 %v3611_v27  ;;  %v3615_v44 = vld [vmem:[%s4604_s1 + $0xc8] sm:$0xff]  ;;  %v3614_v48 = vld [vmem:[%s4604_s1 + $0xc0] sm:$0xff]  ;;  %v3653_v0 = vld [vmem:[%s4604_s1 + $0x1f8] sm:$0xff] }
 0x161   : > { %2524 = vmatpush.bf16.msra.mxu3 %v3619_v28  ;;  %v2956_v49 = vld [vmem:[%s4602_s6] sm:$0xf]  ;;  %v3567_v50 = vld [vmem:[%s4602_s6 + $0x38] sm:$0xf0]  ;;  %v3560_v51 = vld [vmem:[%s4602_s6 + $0x4] sm:$0xf] }
 0x162   : > { %2468 = vmatpush.bf16.msra.mxu0 %v3594_v29  ;;  %v2958_v52 = vld [vmem:[%s4602_s6 + $0x3c] sm:$0xf0]  ;;  %v2964_v53 = vld [vmem:[%s4602_s6 + $0x8] sm:$0xf]  ;;  %v3568_v54 = vld [vmem:[%s4602_s6 + $0x40] sm:$0xf0]  ;;  %v2957_v59 = vor.u32 %v3567_v50, %v2956_v49 }
 0x163   : > { %2487 = vmatpush.bf16.msra.mxu1 %v3602_v30  ;;  %v3561_v55 = vld [vmem:[%s4602_s6 + $0xc] sm:$0xf]  ;;  %v2966_v56 = vld [vmem:[%s4602_s6 + $0x44] sm:$0xf0]  ;;  %v2961_v60 = vor.u32 %v3560_v51, %v2958_v52  ;;  %v2965_v61 = vor.u32 %v3568_v54, %v2964_v53  ;;  %v3644_v1 = vld [vmem:[%s4604_s1 + $0x1b0] sm:$0xff] }
 0x164   : > { %2506 = vmatpush.bf16.msra.mxu2 %v3610_v31  ;;  %v2969_v62 = vor.u32 %v3561_v55, %v2966_v56  ;;  %v3628_v2 = vld [vmem:[%s4604_s1 + $0x130] sm:$0xff]  ;;  %v3643_v5 = vld [vmem:[%s4604_s1 + $0x1a8] sm:$0xff]  ;;  %v3642_v9 = vld [vmem:[%s4604_s1 + $0x1a0] sm:$0xff] }
 0x165   : > { %2525 = vmatpush.bf16.msra.mxu3 %v3618_v32  ;;  %v3636_v3 = vld [vmem:[%s4604_s1 + $0x170] sm:$0xff]  ;;  %v3627_v6 = vld [vmem:[%s4604_s1 + $0x128] sm:$0xff]  ;;  %v3626_v10 = vld [vmem:[%s4604_s1 + $0x120] sm:$0xff] }
 0x166   : > { %2469 = vmatpush.bf16.msra.mxu0 %v3593_v33  ;;  %v3652_v4 = vld [vmem:[%s4604_s1 + $0x1f0] sm:$0xff]  ;;  %v3635_v7 = vld [vmem:[%s4604_s1 + $0x168] sm:$0xff]  ;;  %v3634_v11 = vld [vmem:[%s4604_s1 + $0x160] sm:$0xff] }
 0x167   : > { %2488 = vmatpush.bf16.msra.mxu1 %v3601_v34  ;;  %v3651_v8 = vld [vmem:[%s4604_s1 + $0x1e8] sm:$0xff]  ;;  %v3650_v12 = vld [vmem:[%s4604_s1 + $0x1e0] sm:$0xff]  ;;  %v3641_v21 = vld [vmem:[%s4604_s1 + $0x198] sm:$0xff] }
 0x168   : > { %2507 = vmatpush.bf16.msra.mxu2 %v3609_v35  ;;  %v3016_v13 = vld [vmem:[%s4602_s6 + $0x78] sm:$0xf]  ;;  %v3582_v14 = vld [vmem:[%s4602_s6 + $0xb0] sm:$0xf0]  ;;  %v3575_v15 = vld [vmem:[%s4602_s6 + $0x7c] sm:$0xf] }
 0x169   : > { %2526 = vmatpush.bf16.msra.mxu3 %v3617_v36  ;;  %v3018_v16 = vld [vmem:[%s4602_s6 + $0xb4] sm:$0xf0]  ;;  %v3024_v17 = vld [vmem:[%s4602_s6 + $0x80] sm:$0xf]  ;;  %v3583_v18 = vld [vmem:[%s4602_s6 + $0xb8] sm:$0xf0]  ;;  %v3017_v23 = vor.u32 %v3582_v14, %v3016_v13 }
 0x16a   : > { %2470 = vmatpush.bf16.msra.mxu0 %v3592_v37  ;;  %v3576_v19 = vld [vmem:[%s4602_s6 + $0x84] sm:$0xf]  ;;  %v3026_v20 = vld [vmem:[%s4602_s6 + $0xbc] sm:$0xf0]  ;;  %v3625_v22 = vld [vmem:[%s4604_s1 + $0x118] sm:$0xff]  ;;  %v3021_v24 = vor.u32 %v3575_v15, %v3018_v16  ;;  %v3025_v25 = vor.u32 %v3583_v18, %v3024_v17 }
 0x16b   : > { %2489 = vmatpush.bf16.msra.mxu1 %v3600_v38  ;;  %v3029_v26 = vor.u32 %v3576_v19, %v3026_v20  ;;  %v3633_v27 = vld [vmem:[%s4604_s1 + $0x158] sm:$0xff]  ;;  %v3640_v29 = vld [vmem:[%s4604_s1 + $0x190] sm:$0xff]  ;;  %v3639_v33 = vld [vmem:[%s4604_s1 + $0x188] sm:$0xff] }
 0x16c   : > { %2508 = vmatpush.bf16.msra.mxu2 %v3608_v39  ;;  %v3649_v28 = vld [vmem:[%s4604_s1 + $0x1d8] sm:$0xff]  ;;  %v3624_v30 = vld [vmem:[%s4604_s1 + $0x110] sm:$0xff]  ;;  %v3623_v34 = vld [vmem:[%s4604_s1 + $0x108] sm:$0xff] }
 0x16d   : > { %2527 = vmatpush.bf16.msra.mxu3 %v3616_v40  ;;  %v3632_v31 = vld [vmem:[%s4604_s1 + $0x150] sm:$0xff]  ;;  %v3631_v35 = vld [vmem:[%s4604_s1 + $0x148] sm:$0xff]  ;;  %v3638_v37 = vld [vmem:[%s4604_s1 + $0x180] sm:$0xff] }
 0x16e   : > { %2471 = vmatpush.bf16.msra.mxu0 %v3591_v41  ;;  %v3648_v32 = vld [vmem:[%s4604_s1 + $0x1d0] sm:$0xff]  ;;  %v3647_v36 = vld [vmem:[%s4604_s1 + $0x1c8] sm:$0xff]  ;;  %v3622_v38 = vld [vmem:[%s4604_s1 + $0x100] sm:$0xff] }
 0x16f   : > { %2490 = vmatpush.bf16.msra.mxu1 %v3599_v42  ;;  %v3630_v39 = vld [vmem:[%s4604_s1 + $0x140] sm:$0xff]  ;;  %v3677_v42 = vld [vmem:[%s4604_s1 + $0x2b8] sm:$0xff]  ;;  %v3676_v54 = vld [vmem:[%s4604_s1 + $0x2b0] sm:$0xff] }
 0x170   : > { %2509 = vmatpush.bf16.msra.mxu2 %v3607_v43  ;;  %v3646_v40 = vld [vmem:[%s4604_s1 + $0x1c0] sm:$0xff]  ;;  %v3661_v43 = vld [vmem:[%s4604_s1 + $0x238] sm:$0xff]  ;;  %v3672_v18 = vld [vmem:[%s4604_s1 + $0x290] sm:$0xff] }
 0x171   : > { %2528 = vmatpush.bf16.msra.mxu3 %v3615_v44  ;;  %v2972_v41 = vld [vmem:[%s4602_s6 + $0x10] sm:$0xf]  ;;  %v3569_v44 = vld [vmem:[%s4602_s6 + $0x48] sm:$0xf0]  ;;  %v3563_v49 = vld [vmem:[%s4602_s6 + $0x1c] sm:$0xf] }
 0x172   : > { %2472 = vmatpush.bf16.msra.mxu0 %v3590_v45  ;;  %v3562_v45 = vld [vmem:[%s4602_s6 + $0x14] sm:$0xf]  ;;  %v2982_v50 = vld [vmem:[%s4602_s6 + $0x54] sm:$0xf0]  ;;  %v2973_v53 = vor.u32 %v3569_v44, %v2972_v41  ;;  %v3042_v14 = vld [vmem:[%s4602_s6 + $0xcc] sm:$0xf0] }
 0x173   : > { %2491 = vmatpush.bf16.msra.mxu1 %v3598_v46  ;;  %v2974_v46 = vld [vmem:[%s4602_s6 + $0x4c] sm:$0xf0]  ;;  %v3669_v51 = vld [vmem:[%s4604_s1 + $0x278] sm:$0xff] }
 0x174   : > { %2510 = vmatpush.bf16.msra.mxu2 %v3606_v47  ;;  %v2980_v47 = vld [vmem:[%s4602_s6 + $0x18] sm:$0xf]  ;;  %v2977_v55 = vor.u32 %v3562_v45, %v2974_v46  ;;  %v2996_v41 = vld [vmem:[%s4602_s6 + $0x28] sm:$0xf]  ;;  %v3692_v46 = vld [vmem:[%s4604_s1 + $0x330] sm:$0xff] }
 0x175   : > { %2529 = vmatpush.bf16.msra.mxu3 %v3614_v48  ;;  %2473 = vmatmul.bf16.vlgmr.msra.gmra.mxu0 %v2957_v59  ;;  %v3570_v48 = vld [vmem:[%s4602_s6 + $0x50] sm:$0xf0]  ;;  %v3685_v52 = vld [vmem:[%s4604_s1 + $0x2f8] sm:$0xff] }
 0x176   : > { %2541 = vmatpush.bf16.msrb.mxu0 %v3629_v58  ;;  %2492 = vmatmul.bf16.vlgmr.msra.gmra.mxu1 %v2961_v60  ;;  %v2981_v56 = vor.u32 %v3570_v48, %v2980_v47  ;;  %v3660_v58 = vld [vmem:[%s4604_s1 + $0x230] sm:$0xff]  ;;  %v3657_v13 = vld [vmem:[%s4604_s1 + $0x218] sm:$0xff] }
 0x177   : > { %2511 = vmatmul.bf16.vlgmr.msra.gmra.mxu2 %v2965_v61  ;;  %2560 = vmatpush.bf16.msrb.mxu1 %v3637_v63  ;;  %v3668_v59 = vld [vmem:[%s4604_s1 + $0x270] sm:$0xff]  ;;  %v3675_v61 = vld [vmem:[%s4604_s1 + $0x2a8] sm:$0xff]  ;;  %v3665_v15 = vld [vmem:[%s4604_s1 + $0x258] sm:$0xff] }
 0x178   : > { %2579 = vmatpush.bf16.msrb.mxu2 %v3645_v57  ;;  %2530 = vmatmul.bf16.vlgmr.msra.gmra.mxu3 %v2969_v62  ;;  %v2985_v57 = vor.u32 %v3563_v49, %v2982_v50  ;;  %v3684_v60 = vld [vmem:[%s4604_s1 + $0x2f0] sm:$0xff]  ;;  %v3659_v62 = vld [vmem:[%s4604_s1 + $0x228] sm:$0xff]  ;;  %v3681_v16 = vld [vmem:[%s4604_s1 + $0x2d8] sm:$0xff] }
 0x179   : > { %2598 = vmatpush.bf16.msrb.mxu3 %v3653_v0  ;;  %v3667_v63 = vld [vmem:[%s4604_s1 + $0x268] sm:$0xff]  ;;  %v3700_v50 = vld [vmem:[%s4604_s1 + $0x370] sm:$0xff] }
 0x17a   : > { %2542 = vmatpush.bf16.msrb.mxu0 %v3628_v2  ;;  %v3683_v0 = vld [vmem:[%s4604_s1 + $0x2e8] sm:$0xff]  ;;  %v3658_v2 = vld [vmem:[%s4604_s1 + $0x220] sm:$0xff] }
 0x17b   : > { %2561 = vmatpush.bf16.msrb.mxu1 %v3636_v3  ;;  %v3666_v3 = vld [vmem:[%s4604_s1 + $0x260] sm:$0xff]  ;;  %v2998_v44 = vld [vmem:[%s4602_s6 + $0x64] sm:$0xf0] }
 0x17c   : > { %2580 = vmatpush.bf16.msrb.mxu2 %v3644_v1  ;;  %v3674_v1 = vld [vmem:[%s4604_s1 + $0x2a0] sm:$0xff] }
 0x17d   : > { %2599 = vmatpush.bf16.msrb.mxu3 %v3652_v4  ;;  %v3682_v4 = vld [vmem:[%s4604_s1 + $0x2e0] sm:$0xff] }
 0x17e   : > { %2543 = vmatpush.bf16.msrb.mxu0 %v3627_v6  ;;  %v3584_v6 = vld [vmem:[%s4602_s6 + $0xc0] sm:$0xf0] }
 0x17f   : > { %2562 = vmatpush.bf16.msrb.mxu1 %v3635_v7  ;;  %v3673_v7 = vld [vmem:[%s4604_s1 + $0x298] sm:$0xff] }
 0x180   : > { %2581 = vmatpush.bf16.msrb.mxu2 %v3643_v5  ;;  %v3032_v5 = vld [vmem:[%s4602_s6 + $0x88] sm:$0xf] }
 0x181   : > { %2600 = vmatpush.bf16.msrb.mxu3 %v3651_v8  ;;  %v3577_v8 = vld [vmem:[%s4602_s6 + $0x8c] sm:$0xf]  ;;  %v3033_v17 = vor.u32 %v3584_v6, %v3032_v5  ;;  %v3688_v6 = vld [vmem:[%s4604_s1 + $0x310] sm:$0xff] }
 0x182   : > { %2544 = vmatpush.bf16.msrb.mxu0 %v3626_v10  ;;  %v3040_v10 = vld [vmem:[%s4602_s6 + $0x90] sm:$0xf] }
 0x183   : > { %2563 = vmatpush.bf16.msrb.mxu1 %v3634_v11  ;;  %v3585_v11 = vld [vmem:[%s4602_s6 + $0xc8] sm:$0xf0] }
 0x184   : > { %2582 = vmatpush.bf16.msrb.mxu2 %v3642_v9  ;;  %v3034_v9 = vld [vmem:[%s4602_s6 + $0xc4] sm:$0xf0]  ;;  %v3041_v20 = vor.u32 %v3585_v11, %v3040_v10  ;;  %v3696_v10 = vld [vmem:[%s4604_s1 + $0x350] sm:$0xff] }
 0x185   : > { %2601 = vmatpush.bf16.msrb.mxu3 %v3650_v12  ;;  %2478 = vmatmul.bf16.gmra.mxu0 %v3017_v23  ;;  %v3578_v12 = vld [vmem:[%s4602_s6 + $0x94] sm:$0xf]  ;;  %v3037_v19 = vor.u32 %v3577_v8, %v3034_v9  ;;  %v3703_v11 = vld [vmem:[%s4604_s1 + $0x388] sm:$0xff] }
 0x186   : > { %2545 = vmatpush.bf16.msrb.mxu0 %v3625_v22  ;;  %2497 = vmatmul.bf16.gmra.mxu1 %v3021_v24  ;;  %v3656_v22 = vld [vmem:[%s4604_s1 + $0x210] sm:$0xff] }
 0x187   : > { %2516 = vmatmul.bf16.gmra.mxu2 %v3025_v25  ;;  %2564 = vmatpush.bf16.msrb.mxu1 %v3633_v27  ;;  %v3664_v23 = vld [vmem:[%s4604_s1 + $0x250] sm:$0xff]  ;;  %v3671_v25 = vld [vmem:[%s4604_s1 + $0x288] sm:$0xff] }
 0x188   : > { %2583 = vmatpush.bf16.msrb.mxu2 %v3641_v21  ;;  %2535 = vmatmul.bf16.gmra.mxu3 %v3029_v26  ;;  %v3045_v21 = vor.u32 %v3578_v12, %v3042_v14  ;;  %v3680_v24 = vld [vmem:[%s4604_s1 + $0x2d0] sm:$0xff]  ;;  %v3655_v26 = vld [vmem:[%s4604_s1 + $0x208] sm:$0xff]  ;;  %v3702_v14 = vld [vmem:[%s4604_s1 + $0x380] sm:$0xff] }
 0x189   : > { %2602 = vmatpush.bf16.msrb.mxu3 %v3649_v28  ;;  %v3663_v27 = vld [vmem:[%s4604_s1 + $0x248] sm:$0xff] }
 0x18a   : > { %2546 = vmatpush.bf16.msrb.mxu0 %v3624_v30  ;;  %v3679_v28 = vld [vmem:[%s4604_s1 + $0x2c8] sm:$0xff]  ;;  %v3709_v30 = vld [vmem:[%s4604_s1 + $0x3b8] sm:$0xff] }
 0x18b   : > { %2565 = vmatpush.bf16.msrb.mxu1 %v3632_v31  ;;  %v3654_v31 = vld [vmem:[%s4604_s1 + $0x200] sm:$0xff]  ;;  %v3687_v12 = vld [vmem:[%s4604_s1 + $0x308] sm:$0xff] }
 0x18c   : > { %2584 = vmatpush.bf16.msrb.mxu2 %v3640_v29  ;;  %v3670_v29 = vld [vmem:[%s4604_s1 + $0x280] sm:$0xff] }
 0x18d   : > { %2603 = vmatpush.bf16.msrb.mxu3 %v3648_v32  ;;  %v3662_v32 = vld [vmem:[%s4604_s1 + $0x240] sm:$0xff] }
 0x18e   : > { %2547 = vmatpush.bf16.msrb.mxu0 %v3623_v34  ;;  %v2988_v34 = vld [vmem:[%s4602_s6 + $0x20] sm:$0xf] }
 0x18f   : > { %2566 = vmatpush.bf16.msrb.mxu1 %v3631_v35  ;;  %v3571_v35 = vld [vmem:[%s4602_s6 + $0x58] sm:$0xf0] }
 0x190   : > { %2585 = vmatpush.bf16.msrb.mxu2 %v3639_v33  ;;  %v3678_v33 = vld [vmem:[%s4604_s1 + $0x2c0] sm:$0xff]  ;;  %v2989_v45 = vor.u32 %v3571_v35, %v2988_v34 }
 0x191   : > { %2604 = vmatpush.bf16.msrb.mxu3 %v3647_v36  ;;  %v3693_v36 = vld [vmem:[%s4604_s1 + $0x338] sm:$0xff] }
 0x192   : > { %2548 = vmatpush.bf16.msrb.mxu0 %v3622_v38  ;;  %v3701_v38 = vld [vmem:[%s4604_s1 + $0x378] sm:$0xff] }
 0x193   : > { %2567 = vmatpush.bf16.msrb.mxu1 %v3630_v39  ;;  %v3708_v39 = vld [vmem:[%s4604_s1 + $0x3b0] sm:$0xff] }
 0x194   : > { %2586 = vmatpush.bf16.msrb.mxu2 %v3638_v37  ;;  %v3564_v37 = vld [vmem:[%s4602_s6 + $0x24] sm:$0xf] }
 0x195   : > { %2605 = vmatpush.bf16.msrb.mxu3 %v3646_v40  ;;  %2549 = vmatmul.bf16.vlgmr.msrb.gmra.mxu0 %v2973_v53  ;;  %v2990_v40 = vld [vmem:[%s4602_s6 + $0x5c] sm:$0xf0]  ;;  %v3699_v53 = vld [vmem:[%s4604_s1 + $0x368] sm:$0xff] }
 0x196   : > { %2617 = vmatpush.bf16.msra.mxu0 %v3661_v43  ;;  %2568 = vmatmul.bf16.vlgmr.msrb.gmra.mxu1 %v2977_v55  ;;  %v3565_v43 = vld [vmem:[%s4602_s6 + $0x2c] sm:$0xf]  ;;  %v2993_v47 = vor.u32 %v3564_v37, %v2990_v40  ;;  %v3690_v55 = vld [vmem:[%s4604_s1 + $0x320] sm:$0xff] }
 0x197   : > { %2636 = vmatpush.bf16.msra.mxu1 %v3669_v51  ;;  %2587 = vmatmul.bf16.vlgmr.msrb.gmra.mxu2 %v2981_v56  ;;  %v3001_v49 = vor.u32 %v3565_v43, %v2998_v44  ;;  %v3707_v51 = vld [vmem:[%s4604_s1 + $0x3a8] sm:$0xff]  ;;  %v3698_v56 = vld [vmem:[%s4604_s1 + $0x360] sm:$0xff] }
 0x198   : > { %2655 = vmatpush.bf16.msra.mxu2 %v3677_v42  ;;  %2606 = vmatmul.bf16.vlgmr.msrb.gmra.mxu3 %v2985_v57  ;;  %v3572_v42 = vld [vmem:[%s4602_s6 + $0x60] sm:$0xf0]  ;;  %v3705_v57 = vld [vmem:[%s4604_s1 + $0x398] sm:$0xff] }
 0x199   : > { %2674 = vmatpush.bf16.msra.mxu3 %v3685_v52  ;;  %v2997_v48 = vor.u32 %v3572_v42, %v2996_v41  ;;  %v3691_v52 = vld [vmem:[%s4604_s1 + $0x328] sm:$0xff] }
 0x19a   : > { %2618 = vmatpush.bf16.msra.mxu0 %v3660_v58  ;;  %v3048_v58 = vld [vmem:[%s4602_s6 + $0x98] sm:$0xf] }
 0x19b   : > { %2637 = vmatpush.bf16.msra.mxu1 %v3668_v59  ;;  %v3689_v59 = vld [vmem:[%s4604_s1 + $0x318] sm:$0xff] }
 0x19c   : > { %2656 = vmatpush.bf16.msra.mxu2 %v3676_v54  ;;  %v3706_v54 = vld [vmem:[%s4604_s1 + $0x3a0] sm:$0xff] }
 0x19d   : > { %2675 = vmatpush.bf16.msra.mxu3 %v3684_v60  ;;  %v3586_v60 = vld [vmem:[%s4602_s6 + $0xd0] sm:$0xf0] }
 0x19e   : > { %2619 = vmatpush.bf16.msra.mxu0 %v3659_v62  ;;  %v3050_v62 = vld [vmem:[%s4602_s6 + $0xd4] sm:$0xf0]  ;;  %v3049_v5 = vor.u32 %v3586_v60, %v3048_v58 }
 0x19f   : > { %2638 = vmatpush.bf16.msra.mxu1 %v3667_v63  ;;  %v3056_v63 = vld [vmem:[%s4602_s6 + $0xa0] sm:$0xf] }
 0x1a0   : > { %2657 = vmatpush.bf16.msra.mxu2 %v3675_v61  ;;  %v3579_v61 = vld [vmem:[%s4602_s6 + $0x9c] sm:$0xf] }
 0x1a1   : > { %2676 = vmatpush.bf16.msra.mxu3 %v3683_v0  ;;  %v3587_v0 = vld [vmem:[%s4602_s6 + $0xd8] sm:$0xf0] }
 0x1a2   : > { %2620 = vmatpush.bf16.msra.mxu0 %v3658_v2  ;;  %v3058_v2 = vld [vmem:[%s4602_s6 + $0xdc] sm:$0xf0]  ;;  %v3057_v8 = vor.u32 %v3587_v0, %v3056_v63 }
 0x1a3   : > { %2639 = vmatpush.bf16.msra.mxu1 %v3666_v3  ;;  %v3697_v3 = vld [vmem:[%s4604_s1 + $0x358] sm:$0xff] }
 0x1a4   : > { %2658 = vmatpush.bf16.msra.mxu2 %v3674_v1  ;;  %v3580_v1 = vld [vmem:[%s4602_s6 + $0xa4] sm:$0xf] }
 0x1a5   : > { %2677 = vmatpush.bf16.msra.mxu3 %v3682_v4  ;;  %2554 = vmatmul.bf16.gmra.mxu0 %v3033_v17  ;;  %v3704_v4 = vld [vmem:[%s4604_s1 + $0x390] sm:$0xff]  ;;  %v3061_v9 = vor.u32 %v3580_v1, %v3058_v2 }
 0x1a6   : > { %2621 = vmatpush.bf16.msra.mxu0 %v3657_v13  ;;  %2573 = vmatmul.bf16.gmra.mxu1 %v3037_v19  ;;  %v3695_v13 = vld [vmem:[%s4604_s1 + $0x348] sm:$0xff]  ;;  %v3004_v17 = vld [vmem:[%s4602_s6 + $0x30] sm:$0xf]  ;;  %v3566_v19 = vld [vmem:[%s4602_s6 + $0x34] sm:$0xf] }
 0x1a7   : > { %2640 = vmatpush.bf16.msra.mxu1 %v3665_v15  ;;  %2592 = vmatmul.bf16.gmra.mxu2 %v3041_v20  ;;  %v3686_v15 = vld [vmem:[%s4604_s1 + $0x300] sm:$0xff] }
 0x1a8   : > { %2659 = vmatpush.bf16.msra.mxu2 %v3673_v7  ;;  %2611 = vmatmul.bf16.gmra.mxu3 %v3045_v21  ;;  %v3053_v7 = vor.u32 %v3579_v61, %v3050_v62  ;;  %v3006_v20 = vld [vmem:[%s4602_s6 + $0x6c] sm:$0xf0]  ;;  %v3012_v21 = vld [vmem:[%s4602_s6 + $0x38] sm:$0xf] }
 0x1a9   : > { %2678 = vmatpush.bf16.msra.mxu3 %v3681_v16  ;;  %v3694_v16 = vld [vmem:[%s4604_s1 + $0x340] sm:$0xff] }
 0x1aa   : > { %2622 = vmatpush.bf16.msra.mxu0 %v3656_v22  ;;  %v3574_v22 = vld [vmem:[%s4602_s6 + $0x70] sm:$0xf0] }
 0x1ab   : > { %2641 = vmatpush.bf16.msra.mxu1 %v3664_v23  ;;  %v3064_v23 = vld [vmem:[%s4602_s6 + $0xa8] sm:$0xf] }
 0x1ac   : > { %2660 = vmatpush.bf16.msra.mxu2 %v3672_v18  ;;  %v3573_v18 = vld [vmem:[%s4602_s6 + $0x68] sm:$0xf0] }
 0x1ad   : > { %2679 = vmatpush.bf16.msra.mxu3 %v3680_v24  ;;  %v3588_v24 = vld [vmem:[%s4602_s6 + $0xe0] sm:$0xf0] }
 0x1ae   : > { %2623 = vmatpush.bf16.msra.mxu0 %v3655_v26  ;;  %v3009_v26 = vor.u32 %v3566_v19, %v3006_v20 }
 0x1af   : > { %2642 = vmatpush.bf16.msra.mxu1 %v3663_v27  ;;  %v3013_v27 = vor.u32 %v3574_v22, %v3012_v21 }
 0x1b0   : > { %2661 = vmatpush.bf16.msra.mxu2 %v3671_v25  ;;  %v3005_v25 = vor.u32 %v3573_v18, %v3004_v17 }
 0x1b1   : > { %2680 = vmatpush.bf16.msra.mxu3 %v3679_v28  ;;  %v3065_v28 = vor.u32 %v3588_v24, %v3064_v23 }
 0x1b2   : > { %2624 = vmatpush.bf16.msra.mxu0 %v3654_v31  ;;  %v3072_v31 = vld [vmem:[%s4602_s6 + $0xb0] sm:$0xf] }
 0x1b3   : > { %2643 = vmatpush.bf16.msra.mxu1 %v3662_v32  ;;  %v3589_v32 = vld [vmem:[%s4602_s6 + $0xe8] sm:$0xf0] }
 0x1b4   : > { %2662 = vmatpush.bf16.msra.mxu2 %v3670_v29  ;;  %v3581_v29 = vld [vmem:[%s4602_s6 + $0xac] sm:$0xf]  ;;  %v3073_v34 = vor.u32 %v3589_v32, %v3072_v31 }
 0x1b5   : > { %2681 = vmatpush.bf16.msra.mxu3 %v3678_v33  ;;  %2625 = vmatmul.bf16.vlgmr.msra.gmra.mxu0 %v2989_v45 }
 0x1b6   : > { %2693 = vmatpush.bf16.msrb.mxu0 %v3693_v36  ;;  %2644 = vmatmul.bf16.vlgmr.msra.gmra.mxu1 %v2993_v47 }
 0x1b7   : > { %2712 = vmatpush.bf16.msrb.mxu1 %v3701_v38  ;;  %2663 = vmatmul.bf16.vlgmr.msra.gmra.mxu2 %v2997_v48 }
 0x1b8   : > { %2731 = vmatpush.bf16.msrb.mxu2 %v3709_v30  ;;  %2682 = vmatmul.bf16.vlgmr.msra.gmra.mxu3 %v3001_v49  ;;  %v3066_v30 = vld [vmem:[%s4602_s6 + $0xe4] sm:$0xf0] }
 0x1b9   : > { %3710 = vmatpush.bf16.msrb.mxu3 %v3693_v36  ;;  %v3069_v33 = vor.u32 %v3581_v29, %v3066_v30 }
 0x1ba   : > { %2694 = vmatpush.bf16.msrb.mxu0 %v3692_v46 }
 0x1bb   : > { %2713 = vmatpush.bf16.msrb.mxu1 %v3700_v50 }
 0x1bc   : > { %2732 = vmatpush.bf16.msrb.mxu2 %v3708_v39 }
 0x1bd   : > { %3711 = vmatpush.bf16.msrb.mxu3 %v3692_v46 }
 0x1be   : > { %2695 = vmatpush.bf16.msrb.mxu0 %v3691_v52 }
 0x1bf   : > { %2714 = vmatpush.bf16.msrb.mxu1 %v3699_v53 }
 0x1c0   : > { %2733 = vmatpush.bf16.msrb.mxu2 %v3707_v51 }
 0x1c1   : > { %3712 = vmatpush.bf16.msrb.mxu3 %v3691_v52 }
 0x1c2   : > { %2696 = vmatpush.bf16.msrb.mxu0 %v3690_v55 }
 0x1c3   : > { %2715 = vmatpush.bf16.msrb.mxu1 %v3698_v56 }
 0x1c4   : > { %2734 = vmatpush.bf16.msrb.mxu2 %v3706_v54 }
 0x1c5   : > { %3713 = vmatpush.bf16.msrb.mxu3 %v3690_v55  ;;  %2630 = vmatmul.bf16.gmra.mxu0 %v3049_v5 }
 0x1c6   : > { %2697 = vmatpush.bf16.msrb.mxu0 %v3689_v59  ;;  %2649 = vmatmul.bf16.gmra.mxu1 %v3053_v7 }
 0x1c7   : > { %2716 = vmatpush.bf16.msrb.mxu1 %v3697_v3  ;;  %2668 = vmatmul.bf16.gmra.mxu2 %v3057_v8 }
 0x1c8   : > { %2735 = vmatpush.bf16.msrb.mxu2 %v3705_v57  ;;  %2687 = vmatmul.bf16.gmra.mxu3 %v3061_v9 }
 0x1c9   : > { %3714 = vmatpush.bf16.msrb.mxu3 %v3689_v59 }
 0x1ca   : > { %2698 = vmatpush.bf16.msrb.mxu0 %v3688_v6 }
 0x1cb   : > { %2717 = vmatpush.bf16.msrb.mxu1 %v3696_v10 }
 0x1cc   : > { %2736 = vmatpush.bf16.msrb.mxu2 %v3704_v4 }
 0x1cd   : > { %3715 = vmatpush.bf16.msrb.mxu3 %v3688_v6 }
 0x1ce   : > { %2699 = vmatpush.bf16.msrb.mxu0 %v3687_v12 }
 0x1cf   : > { %2718 = vmatpush.bf16.msrb.mxu1 %v3695_v13 }
 0x1d0   : > { %2737 = vmatpush.bf16.msrb.mxu2 %v3703_v11 }
 0x1d1   : > { %3716 = vmatpush.bf16.msrb.mxu3 %v3687_v12 }
 0x1d2   : > { %2700 = vmatpush.bf16.msrb.mxu0 %v3686_v15 }
 0x1d3   : > { %2719 = vmatpush.bf16.msrb.mxu1 %v3694_v16 }
 0x1d4   : > { %2738 = vmatpush.bf16.msrb.mxu2 %v3702_v14 }
 0x1d5   : > { %3717 = vmatpush.bf16.msrb.mxu3 %v3686_v15  ;;  %2701 = vmatmul.bf16.vlgmr.msrb.gmra.mxu0 %v3005_v25 }
 0x1d6   : > { %2720 = vmatmul.bf16.vlgmr.msrb.gmra.mxu1 %v3009_v26 }
 0x1d7   : > { %2739 = vmatmul.bf16.vlgmr.msrb.gmra.mxu2 %v3013_v27 }
 0x1d8   : > { %2706 = vmatmul.bf16.vlgmr.msrb.gmra.mxu3 %v3065_v28 }
 0x1e6   : > { %2725 = vmatmul.bf16.gmra.mxu1 %v3069_v33 }
 0x1e7   : > { %2744 = vmatmul.bf16.gmra.mxu2 %v3073_v34 }
 0x1f2   : > { %v2474_v35 = vpop.f32.mrf.mxu0 }
 0x1f3   : > { %v2493_v36 = vpop.f32.mrf.mxu1 }
 0x1f4   : > { %v2494_v37 = vadd.f32 %v2493_v36, %v2474_v35 }
 0x1fa   : > { %v2512_v38 = vpop.f32.mrf.mxu2  ;;  %v2476_v41 = vpop.f32.mrf.mxu0 }
 0x1fb   : > { %v2531_v39 = vpop.f32.mrf.mxu3  ;;  %v2513_v40 = vadd.f32 %v2512_v38, %v2494_v37  ;;  %v2495_v42 = vpop.f32.mrf.mxu1 }
 0x1fc   : > { %v2496_v43 = vadd.f32 %v2495_v42, %v2476_v41 }
 0x1fd   : > { %v2532_v14 = vadd.f32 %v2531_v39, %v2513_v40 }
 0x202   : > { %v2514_v44 = vpop.f32.mrf.mxu2  ;;  %v2479_v47 = vpop.f32.mrf.mxu0 }
 0x203   : > { %v2533_v45 = vpop.f32.mrf.mxu3  ;;  %v2515_v46 = vadd.f32 %v2514_v44, %v2496_v43  ;;  %v2498_v48 = vpop.f32.mrf.mxu1 }
 0x204   : > { %v2499_v49 = vadd.f32 %v2498_v48, %v2479_v47 }
 0x205   : > { %v2534_v21 = vadd.f32 %v2533_v45, %v2515_v46 }
 0x20a   : > { %v2517_v50 = vpop.f32.mrf.mxu2  ;;  %v2481_v53 = vpop.f32.mrf.mxu0 }
 0x20b   : > { %v2536_v51 = vpop.f32.mrf.mxu3  ;;  %v2518_v52 = vadd.f32 %v2517_v50, %v2499_v49  ;;  %v2500_v54 = vpop.f32.mrf.mxu1 }
 0x20c   : > { %v2501_v55 = vadd.f32 %v2500_v54, %v2481_v53 }
 0x20d   : > { %v2537_v34 = vadd.f32 %v2536_v51, %v2518_v52  ;;  %v1317_v52 = vld [vmem:[#allocation2 + $0x10] sm:$0xff] }
 0x212   : > { %v2519_v56 = vpop.f32.mrf.mxu2  ;;  %v2550_v59 = vpop.f32.mrf.mxu0 }
 0x213   : > { %v2538_v57 = vpop.f32.mrf.mxu3  ;;  %v2520_v58 = vadd.f32 %v2519_v56, %v2501_v55  ;;  %v2569_v60 = vpop.f32.mrf.mxu1  ;;  %v2551_v18 = vadd.f32 %v2550_v59, %v2532_v14 }
 0x215   : > { %v2570_v19 = vadd.f32 %v2569_v60, %v2551_v18  ;;  %v2539_v46 = vadd.f32 %v2538_v57, %v2520_v58 }
 0x21a   : > { %v2588_v61 = vpop.f32.mrf.mxu2  ;;  %v2552_v63 = vpop.f32.mrf.mxu0 }
 0x21b   : > { %v2607_v62 = vpop.f32.mrf.mxu3  ;;  %v2571_v0 = vpop.f32.mrf.mxu1  ;;  %v2589_v22 = vadd.f32 %v2588_v61, %v2570_v19  ;;  %v2553_v26 = vadd.f32 %v2552_v63, %v2534_v21  ;;  %v1319_v19 = vld [vmem:[#allocation2 + $0x18] sm:$0xff] }
 0x21d   : > { %v2608_v27 = vadd.f32 %v2607_v62, %v2589_v22  ;;  %v2572_v28 = vadd.f32 %v2571_v0, %v2553_v26 }
 0x222   : > { %v2590_v1 = vpop.f32.mrf.mxu2  ;;  %v2555_v3 = vpop.f32.mrf.mxu0 }
 0x223   : > { %v2609_v2 = vpop.f32.mrf.mxu3  ;;  %v2574_v4 = vpop.f32.mrf.mxu1  ;;  %v2591_v31 = vadd.f32 %v2590_v1, %v2572_v28  ;;  %v2556_v38 = vadd.f32 %v2555_v3, %v2537_v34 }
 0x225   : > { %v2610_v37 = vadd.f32 %v2609_v2, %v2591_v31  ;;  %v2575_v42 = vadd.f32 %v2574_v4, %v2556_v38 }
 0x22a   : > { %v2593_v5 = vpop.f32.mrf.mxu2  ;;  %v2557_v7 = vpop.f32.mrf.mxu0 }
 0x22b   : > { %v2612_v6 = vpop.f32.mrf.mxu3  ;;  %v2576_v8 = vpop.f32.mrf.mxu1  ;;  %v2594_v47 = vadd.f32 %v2593_v5, %v2575_v42  ;;  %v2558_v50 = vadd.f32 %v2557_v7, %v2539_v46 }
 0x22d   : > { %v2613_v55 = vadd.f32 %v2612_v6, %v2594_v47  ;;  %v2577_v59 = vadd.f32 %v2576_v8, %v2558_v50 }
 0x232   : > { %v2595_v9 = vpop.f32.mrf.mxu2  ;;  %v2626_v11 = vpop.f32.mrf.mxu0 }
 0x233   : > { %v2614_v10 = vpop.f32.mrf.mxu3  ;;  %v2645_v12 = vpop.f32.mrf.mxu1  ;;  %v2627_v29 = vadd.f32 %v2626_v11, %v2608_v27  ;;  %v2596_v1 = vadd.f32 %v2595_v9, %v2577_v59  ;;  %v1318_v11 = vld [vmem:[#allocation2] sm:$0xff]  ;;  %v1320_v27 = vld [vmem:[#allocation2 + $0x8] sm:$0xff] }
 0x235   : > { %v2646_v35 = vadd.f32 %v2645_v12, %v2627_v29  ;;  %v2615_v58 = vadd.f32 %v2614_v10, %v2596_v1 }
 0x23a   : > { %v2664_v13 = vpop.f32.mrf.mxu2  ;;  %v2628_v16 = vpop.f32.mrf.mxu0 }
 0x23b   : > { %v2683_v15 = vpop.f32.mrf.mxu3  ;;  %v2647_v17 = vpop.f32.mrf.mxu1  ;;  %v2665_v39 = vadd.f32 %v2664_v13, %v2646_v35  ;;  %v2629_v40 = vadd.f32 %v2628_v16, %v2610_v37 }
 0x23d   : > { %v2684_v43 = vadd.f32 %v2683_v15, %v2665_v39  ;;  %v2648_v48 = vadd.f32 %v2647_v17, %v2629_v40 }
 0x242   : > { %v2666_v20 = vpop.f32.mrf.mxu2  ;;  %v2631_v23 = vpop.f32.mrf.mxu0 }
 0x243   : > { %v2685_v24 = vpop.f32.mrf.mxu3  ;;  %v2650_v25 = vpop.f32.mrf.mxu1  ;;  %v2667_v53 = vadd.f32 %v2666_v20, %v2648_v48  ;;  %v2632_v61 = vadd.f32 %v2631_v23, %v2613_v55 }
 0x245   : > { %v2686_v60 = vadd.f32 %v2685_v24, %v2667_v53  ;;  %v2651_v57 = vadd.f32 %v2650_v25, %v2632_v61 }
 0x24a   : > { %v2669_v30 = vpop.f32.mrf.mxu2  ;;  %v2633_v32 = vpop.f32.mrf.mxu0 }
 0x24b   : > { %v2652_v33 = vpop.f32.mrf.mxu1  ;;  %v2688_v36 = vpop.f32.mrf.mxu3  ;;  %v2670_v4 = vadd.f32 %v2669_v30, %v2651_v57  ;;  %v2634_v12 = vadd.f32 %v2633_v32, %v2615_v58 }
 0x24d   : > { %v2689_v8 = vadd.f32 %v2688_v36, %v2670_v4  ;;  %v2653_v16 = vadd.f32 %v2652_v33, %v2634_v12 }
 0x252   : > { %v2671_v41 = vpop.f32.mrf.mxu2  ;;  %v2702_v44 = vpop.f32.mrf.mxu0 }
 0x253   : > { %v2721_v45 = vpop.f32.mrf.mxu1  ;;  %v2703_v49 = vadd.f32 %v2702_v44, %v2684_v43  ;;  %v2690_v54 = vpop.f32.mrf.mxu3  ;;  %v2672_v18 = vadd.f32 %v2671_v41, %v2653_v16 }
 0x255   : > { %v2722_v51 = vadd.f32 %v2721_v45, %v2703_v49  ;;  %v2691_v10 = vadd.f32 %v2690_v54, %v2672_v18 }
 0x25a   : > { %v2740_v56 = vpop.f32.mrf.mxu2  ;;  %v2704_v63 = vpop.f32.mrf.mxu0 }
 0x25b   : > { %v2741_v62 = vadd.f32 %v2740_v56, %v2722_v51  ;;  %v2723_v0 = vpop.f32.mrf.mxu1  ;;  %v2705_v3 = vadd.f32 %v2704_v63, %v2686_v60  ;;  %v2707_v7 = vpop.f32.mrf.mxu3 }
 0x25c   : > { %v2708_v17 = vadd.f32 %v2707_v7, %v2689_v8 }
 0x25d   : > { %v2750_v2 = vadd.f32 %v2741_v62, %v1317_v52  ;;  %v2724_v5 = vadd.f32 %v2723_v0, %v2705_v3 }
 0x25f   : > { %2754 = vst [vmem:[#allocation2 + $0x10] sm:$0xff] %v2750_v2 }
 0x262   : > { %v2742_v6 = vpop.f32.mrf.mxu2 }
 0x263   : > { %v2743_v13 = vadd.f32 %v2742_v6, %v2724_v5  ;;  %v2726_v14 = vpop.f32.mrf.mxu1  ;;  %v2709_v22 = vpop.f32.mrf.mxu3 }
 0x264   : > { %v2727_v9 = vadd.f32 %v2726_v14, %v2708_v17  ;;  %v2710_v25 = vadd.f32 %v2709_v22, %v2691_v10 }
 0x265   : > { %v2751_v15 = vadd.f32 %v2743_v13, %v1318_v11 }
 0x267   : > { %2755 = vst [vmem:[#allocation2] sm:$0xff] %v2751_v15 }
 0x26a   : > { %v2745_v20 = vpop.f32.mrf.mxu2 }
 0x26b   : > { %v2746_v21 = vadd.f32 %v2745_v20, %v2727_v9  ;;  %v2728_v24 = vpop.f32.mrf.mxu1 }
 0x26c   : > { %v2729_v26 = vadd.f32 %v2728_v24, %v2710_v25 }
 0x26d   : > { %v2752_v23 = vadd.f32 %v2746_v21, %v1319_v19 }
 0x26f   : > { %2756 = vst [vmem:[#allocation2 + $0x18] sm:$0xff] %v2752_v23 }
 0x272   : > { %v2747_v28 = vpop.f32.mrf.mxu2 }
 0x273   : > { %v2748_v29 = vadd.f32 %v2747_v28, %v2729_v26  ;;  %2761 = sbr.rel (%p3554_p5) target bundleno = 644 (0x284), region = 107 }
 0x275   : > { %v2753_v30 = vadd.f32 %v2748_v29, %v1320_v27 }
 0x277   : > { %2757 = vst [vmem:[#allocation2 + $0x8] sm:$0xff] %v2753_v30 }
 0x278   : > { %v2762_v31 = vld [vmem:[#allocation2 + $0x10] sm:$0xff]  ;;  %v3813_v32 = vld [vmem:[%s1308_s4] ss:$0 sm:$0xff]  ;;  %v2764_v34 = vld [vmem:[#allocation2 + $0x18] sm:$0xff] }
 0x279   : > { %v2763_v33 = vld [vmem:[#allocation2] sm:$0xff]  ;;  %v2770_v36 = vadd.f32 %v3813_v32, %v2762_v31  ;;  %v2772_v38 = vadd.f32 %v3813_v32, %v2764_v34 }
 0x27a   : > { %v2771_v37 = vadd.f32 %v3813_v32, %v2763_v33 }
 0x27b   : > { %v2774_v40 = vmax.f32 %v2770_v36, 0.0  ;;  %v2776_v42 = vmax.f32 %v2772_v38, 0.0 }
 0x27c   : > { %v2775_v41 = vmax.f32 %v2771_v37, 0.0 }
 0x27d   : > { %2778 = vst [vmem:[%s4606_s25] sm:$0xff] %v2774_v40 }
 0x27e   : > { %v2765_v35 = vld [vmem:[#allocation2 + $0x8] sm:$0xff]  ;;  %2779 = vst [vmem:[%s4606_s25 + $0x8] sm:$0xff] %v2775_v41 }
 0x27f   : > { %v2773_v39 = vadd.f32 %v3813_v32, %v2765_v35  ;;  %2780 = vst [vmem:[%s4606_s25 + $0x10] sm:$0xff] %v2776_v42 }
 0x281   : > { %v2777_v43 = vmax.f32 %v2773_v39, 0.0 }
 0x283   : > { %2781 = vst [vmem:[%s4606_s25 + $0x18] sm:$0xff] %v2777_v43 }
 0x284 PF: > { %2788 = sbr.rel (!%p4017_p12) target bundleno = 652 (0x28c), region = 111  ;;  %s3556_s14 = sshll.u32 (%p4017_p12), %s3888_s19, 3  ;;  %v2825_v44 = vld [vmem:[%s4606_s25] sm:$0xff] (%p4017_p12) }
 0x285   : > { %v2827_v45 = vld [vmem:[%s4606_s25 + $0x8] sm:$0xff] (%p4017_p12)  ;;  %s2790_s5 = scalar_lea.vmem (%p4017_p12), %s4845_s3, %s3556_s14 }
 0x286   : > { %v2829_v46 = vld [vmem:[%s4606_s25 + $0x10] sm:$0xff] (%p4017_p12)  ;;  %2826 = vst [vmem:[%s2790_s5] sm:$0xff] (%p4017_p12), %v2825_v44 }
 0x287   : > { %2828 = vst [vmem:[%s2790_s5 + $0x18] sm:$0xff] (%p4017_p12), %v2827_v45 }
 0x288   : > { %2830 = vst [vmem:[%s2790_s5 + $0x30] sm:$0xff] (%p4017_p12), %v2829_v46 }
 0x28a   : > { %v2831_v47 = vld [vmem:[%s4606_s25 + $0x18] sm:$0xff] }
 0x28b   : > { %2832 = vst [vmem:[%s2790_s5 + $0x48] sm:$0xff] %v2831_v47 }
 0x28c PF: > { %s13_s22 = sadd.s32 1, %s3900_s22   ;;  %s4855_s10 = sld [smem:[#allocation6_spill]] }
 0x28d   : > { %p10_p6 = scmp.ge.s32.totalorder %s13_s22, 32   ;;  %s4856_s12 = smov %s3864_s13 }
 0x28e   : > { %s4857_s13 = smov %s4015_s9  ;;  %s4858_s14 = smov %s3872_s15 }
 0x28f   : > { %s4859_s15 = smov %s4012_s8  ;;  %s4860_s16 = smov %s3880_s17 }
 0x290   : > { %s4861_s17 = smov %s3998_s30  ;;  %s4862_s18 = smov %s3892_s20 }
 0x291   : > { %s4863_s19 = smov %s3896_s21  ;;  %s4864_s20 = smov %s4867_s24 }
 0x292   : > { %s4865_s21 = smov %s4855_s10  ;;  %12 = sbr.rel (!%p10_p6) target bundleno = 9 (0x9), region = 197 }

// kernel: furniture_forward.3
= control target key start
LH: loop header
LB: loop body
LE: loop exit
PB: predicated region body
PF: predicated region fallthrough
CT: control target
= control target key end

     0   :  { %s8545_s0 = inlined_call_operand.vmem [shape: bf16[128,10240], index: 0, kind: input, shape index: {}]   ;;  %s8546_s1 = inlined_call_operand.vmem [shape: bf16[10240,256], index: 1, kind: input, shape index: {}]   ;;  %s8547_s2 = inlined_call_operand.vmem [shape: f32[1,256], index: 2, kind: input, shape index: {}]   ;;  %s8548_s3 = inlined_call_operand.vmem [shape: f32[128,256], index: 3, kind: output, shape index: {}]  }
   0x1   :  { %8550 = sst [smem:[#allocation7_spill]] %s8545_s0 }
   0x2   :  { %8551 = sst [smem:[#allocation8_spill]] %s8546_s1 }
   0x3   :  { %s7030_s12 = smov 0   ;;  %s7032_s13 = smov 0  }
   0x4   :  { %s7034_s14 = smov 0   ;;  %s7036_s15 = smov 0  }
   0x5   :  { %s7038_s16 = smov 0   ;;  %s7040_s17 = smov 0  }
   0x6   :  { %s7042_s18 = smov 0   ;;  %s7044_s19 = smov 0  }
   0x7   :  { %s7046_s20 = smov 0   ;;  %s7048_s21 = smov 0  }
   0x8   :  { %s7050_s22 = smov 0  }
   0x9 LB: > { %s5528_s23 = sadd.s32 4294967295, %s7007_s22   ;;  %s22_s24 = sadd.s32 1, %s6999_s20  ;;  %s7007_s22 = sphi %s7050_s22, %s13_s22   ;;  %s7003_s21 = sphi %s7048_s21, %s8568_s21   ;;  %s6999_s20 = sphi %s7046_s20, %s8567_s20   ;;  %s6995_s19 = sphi %s7044_s19, %s8566_s19   ;;  %s6991_s18 = sphi %s7042_s18, %s8565_s18   ;;  %s6987_s17 = sphi %s7040_s17, %s8564_s17   ;;  %s6983_s16 = sphi %s7038_s16, %s8563_s16   ;;  %s6979_s15 = sphi %s7036_s15, %s8562_s15   ;;  %s6975_s14 = sphi %s7034_s14, %s8561_s14   ;;  %s6971_s13 = sphi %s7032_s13, %s8560_s13   ;;  %s6967_s12 = sphi %s7030_s12, %s8559_s12  }
   0xa   : > { %p23_p0 = scmp.ge.s32.totalorder %s22_s24, 5  ;;  %s25_s25 = sadd.s32 1, %s7003_s21 }
   0xb   : > { %s32_s26 = sadd.s32 1, %s6987_s17  ;;  %p39_p1 = scmp.ne.s32.totalorder %s6987_s17, %s6983_s16 }
   0xc   : > { %s8570_s24 = smov (%p23_p0, %s22_s24), 0  ;;  %s8572_s25 = smov (!%p23_p0, %s25_s25), %s7003_s21 }
   0xd   : > { %s29_s27 = ssub.s32 %s6999_s20, %s8570_s24  ;;  %p40_p2 = scmp.eq.s32.totalorder %s7007_s22, 0 }
   0xe   : > { %p27_p3 = scmp.ge.s32.totalorder %s8572_s25, 2  ;;  %p30_p4 = scmp.eq.s32.totalorder %s29_s27, 0 }
   0xf   : > { %p7097_p5 = por %p40_p2, %p39_p1  ;;  %s60_s29 = sadd.s32 1, %s6979_s15 }
  0x10   : > { %s8574_s25 = smov (%p27_p3, %s8572_s25), 0  ;;  %p67_p6 = scmp.ne.s32.totalorder %s6979_s15, %s6975_s14 }
  0x11   : > { %8553 = sst [smem:[#allocation6_spill]] %s8574_s25  ;;  %s56_s4 = ssub.s32 %s7003_s21, %s8574_s25 }
  0x12   : > { %s7105_s30 = scalar_select %p30_p4, %s6987_s17, %s32_s26  }
  0x13   : > { %s57_s5 = sor.u32 %s56_s4, %s29_s27  ;;  %p110_p7 = scmp.eq.s32.totalorder %s56_s4, 0 }
  0x14   : > { %p58_p8 = scmp.eq.s32.totalorder %s57_s5, 0  ;;  %p7111_p9 = por %p67_p6, %p40_p2 }
  0x15   : > { %s112_s7 = sadd.s32 1, %s6971_s13  ;;  %p122_p10 = scmp.ne.s32.totalorder %s6971_s13, %s6967_s12 }
  0x16   : > { %s7119_s8 = scalar_select %p58_p8, %s6979_s15, %s60_s29  }
  0x17   : > { %s7122_s9 = scalar_select %p110_p7, %s6971_s13, %s112_s7  }
  0x18   : > { %p123_p11 = scmp.eq.s32.totalorder %s5528_s23, 9  ;;  %p5531_p13 = scmp.ge.s32.totalorder %s7007_s22, 10 }
  0x1a   : > { %p7124_p12 = por %p123_p11, %p122_p10  ;;  %145 = sbr.rel (%p5531_p13) target bundleno = 435 (0x1b3), region = 16 }
  0x1f   : > { %148 = sbr.rel (!%p7097_p5) target bundleno = 169 (0xa9), region = 20  ;;  %s150_s11 = sand.u32 (%p7097_p5), 1, %s6987_s17  }
  0x20   : > { %s6573_s26 = sshll.u32 (%p7097_p5), %s6999_s20, 6  ;;  %s5532_s27 = sshll.u32 (%p7097_p5), %s150_s11, 10 }
  0x21   : > { %s8556_s0 = sld [smem:[#allocation7_spill]] (%p7097_p5)  ;;  %s7141_s23 = scalar_lea.vmem (%p7097_p5), [#allocation3], %s5532_s27 }
  0x27   : > { %s7136_s5 = scalar_lea.vmem %s8556_s0, %s6573_s26 }
  0x28   : > { %v168_v0 = vld [vmem:[%s7136_s5] sm:$0xff]  ;;  %v170_v1 = vld [vmem:[%s7136_s5 + $0x8] sm:$0xff]  ;;  %v172_v2 = vld [vmem:[%s7136_s5 + $0x10] sm:$0xff] }
  0x29   : > { %169 = vst [vmem:[%s7141_s23] sm:$0xff] %v168_v0  ;;  %v174_v3 = vld [vmem:[%s7136_s5 + $0x18] sm:$0xff]  ;;  %v176_v4 = vld [vmem:[%s7136_s5 + $0x20] sm:$0xff]  ;;  %v178_v5 = vld [vmem:[%s7136_s5 + $0x28] sm:$0xff] }
  0x2a   : > { %171 = vst [vmem:[%s7141_s23 + $0x8] sm:$0xff] %v170_v1  ;;  %v180_v6 = vld [vmem:[%s7136_s5 + $0x30] sm:$0xff]  ;;  %v182_v7 = vld [vmem:[%s7136_s5 + $0x38] sm:$0xff]  ;;  %v184_v8 = vld [vmem:[%s7136_s5 + $0x140] sm:$0xff] }
  0x2b   : > { %173 = vst [vmem:[%s7141_s23 + $0x10] sm:$0xff] %v172_v2  ;;  %v186_v9 = vld [vmem:[%s7136_s5 + $0x148] sm:$0xff]  ;;  %v188_v10 = vld [vmem:[%s7136_s5 + $0x150] sm:$0xff]  ;;  %v190_v11 = vld [vmem:[%s7136_s5 + $0x158] sm:$0xff] }
  0x2c   : > { %175 = vst [vmem:[%s7141_s23 + $0x18] sm:$0xff] %v174_v3  ;;  %v192_v12 = vld [vmem:[%s7136_s5 + $0x160] sm:$0xff]  ;;  %v194_v13 = vld [vmem:[%s7136_s5 + $0x168] sm:$0xff]  ;;  %v196_v14 = vld [vmem:[%s7136_s5 + $0x170] sm:$0xff] }
  0x2d   : > { %177 = vst [vmem:[%s7141_s23 + $0x20] sm:$0xff] %v176_v4  ;;  %v198_v15 = vld [vmem:[%s7136_s5 + $0x178] sm:$0xff]  ;;  %v200_v16 = vld [vmem:[%s7136_s5 + $0x280] sm:$0xff]  ;;  %v202_v17 = vld [vmem:[%s7136_s5 + $0x288] sm:$0xff] }
  0x2e   : > { %179 = vst [vmem:[%s7141_s23 + $0x28] sm:$0xff] %v178_v5  ;;  %v204_v18 = vld [vmem:[%s7136_s5 + $0x290] sm:$0xff]  ;;  %v206_v19 = vld [vmem:[%s7136_s5 + $0x298] sm:$0xff]  ;;  %v208_v20 = vld [vmem:[%s7136_s5 + $0x2a0] sm:$0xff] }
  0x2f   : > { %181 = vst [vmem:[%s7141_s23 + $0x30] sm:$0xff] %v180_v6  ;;  %v210_v21 = vld [vmem:[%s7136_s5 + $0x2a8] sm:$0xff]  ;;  %v212_v22 = vld [vmem:[%s7136_s5 + $0x2b0] sm:$0xff]  ;;  %v214_v23 = vld [vmem:[%s7136_s5 + $0x2b8] sm:$0xff] }
  0x30   : > { %183 = vst [vmem:[%s7141_s23 + $0x38] sm:$0xff] %v182_v7  ;;  %v216_v24 = vld [vmem:[%s7136_s5 + $0x3c0] sm:$0xff]  ;;  %v218_v25 = vld [vmem:[%s7136_s5 + $0x3c8] sm:$0xff]  ;;  %v220_v26 = vld [vmem:[%s7136_s5 + $0x3d0] sm:$0xff] }
  0x31   : > { %185 = vst [vmem:[%s7141_s23 + $0x40] sm:$0xff] %v184_v8  ;;  %v222_v27 = vld [vmem:[%s7136_s5 + $0x3d8] sm:$0xff]  ;;  %v224_v28 = vld [vmem:[%s7136_s5 + $0x3e0] sm:$0xff]  ;;  %v226_v29 = vld [vmem:[%s7136_s5 + $0x3e8] sm:$0xff] }
  0x32   : > { %187 = vst [vmem:[%s7141_s23 + $0x48] sm:$0xff] %v186_v9  ;;  %v228_v30 = vld [vmem:[%s7136_s5 + $0x3f0] sm:$0xff]  ;;  %v230_v31 = vld [vmem:[%s7136_s5 + $0x3f8] sm:$0xff]  ;;  %v232_v32 = vld [vmem:[%s7136_s5 + $0x500] sm:$0xff] }
  0x33   : > { %189 = vst [vmem:[%s7141_s23 + $0x50] sm:$0xff] %v188_v10  ;;  %v234_v33 = vld [vmem:[%s7136_s5 + $0x508] sm:$0xff]  ;;  %v236_v34 = vld [vmem:[%s7136_s5 + $0x510] sm:$0xff]  ;;  %v238_v35 = vld [vmem:[%s7136_s5 + $0x518] sm:$0xff] }
  0x34   : > { %191 = vst [vmem:[%s7141_s23 + $0x58] sm:$0xff] %v190_v11  ;;  %v240_v36 = vld [vmem:[%s7136_s5 + $0x520] sm:$0xff]  ;;  %v242_v37 = vld [vmem:[%s7136_s5 + $0x528] sm:$0xff]  ;;  %v244_v38 = vld [vmem:[%s7136_s5 + $0x530] sm:$0xff] }
  0x35   : > { %193 = vst [vmem:[%s7141_s23 + $0x60] sm:$0xff] %v192_v12  ;;  %v246_v39 = vld [vmem:[%s7136_s5 + $0x538] sm:$0xff]  ;;  %v248_v40 = vld [vmem:[%s7136_s5 + $0x640] sm:$0xff]  ;;  %v250_v41 = vld [vmem:[%s7136_s5 + $0x648] sm:$0xff] }
  0x36   : > { %195 = vst [vmem:[%s7141_s23 + $0x68] sm:$0xff] %v194_v13  ;;  %v252_v42 = vld [vmem:[%s7136_s5 + $0x650] sm:$0xff]  ;;  %v254_v43 = vld [vmem:[%s7136_s5 + $0x658] sm:$0xff]  ;;  %v256_v44 = vld [vmem:[%s7136_s5 + $0x660] sm:$0xff] }
  0x37   : > { %197 = vst [vmem:[%s7141_s23 + $0x70] sm:$0xff] %v196_v14  ;;  %v258_v45 = vld [vmem:[%s7136_s5 + $0x668] sm:$0xff]  ;;  %v260_v46 = vld [vmem:[%s7136_s5 + $0x670] sm:$0xff]  ;;  %v262_v47 = vld [vmem:[%s7136_s5 + $0x678] sm:$0xff] }
  0x38   : > { %199 = vst [vmem:[%s7141_s23 + $0x78] sm:$0xff] %v198_v15  ;;  %v264_v48 = vld [vmem:[%s7136_s5 + $0x780] sm:$0xff]  ;;  %v266_v49 = vld [vmem:[%s7136_s5 + $0x788] sm:$0xff]  ;;  %v268_v50 = vld [vmem:[%s7136_s5 + $0x790] sm:$0xff] }
  0x39   : > { %201 = vst [vmem:[%s7141_s23 + $0x80] sm:$0xff] %v200_v16  ;;  %v270_v51 = vld [vmem:[%s7136_s5 + $0x798] sm:$0xff]  ;;  %v272_v52 = vld [vmem:[%s7136_s5 + $0x7a0] sm:$0xff]  ;;  %v274_v53 = vld [vmem:[%s7136_s5 + $0x7a8] sm:$0xff] }
  0x3a   : > { %203 = vst [vmem:[%s7141_s23 + $0x88] sm:$0xff] %v202_v17  ;;  %v276_v54 = vld [vmem:[%s7136_s5 + $0x7b0] sm:$0xff]  ;;  %v278_v55 = vld [vmem:[%s7136_s5 + $0x7b8] sm:$0xff]  ;;  %v280_v56 = vld [vmem:[%s7136_s5 + $0x8c0] sm:$0xff] }
  0x3b   : > { %205 = vst [vmem:[%s7141_s23 + $0x90] sm:$0xff] %v204_v18  ;;  %v282_v57 = vld [vmem:[%s7136_s5 + $0x8c8] sm:$0xff]  ;;  %v284_v58 = vld [vmem:[%s7136_s5 + $0x8d0] sm:$0xff]  ;;  %v286_v59 = vld [vmem:[%s7136_s5 + $0x8d8] sm:$0xff] }
  0x3c   : > { %207 = vst [vmem:[%s7141_s23 + $0x98] sm:$0xff] %v206_v19  ;;  %v288_v60 = vld [vmem:[%s7136_s5 + $0x8e0] sm:$0xff]  ;;  %v290_v61 = vld [vmem:[%s7136_s5 + $0x8e8] sm:$0xff]  ;;  %v292_v62 = vld [vmem:[%s7136_s5 + $0x8f0] sm:$0xff] }
  0x3d   : > { %209 = vst [vmem:[%s7141_s23 + $0xa0] sm:$0xff] %v208_v20  ;;  %v294_v63 = vld [vmem:[%s7136_s5 + $0x8f8] sm:$0xff]  ;;  %v296_v0 = vld [vmem:[%s7136_s5 + $0xa00] sm:$0xff]  ;;  %v298_v1 = vld [vmem:[%s7136_s5 + $0xa08] sm:$0xff] }
  0x3e   : > { %211 = vst [vmem:[%s7141_s23 + $0xa8] sm:$0xff] %v210_v21  ;;  %v300_v2 = vld [vmem:[%s7136_s5 + $0xa10] sm:$0xff]  ;;  %v302_v3 = vld [vmem:[%s7136_s5 + $0xa18] sm:$0xff]  ;;  %v304_v4 = vld [vmem:[%s7136_s5 + $0xa20] sm:$0xff] }
  0x3f   : > { %213 = vst [vmem:[%s7141_s23 + $0xb0] sm:$0xff] %v212_v22  ;;  %v306_v5 = vld [vmem:[%s7136_s5 + $0xa28] sm:$0xff]  ;;  %v308_v6 = vld [vmem:[%s7136_s5 + $0xa30] sm:$0xff]  ;;  %v310_v7 = vld [vmem:[%s7136_s5 + $0xa38] sm:$0xff] }
  0x40   : > { %215 = vst [vmem:[%s7141_s23 + $0xb8] sm:$0xff] %v214_v23  ;;  %v312_v8 = vld [vmem:[%s7136_s5 + $0xb40] sm:$0xff]  ;;  %v314_v9 = vld [vmem:[%s7136_s5 + $0xb48] sm:$0xff]  ;;  %v316_v10 = vld [vmem:[%s7136_s5 + $0xb50] sm:$0xff] }
  0x41   : > { %217 = vst [vmem:[%s7141_s23 + $0xc0] sm:$0xff] %v216_v24  ;;  %v318_v11 = vld [vmem:[%s7136_s5 + $0xb58] sm:$0xff]  ;;  %v320_v12 = vld [vmem:[%s7136_s5 + $0xb60] sm:$0xff]  ;;  %v322_v13 = vld [vmem:[%s7136_s5 + $0xb68] sm:$0xff] }
  0x42   : > { %219 = vst [vmem:[%s7141_s23 + $0xc8] sm:$0xff] %v218_v25  ;;  %v324_v14 = vld [vmem:[%s7136_s5 + $0xb70] sm:$0xff]  ;;  %v326_v15 = vld [vmem:[%s7136_s5 + $0xb78] sm:$0xff]  ;;  %v328_v16 = vld [vmem:[%s7136_s5 + $0xc80] sm:$0xff] }
  0x43   : > { %221 = vst [vmem:[%s7141_s23 + $0xd0] sm:$0xff] %v220_v26  ;;  %v330_v17 = vld [vmem:[%s7136_s5 + $0xc88] sm:$0xff]  ;;  %v332_v18 = vld [vmem:[%s7136_s5 + $0xc90] sm:$0xff]  ;;  %v334_v19 = vld [vmem:[%s7136_s5 + $0xc98] sm:$0xff] }
  0x44   : > { %223 = vst [vmem:[%s7141_s23 + $0xd8] sm:$0xff] %v222_v27  ;;  %v336_v20 = vld [vmem:[%s7136_s5 + $0xca0] sm:$0xff]  ;;  %v338_v21 = vld [vmem:[%s7136_s5 + $0xca8] sm:$0xff]  ;;  %v340_v22 = vld [vmem:[%s7136_s5 + $0xcb0] sm:$0xff] }
  0x45   : > { %225 = vst [vmem:[%s7141_s23 + $0xe0] sm:$0xff] %v224_v28  ;;  %v342_v23 = vld [vmem:[%s7136_s5 + $0xcb8] sm:$0xff]  ;;  %v344_v24 = vld [vmem:[%s7136_s5 + $0xdc0] sm:$0xff]  ;;  %v346_v25 = vld [vmem:[%s7136_s5 + $0xdc8] sm:$0xff] }
  0x46   : > { %227 = vst [vmem:[%s7141_s23 + $0xe8] sm:$0xff] %v226_v29  ;;  %v348_v26 = vld [vmem:[%s7136_s5 + $0xdd0] sm:$0xff]  ;;  %v350_v27 = vld [vmem:[%s7136_s5 + $0xdd8] sm:$0xff]  ;;  %v352_v28 = vld [vmem:[%s7136_s5 + $0xde0] sm:$0xff] }
  0x47   : > { %229 = vst [vmem:[%s7141_s23 + $0xf0] sm:$0xff] %v228_v30  ;;  %v354_v29 = vld [vmem:[%s7136_s5 + $0xde8] sm:$0xff]  ;;  %v356_v30 = vld [vmem:[%s7136_s5 + $0xdf0] sm:$0xff] }
  0x48   : > { %231 = vst [vmem:[%s7141_s23 + $0xf8] sm:$0xff] %v230_v31  ;;  %v358_v31 = vld [vmem:[%s7136_s5 + $0xdf8] sm:$0xff] }
  0x49   : > { %233 = vst [vmem:[%s7141_s23 + $0x100] sm:$0xff] %v232_v32  ;;  %v360_v32 = vld [vmem:[%s7136_s5 + $0xf00] sm:$0xff] }
  0x4a   : > { %235 = vst [vmem:[%s7141_s23 + $0x108] sm:$0xff] %v234_v33  ;;  %v362_v33 = vld [vmem:[%s7136_s5 + $0xf08] sm:$0xff] }
  0x4b   : > { %237 = vst [vmem:[%s7141_s23 + $0x110] sm:$0xff] %v236_v34  ;;  %v364_v34 = vld [vmem:[%s7136_s5 + $0xf10] sm:$0xff] }
  0x4c   : > { %239 = vst [vmem:[%s7141_s23 + $0x118] sm:$0xff] %v238_v35  ;;  %v366_v35 = vld [vmem:[%s7136_s5 + $0xf18] sm:$0xff] }
  0x4d   : > { %241 = vst [vmem:[%s7141_s23 + $0x120] sm:$0xff] %v240_v36  ;;  %v368_v36 = vld [vmem:[%s7136_s5 + $0xf20] sm:$0xff] }
  0x4e   : > { %243 = vst [vmem:[%s7141_s23 + $0x128] sm:$0xff] %v242_v37  ;;  %v370_v37 = vld [vmem:[%s7136_s5 + $0xf28] sm:$0xff] }
  0x4f   : > { %245 = vst [vmem:[%s7141_s23 + $0x130] sm:$0xff] %v244_v38  ;;  %v372_v38 = vld [vmem:[%s7136_s5 + $0xf30] sm:$0xff] }
  0x50   : > { %247 = vst [vmem:[%s7141_s23 + $0x138] sm:$0xff] %v246_v39  ;;  %v374_v39 = vld [vmem:[%s7136_s5 + $0xf38] sm:$0xff] }
  0x51   : > { %249 = vst [vmem:[%s7141_s23 + $0x140] sm:$0xff] %v248_v40  ;;  %v376_v40 = vld [vmem:[%s7136_s5 + $0x1040] sm:$0xff] }
  0x52   : > { %251 = vst [vmem:[%s7141_s23 + $0x148] sm:$0xff] %v250_v41  ;;  %v378_v41 = vld [vmem:[%s7136_s5 + $0x1048] sm:$0xff] }
  0x53   : > { %253 = vst [vmem:[%s7141_s23 + $0x150] sm:$0xff] %v252_v42  ;;  %v380_v42 = vld [vmem:[%s7136_s5 + $0x1050] sm:$0xff] }
  0x54   : > { %255 = vst [vmem:[%s7141_s23 + $0x158] sm:$0xff] %v254_v43  ;;  %v382_v43 = vld [vmem:[%s7136_s5 + $0x1058] sm:$0xff] }
  0x55   : > { %257 = vst [vmem:[%s7141_s23 + $0x160] sm:$0xff] %v256_v44  ;;  %v384_v44 = vld [vmem:[%s7136_s5 + $0x1060] sm:$0xff] }
  0x56   : > { %259 = vst [vmem:[%s7141_s23 + $0x168] sm:$0xff] %v258_v45  ;;  %v386_v45 = vld [vmem:[%s7136_s5 + $0x1068] sm:$0xff] }
  0x57   : > { %261 = vst [vmem:[%s7141_s23 + $0x170] sm:$0xff] %v260_v46  ;;  %v388_v46 = vld [vmem:[%s7136_s5 + $0x1070] sm:$0xff] }
  0x58   : > { %263 = vst [vmem:[%s7141_s23 + $0x178] sm:$0xff] %v262_v47  ;;  %v390_v47 = vld [vmem:[%s7136_s5 + $0x1078] sm:$0xff] }
  0x59   : > { %265 = vst [vmem:[%s7141_s23 + $0x180] sm:$0xff] %v264_v48  ;;  %v392_v48 = vld [vmem:[%s7136_s5 + $0x1180] sm:$0xff] }
  0x5a   : > { %267 = vst [vmem:[%s7141_s23 + $0x188] sm:$0xff] %v266_v49  ;;  %v394_v49 = vld [vmem:[%s7136_s5 + $0x1188] sm:$0xff] }
  0x5b   : > { %269 = vst [vmem:[%s7141_s23 + $0x190] sm:$0xff] %v268_v50  ;;  %v396_v50 = vld [vmem:[%s7136_s5 + $0x1190] sm:$0xff] }
  0x5c   : > { %271 = vst [vmem:[%s7141_s23 + $0x198] sm:$0xff] %v270_v51  ;;  %v398_v51 = vld [vmem:[%s7136_s5 + $0x1198] sm:$0xff] }
  0x5d   : > { %273 = vst [vmem:[%s7141_s23 + $0x1a0] sm:$0xff] %v272_v52  ;;  %v400_v52 = vld [vmem:[%s7136_s5 + $0x11a0] sm:$0xff] }
  0x5e   : > { %275 = vst [vmem:[%s7141_s23 + $0x1a8] sm:$0xff] %v274_v53  ;;  %v402_v53 = vld [vmem:[%s7136_s5 + $0x11a8] sm:$0xff] }
  0x5f   : > { %277 = vst [vmem:[%s7141_s23 + $0x1b0] sm:$0xff] %v276_v54  ;;  %v404_v54 = vld [vmem:[%s7136_s5 + $0x11b0] sm:$0xff] }
  0x60   : > { %279 = vst [vmem:[%s7141_s23 + $0x1b8] sm:$0xff] %v278_v55  ;;  %v406_v55 = vld [vmem:[%s7136_s5 + $0x11b8] sm:$0xff] }
  0x61   : > { %281 = vst [vmem:[%s7141_s23 + $0x1c0] sm:$0xff] %v280_v56  ;;  %v408_v56 = vld [vmem:[%s7136_s5 + $0x12c0] sm:$0xff] }
  0x62   : > { %283 = vst [vmem:[%s7141_s23 + $0x1c8] sm:$0xff] %v282_v57  ;;  %v410_v57 = vld [vmem:[%s7136_s5 + $0x12c8] sm:$0xff] }
  0x63   : > { %285 = vst [vmem:[%s7141_s23 + $0x1d0] sm:$0xff] %v284_v58  ;;  %v412_v58 = vld [vmem:[%s7136_s5 + $0x12d0] sm:$0xff] }
  0x64   : > { %287 = vst [vmem:[%s7141_s23 + $0x1d8] sm:$0xff] %v286_v59  ;;  %v414_v59 = vld [vmem:[%s7136_s5 + $0x12d8] sm:$0xff] }
  0x65   : > { %289 = vst [vmem:[%s7141_s23 + $0x1e0] sm:$0xff] %v288_v60  ;;  %v416_v60 = vld [vmem:[%s7136_s5 + $0x12e0] sm:$0xff] }
  0x66   : > { %291 = vst [vmem:[%s7141_s23 + $0x1e8] sm:$0xff] %v290_v61  ;;  %v418_v61 = vld [vmem:[%s7136_s5 + $0x12e8] sm:$0xff] }
  0x67   : > { %293 = vst [vmem:[%s7141_s23 + $0x1f0] sm:$0xff] %v292_v62  ;;  %v420_v62 = vld [vmem:[%s7136_s5 + $0x12f0] sm:$0xff] }
  0x68   : > { %295 = vst [vmem:[%s7141_s23 + $0x1f8] sm:$0xff] %v294_v63  ;;  %v422_v63 = vld [vmem:[%s7136_s5 + $0x12f8] sm:$0xff] }
  0x69   : > { %297 = vst [vmem:[%s7141_s23 + $0x200] sm:$0xff] %v296_v0 }
  0x6a   : > { %299 = vst [vmem:[%s7141_s23 + $0x208] sm:$0xff] %v298_v1 }
  0x6b   : > { %301 = vst [vmem:[%s7141_s23 + $0x210] sm:$0xff] %v300_v2 }
  0x6c   : > { %303 = vst [vmem:[%s7141_s23 + $0x218] sm:$0xff] %v302_v3 }
  0x6d   : > { %305 = vst [vmem:[%s7141_s23 + $0x220] sm:$0xff] %v304_v4 }
  0x6e   : > { %307 = vst [vmem:[%s7141_s23 + $0x228] sm:$0xff] %v306_v5 }
  0x6f   : > { %309 = vst [vmem:[%s7141_s23 + $0x230] sm:$0xff] %v308_v6 }
  0x70   : > { %311 = vst [vmem:[%s7141_s23 + $0x238] sm:$0xff] %v310_v7 }
  0x71   : > { %313 = vst [vmem:[%s7141_s23 + $0x240] sm:$0xff] %v312_v8 }
  0x72   : > { %315 = vst [vmem:[%s7141_s23 + $0x248] sm:$0xff] %v314_v9 }
  0x73   : > { %317 = vst [vmem:[%s7141_s23 + $0x250] sm:$0xff] %v316_v10 }
  0x74   : > { %319 = vst [vmem:[%s7141_s23 + $0x258] sm:$0xff] %v318_v11 }
  0x75   : > { %321 = vst [vmem:[%s7141_s23 + $0x260] sm:$0xff] %v320_v12 }
  0x76   : > { %323 = vst [vmem:[%s7141_s23 + $0x268] sm:$0xff] %v322_v13 }
  0x77   : > { %325 = vst [vmem:[%s7141_s23 + $0x270] sm:$0xff] %v324_v14 }
  0x78   : > { %327 = vst [vmem:[%s7141_s23 + $0x278] sm:$0xff] %v326_v15 }
  0x79   : > { %329 = vst [vmem:[%s7141_s23 + $0x280] sm:$0xff] %v328_v16 }
  0x7a   : > { %331 = vst [vmem:[%s7141_s23 + $0x288] sm:$0xff] %v330_v17 }
  0x7b   : > { %333 = vst [vmem:[%s7141_s23 + $0x290] sm:$0xff] %v332_v18 }
  0x7c   : > { %335 = vst [vmem:[%s7141_s23 + $0x298] sm:$0xff] %v334_v19 }
  0x7d   : > { %337 = vst [vmem:[%s7141_s23 + $0x2a0] sm:$0xff] %v336_v20 }
  0x7e   : > { %339 = vst [vmem:[%s7141_s23 + $0x2a8] sm:$0xff] %v338_v21 }
  0x7f   : > { %341 = vst [vmem:[%s7141_s23 + $0x2b0] sm:$0xff] %v340_v22 }
  0x80   : > { %343 = vst [vmem:[%s7141_s23 + $0x2b8] sm:$0xff] %v342_v23 }
  0x81   : > { %345 = vst [vmem:[%s7141_s23 + $0x2c0] sm:$0xff] %v344_v24 }
  0x82   : > { %347 = vst [vmem:[%s7141_s23 + $0x2c8] sm:$0xff] %v346_v25 }
  0x83   : > { %349 = vst [vmem:[%s7141_s23 + $0x2d0] sm:$0xff] %v348_v26 }
  0x84   : > { %351 = vst [vmem:[%s7141_s23 + $0x2d8] sm:$0xff] %v350_v27 }
  0x85   : > { %353 = vst [vmem:[%s7141_s23 + $0x2e0] sm:$0xff] %v352_v28 }
  0x86   : > { %355 = vst [vmem:[%s7141_s23 + $0x2e8] sm:$0xff] %v354_v29 }
  0x87   : > { %357 = vst [vmem:[%s7141_s23 + $0x2f0] sm:$0xff] %v356_v30 }
  0x88   : > { %359 = vst [vmem:[%s7141_s23 + $0x2f8] sm:$0xff] %v358_v31 }
  0x89   : > { %361 = vst [vmem:[%s7141_s23 + $0x300] sm:$0xff] %v360_v32 }
  0x8a   : > { %363 = vst [vmem:[%s7141_s23 + $0x308] sm:$0xff] %v362_v33 }
  0x8b   : > { %365 = vst [vmem:[%s7141_s23 + $0x310] sm:$0xff] %v364_v34 }
  0x8c   : > { %367 = vst [vmem:[%s7141_s23 + $0x318] sm:$0xff] %v366_v35 }
  0x8d   : > { %369 = vst [vmem:[%s7141_s23 + $0x320] sm:$0xff] %v368_v36 }
  0x8e   : > { %371 = vst [vmem:[%s7141_s23 + $0x328] sm:$0xff] %v370_v37 }
  0x8f   : > { %373 = vst [vmem:[%s7141_s23 + $0x330] sm:$0xff] %v372_v38 }
  0x90   : > { %375 = vst [vmem:[%s7141_s23 + $0x338] sm:$0xff] %v374_v39 }
  0x91   : > { %377 = vst [vmem:[%s7141_s23 + $0x340] sm:$0xff] %v376_v40 }
  0x92   : > { %379 = vst [vmem:[%s7141_s23 + $0x348] sm:$0xff] %v378_v41 }
  0x93   : > { %381 = vst [vmem:[%s7141_s23 + $0x350] sm:$0xff] %v380_v42 }
  0x94   : > { %383 = vst [vmem:[%s7141_s23 + $0x358] sm:$0xff] %v382_v43 }
  0x95   : > { %385 = vst [vmem:[%s7141_s23 + $0x360] sm:$0xff] %v384_v44 }
  0x96   : > { %387 = vst [vmem:[%s7141_s23 + $0x368] sm:$0xff] %v386_v45 }
  0x97   : > { %389 = vst [vmem:[%s7141_s23 + $0x370] sm:$0xff] %v388_v46 }
  0x98   : > { %391 = vst [vmem:[%s7141_s23 + $0x378] sm:$0xff] %v390_v47 }
  0x99   : > { %393 = vst [vmem:[%s7141_s23 + $0x380] sm:$0xff] %v392_v48 }
  0x9a   : > { %395 = vst [vmem:[%s7141_s23 + $0x388] sm:$0xff] %v394_v49 }
  0x9b   : > { %397 = vst [vmem:[%s7141_s23 + $0x390] sm:$0xff] %v396_v50 }
  0x9c   : > { %399 = vst [vmem:[%s7141_s23 + $0x398] sm:$0xff] %v398_v51 }
  0x9d   : > { %401 = vst [vmem:[%s7141_s23 + $0x3a0] sm:$0xff] %v400_v52 }
  0x9e   : > { %403 = vst [vmem:[%s7141_s23 + $0x3a8] sm:$0xff] %v402_v53 }
  0x9f   : > { %405 = vst [vmem:[%s7141_s23 + $0x3b0] sm:$0xff] %v404_v54 }
  0xa0   : > { %407 = vst [vmem:[%s7141_s23 + $0x3b8] sm:$0xff] %v406_v55 }
  0xa1   : > { %409 = vst [vmem:[%s7141_s23 + $0x3c0] sm:$0xff] %v408_v56 }
  0xa2   : > { %411 = vst [vmem:[%s7141_s23 + $0x3c8] sm:$0xff] %v410_v57 }
  0xa3   : > { %413 = vst [vmem:[%s7141_s23 + $0x3d0] sm:$0xff] %v412_v58 }
  0xa4   : > { %415 = vst [vmem:[%s7141_s23 + $0x3d8] sm:$0xff] %v414_v59 }
  0xa5   : > { %417 = vst [vmem:[%s7141_s23 + $0x3e0] sm:$0xff] %v416_v60 }
  0xa6   : > { %419 = vst [vmem:[%s7141_s23 + $0x3e8] sm:$0xff] %v418_v61 }
  0xa7   : > { %421 = vst [vmem:[%s7141_s23 + $0x3f0] sm:$0xff] %v420_v62 }
  0xa8   : > { %423 = vst [vmem:[%s7141_s23 + $0x3f8] sm:$0xff] %v422_v63 }
  0xa9 PF: > { %429 = sbr.rel (!%p7111_p9) target bundleno = 435 (0x1b3), region = 43  ;;  %s431_s28 = sand.u32 (%p7111_p9), 1, %s6979_s15  }
  0xaa   : > { %s6574_s7 = sshll.u32 (%p7111_p9), %s6999_s20, 9  ;;  %s5535_s11 = sshll.u32 (%p7111_p9), %s431_s28, 10 }
  0xab   : > { %s436_s26 = sadd.s32 (%p7111_p9), %s7003_s21, %s6574_s7  ;;  %s8557_s1 = sld [smem:[#allocation8_spill]] (%p7111_p9) }
  0xac   : > { %s5538_s27 = sshll.u32 (%p7111_p9), %s436_s26, 2  ;;  %s7409_s6 = scalar_lea.vmem (%p7111_p9), [#allocation4], %s5535_s11 }
  0xb1   : > { %s7404_s0 = scalar_lea.vmem %s8557_s1, %s5538_s27 }
  0xb2   : > { %v455_v0 = vld [vmem:[%s7404_s0] sm:$0xf]  ;;  %v457_v1 = vld [vmem:[%s7404_s0 + $0x8] sm:$0xf]  ;;  %v459_v2 = vld [vmem:[%s7404_s0 + $0x10] sm:$0xf] }
  0xb3   : > { %456 = vst [vmem:[%s7409_s6] sm:$0xf] %v455_v0  ;;  %v461_v3 = vld [vmem:[%s7404_s0 + $0x18] sm:$0xf]  ;;  %v463_v4 = vld [vmem:[%s7404_s0 + $0x20] sm:$0xf] }
  0xb4   : > { %458 = vst [vmem:[%s7409_s6 + $0x4] sm:$0xf] %v457_v1  ;;  %v465_v5 = vld [vmem:[%s7404_s0 + $0x28] sm:$0xf]  ;;  %v467_v6 = vld [vmem:[%s7404_s0 + $0x30] sm:$0xf] }
  0xb5   : > { %460 = vst [vmem:[%s7409_s6 + $0x8] sm:$0xf] %v459_v2  ;;  %v469_v7 = vld [vmem:[%s7404_s0 + $0x38] sm:$0xf]  ;;  %v471_v8 = vld [vmem:[%s7404_s0 + $0x40] sm:$0xf] }
  0xb6   : > { %462 = vst [vmem:[%s7409_s6 + $0xc] sm:$0xf] %v461_v3  ;;  %v473_v9 = vld [vmem:[%s7404_s0 + $0x48] sm:$0xf]  ;;  %v475_v10 = vld [vmem:[%s7404_s0 + $0x50] sm:$0xf] }
  0xb7   : > { %464 = vst [vmem:[%s7409_s6 + $0x10] sm:$0xf] %v463_v4  ;;  %v477_v11 = vld [vmem:[%s7404_s0 + $0x58] sm:$0xf]  ;;  %v479_v12 = vld [vmem:[%s7404_s0 + $0x60] sm:$0xf] }
  0xb8   : > { %466 = vst [vmem:[%s7409_s6 + $0x14] sm:$0xf] %v465_v5  ;;  %v481_v13 = vld [vmem:[%s7404_s0 + $0x68] sm:$0xf]  ;;  %v483_v14 = vld [vmem:[%s7404_s0 + $0x70] sm:$0xf] }
  0xb9   : > { %468 = vst [vmem:[%s7409_s6 + $0x18] sm:$0xf] %v467_v6  ;;  %v485_v15 = vld [vmem:[%s7404_s0 + $0x78] sm:$0xf]  ;;  %v487_v16 = vld [vmem:[%s7404_s0 + $0x80] sm:$0xf] }
  0xba   : > { %470 = vst [vmem:[%s7409_s6 + $0x1c] sm:$0xf] %v469_v7  ;;  %v489_v17 = vld [vmem:[%s7404_s0 + $0x88] sm:$0xf]  ;;  %v491_v18 = vld [vmem:[%s7404_s0 + $0x90] sm:$0xf] }
  0xbb   : > { %472 = vst [vmem:[%s7409_s6 + $0x20] sm:$0xf] %v471_v8  ;;  %v493_v19 = vld [vmem:[%s7404_s0 + $0x98] sm:$0xf]  ;;  %v495_v20 = vld [vmem:[%s7404_s0 + $0xa0] sm:$0xf] }
  0xbc   : > { %474 = vst [vmem:[%s7409_s6 + $0x24] sm:$0xf] %v473_v9  ;;  %v497_v21 = vld [vmem:[%s7404_s0 + $0xa8] sm:$0xf]  ;;  %v499_v22 = vld [vmem:[%s7404_s0 + $0xb0] sm:$0xf] }
  0xbd   : > { %476 = vst [vmem:[%s7409_s6 + $0x28] sm:$0xf] %v475_v10  ;;  %v501_v23 = vld [vmem:[%s7404_s0 + $0xb8] sm:$0xf]  ;;  %v503_v24 = vld [vmem:[%s7404_s0 + $0xc0] sm:$0xf] }
  0xbe   : > { %478 = vst [vmem:[%s7409_s6 + $0x2c] sm:$0xf] %v477_v11  ;;  %v505_v25 = vld [vmem:[%s7404_s0 + $0xc8] sm:$0xf]  ;;  %v507_v26 = vld [vmem:[%s7404_s0 + $0xd0] sm:$0xf] }
  0xbf   : > { %480 = vst [vmem:[%s7409_s6 + $0x30] sm:$0xf] %v479_v12  ;;  %v509_v27 = vld [vmem:[%s7404_s0 + $0xd8] sm:$0xf]  ;;  %v511_v28 = vld [vmem:[%s7404_s0 + $0xe0] sm:$0xf] }
  0xc0   : > { %482 = vst [vmem:[%s7409_s6 + $0x34] sm:$0xf] %v481_v13  ;;  %v513_v29 = vld [vmem:[%s7404_s0 + $0xe8] sm:$0xf]  ;;  %v515_v30 = vld [vmem:[%s7404_s0 + $0xf0] sm:$0xf] }
  0xc1   : > { %484 = vst [vmem:[%s7409_s6 + $0x38] sm:$0xf] %v483_v14  ;;  %v517_v31 = vld [vmem:[%s7404_s0 + $0xf8] sm:$0xf]  ;;  %v519_v32 = vld [vmem:[%s7404_s0 + $0x100] sm:$0xf] }
  0xc2   : > { %486 = vst [vmem:[%s7409_s6 + $0x3c] sm:$0xf] %v485_v15  ;;  %v521_v33 = vld [vmem:[%s7404_s0 + $0x108] sm:$0xf]  ;;  %v523_v34 = vld [vmem:[%s7404_s0 + $0x110] sm:$0xf] }
  0xc3   : > { %488 = vst [vmem:[%s7409_s6 + $0x40] sm:$0xf] %v487_v16  ;;  %v525_v35 = vld [vmem:[%s7404_s0 + $0x118] sm:$0xf]  ;;  %v527_v36 = vld [vmem:[%s7404_s0 + $0x120] sm:$0xf] }
  0xc4   : > { %490 = vst [vmem:[%s7409_s6 + $0x44] sm:$0xf] %v489_v17  ;;  %v529_v37 = vld [vmem:[%s7404_s0 + $0x128] sm:$0xf]  ;;  %v531_v38 = vld [vmem:[%s7404_s0 + $0x130] sm:$0xf] }
  0xc5   : > { %492 = vst [vmem:[%s7409_s6 + $0x48] sm:$0xf] %v491_v18  ;;  %v533_v39 = vld [vmem:[%s7404_s0 + $0x138] sm:$0xf]  ;;  %v535_v40 = vld [vmem:[%s7404_s0 + $0x140] sm:$0xf] }
  0xc6   : > { %494 = vst [vmem:[%s7409_s6 + $0x4c] sm:$0xf] %v493_v19  ;;  %v537_v41 = vld [vmem:[%s7404_s0 + $0x148] sm:$0xf]  ;;  %v539_v42 = vld [vmem:[%s7404_s0 + $0x150] sm:$0xf] }
  0xc7   : > { %496 = vst [vmem:[%s7409_s6 + $0x50] sm:$0xf] %v495_v20  ;;  %v541_v43 = vld [vmem:[%s7404_s0 + $0x158] sm:$0xf]  ;;  %v543_v44 = vld [vmem:[%s7404_s0 + $0x160] sm:$0xf] }
  0xc8   : > { %498 = vst [vmem:[%s7409_s6 + $0x54] sm:$0xf] %v497_v21  ;;  %v545_v45 = vld [vmem:[%s7404_s0 + $0x168] sm:$0xf]  ;;  %v547_v46 = vld [vmem:[%s7404_s0 + $0x170] sm:$0xf] }
  0xc9   : > { %500 = vst [vmem:[%s7409_s6 + $0x58] sm:$0xf] %v499_v22  ;;  %v549_v47 = vld [vmem:[%s7404_s0 + $0x178] sm:$0xf]  ;;  %v551_v48 = vld [vmem:[%s7404_s0 + $0x180] sm:$0xf] }
  0xca   : > { %502 = vst [vmem:[%s7409_s6 + $0x5c] sm:$0xf] %v501_v23  ;;  %v553_v49 = vld [vmem:[%s7404_s0 + $0x188] sm:$0xf]  ;;  %v555_v50 = vld [vmem:[%s7404_s0 + $0x190] sm:$0xf] }
  0xcb   : > { %504 = vst [vmem:[%s7409_s6 + $0x60] sm:$0xf] %v503_v24  ;;  %v557_v51 = vld [vmem:[%s7404_s0 + $0x198] sm:$0xf]  ;;  %v559_v52 = vld [vmem:[%s7404_s0 + $0x1a0] sm:$0xf] }
  0xcc   : > { %506 = vst [vmem:[%s7409_s6 + $0x64] sm:$0xf] %v505_v25  ;;  %v561_v53 = vld [vmem:[%s7404_s0 + $0x1a8] sm:$0xf]  ;;  %v563_v54 = vld [vmem:[%s7404_s0 + $0x1b0] sm:$0xf] }
  0xcd   : > { %508 = vst [vmem:[%s7409_s6 + $0x68] sm:$0xf] %v507_v26  ;;  %v565_v55 = vld [vmem:[%s7404_s0 + $0x1b8] sm:$0xf]  ;;  %v567_v56 = vld [vmem:[%s7404_s0 + $0x1c0] sm:$0xf] }
  0xce   : > { %510 = vst [vmem:[%s7409_s6 + $0x6c] sm:$0xf] %v509_v27  ;;  %v569_v57 = vld [vmem:[%s7404_s0 + $0x1c8] sm:$0xf]  ;;  %v571_v58 = vld [vmem:[%s7404_s0 + $0x1d0] sm:$0xf] }
  0xcf   : > { %512 = vst [vmem:[%s7409_s6 + $0x70] sm:$0xf] %v511_v28  ;;  %v573_v59 = vld [vmem:[%s7404_s0 + $0x1d8] sm:$0xf]  ;;  %v575_v60 = vld [vmem:[%s7404_s0 + $0x1e0] sm:$0xf] }
  0xd0   : > { %514 = vst [vmem:[%s7409_s6 + $0x74] sm:$0xf] %v513_v29  ;;  %v577_v61 = vld [vmem:[%s7404_s0 + $0x1e8] sm:$0xf]  ;;  %v579_v62 = vld [vmem:[%s7404_s0 + $0x1f0] sm:$0xf] }
  0xd1   : > { %516 = vst [vmem:[%s7409_s6 + $0x78] sm:$0xf] %v515_v30  ;;  %v581_v63 = vld [vmem:[%s7404_s0 + $0x1f8] sm:$0xf]  ;;  %v583_v0 = vld [vmem:[%s7404_s0 + $0x200] sm:$0xf] }
  0xd2   : > { %518 = vst [vmem:[%s7409_s6 + $0x7c] sm:$0xf] %v517_v31  ;;  %v585_v1 = vld [vmem:[%s7404_s0 + $0x208] sm:$0xf]  ;;  %v587_v2 = vld [vmem:[%s7404_s0 + $0x210] sm:$0xf] }
  0xd3   : > { %520 = vst [vmem:[%s7409_s6 + $0x80] sm:$0xf] %v519_v32  ;;  %v589_v3 = vld [vmem:[%s7404_s0 + $0x218] sm:$0xf]  ;;  %v591_v4 = vld [vmem:[%s7404_s0 + $0x220] sm:$0xf] }
  0xd4   : > { %522 = vst [vmem:[%s7409_s6 + $0x84] sm:$0xf] %v521_v33  ;;  %v593_v5 = vld [vmem:[%s7404_s0 + $0x228] sm:$0xf]  ;;  %v595_v6 = vld [vmem:[%s7404_s0 + $0x230] sm:$0xf] }
  0xd5   : > { %524 = vst [vmem:[%s7409_s6 + $0x88] sm:$0xf] %v523_v34  ;;  %v597_v7 = vld [vmem:[%s7404_s0 + $0x238] sm:$0xf]  ;;  %v599_v8 = vld [vmem:[%s7404_s0 + $0x240] sm:$0xf] }
  0xd6   : > { %526 = vst [vmem:[%s7409_s6 + $0x8c] sm:$0xf] %v525_v35  ;;  %v601_v9 = vld [vmem:[%s7404_s0 + $0x248] sm:$0xf]  ;;  %v603_v10 = vld [vmem:[%s7404_s0 + $0x250] sm:$0xf] }
  0xd7   : > { %528 = vst [vmem:[%s7409_s6 + $0x90] sm:$0xf] %v527_v36  ;;  %v605_v11 = vld [vmem:[%s7404_s0 + $0x258] sm:$0xf]  ;;  %v607_v12 = vld [vmem:[%s7404_s0 + $0x260] sm:$0xf] }
  0xd8   : > { %530 = vst [vmem:[%s7409_s6 + $0x94] sm:$0xf] %v529_v37  ;;  %v609_v13 = vld [vmem:[%s7404_s0 + $0x268] sm:$0xf]  ;;  %v611_v14 = vld [vmem:[%s7404_s0 + $0x270] sm:$0xf] }
  0xd9   : > { %532 = vst [vmem:[%s7409_s6 + $0x98] sm:$0xf] %v531_v38  ;;  %v613_v15 = vld [vmem:[%s7404_s0 + $0x278] sm:$0xf]  ;;  %v615_v16 = vld [vmem:[%s7404_s0 + $0x280] sm:$0xf] }
  0xda   : > { %534 = vst [vmem:[%s7409_s6 + $0x9c] sm:$0xf] %v533_v39  ;;  %v617_v17 = vld [vmem:[%s7404_s0 + $0x288] sm:$0xf]  ;;  %v619_v18 = vld [vmem:[%s7404_s0 + $0x290] sm:$0xf] }
  0xdb   : > { %536 = vst [vmem:[%s7409_s6 + $0xa0] sm:$0xf] %v535_v40  ;;  %v621_v19 = vld [vmem:[%s7404_s0 + $0x298] sm:$0xf]  ;;  %v623_v20 = vld [vmem:[%s7404_s0 + $0x2a0] sm:$0xf] }
  0xdc   : > { %538 = vst [vmem:[%s7409_s6 + $0xa4] sm:$0xf] %v537_v41  ;;  %v625_v21 = vld [vmem:[%s7404_s0 + $0x2a8] sm:$0xf]  ;;  %v627_v22 = vld [vmem:[%s7404_s0 + $0x2b0] sm:$0xf] }
  0xdd   : > { %540 = vst [vmem:[%s7409_s6 + $0xa8] sm:$0xf] %v539_v42  ;;  %v629_v23 = vld [vmem:[%s7404_s0 + $0x2b8] sm:$0xf]  ;;  %v631_v24 = vld [vmem:[%s7404_s0 + $0x2c0] sm:$0xf] }
  0xde   : > { %542 = vst [vmem:[%s7409_s6 + $0xac] sm:$0xf] %v541_v43  ;;  %v633_v25 = vld [vmem:[%s7404_s0 + $0x2c8] sm:$0xf]  ;;  %v635_v26 = vld [vmem:[%s7404_s0 + $0x2d0] sm:$0xf] }
  0xdf   : > { %544 = vst [vmem:[%s7409_s6 + $0xb0] sm:$0xf] %v543_v44  ;;  %v637_v27 = vld [vmem:[%s7404_s0 + $0x2d8] sm:$0xf]  ;;  %v639_v28 = vld [vmem:[%s7404_s0 + $0x2e0] sm:$0xf] }
  0xe0   : > { %546 = vst [vmem:[%s7409_s6 + $0xb4] sm:$0xf] %v545_v45  ;;  %v641_v29 = vld [vmem:[%s7404_s0 + $0x2e8] sm:$0xf]  ;;  %v643_v30 = vld [vmem:[%s7404_s0 + $0x2f0] sm:$0xf] }
  0xe1   : > { %548 = vst [vmem:[%s7409_s6 + $0xb8] sm:$0xf] %v547_v46  ;;  %v645_v31 = vld [vmem:[%s7404_s0 + $0x2f8] sm:$0xf]  ;;  %v647_v32 = vld [vmem:[%s7404_s0 + $0x300] sm:$0xf] }
  0xe2   : > { %550 = vst [vmem:[%s7409_s6 + $0xbc] sm:$0xf] %v549_v47  ;;  %v649_v33 = vld [vmem:[%s7404_s0 + $0x308] sm:$0xf]  ;;  %v651_v34 = vld [vmem:[%s7404_s0 + $0x310] sm:$0xf] }
  0xe3   : > { %552 = vst [vmem:[%s7409_s6 + $0xc0] sm:$0xf] %v551_v48  ;;  %v653_v35 = vld [vmem:[%s7404_s0 + $0x318] sm:$0xf]  ;;  %v655_v36 = vld [vmem:[%s7404_s0 + $0x320] sm:$0xf] }
  0xe4   : > { %554 = vst [vmem:[%s7409_s6 + $0xc4] sm:$0xf] %v553_v49  ;;  %v657_v37 = vld [vmem:[%s7404_s0 + $0x328] sm:$0xf]  ;;  %v659_v38 = vld [vmem:[%s7404_s0 + $0x330] sm:$0xf] }
  0xe5   : > { %556 = vst [vmem:[%s7409_s6 + $0xc8] sm:$0xf] %v555_v50  ;;  %v661_v39 = vld [vmem:[%s7404_s0 + $0x338] sm:$0xf]  ;;  %v663_v40 = vld [vmem:[%s7404_s0 + $0x340] sm:$0xf] }
  0xe6   : > { %558 = vst [vmem:[%s7409_s6 + $0xcc] sm:$0xf] %v557_v51  ;;  %v665_v41 = vld [vmem:[%s7404_s0 + $0x348] sm:$0xf]  ;;  %v667_v42 = vld [vmem:[%s7404_s0 + $0x350] sm:$0xf] }
  0xe7   : > { %560 = vst [vmem:[%s7409_s6 + $0xd0] sm:$0xf] %v559_v52  ;;  %v669_v43 = vld [vmem:[%s7404_s0 + $0x358] sm:$0xf]  ;;  %v671_v44 = vld [vmem:[%s7404_s0 + $0x360] sm:$0xf] }
  0xe8   : > { %562 = vst [vmem:[%s7409_s6 + $0xd4] sm:$0xf] %v561_v53  ;;  %v673_v45 = vld [vmem:[%s7404_s0 + $0x368] sm:$0xf]  ;;  %v675_v46 = vld [vmem:[%s7404_s0 + $0x370] sm:$0xf] }
  0xe9   : > { %564 = vst [vmem:[%s7409_s6 + $0xd8] sm:$0xf] %v563_v54  ;;  %v677_v47 = vld [vmem:[%s7404_s0 + $0x378] sm:$0xf]  ;;  %v679_v48 = vld [vmem:[%s7404_s0 + $0x380] sm:$0xf] }
  0xea   : > { %566 = vst [vmem:[%s7409_s6 + $0xdc] sm:$0xf] %v565_v55  ;;  %v681_v49 = vld [vmem:[%s7404_s0 + $0x388] sm:$0xf]  ;;  %v683_v50 = vld [vmem:[%s7404_s0 + $0x390] sm:$0xf] }
  0xeb   : > { %568 = vst [vmem:[%s7409_s6 + $0xe0] sm:$0xf] %v567_v56  ;;  %v685_v51 = vld [vmem:[%s7404_s0 + $0x398] sm:$0xf]  ;;  %v687_v52 = vld [vmem:[%s7404_s0 + $0x3a0] sm:$0xf] }
  0xec   : > { %570 = vst [vmem:[%s7409_s6 + $0xe4] sm:$0xf] %v569_v57  ;;  %v689_v53 = vld [vmem:[%s7404_s0 + $0x3a8] sm:$0xf]  ;;  %v691_v54 = vld [vmem:[%s7404_s0 + $0x3b0] sm:$0xf] }
  0xed   : > { %572 = vst [vmem:[%s7409_s6 + $0xe8] sm:$0xf] %v571_v58  ;;  %v693_v55 = vld [vmem:[%s7404_s0 + $0x3b8] sm:$0xf]  ;;  %v695_v56 = vld [vmem:[%s7404_s0 + $0x3c0] sm:$0xf] }
  0xee   : > { %574 = vst [vmem:[%s7409_s6 + $0xec] sm:$0xf] %v573_v59  ;;  %v697_v57 = vld [vmem:[%s7404_s0 + $0x3c8] sm:$0xf]  ;;  %v699_v58 = vld [vmem:[%s7404_s0 + $0x3d0] sm:$0xf] }
  0xef   : > { %576 = vst [vmem:[%s7409_s6 + $0xf0] sm:$0xf] %v575_v60  ;;  %v701_v59 = vld [vmem:[%s7404_s0 + $0x3d8] sm:$0xf]  ;;  %v703_v60 = vld [vmem:[%s7404_s0 + $0x3e0] sm:$0xf] }
  0xf0   : > { %578 = vst [vmem:[%s7409_s6 + $0xf4] sm:$0xf] %v577_v61  ;;  %v705_v61 = vld [vmem:[%s7404_s0 + $0x3e8] sm:$0xf] }
  0xf1   : > { %580 = vst [vmem:[%s7409_s6 + $0xf8] sm:$0xf] %v579_v62  ;;  %v707_v62 = vld [vmem:[%s7404_s0 + $0x3f0] sm:$0xf] }
  0xf2   : > { %582 = vst [vmem:[%s7409_s6 + $0xfc] sm:$0xf] %v581_v63  ;;  %v709_v63 = vld [vmem:[%s7404_s0 + $0x3f8] sm:$0xf] }
  0xf3   : > { %584 = vst [vmem:[%s7409_s6 + $0x100] sm:$0xf] %v583_v0  ;;  %v711_v0 = vld [vmem:[%s7404_s0 + $0x400] sm:$0xf] }
  0xf4   : > { %586 = vst [vmem:[%s7409_s6 + $0x104] sm:$0xf] %v585_v1  ;;  %v713_v1 = vld [vmem:[%s7404_s0 + $0x408] sm:$0xf] }
  0xf5   : > { %588 = vst [vmem:[%s7409_s6 + $0x108] sm:$0xf] %v587_v2  ;;  %v715_v2 = vld [vmem:[%s7404_s0 + $0x410] sm:$0xf] }
  0xf6   : > { %590 = vst [vmem:[%s7409_s6 + $0x10c] sm:$0xf] %v589_v3  ;;  %v717_v3 = vld [vmem:[%s7404_s0 + $0x418] sm:$0xf] }
  0xf7   : > { %592 = vst [vmem:[%s7409_s6 + $0x110] sm:$0xf] %v591_v4  ;;  %v719_v4 = vld [vmem:[%s7404_s0 + $0x420] sm:$0xf] }
  0xf8   : > { %594 = vst [vmem:[%s7409_s6 + $0x114] sm:$0xf] %v593_v5  ;;  %v721_v5 = vld [vmem:[%s7404_s0 + $0x428] sm:$0xf] }
  0xf9   : > { %596 = vst [vmem:[%s7409_s6 + $0x118] sm:$0xf] %v595_v6  ;;  %v723_v6 = vld [vmem:[%s7404_s0 + $0x430] sm:$0xf] }
  0xfa   : > { %598 = vst [vmem:[%s7409_s6 + $0x11c] sm:$0xf] %v597_v7  ;;  %v725_v7 = vld [vmem:[%s7404_s0 + $0x438] sm:$0xf] }
  0xfb   : > { %600 = vst [vmem:[%s7409_s6 + $0x120] sm:$0xf] %v599_v8  ;;  %v727_v8 = vld [vmem:[%s7404_s0 + $0x440] sm:$0xf] }
  0xfc   : > { %602 = vst [vmem:[%s7409_s6 + $0x124] sm:$0xf] %v601_v9  ;;  %v729_v9 = vld [vmem:[%s7404_s0 + $0x448] sm:$0xf] }
  0xfd   : > { %604 = vst [vmem:[%s7409_s6 + $0x128] sm:$0xf] %v603_v10  ;;  %v731_v10 = vld [vmem:[%s7404_s0 + $0x450] sm:$0xf] }
  0xfe   : > { %606 = vst [vmem:[%s7409_s6 + $0x12c] sm:$0xf] %v605_v11  ;;  %v733_v11 = vld [vmem:[%s7404_s0 + $0x458] sm:$0xf] }
  0xff   : > { %608 = vst [vmem:[%s7409_s6 + $0x130] sm:$0xf] %v607_v12  ;;  %v735_v12 = vld [vmem:[%s7404_s0 + $0x460] sm:$0xf] }
 0x100   : > { %610 = vst [vmem:[%s7409_s6 + $0x134] sm:$0xf] %v609_v13  ;;  %v737_v13 = vld [vmem:[%s7404_s0 + $0x468] sm:$0xf] }
 0x101   : > { %612 = vst [vmem:[%s7409_s6 + $0x138] sm:$0xf] %v611_v14  ;;  %v739_v14 = vld [vmem:[%s7404_s0 + $0x470] sm:$0xf] }
 0x102   : > { %614 = vst [vmem:[%s7409_s6 + $0x13c] sm:$0xf] %v613_v15  ;;  %v741_v15 = vld [vmem:[%s7404_s0 + $0x478] sm:$0xf] }
 0x103   : > { %616 = vst [vmem:[%s7409_s6 + $0x140] sm:$0xf] %v615_v16  ;;  %v743_v16 = vld [vmem:[%s7404_s0 + $0x480] sm:$0xf] }
 0x104   : > { %618 = vst [vmem:[%s7409_s6 + $0x144] sm:$0xf] %v617_v17  ;;  %v745_v17 = vld [vmem:[%s7404_s0 + $0x488] sm:$0xf] }
 0x105   : > { %620 = vst [vmem:[%s7409_s6 + $0x148] sm:$0xf] %v619_v18  ;;  %v747_v18 = vld [vmem:[%s7404_s0 + $0x490] sm:$0xf] }
 0x106   : > { %622 = vst [vmem:[%s7409_s6 + $0x14c] sm:$0xf] %v621_v19  ;;  %v749_v19 = vld [vmem:[%s7404_s0 + $0x498] sm:$0xf] }
 0x107   : > { %624 = vst [vmem:[%s7409_s6 + $0x150] sm:$0xf] %v623_v20  ;;  %v751_v20 = vld [vmem:[%s7404_s0 + $0x4a0] sm:$0xf] }
 0x108   : > { %626 = vst [vmem:[%s7409_s6 + $0x154] sm:$0xf] %v625_v21  ;;  %v753_v21 = vld [vmem:[%s7404_s0 + $0x4a8] sm:$0xf] }
 0x109   : > { %628 = vst [vmem:[%s7409_s6 + $0x158] sm:$0xf] %v627_v22  ;;  %v755_v22 = vld [vmem:[%s7404_s0 + $0x4b0] sm:$0xf] }
 0x10a   : > { %630 = vst [vmem:[%s7409_s6 + $0x15c] sm:$0xf] %v629_v23  ;;  %v757_v23 = vld [vmem:[%s7404_s0 + $0x4b8] sm:$0xf] }
 0x10b   : > { %632 = vst [vmem:[%s7409_s6 + $0x160] sm:$0xf] %v631_v24  ;;  %v759_v24 = vld [vmem:[%s7404_s0 + $0x4c0] sm:$0xf] }
 0x10c   : > { %634 = vst [vmem:[%s7409_s6 + $0x164] sm:$0xf] %v633_v25  ;;  %v761_v25 = vld [vmem:[%s7404_s0 + $0x4c8] sm:$0xf] }
 0x10d   : > { %636 = vst [vmem:[%s7409_s6 + $0x168] sm:$0xf] %v635_v26  ;;  %v763_v26 = vld [vmem:[%s7404_s0 + $0x4d0] sm:$0xf] }
 0x10e   : > { %638 = vst [vmem:[%s7409_s6 + $0x16c] sm:$0xf] %v637_v27  ;;  %v765_v27 = vld [vmem:[%s7404_s0 + $0x4d8] sm:$0xf] }
 0x10f   : > { %640 = vst [vmem:[%s7409_s6 + $0x170] sm:$0xf] %v639_v28  ;;  %v767_v28 = vld [vmem:[%s7404_s0 + $0x4e0] sm:$0xf] }
 0x110   : > { %642 = vst [vmem:[%s7409_s6 + $0x174] sm:$0xf] %v641_v29  ;;  %v769_v29 = vld [vmem:[%s7404_s0 + $0x4e8] sm:$0xf] }
 0x111   : > { %644 = vst [vmem:[%s7409_s6 + $0x178] sm:$0xf] %v643_v30  ;;  %v771_v30 = vld [vmem:[%s7404_s0 + $0x4f0] sm:$0xf] }
 0x112   : > { %646 = vst [vmem:[%s7409_s6 + $0x17c] sm:$0xf] %v645_v31  ;;  %v773_v31 = vld [vmem:[%s7404_s0 + $0x4f8] sm:$0xf] }
 0x113   : > { %648 = vst [vmem:[%s7409_s6 + $0x180] sm:$0xf] %v647_v32  ;;  %v775_v32 = vld [vmem:[%s7404_s0 + $0x500] sm:$0xf] }
 0x114   : > { %650 = vst [vmem:[%s7409_s6 + $0x184] sm:$0xf] %v649_v33  ;;  %v777_v33 = vld [vmem:[%s7404_s0 + $0x508] sm:$0xf] }
 0x115   : > { %652 = vst [vmem:[%s7409_s6 + $0x188] sm:$0xf] %v651_v34  ;;  %v779_v34 = vld [vmem:[%s7404_s0 + $0x510] sm:$0xf] }
 0x116   : > { %654 = vst [vmem:[%s7409_s6 + $0x18c] sm:$0xf] %v653_v35  ;;  %v781_v35 = vld [vmem:[%s7404_s0 + $0x518] sm:$0xf] }
 0x117   : > { %656 = vst [vmem:[%s7409_s6 + $0x190] sm:$0xf] %v655_v36  ;;  %v783_v36 = vld [vmem:[%s7404_s0 + $0x520] sm:$0xf] }
 0x118   : > { %658 = vst [vmem:[%s7409_s6 + $0x194] sm:$0xf] %v657_v37  ;;  %v785_v37 = vld [vmem:[%s7404_s0 + $0x528] sm:$0xf] }
 0x119   : > { %660 = vst [vmem:[%s7409_s6 + $0x198] sm:$0xf] %v659_v38  ;;  %v787_v38 = vld [vmem:[%s7404_s0 + $0x530] sm:$0xf] }
 0x11a   : > { %662 = vst [vmem:[%s7409_s6 + $0x19c] sm:$0xf] %v661_v39  ;;  %v789_v39 = vld [vmem:[%s7404_s0 + $0x538] sm:$0xf] }
 0x11b   : > { %664 = vst [vmem:[%s7409_s6 + $0x1a0] sm:$0xf] %v663_v40  ;;  %v791_v40 = vld [vmem:[%s7404_s0 + $0x540] sm:$0xf] }
 0x11c   : > { %666 = vst [vmem:[%s7409_s6 + $0x1a4] sm:$0xf] %v665_v41  ;;  %v793_v41 = vld [vmem:[%s7404_s0 + $0x548] sm:$0xf] }
 0x11d   : > { %668 = vst [vmem:[%s7409_s6 + $0x1a8] sm:$0xf] %v667_v42  ;;  %v795_v42 = vld [vmem:[%s7404_s0 + $0x550] sm:$0xf] }
 0x11e   : > { %670 = vst [vmem:[%s7409_s6 + $0x1ac] sm:$0xf] %v669_v43  ;;  %v797_v43 = vld [vmem:[%s7404_s0 + $0x558] sm:$0xf] }
 0x11f   : > { %672 = vst [vmem:[%s7409_s6 + $0x1b0] sm:$0xf] %v671_v44  ;;  %v799_v44 = vld [vmem:[%s7404_s0 + $0x560] sm:$0xf] }
 0x120   : > { %674 = vst [vmem:[%s7409_s6 + $0x1b4] sm:$0xf] %v673_v45  ;;  %v801_v45 = vld [vmem:[%s7404_s0 + $0x568] sm:$0xf] }
 0x121   : > { %676 = vst [vmem:[%s7409_s6 + $0x1b8] sm:$0xf] %v675_v46  ;;  %v803_v46 = vld [vmem:[%s7404_s0 + $0x570] sm:$0xf] }
 0x122   : > { %678 = vst [vmem:[%s7409_s6 + $0x1bc] sm:$0xf] %v677_v47  ;;  %v805_v47 = vld [vmem:[%s7404_s0 + $0x578] sm:$0xf] }
 0x123   : > { %680 = vst [vmem:[%s7409_s6 + $0x1c0] sm:$0xf] %v679_v48  ;;  %v807_v48 = vld [vmem:[%s7404_s0 + $0x580] sm:$0xf] }
 0x124   : > { %682 = vst [vmem:[%s7409_s6 + $0x1c4] sm:$0xf] %v681_v49  ;;  %v809_v49 = vld [vmem:[%s7404_s0 + $0x588] sm:$0xf] }
 0x125   : > { %684 = vst [vmem:[%s7409_s6 + $0x1c8] sm:$0xf] %v683_v50  ;;  %v811_v50 = vld [vmem:[%s7404_s0 + $0x590] sm:$0xf] }
 0x126   : > { %686 = vst [vmem:[%s7409_s6 + $0x1cc] sm:$0xf] %v685_v51  ;;  %v813_v51 = vld [vmem:[%s7404_s0 + $0x598] sm:$0xf] }
 0x127   : > { %688 = vst [vmem:[%s7409_s6 + $0x1d0] sm:$0xf] %v687_v52  ;;  %v815_v52 = vld [vmem:[%s7404_s0 + $0x5a0] sm:$0xf] }
 0x128   : > { %690 = vst [vmem:[%s7409_s6 + $0x1d4] sm:$0xf] %v689_v53  ;;  %v817_v53 = vld [vmem:[%s7404_s0 + $0x5a8] sm:$0xf] }
 0x129   : > { %692 = vst [vmem:[%s7409_s6 + $0x1d8] sm:$0xf] %v691_v54  ;;  %v819_v54 = vld [vmem:[%s7404_s0 + $0x5b0] sm:$0xf] }
 0x12a   : > { %694 = vst [vmem:[%s7409_s6 + $0x1dc] sm:$0xf] %v693_v55  ;;  %v821_v55 = vld [vmem:[%s7404_s0 + $0x5b8] sm:$0xf] }
 0x12b   : > { %696 = vst [vmem:[%s7409_s6 + $0x1e0] sm:$0xf] %v695_v56  ;;  %v823_v56 = vld [vmem:[%s7404_s0 + $0x5c0] sm:$0xf] }
 0x12c   : > { %698 = vst [vmem:[%s7409_s6 + $0x1e4] sm:$0xf] %v697_v57  ;;  %v825_v57 = vld [vmem:[%s7404_s0 + $0x5c8] sm:$0xf] }
 0x12d   : > { %700 = vst [vmem:[%s7409_s6 + $0x1e8] sm:$0xf] %v699_v58  ;;  %v827_v58 = vld [vmem:[%s7404_s0 + $0x5d0] sm:$0xf] }
 0x12e   : > { %702 = vst [vmem:[%s7409_s6 + $0x1ec] sm:$0xf] %v701_v59  ;;  %v829_v59 = vld [vmem:[%s7404_s0 + $0x5d8] sm:$0xf] }
 0x12f   : > { %704 = vst [vmem:[%s7409_s6 + $0x1f0] sm:$0xf] %v703_v60  ;;  %v831_v60 = vld [vmem:[%s7404_s0 + $0x5e0] sm:$0xf] }
 0x130   : > { %706 = vst [vmem:[%s7409_s6 + $0x1f4] sm:$0xf] %v705_v61  ;;  %v833_v61 = vld [vmem:[%s7404_s0 + $0x5e8] sm:$0xf] }
 0x131   : > { %708 = vst [vmem:[%s7409_s6 + $0x1f8] sm:$0xf] %v707_v62  ;;  %v835_v62 = vld [vmem:[%s7404_s0 + $0x5f0] sm:$0xf] }
 0x132   : > { %710 = vst [vmem:[%s7409_s6 + $0x1fc] sm:$0xf] %v709_v63  ;;  %v837_v63 = vld [vmem:[%s7404_s0 + $0x5f8] sm:$0xf] }
 0x133   : > { %712 = vst [vmem:[%s7409_s6 + $0x200] sm:$0xf] %v711_v0  ;;  %v839_v0 = vld [vmem:[%s7404_s0 + $0x600] sm:$0xf] }
 0x134   : > { %714 = vst [vmem:[%s7409_s6 + $0x204] sm:$0xf] %v713_v1  ;;  %v841_v1 = vld [vmem:[%s7404_s0 + $0x608] sm:$0xf] }
 0x135   : > { %716 = vst [vmem:[%s7409_s6 + $0x208] sm:$0xf] %v715_v2  ;;  %v843_v2 = vld [vmem:[%s7404_s0 + $0x610] sm:$0xf] }
 0x136   : > { %718 = vst [vmem:[%s7409_s6 + $0x20c] sm:$0xf] %v717_v3  ;;  %v845_v3 = vld [vmem:[%s7404_s0 + $0x618] sm:$0xf] }
 0x137   : > { %720 = vst [vmem:[%s7409_s6 + $0x210] sm:$0xf] %v719_v4  ;;  %v847_v4 = vld [vmem:[%s7404_s0 + $0x620] sm:$0xf] }
 0x138   : > { %722 = vst [vmem:[%s7409_s6 + $0x214] sm:$0xf] %v721_v5  ;;  %v849_v5 = vld [vmem:[%s7404_s0 + $0x628] sm:$0xf] }
 0x139   : > { %724 = vst [vmem:[%s7409_s6 + $0x218] sm:$0xf] %v723_v6  ;;  %v851_v6 = vld [vmem:[%s7404_s0 + $0x630] sm:$0xf] }
 0x13a   : > { %726 = vst [vmem:[%s7409_s6 + $0x21c] sm:$0xf] %v725_v7  ;;  %v853_v7 = vld [vmem:[%s7404_s0 + $0x638] sm:$0xf] }
 0x13b   : > { %728 = vst [vmem:[%s7409_s6 + $0x220] sm:$0xf] %v727_v8  ;;  %v855_v8 = vld [vmem:[%s7404_s0 + $0x640] sm:$0xf] }
 0x13c   : > { %730 = vst [vmem:[%s7409_s6 + $0x224] sm:$0xf] %v729_v9  ;;  %v857_v9 = vld [vmem:[%s7404_s0 + $0x648] sm:$0xf] }
 0x13d   : > { %732 = vst [vmem:[%s7409_s6 + $0x228] sm:$0xf] %v731_v10  ;;  %v859_v10 = vld [vmem:[%s7404_s0 + $0x650] sm:$0xf] }
 0x13e   : > { %734 = vst [vmem:[%s7409_s6 + $0x22c] sm:$0xf] %v733_v11  ;;  %v861_v11 = vld [vmem:[%s7404_s0 + $0x658] sm:$0xf] }
 0x13f   : > { %736 = vst [vmem:[%s7409_s6 + $0x230] sm:$0xf] %v735_v12  ;;  %v863_v12 = vld [vmem:[%s7404_s0 + $0x660] sm:$0xf] }
 0x140   : > { %738 = vst [vmem:[%s7409_s6 + $0x234] sm:$0xf] %v737_v13  ;;  %v865_v13 = vld [vmem:[%s7404_s0 + $0x668] sm:$0xf] }
 0x141   : > { %740 = vst [vmem:[%s7409_s6 + $0x238] sm:$0xf] %v739_v14  ;;  %v867_v14 = vld [vmem:[%s7404_s0 + $0x670] sm:$0xf] }
 0x142   : > { %742 = vst [vmem:[%s7409_s6 + $0x23c] sm:$0xf] %v741_v15  ;;  %v869_v15 = vld [vmem:[%s7404_s0 + $0x678] sm:$0xf] }
 0x143   : > { %744 = vst [vmem:[%s7409_s6 + $0x240] sm:$0xf] %v743_v16  ;;  %v871_v16 = vld [vmem:[%s7404_s0 + $0x680] sm:$0xf] }
 0x144   : > { %746 = vst [vmem:[%s7409_s6 + $0x244] sm:$0xf] %v745_v17  ;;  %v873_v17 = vld [vmem:[%s7404_s0 + $0x688] sm:$0xf] }
 0x145   : > { %748 = vst [vmem:[%s7409_s6 + $0x248] sm:$0xf] %v747_v18  ;;  %v875_v18 = vld [vmem:[%s7404_s0 + $0x690] sm:$0xf] }
 0x146   : > { %750 = vst [vmem:[%s7409_s6 + $0x24c] sm:$0xf] %v749_v19  ;;  %v877_v19 = vld [vmem:[%s7404_s0 + $0x698] sm:$0xf] }
 0x147   : > { %752 = vst [vmem:[%s7409_s6 + $0x250] sm:$0xf] %v751_v20  ;;  %v879_v20 = vld [vmem:[%s7404_s0 + $0x6a0] sm:$0xf] }
 0x148   : > { %754 = vst [vmem:[%s7409_s6 + $0x254] sm:$0xf] %v753_v21  ;;  %v881_v21 = vld [vmem:[%s7404_s0 + $0x6a8] sm:$0xf] }
 0x149   : > { %756 = vst [vmem:[%s7409_s6 + $0x258] sm:$0xf] %v755_v22  ;;  %v883_v22 = vld [vmem:[%s7404_s0 + $0x6b0] sm:$0xf] }
 0x14a   : > { %758 = vst [vmem:[%s7409_s6 + $0x25c] sm:$0xf] %v757_v23  ;;  %v885_v23 = vld [vmem:[%s7404_s0 + $0x6b8] sm:$0xf] }
 0x14b   : > { %760 = vst [vmem:[%s7409_s6 + $0x260] sm:$0xf] %v759_v24  ;;  %v887_v24 = vld [vmem:[%s7404_s0 + $0x6c0] sm:$0xf] }
 0x14c   : > { %762 = vst [vmem:[%s7409_s6 + $0x264] sm:$0xf] %v761_v25  ;;  %v889_v25 = vld [vmem:[%s7404_s0 + $0x6c8] sm:$0xf] }
 0x14d   : > { %764 = vst [vmem:[%s7409_s6 + $0x268] sm:$0xf] %v763_v26  ;;  %v891_v26 = vld [vmem:[%s7404_s0 + $0x6d0] sm:$0xf] }
 0x14e   : > { %766 = vst [vmem:[%s7409_s6 + $0x26c] sm:$0xf] %v765_v27  ;;  %v893_v27 = vld [vmem:[%s7404_s0 + $0x6d8] sm:$0xf] }
 0x14f   : > { %768 = vst [vmem:[%s7409_s6 + $0x270] sm:$0xf] %v767_v28  ;;  %v895_v28 = vld [vmem:[%s7404_s0 + $0x6e0] sm:$0xf] }
 0x150   : > { %770 = vst [vmem:[%s7409_s6 + $0x274] sm:$0xf] %v769_v29  ;;  %v897_v29 = vld [vmem:[%s7404_s0 + $0x6e8] sm:$0xf] }
 0x151   : > { %772 = vst [vmem:[%s7409_s6 + $0x278] sm:$0xf] %v771_v30  ;;  %v899_v30 = vld [vmem:[%s7404_s0 + $0x6f0] sm:$0xf] }
 0x152   : > { %774 = vst [vmem:[%s7409_s6 + $0x27c] sm:$0xf] %v773_v31  ;;  %v901_v31 = vld [vmem:[%s7404_s0 + $0x6f8] sm:$0xf] }
 0x153   : > { %776 = vst [vmem:[%s7409_s6 + $0x280] sm:$0xf] %v775_v32  ;;  %v903_v32 = vld [vmem:[%s7404_s0 + $0x700] sm:$0xf] }
 0x154   : > { %778 = vst [vmem:[%s7409_s6 + $0x284] sm:$0xf] %v777_v33  ;;  %v905_v33 = vld [vmem:[%s7404_s0 + $0x708] sm:$0xf] }
 0x155   : > { %780 = vst [vmem:[%s7409_s6 + $0x288] sm:$0xf] %v779_v34  ;;  %v907_v34 = vld [vmem:[%s7404_s0 + $0x710] sm:$0xf] }
 0x156   : > { %782 = vst [vmem:[%s7409_s6 + $0x28c] sm:$0xf] %v781_v35  ;;  %v909_v35 = vld [vmem:[%s7404_s0 + $0x718] sm:$0xf] }
 0x157   : > { %784 = vst [vmem:[%s7409_s6 + $0x290] sm:$0xf] %v783_v36  ;;  %v911_v36 = vld [vmem:[%s7404_s0 + $0x720] sm:$0xf] }
 0x158   : > { %786 = vst [vmem:[%s7409_s6 + $0x294] sm:$0xf] %v785_v37  ;;  %v913_v37 = vld [vmem:[%s7404_s0 + $0x728] sm:$0xf] }
 0x159   : > { %788 = vst [vmem:[%s7409_s6 + $0x298] sm:$0xf] %v787_v38  ;;  %v915_v38 = vld [vmem:[%s7404_s0 + $0x730] sm:$0xf] }
 0x15a   : > { %790 = vst [vmem:[%s7409_s6 + $0x29c] sm:$0xf] %v789_v39  ;;  %v917_v39 = vld [vmem:[%s7404_s0 + $0x738] sm:$0xf] }
 0x15b   : > { %792 = vst [vmem:[%s7409_s6 + $0x2a0] sm:$0xf] %v791_v40  ;;  %v919_v40 = vld [vmem:[%s7404_s0 + $0x740] sm:$0xf] }
 0x15c   : > { %794 = vst [vmem:[%s7409_s6 + $0x2a4] sm:$0xf] %v793_v41  ;;  %v921_v41 = vld [vmem:[%s7404_s0 + $0x748] sm:$0xf] }
 0x15d   : > { %796 = vst [vmem:[%s7409_s6 + $0x2a8] sm:$0xf] %v795_v42  ;;  %v923_v42 = vld [vmem:[%s7404_s0 + $0x750] sm:$0xf] }
 0x15e   : > { %798 = vst [vmem:[%s7409_s6 + $0x2ac] sm:$0xf] %v797_v43  ;;  %v925_v43 = vld [vmem:[%s7404_s0 + $0x758] sm:$0xf] }
 0x15f   : > { %800 = vst [vmem:[%s7409_s6 + $0x2b0] sm:$0xf] %v799_v44  ;;  %v927_v44 = vld [vmem:[%s7404_s0 + $0x760] sm:$0xf] }
 0x160   : > { %802 = vst [vmem:[%s7409_s6 + $0x2b4] sm:$0xf] %v801_v45  ;;  %v929_v45 = vld [vmem:[%s7404_s0 + $0x768] sm:$0xf] }
 0x161   : > { %804 = vst [vmem:[%s7409_s6 + $0x2b8] sm:$0xf] %v803_v46  ;;  %v931_v46 = vld [vmem:[%s7404_s0 + $0x770] sm:$0xf] }
 0x162   : > { %806 = vst [vmem:[%s7409_s6 + $0x2bc] sm:$0xf] %v805_v47  ;;  %v933_v47 = vld [vmem:[%s7404_s0 + $0x778] sm:$0xf] }
 0x163   : > { %808 = vst [vmem:[%s7409_s6 + $0x2c0] sm:$0xf] %v807_v48  ;;  %v935_v48 = vld [vmem:[%s7404_s0 + $0x780] sm:$0xf] }
 0x164   : > { %810 = vst [vmem:[%s7409_s6 + $0x2c4] sm:$0xf] %v809_v49  ;;  %v937_v49 = vld [vmem:[%s7404_s0 + $0x788] sm:$0xf] }
 0x165   : > { %812 = vst [vmem:[%s7409_s6 + $0x2c8] sm:$0xf] %v811_v50  ;;  %v939_v50 = vld [vmem:[%s7404_s0 + $0x790] sm:$0xf] }
 0x166   : > { %814 = vst [vmem:[%s7409_s6 + $0x2cc] sm:$0xf] %v813_v51  ;;  %v941_v51 = vld [vmem:[%s7404_s0 + $0x798] sm:$0xf] }
 0x167   : > { %816 = vst [vmem:[%s7409_s6 + $0x2d0] sm:$0xf] %v815_v52  ;;  %v943_v52 = vld [vmem:[%s7404_s0 + $0x7a0] sm:$0xf] }
 0x168   : > { %818 = vst [vmem:[%s7409_s6 + $0x2d4] sm:$0xf] %v817_v53  ;;  %v945_v53 = vld [vmem:[%s7404_s0 + $0x7a8] sm:$0xf] }
 0x169   : > { %820 = vst [vmem:[%s7409_s6 + $0x2d8] sm:$0xf] %v819_v54  ;;  %v947_v54 = vld [vmem:[%s7404_s0 + $0x7b0] sm:$0xf] }
 0x16a   : > { %822 = vst [vmem:[%s7409_s6 + $0x2dc] sm:$0xf] %v821_v55  ;;  %v949_v55 = vld [vmem:[%s7404_s0 + $0x7b8] sm:$0xf] }
 0x16b   : > { %824 = vst [vmem:[%s7409_s6 + $0x2e0] sm:$0xf] %v823_v56  ;;  %v951_v56 = vld [vmem:[%s7404_s0 + $0x7c0] sm:$0xf] }
 0x16c   : > { %826 = vst [vmem:[%s7409_s6 + $0x2e4] sm:$0xf] %v825_v57  ;;  %v953_v57 = vld [vmem:[%s7404_s0 + $0x7c8] sm:$0xf] }
 0x16d   : > { %828 = vst [vmem:[%s7409_s6 + $0x2e8] sm:$0xf] %v827_v58  ;;  %v955_v58 = vld [vmem:[%s7404_s0 + $0x7d0] sm:$0xf] }
 0x16e   : > { %830 = vst [vmem:[%s7409_s6 + $0x2ec] sm:$0xf] %v829_v59  ;;  %v957_v59 = vld [vmem:[%s7404_s0 + $0x7d8] sm:$0xf] }
 0x16f   : > { %832 = vst [vmem:[%s7409_s6 + $0x2f0] sm:$0xf] %v831_v60  ;;  %v959_v60 = vld [vmem:[%s7404_s0 + $0x7e0] sm:$0xf] }
 0x170   : > { %834 = vst [vmem:[%s7409_s6 + $0x2f4] sm:$0xf] %v833_v61  ;;  %v961_v61 = vld [vmem:[%s7404_s0 + $0x7e8] sm:$0xf] }
 0x171   : > { %836 = vst [vmem:[%s7409_s6 + $0x2f8] sm:$0xf] %v835_v62  ;;  %v963_v62 = vld [vmem:[%s7404_s0 + $0x7f0] sm:$0xf] }
 0x172   : > { %838 = vst [vmem:[%s7409_s6 + $0x2fc] sm:$0xf] %v837_v63  ;;  %v965_v63 = vld [vmem:[%s7404_s0 + $0x7f8] sm:$0xf] }
 0x173   : > { %840 = vst [vmem:[%s7409_s6 + $0x300] sm:$0xf] %v839_v0 }
 0x174   : > { %842 = vst [vmem:[%s7409_s6 + $0x304] sm:$0xf] %v841_v1 }
 0x175   : > { %844 = vst [vmem:[%s7409_s6 + $0x308] sm:$0xf] %v843_v2 }
 0x176   : > { %846 = vst [vmem:[%s7409_s6 + $0x30c] sm:$0xf] %v845_v3 }
 0x177   : > { %848 = vst [vmem:[%s7409_s6 + $0x310] sm:$0xf] %v847_v4 }
 0x178   : > { %850 = vst [vmem:[%s7409_s6 + $0x314] sm:$0xf] %v849_v5 }
 0x179   : > { %852 = vst [vmem:[%s7409_s6 + $0x318] sm:$0xf] %v851_v6 }
 0x17a   : > { %854 = vst [vmem:[%s7409_s6 + $0x31c] sm:$0xf] %v853_v7 }
 0x17b   : > { %856 = vst [vmem:[%s7409_s6 + $0x320] sm:$0xf] %v855_v8 }
 0x17c   : > { %858 = vst [vmem:[%s7409_s6 + $0x324] sm:$0xf] %v857_v9 }
 0x17d   : > { %860 = vst [vmem:[%s7409_s6 + $0x328] sm:$0xf] %v859_v10 }
 0x17e   : > { %862 = vst [vmem:[%s7409_s6 + $0x32c] sm:$0xf] %v861_v11 }
 0x17f   : > { %864 = vst [vmem:[%s7409_s6 + $0x330] sm:$0xf] %v863_v12 }
 0x180   : > { %866 = vst [vmem:[%s7409_s6 + $0x334] sm:$0xf] %v865_v13 }
 0x181   : > { %868 = vst [vmem:[%s7409_s6 + $0x338] sm:$0xf] %v867_v14 }
 0x182   : > { %870 = vst [vmem:[%s7409_s6 + $0x33c] sm:$0xf] %v869_v15 }
 0x183   : > { %872 = vst [vmem:[%s7409_s6 + $0x340] sm:$0xf] %v871_v16 }
 0x184   : > { %874 = vst [vmem:[%s7409_s6 + $0x344] sm:$0xf] %v873_v17 }
 0x185   : > { %876 = vst [vmem:[%s7409_s6 + $0x348] sm:$0xf] %v875_v18 }
 0x186   : > { %878 = vst [vmem:[%s7409_s6 + $0x34c] sm:$0xf] %v877_v19 }
 0x187   : > { %880 = vst [vmem:[%s7409_s6 + $0x350] sm:$0xf] %v879_v20 }
 0x188   : > { %882 = vst [vmem:[%s7409_s6 + $0x354] sm:$0xf] %v881_v21 }
 0x189   : > { %884 = vst [vmem:[%s7409_s6 + $0x358] sm:$0xf] %v883_v22 }
 0x18a   : > { %886 = vst [vmem:[%s7409_s6 + $0x35c] sm:$0xf] %v885_v23 }
 0x18b   : > { %888 = vst [vmem:[%s7409_s6 + $0x360] sm:$0xf] %v887_v24 }
 0x18c   : > { %890 = vst [vmem:[%s7409_s6 + $0x364] sm:$0xf] %v889_v25 }
 0x18d   : > { %892 = vst [vmem:[%s7409_s6 + $0x368] sm:$0xf] %v891_v26 }
 0x18e   : > { %894 = vst [vmem:[%s7409_s6 + $0x36c] sm:$0xf] %v893_v27 }
 0x18f   : > { %896 = vst [vmem:[%s7409_s6 + $0x370] sm:$0xf] %v895_v28 }
 0x190   : > { %898 = vst [vmem:[%s7409_s6 + $0x374] sm:$0xf] %v897_v29 }
 0x191   : > { %900 = vst [vmem:[%s7409_s6 + $0x378] sm:$0xf] %v899_v30 }
 0x192   : > { %902 = vst [vmem:[%s7409_s6 + $0x37c] sm:$0xf] %v901_v31 }
 0x193   : > { %904 = vst [vmem:[%s7409_s6 + $0x380] sm:$0xf] %v903_v32 }
 0x194   : > { %906 = vst [vmem:[%s7409_s6 + $0x384] sm:$0xf] %v905_v33 }
 0x195   : > { %908 = vst [vmem:[%s7409_s6 + $0x388] sm:$0xf] %v907_v34 }
 0x196   : > { %910 = vst [vmem:[%s7409_s6 + $0x38c] sm:$0xf] %v909_v35 }
 0x197   : > { %912 = vst [vmem:[%s7409_s6 + $0x390] sm:$0xf] %v911_v36 }
 0x198   : > { %914 = vst [vmem:[%s7409_s6 + $0x394] sm:$0xf] %v913_v37 }
 0x199   : > { %916 = vst [vmem:[%s7409_s6 + $0x398] sm:$0xf] %v915_v38 }
 0x19a   : > { %918 = vst [vmem:[%s7409_s6 + $0x39c] sm:$0xf] %v917_v39 }
 0x19b   : > { %920 = vst [vmem:[%s7409_s6 + $0x3a0] sm:$0xf] %v919_v40 }
 0x19c   : > { %922 = vst [vmem:[%s7409_s6 + $0x3a4] sm:$0xf] %v921_v41 }
 0x19d   : > { %924 = vst [vmem:[%s7409_s6 + $0x3a8] sm:$0xf] %v923_v42 }
 0x19e   : > { %926 = vst [vmem:[%s7409_s6 + $0x3ac] sm:$0xf] %v925_v43 }
 0x19f   : > { %928 = vst [vmem:[%s7409_s6 + $0x3b0] sm:$0xf] %v927_v44 }
 0x1a0   : > { %930 = vst [vmem:[%s7409_s6 + $0x3b4] sm:$0xf] %v929_v45 }
 0x1a1   : > { %932 = vst [vmem:[%s7409_s6 + $0x3b8] sm:$0xf] %v931_v46 }
 0x1a2   : > { %934 = vst [vmem:[%s7409_s6 + $0x3bc] sm:$0xf] %v933_v47 }
 0x1a3   : > { %936 = vst [vmem:[%s7409_s6 + $0x3c0] sm:$0xf] %v935_v48 }
 0x1a4   : > { %938 = vst [vmem:[%s7409_s6 + $0x3c4] sm:$0xf] %v937_v49 }
 0x1a5   : > { %940 = vst [vmem:[%s7409_s6 + $0x3c8] sm:$0xf] %v939_v50 }
 0x1a6   : > { %942 = vst [vmem:[%s7409_s6 + $0x3cc] sm:$0xf] %v941_v51 }
 0x1a7   : > { %944 = vst [vmem:[%s7409_s6 + $0x3d0] sm:$0xf] %v943_v52 }
 0x1a8   : > { %946 = vst [vmem:[%s7409_s6 + $0x3d4] sm:$0xf] %v945_v53 }
 0x1a9   : > { %948 = vst [vmem:[%s7409_s6 + $0x3d8] sm:$0xf] %v947_v54 }
 0x1aa   : > { %950 = vst [vmem:[%s7409_s6 + $0x3dc] sm:$0xf] %v949_v55 }
 0x1ab   : > { %952 = vst [vmem:[%s7409_s6 + $0x3e0] sm:$0xf] %v951_v56 }
 0x1ac   : > { %954 = vst [vmem:[%s7409_s6 + $0x3e4] sm:$0xf] %v953_v57 }
 0x1ad   : > { %956 = vst [vmem:[%s7409_s6 + $0x3e8] sm:$0xf] %v955_v58 }
 0x1ae   : > { %958 = vst [vmem:[%s7409_s6 + $0x3ec] sm:$0xf] %v957_v59 }
 0x1af   : > { %960 = vst [vmem:[%s7409_s6 + $0x3f0] sm:$0xf] %v959_v60 }
 0x1b0   : > { %962 = vst [vmem:[%s7409_s6 + $0x3f4] sm:$0xf] %v961_v61 }
 0x1b1   : > { %964 = vst [vmem:[%s7409_s6 + $0x3f8] sm:$0xf] %v963_v62 }
 0x1b2   : > { %966 = vst [vmem:[%s7409_s6 + $0x3fc] sm:$0xf] %v965_v63 }
 0x1b3 PF: > { %p5539_p0 = scmp.ge.s32.totalorder %s7007_s22, 1  ;;  %p2557_p1 = scmp.lt.s32.totalorder %s7007_s22, 11 }
 0x1b5   : > { %p2558_p2 = pnand %p5539_p0, %p2557_p1 }
 0x1b6   : > { %s2564_s5 = sand.u32 (!%p2558_p2), 1, %s6983_s16   ;;  %s2571_s23 = sand.u32 (!%p2558_p2), 1, %s6975_s14  }
 0x1b7   : > { %2561 = sbr.rel (%p2558_p2) target bundleno = 1183 (0x49f), region = 99  ;;  %s5540_s28 = sshll.u32 (!%p2558_p2), %s2564_s5, 10 }
 0x1b8   : > { %s5541_s0 = sshll.u32 (!%p2558_p2), %s2571_s23, 10  ;;  %s2597_s7 = sand.u32 (!%p2558_p2), 1, %s6967_s12  }
 0x1b9   : > { %p2602_p3 = scmp.lt.s32.totalorder (!%p2558_p2), %s6995_s19, 1  ;;  %s5542_s11 = sshll.u32 (!%p2558_p2), %s2597_s7, 7 }
 0x1ba   : > { %s7933_s6 = scalar_lea.vmem (!%p2558_p2), [#allocation3], %s5540_s28  ;;  %s7935_s1 = scalar_lea.vmem (!%p2558_p2), [#allocation4], %s5541_s0 }
 0x1bb   : > { %s7937_s25 = scalar_lea.vmem (!%p2558_p2), [#allocation5], %s5542_s11  ;;  %p5543_p4 = scmp.ne.s32.totalorder (!%p2558_p2), %s6991_s18, 0 }
 0x1bc   : > { %s7927_s26 = scalar_select %p2602_p3, %s6995_s19, 1 }
 0x1bd   : > { %2608 = sbr.rel (%p5543_p4) target bundleno = 467 (0x1d3), region = 111 }
 0x1be   : > { %s2604_s4 = scalar_lea.vmem %s8547_s2, %s7927_s26 }
 0x1c2   : > { %v7009_v0 = vmov 0.0  }
 0x1c3   : > { %2609 = vst [vmem:[#allocation2 + $0x30] sm:$0xff] %v7009_v0 }
 0x1c4   : > { %2610 = vst [vmem:[#allocation2] sm:$0xff] %v7009_v0 }
 0x1c5   : > { %2611 = vst [vmem:[#allocation2 + $0x58] sm:$0xff] %v7009_v0 }
 0x1c6   : > { %2612 = vst [vmem:[#allocation2 + $0x18] sm:$0xff] %v7009_v0 }
 0x1c7   : > { %2613 = vst [vmem:[#allocation2 + $0x50] sm:$0xff] %v7009_v0 }
 0x1c8   : > { %2614 = vst [vmem:[#allocation2 + $0x68] sm:$0xff] %v7009_v0 }
 0x1c9   : > { %2615 = vst [vmem:[#allocation2 + $0x8] sm:$0xff] %v7009_v0 }
 0x1ca   : > { %2616 = vst [vmem:[#allocation2 + $0x48] sm:$0xff] %v7009_v0 }
 0x1cb   : > { %2617 = vst [vmem:[#allocation2 + $0x40] sm:$0xff] %v7009_v0 }
 0x1cc   : > { %2618 = vst [vmem:[#allocation2 + $0x20] sm:$0xff] %v7009_v0 }
 0x1cd   : > { %2619 = vst [vmem:[#allocation2 + $0x10] sm:$0xff] %v7009_v0 }
 0x1ce   : > { %2620 = vst [vmem:[#allocation2 + $0x38] sm:$0xff] %v7009_v0 }
 0x1cf   : > { %2621 = vst [vmem:[#allocation2 + $0x60] sm:$0xff] %v7009_v0 }
 0x1d0   : > { %2622 = vst [vmem:[#allocation2 + $0x70] sm:$0xff] %v7009_v0 }
 0x1d1   : > { %2623 = vst [vmem:[#allocation2 + $0x78] sm:$0xff] %v7009_v0 }
 0x1d2   : > { %2624 = vst [vmem:[#allocation2 + $0x28] sm:$0xff] %v7009_v0 }
 0x1d3 PF: > { %v6710_v1 = vld [vmem:[%s7935_s1 + $0x38] sm:$0xff]  ;;  %v6709_v5 = vld [vmem:[%s7935_s1 + $0x30] sm:$0xff]  ;;  %v6708_v9 = vld [vmem:[%s7935_s1 + $0x28] sm:$0xff]  ;;  %p6568_p5 = scmp.ne.s32.totalorder %s6991_s18, 4 }
 0x1d4   : > { %v6718_v2 = vld [vmem:[%s7935_s1 + $0x78] sm:$0xff]  ;;  %4433 = vmatpush.bf16.msra.mxu0 %v6710_v1  ;;  %v6717_v6 = vld [vmem:[%s7935_s1 + $0x70] sm:$0xff]  ;;  %v6716_v10 = vld [vmem:[%s7935_s1 + $0x68] sm:$0xff] }
 0x1d5   : > { %v6726_v3 = vld [vmem:[%s7935_s1 + $0xb8] sm:$0xff]  ;;  %4482 = vmatpush.bf16.msra.mxu1 %v6718_v2  ;;  %v6725_v7 = vld [vmem:[%s7935_s1 + $0xb0] sm:$0xff]  ;;  %v6724_v11 = vld [vmem:[%s7935_s1 + $0xa8] sm:$0xff] }
 0x1d6   : > { %v6734_v4 = vld [vmem:[%s7935_s1 + $0xf8] sm:$0xff]  ;;  %4531 = vmatpush.bf16.msra.mxu2 %v6726_v3  ;;  %v6733_v8 = vld [vmem:[%s7935_s1 + $0xf0] sm:$0xff]  ;;  %v6732_v12 = vld [vmem:[%s7935_s1 + $0xe8] sm:$0xff] }
 0x1d7   : > { %4580 = vmatpush.bf16.msra.mxu3 %v6734_v4  ;;  %v6707_v13 = vld [vmem:[%s7935_s1 + $0x20] sm:$0xff]  ;;  %v6706_v17 = vld [vmem:[%s7935_s1 + $0x18] sm:$0xff]  ;;  %v6705_v21 = vld [vmem:[%s7935_s1 + $0x10] sm:$0xff] }
 0x1d8   : > { %4434 = vmatpush.bf16.msra.mxu0 %v6709_v5  ;;  %v6715_v14 = vld [vmem:[%s7935_s1 + $0x60] sm:$0xff]  ;;  %v6714_v18 = vld [vmem:[%s7935_s1 + $0x58] sm:$0xff]  ;;  %v6713_v22 = vld [vmem:[%s7935_s1 + $0x50] sm:$0xff] }
 0x1d9   : > { %4483 = vmatpush.bf16.msra.mxu1 %v6717_v6  ;;  %v6723_v15 = vld [vmem:[%s7935_s1 + $0xa0] sm:$0xff]  ;;  %v6722_v19 = vld [vmem:[%s7935_s1 + $0x98] sm:$0xff]  ;;  %v6721_v23 = vld [vmem:[%s7935_s1 + $0x90] sm:$0xff] }
 0x1da   : > { %4532 = vmatpush.bf16.msra.mxu2 %v6725_v7  ;;  %v6731_v16 = vld [vmem:[%s7935_s1 + $0xe0] sm:$0xff]  ;;  %v6730_v20 = vld [vmem:[%s7935_s1 + $0xd8] sm:$0xff]  ;;  %v6729_v24 = vld [vmem:[%s7935_s1 + $0xd0] sm:$0xff] }
 0x1db   : > { %4581 = vmatpush.bf16.msra.mxu3 %v6733_v8  ;;  %v6704_v25 = vld [vmem:[%s7935_s1 + $0x8] sm:$0xff]  ;;  %v6703_v29 = vld [vmem:[%s7935_s1] sm:$0xff]  ;;  %v6758_v41 = vld [vmem:[%s7935_s1 + $0x1b8] sm:$0xff] }
 0x1dc   : > { %4435 = vmatpush.bf16.msra.mxu0 %v6708_v9  ;;  %v6712_v26 = vld [vmem:[%s7935_s1 + $0x48] sm:$0xff]  ;;  %v6711_v30 = vld [vmem:[%s7935_s1 + $0x40] sm:$0xff]  ;;  %v6742_v42 = vld [vmem:[%s7935_s1 + $0x138] sm:$0xff] }
 0x1dd   : > { %4484 = vmatpush.bf16.msra.mxu1 %v6716_v10  ;;  %v6720_v27 = vld [vmem:[%s7935_s1 + $0x88] sm:$0xff]  ;;  %v6719_v31 = vld [vmem:[%s7935_s1 + $0x80] sm:$0xff]  ;;  %v6766_v47 = vld [vmem:[%s7935_s1 + $0x1f8] sm:$0xff] }
 0x1de   : > { %4533 = vmatpush.bf16.msra.mxu2 %v6724_v11  ;;  %v6728_v28 = vld [vmem:[%s7935_s1 + $0xc8] sm:$0xff]  ;;  %v6727_v32 = vld [vmem:[%s7935_s1 + $0xc0] sm:$0xff]  ;;  %v6750_v48 = vld [vmem:[%s7935_s1 + $0x178] sm:$0xff] }
 0x1df   : > { %4582 = vmatpush.bf16.msra.mxu3 %v6732_v12  ;;  %v5546_v33 = vld [vmem:[%s7933_s6] sm:$0xf]  ;;  %v6575_v35 = vld [vmem:[%s7933_s6 + $0x4] sm:$0xf]  ;;  %v5554_v37 = vld [vmem:[%s7933_s6 + $0x8] sm:$0xf] }
 0x1e0   : > { %4436 = vmatpush.bf16.msra.mxu0 %v6707_v13  ;;  %v6583_v34 = vld [vmem:[%s7933_s6 + $0x3c] sm:$0xf0]  ;;  %v5548_v36 = vld [vmem:[%s7933_s6 + $0x40] sm:$0xf0]  ;;  %v6584_v38 = vld [vmem:[%s7933_s6 + $0x44] sm:$0xf0] }
 0x1e1   : > { %4485 = vmatpush.bf16.msra.mxu1 %v6715_v14  ;;  %v6576_v39 = vld [vmem:[%s7933_s6 + $0xc] sm:$0xf]  ;;  %v5547_v43 = vor.u32 %v6583_v34, %v5546_v33  ;;  %v5551_v44 = vor.u32 %v6575_v35, %v5548_v36  ;;  %v5555_v45 = vor.u32 %v6584_v38, %v5554_v37  ;;  %v6757_v49 = vld [vmem:[%s7935_s1 + $0x1b0] sm:$0xff]  ;;  %v5610_v57 = vld [vmem:[%s7933_s6 + $0x80] sm:$0xf] }
 0x1e2   : > { %4534 = vmatpush.bf16.msra.mxu2 %v6723_v15  ;;  %v5556_v40 = vld [vmem:[%s7933_s6 + $0x48] sm:$0xf0]  ;;  %v6741_v50 = vld [vmem:[%s7935_s1 + $0x130] sm:$0xff]  ;;  %v6599_v58 = vld [vmem:[%s7933_s6 + $0xbc] sm:$0xf0] }
 0x1e3   : > { %4583 = vmatpush.bf16.msra.mxu3 %v6731_v16  ;;  %v5559_v46 = vor.u32 %v6576_v39, %v5556_v40  ;;  %v6765_v51 = vld [vmem:[%s7935_s1 + $0x1f0] sm:$0xff]  ;;  %v6756_v53 = vld [vmem:[%s7935_s1 + $0x1a8] sm:$0xff]  ;;  %v6591_v59 = vld [vmem:[%s7933_s6 + $0x84] sm:$0xf]  ;;  %v5611_v1 = vor.u32 %v6599_v58, %v5610_v57 }
 0x1e4   : > { %4437 = vmatpush.bf16.msra.mxu0 %v6706_v17  ;;  %v6749_v52 = vld [vmem:[%s7935_s1 + $0x170] sm:$0xff]  ;;  %v6740_v54 = vld [vmem:[%s7935_s1 + $0x128] sm:$0xff]  ;;  %v5612_v60 = vld [vmem:[%s7933_s6 + $0xc0] sm:$0xf0] }
 0x1e5   : > { %4486 = vmatpush.bf16.msra.mxu1 %v6714_v18  ;;  %v6764_v55 = vld [vmem:[%s7935_s1 + $0x1e8] sm:$0xff]  ;;  %v5615_v2 = vor.u32 %v6591_v59, %v5612_v60  ;;  %v6755_v5 = vld [vmem:[%s7935_s1 + $0x1a0] sm:$0xff]  ;;  %v6753_v37 = vld [vmem:[%s7935_s1 + $0x190] sm:$0xff] }
 0x1e6   : > { %4535 = vmatpush.bf16.msra.mxu2 %v6722_v19  ;;  %v6748_v56 = vld [vmem:[%s7935_s1 + $0x168] sm:$0xff]  ;;  %v6739_v6 = vld [vmem:[%s7935_s1 + $0x120] sm:$0xff]  ;;  %v6737_v38 = vld [vmem:[%s7935_s1 + $0x110] sm:$0xff] }
 0x1e7   : > { %4584 = vmatpush.bf16.msra.mxu3 %v6730_v20  ;;  %v5618_v61 = vld [vmem:[%s7933_s6 + $0x88] sm:$0xf]  ;;  %v6592_v63 = vld [vmem:[%s7933_s6 + $0x8c] sm:$0xf]  ;;  %v6763_v7 = vld [vmem:[%s7935_s1 + $0x1e0] sm:$0xff] }
 0x1e8   : > { %4438 = vmatpush.bf16.msra.mxu0 %v6705_v21  ;;  %v6600_v62 = vld [vmem:[%s7933_s6 + $0xc4] sm:$0xf0]  ;;  %v5620_v0 = vld [vmem:[%s7933_s6 + $0xc8] sm:$0xf0]  ;;  %v6747_v8 = vld [vmem:[%s7935_s1 + $0x160] sm:$0xff] }
 0x1e9   : > { %4487 = vmatpush.bf16.msra.mxu1 %v6713_v22  ;;  %v5619_v3 = vor.u32 %v6600_v62, %v5618_v61  ;;  %v5623_v4 = vor.u32 %v6592_v63, %v5620_v0  ;;  %v5674_v9 = vld [vmem:[%s7933_s6 + $0x100] sm:$0xf]  ;;  %v6607_v11 = vld [vmem:[%s7933_s6 + $0x104] sm:$0xf]  ;;  %v5682_v13 = vld [vmem:[%s7933_s6 + $0x108] sm:$0xf] }
 0x1ea   : > { %4536 = vmatpush.bf16.msra.mxu2 %v6721_v23  ;;  %v6615_v10 = vld [vmem:[%s7933_s6 + $0x13c] sm:$0xf0]  ;;  %v5676_v12 = vld [vmem:[%s7933_s6 + $0x140] sm:$0xf0]  ;;  %v6616_v14 = vld [vmem:[%s7933_s6 + $0x144] sm:$0xf0] }
 0x1eb   : > { %4585 = vmatpush.bf16.msra.mxu3 %v6729_v24  ;;  %v6608_v15 = vld [vmem:[%s7933_s6 + $0x10c] sm:$0xf]  ;;  %v5675_v17 = vor.u32 %v6615_v10, %v5674_v9  ;;  %v5679_v18 = vor.u32 %v6607_v11, %v5676_v12  ;;  %v5683_v19 = vor.u32 %v6616_v14, %v5682_v13  ;;  %v6754_v21 = vld [vmem:[%s7935_s1 + $0x198] sm:$0xff]  ;;  %v6761_v39 = vld [vmem:[%s7935_s1 + $0x1d0] sm:$0xff] }
 0x1ec   : > { %4439 = vmatpush.bf16.msra.mxu0 %v6704_v25  ;;  %v5684_v16 = vld [vmem:[%s7933_s6 + $0x148] sm:$0xf0]  ;;  %v6738_v22 = vld [vmem:[%s7935_s1 + $0x118] sm:$0xff]  ;;  %v5738_v25 = vld [vmem:[%s7933_s6 + $0x180] sm:$0xf] }
 0x1ed   : > { %4488 = vmatpush.bf16.msra.mxu1 %v6712_v26  ;;  %v5687_v20 = vor.u32 %v6608_v15, %v5684_v16  ;;  %v6762_v23 = vld [vmem:[%s7935_s1 + $0x1d8] sm:$0xff]  ;;  %v6631_v26 = vld [vmem:[%s7933_s6 + $0x1bc] sm:$0xf0]  ;;  %v6745_v40 = vld [vmem:[%s7935_s1 + $0x150] sm:$0xff] }
 0x1ee   : > { %4537 = vmatpush.bf16.msra.mxu2 %v6720_v27  ;;  %v6746_v24 = vld [vmem:[%s7935_s1 + $0x158] sm:$0xff]  ;;  %v6623_v27 = vld [vmem:[%s7933_s6 + $0x184] sm:$0xf]  ;;  %v5739_v33 = vor.u32 %v6631_v26, %v5738_v25  ;;  %v5866_v57 = vld [vmem:[%s7933_s6 + $0x280] sm:$0xf] }
 0x1ef   : > { %4586 = vmatpush.bf16.msra.mxu3 %v6728_v28  ;;  %v5740_v28 = vld [vmem:[%s7933_s6 + $0x1c0] sm:$0xf0]  ;;  %v6663_v58 = vld [vmem:[%s7933_s6 + $0x2bc] sm:$0xf0]  ;;  %v5874_v61 = vld [vmem:[%s7933_s6 + $0x288] sm:$0xf] }
 0x1f0   : > { %4440 = vmatpush.bf16.msra.mxu0 %v6703_v29  ;;  %v5746_v29 = vld [vmem:[%s7933_s6 + $0x188] sm:$0xf]  ;;  %v5743_v34 = vor.u32 %v6623_v27, %v5740_v28  ;;  %v6655_v59 = vld [vmem:[%s7933_s6 + $0x284] sm:$0xf]  ;;  %v6656_v63 = vld [vmem:[%s7933_s6 + $0x28c] sm:$0xf] }
 0x1f1   : > { %4489 = vmatpush.bf16.msra.mxu1 %v6711_v30  ;;  %v6632_v30 = vld [vmem:[%s7933_s6 + $0x1c4] sm:$0xf0]  ;;  %v5868_v60 = vld [vmem:[%s7933_s6 + $0x2c0] sm:$0xf0]  ;;  %v5876_v0 = vld [vmem:[%s7933_s6 + $0x2c8] sm:$0xf0] }
 0x1f2   : > { %4538 = vmatpush.bf16.msra.mxu2 %v6719_v31  ;;  %v6624_v31 = vld [vmem:[%s7933_s6 + $0x18c] sm:$0xf]  ;;  %v5747_v35 = vor.u32 %v6632_v30, %v5746_v29  ;;  %v6664_v62 = vld [vmem:[%s7933_s6 + $0x2c4] sm:$0xf0]  ;;  %v5930_v9 = vld [vmem:[%s7933_s6 + $0x300] sm:$0xf] }
 0x1f3   : > { %4587 = vmatpush.bf16.msra.mxu3 %v6727_v32  ;;  %4441 = vmatmul.bf16.vlgmr.msra.gmra.mxu0 %v5547_v43  ;;  %v5748_v32 = vld [vmem:[%s7933_s6 + $0x1c8] sm:$0xf0]  ;;  %v6639_v43 = vld [vmem:[%s7933_s6 + $0x204] sm:$0xf]  ;;  %v6679_v10 = vld [vmem:[%s7933_s6 + $0x33c] sm:$0xf0] }
 0x1f4   : > { %4629 = vmatpush.bf16.msrb.mxu0 %v6742_v42  ;;  %4490 = vmatmul.bf16.vlgmr.msra.gmra.mxu1 %v5551_v44  ;;  %v5751_v36 = vor.u32 %v6624_v31, %v5748_v32  ;;  %v6647_v42 = vld [vmem:[%s7933_s6 + $0x23c] sm:$0xf0]  ;;  %v5804_v44 = vld [vmem:[%s7933_s6 + $0x240] sm:$0xf0]  ;;  %v5938_v13 = vld [vmem:[%s7933_s6 + $0x308] sm:$0xf] }
 0x1f5   : > { %4539 = vmatmul.bf16.vlgmr.msra.gmra.mxu2 %v5555_v45  ;;  %4678 = vmatpush.bf16.msrb.mxu1 %v6750_v48  ;;  %v5810_v45 = vld [vmem:[%s7933_s6 + $0x208] sm:$0xf]  ;;  %v5812_v48 = vld [vmem:[%s7933_s6 + $0x248] sm:$0xf0]  ;;  %v6671_v11 = vld [vmem:[%s7933_s6 + $0x304] sm:$0xf] }
 0x1f6   : > { %4727 = vmatpush.bf16.msrb.mxu2 %v6758_v41  ;;  %4588 = vmatmul.bf16.vlgmr.msra.gmra.mxu3 %v5559_v46  ;;  %v5802_v41 = vld [vmem:[%s7933_s6 + $0x200] sm:$0xf]  ;;  %v6648_v46 = vld [vmem:[%s7933_s6 + $0x244] sm:$0xf0]  ;;  %v5932_v12 = vld [vmem:[%s7933_s6 + $0x340] sm:$0xf0] }
 0x1f7   : > { %4776 = vmatpush.bf16.msrb.mxu3 %v6766_v47  ;;  %v6640_v47 = vld [vmem:[%s7933_s6 + $0x20c] sm:$0xf]  ;;  %v6680_v14 = vld [vmem:[%s7933_s6 + $0x344] sm:$0xf0]  ;;  %v5994_v25 = vld [vmem:[%s7933_s6 + $0x380] sm:$0xf] }
 0x1f8   : > { %4630 = vmatpush.bf16.msrb.mxu0 %v6741_v50  ;;  %v5807_v50 = vor.u32 %v6639_v43, %v5804_v44  ;;  %v6672_v15 = vld [vmem:[%s7933_s6 + $0x30c] sm:$0xf]  ;;  %v6695_v26 = vld [vmem:[%s7933_s6 + $0x3bc] sm:$0xf0]  ;;  %v6687_v27 = vld [vmem:[%s7933_s6 + $0x384] sm:$0xf] }
 0x1f9   : > { %4679 = vmatpush.bf16.msrb.mxu1 %v6749_v52  ;;  %v5815_v52 = vor.u32 %v6640_v47, %v5812_v48  ;;  %v5940_v16 = vld [vmem:[%s7933_s6 + $0x348] sm:$0xf0]  ;;  %v5996_v28 = vld [vmem:[%s7933_s6 + $0x3c0] sm:$0xf0]  ;;  %v6002_v29 = vld [vmem:[%s7933_s6 + $0x388] sm:$0xf] }
 0x1fa   : > { %4728 = vmatpush.bf16.msrb.mxu2 %v6757_v49  ;;  %v5803_v49 = vor.u32 %v6647_v42, %v5802_v41  ;;  %v6696_v30 = vld [vmem:[%s7933_s6 + $0x3c4] sm:$0xf0]  ;;  %v6688_v31 = vld [vmem:[%s7933_s6 + $0x38c] sm:$0xf]  ;;  %v5562_v41 = vld [vmem:[%s7933_s6 + $0x10] sm:$0xf] }
 0x1fb   : > { %4777 = vmatpush.bf16.msrb.mxu3 %v6765_v51  ;;  %v5811_v51 = vor.u32 %v6648_v46, %v5810_v45  ;;  %v6004_v32 = vld [vmem:[%s7933_s6 + $0x3c8] sm:$0xf0]  ;;  %v6585_v42 = vld [vmem:[%s7933_s6 + $0x4c] sm:$0xf0]  ;;  %v6577_v43 = vld [vmem:[%s7933_s6 + $0x14] sm:$0xf] }
 0x1fc   : > { %4631 = vmatpush.bf16.msrb.mxu0 %v6740_v54  ;;  %v6736_v54 = vld [vmem:[%s7935_s1 + $0x108] sm:$0xff]  ;;  %v5564_v44 = vld [vmem:[%s7933_s6 + $0x50] sm:$0xf0]  ;;  %v5570_v45 = vld [vmem:[%s7933_s6 + $0x18] sm:$0xf] }
 0x1fd   : > { %4680 = vmatpush.bf16.msrb.mxu1 %v6748_v56  ;;  %v6744_v56 = vld [vmem:[%s7935_s1 + $0x148] sm:$0xff]  ;;  %v6586_v46 = vld [vmem:[%s7933_s6 + $0x54] sm:$0xf0]  ;;  %v6578_v47 = vld [vmem:[%s7933_s6 + $0x1c] sm:$0xf] }
 0x1fe   : > { %4729 = vmatpush.bf16.msrb.mxu2 %v6756_v53  ;;  %v6752_v53 = vld [vmem:[%s7935_s1 + $0x188] sm:$0xff]  ;;  %v5572_v48 = vld [vmem:[%s7933_s6 + $0x58] sm:$0xf0] }
 0x1ff   : > { %4778 = vmatpush.bf16.msrb.mxu3 %v6764_v55  ;;  %v6760_v55 = vld [vmem:[%s7935_s1 + $0x1c8] sm:$0xff] }
 0x200   : > { %4632 = vmatpush.bf16.msrb.mxu0 %v6739_v6  ;;  %v6735_v6 = vld [vmem:[%s7935_s1 + $0x100] sm:$0xff] }
 0x201   : > { %4681 = vmatpush.bf16.msrb.mxu1 %v6747_v8  ;;  %v6743_v8 = vld [vmem:[%s7935_s1 + $0x140] sm:$0xff] }
 0x202   : > { %4730 = vmatpush.bf16.msrb.mxu2 %v6755_v5  ;;  %v6751_v5 = vld [vmem:[%s7935_s1 + $0x180] sm:$0xff] }
 0x203   : > { %4446 = vmatmul.bf16.gmra.mxu0 %v5611_v1  ;;  %4779 = vmatpush.bf16.msrb.mxu3 %v6763_v7  ;;  %v5867_v1 = vor.u32 %v6663_v58, %v5866_v57  ;;  %v6759_v7 = vld [vmem:[%s7935_s1 + $0x1c0] sm:$0xff]  ;;  %v6772_v57 = vld [vmem:[%s7935_s1 + $0x228] sm:$0xff] }
 0x204   : > { %4495 = vmatmul.bf16.gmra.mxu1 %v5615_v2  ;;  %4633 = vmatpush.bf16.msrb.mxu0 %v6738_v22  ;;  %v5871_v2 = vor.u32 %v6655_v59, %v5868_v60  ;;  %v6774_v22 = vld [vmem:[%s7935_s1 + $0x238] sm:$0xff]  ;;  %v6796_v58 = vld [vmem:[%s7935_s1 + $0x2e8] sm:$0xff] }
 0x205   : > { %4544 = vmatmul.bf16.gmra.mxu2 %v5619_v3  ;;  %4682 = vmatpush.bf16.msrb.mxu1 %v6746_v24  ;;  %v5875_v3 = vor.u32 %v6664_v62, %v5874_v61  ;;  %v6782_v24 = vld [vmem:[%s7935_s1 + $0x278] sm:$0xff] }
 0x206   : > { %4593 = vmatmul.bf16.gmra.mxu3 %v5623_v4  ;;  %4731 = vmatpush.bf16.msrb.mxu2 %v6754_v21  ;;  %v5879_v4 = vor.u32 %v6656_v63, %v5876_v0  ;;  %v6790_v21 = vld [vmem:[%s7935_s1 + $0x2b8] sm:$0xff] }
 0x207   : > { %4780 = vmatpush.bf16.msrb.mxu3 %v6762_v23  ;;  %v6798_v23 = vld [vmem:[%s7935_s1 + $0x2f8] sm:$0xff] }
 0x208   : > { %4634 = vmatpush.bf16.msrb.mxu0 %v6737_v38  ;;  %v6773_v38 = vld [vmem:[%s7935_s1 + $0x230] sm:$0xff] }
 0x209   : > { %4683 = vmatpush.bf16.msrb.mxu1 %v6745_v40  ;;  %v6781_v40 = vld [vmem:[%s7935_s1 + $0x270] sm:$0xff] }
 0x20a   : > { %4732 = vmatpush.bf16.msrb.mxu2 %v6753_v37  ;;  %v6789_v37 = vld [vmem:[%s7935_s1 + $0x2b0] sm:$0xff] }
 0x20b   : > { %4781 = vmatpush.bf16.msrb.mxu3 %v6761_v39  ;;  %v6797_v39 = vld [vmem:[%s7935_s1 + $0x2f0] sm:$0xff] }
 0x20c   : > { %4635 = vmatpush.bf16.msrb.mxu0 %v6736_v54  ;;  %v5575_v54 = vor.u32 %v6578_v47, %v5572_v48 }
 0x20d   : > { %4684 = vmatpush.bf16.msrb.mxu1 %v6744_v56  ;;  %v6788_v56 = vld [vmem:[%s7935_s1 + $0x2a8] sm:$0xff] }
 0x20e   : > { %4733 = vmatpush.bf16.msrb.mxu2 %v6752_v53  ;;  %v5571_v53 = vor.u32 %v6586_v46, %v5570_v45 }
 0x20f   : > { %4782 = vmatpush.bf16.msrb.mxu3 %v6760_v55 }
 0x210   : > { %4636 = vmatpush.bf16.msrb.mxu0 %v6735_v6  ;;  %v5628_v6 = vld [vmem:[%s7933_s6 + $0xd0] sm:$0xf0] }
 0x211   : > { %4685 = vmatpush.bf16.msrb.mxu1 %v6743_v8  ;;  %v6602_v8 = vld [vmem:[%s7933_s6 + $0xd4] sm:$0xf0] }
 0x212   : > { %4734 = vmatpush.bf16.msrb.mxu2 %v6751_v5  ;;  %v6593_v5 = vld [vmem:[%s7933_s6 + $0x94] sm:$0xf] }
 0x213   : > { %4451 = vmatmul.bf16.gmra.mxu0 %v5675_v17  ;;  %4783 = vmatpush.bf16.msrb.mxu3 %v6759_v7  ;;  %v5931_v17 = vor.u32 %v6679_v10, %v5930_v9  ;;  %v5634_v7 = vld [vmem:[%s7933_s6 + $0x98] sm:$0xf]  ;;  %v6594_v9 = vld [vmem:[%s7933_s6 + $0x9c] sm:$0xf] }
 0x214   : > { %4500 = vmatmul.bf16.gmra.mxu1 %v5679_v18  ;;  %v5935_v18 = vor.u32 %v6671_v11, %v5932_v12  ;;  %4825 = vmatpush.bf16.msra.mxu0 %v6774_v22  ;;  %v5636_v10 = vld [vmem:[%s7933_s6 + $0xd8] sm:$0xf0]  ;;  %v6787_v22 = vld [vmem:[%s7935_s1 + $0x2a0] sm:$0xff] }
 0x215   : > { %4549 = vmatmul.bf16.gmra.mxu2 %v5683_v19  ;;  %v5939_v19 = vor.u32 %v6680_v14, %v5938_v13  ;;  %4874 = vmatpush.bf16.msra.mxu1 %v6782_v24  ;;  %v5631_v14 = vor.u32 %v6593_v5, %v5628_v6  ;;  %v6795_v24 = vld [vmem:[%s7935_s1 + $0x2e0] sm:$0xff]  ;;  %v6634_v5 = vld [vmem:[%s7933_s6 + $0x1d4] sm:$0xf0]  ;;  %v6626_v6 = vld [vmem:[%s7933_s6 + $0x19c] sm:$0xf] }
 0x216   : > { %4598 = vmatmul.bf16.gmra.mxu3 %v5687_v20  ;;  %v5943_v20 = vor.u32 %v6672_v15, %v5940_v16  ;;  %4923 = vmatpush.bf16.msra.mxu2 %v6790_v21 }
 0x217   : > { %4972 = vmatpush.bf16.msra.mxu3 %v6798_v23  ;;  %v6771_v23 = vld [vmem:[%s7935_s1 + $0x220] sm:$0xff] }
 0x218   : > { %4826 = vmatpush.bf16.msra.mxu0 %v6773_v38  ;;  %v6618_v38 = vld [vmem:[%s7933_s6 + $0x154] sm:$0xf0] }
 0x219   : > { %4875 = vmatpush.bf16.msra.mxu1 %v6781_v40  ;;  %v5700_v40 = vld [vmem:[%s7933_s6 + $0x158] sm:$0xf0] }
 0x21a   : > { %4924 = vmatpush.bf16.msra.mxu2 %v6789_v37  ;;  %v5698_v37 = vld [vmem:[%s7933_s6 + $0x118] sm:$0xf] }
 0x21b   : > { %4973 = vmatpush.bf16.msra.mxu3 %v6797_v39  ;;  %v6610_v39 = vld [vmem:[%s7933_s6 + $0x11c] sm:$0xf]  ;;  %v5699_v48 = vor.u32 %v6618_v38, %v5698_v37  ;;  %v6650_v37 = vld [vmem:[%s7933_s6 + $0x254] sm:$0xf0] }
 0x21c   : > { %4827 = vmatpush.bf16.msra.mxu0 %v6772_v57  ;;  %v6642_v38 = vld [vmem:[%s7933_s6 + $0x21c] sm:$0xf] }
 0x21e   : > { %4925 = vmatpush.bf16.msra.mxu2 %v6788_v56 }
 0x21f   : > { %4974 = vmatpush.bf16.msra.mxu3 %v6796_v58 }
 0x220   : > { %4828 = vmatpush.bf16.msra.mxu0 %v6771_v23 }
 0x222   : > { %4926 = vmatpush.bf16.msra.mxu2 %v6787_v22  ;;  %v6793_v22 = vld [vmem:[%s7935_s1 + $0x2d0] sm:$0xff] }
 0x223   : > { %4456 = vmatmul.bf16.gmra.mxu0 %v5739_v33  ;;  %v5995_v33 = vor.u32 %v6695_v26, %v5994_v25  ;;  %4975 = vmatpush.bf16.msra.mxu3 %v6795_v24 }
 0x224   : > { %4505 = vmatmul.bf16.gmra.mxu1 %v5743_v34  ;;  %v5999_v34 = vor.u32 %v6687_v27, %v5996_v28 }
 0x225   : > { %4554 = vmatmul.bf16.gmra.mxu2 %v5747_v35  ;;  %v6003_v35 = vor.u32 %v6696_v30, %v6002_v29 }
 0x226   : > { %4603 = vmatmul.bf16.gmra.mxu3 %v5751_v36  ;;  %v6007_v36 = vor.u32 %v6688_v31, %v6004_v32  ;;  %v6779_v32 = vld [vmem:[%s7935_s1 + $0x260] sm:$0xff] }
 0x233   : > { %4461 = vmatmul.bf16.gmra.mxu0 %v5803_v49  ;;  %v5563_v49 = vor.u32 %v6585_v42, %v5562_v41 }
 0x234   : > { %4510 = vmatmul.bf16.gmra.mxu1 %v5807_v50  ;;  %v5567_v50 = vor.u32 %v6577_v43, %v5564_v44 }
 0x235   : > { %4559 = vmatmul.bf16.gmra.mxu2 %v5811_v51 }
 0x236   : > { %4608 = vmatmul.bf16.gmra.mxu3 %v5815_v52 }
 0x243   : > { %4466 = vmatmul.bf16.gmra.mxu0 %v5867_v1 }
 0x244   : > { %4515 = vmatmul.bf16.gmra.mxu1 %v5871_v2  ;;  %v6780_v2 = vld [vmem:[%s7935_s1 + $0x268] sm:$0xff] }
 0x245   : > { %4564 = vmatmul.bf16.gmra.mxu2 %v5875_v3  ;;  %v5626_v3 = vld [vmem:[%s7933_s6 + $0x90] sm:$0xf]  ;;  %4876 = vmatpush.bf16.msra.mxu1 %v6780_v2  ;;  %v6625_v2 = vld [vmem:[%s7933_s6 + $0x194] sm:$0xf] }
 0x246   : > { %4613 = vmatmul.bf16.gmra.mxu3 %v5879_v4  ;;  %v6601_v4 = vld [vmem:[%s7933_s6 + $0xcc] sm:$0xf0] }
 0x247   : > { %v5627_v13 = vor.u32 %v6601_v4, %v5626_v3  ;;  %v5756_v3 = vld [vmem:[%s7933_s6 + $0x1d0] sm:$0xf0]  ;;  %v5762_v4 = vld [vmem:[%s7933_s6 + $0x198] sm:$0xf] }
 0x249   : > { %4877 = vmatpush.bf16.msra.mxu1 %v6779_v32  ;;  %v5818_v32 = vld [vmem:[%s7933_s6 + $0x210] sm:$0xf] }
 0x253   : > { %4471 = vmatmul.bf16.gmra.mxu0 %v5931_v17 }
 0x254   : > { %4520 = vmatmul.bf16.gmra.mxu1 %v5935_v18  ;;  %v5635_v18 = vor.u32 %v6602_v8, %v5634_v7  ;;  %v5764_v7 = vld [vmem:[%s7933_s6 + $0x1d8] sm:$0xf0] }
 0x255   : > { %4569 = vmatmul.bf16.gmra.mxu2 %v5939_v19  ;;  %v5639_v19 = vor.u32 %v6594_v9, %v5636_v10 }
 0x256   : > { %4618 = vmatmul.bf16.gmra.mxu3 %v5943_v20 }
 0x263   : > { %4476 = vmatmul.bf16.gmra.mxu0 %v5995_v33  ;;  %v5690_v33 = vld [vmem:[%s7933_s6 + $0x110] sm:$0xf] }
 0x264   : > { %4525 = vmatmul.bf16.gmra.mxu1 %v5999_v34  ;;  %v6617_v34 = vld [vmem:[%s7933_s6 + $0x14c] sm:$0xf0] }
 0x265   : > { %4574 = vmatmul.bf16.gmra.mxu2 %v6003_v35  ;;  %v6609_v35 = vld [vmem:[%s7933_s6 + $0x114] sm:$0xf]  ;;  %v5691_v43 = vor.u32 %v6617_v34, %v5690_v33  ;;  %v6649_v33 = vld [vmem:[%s7933_s6 + $0x24c] sm:$0xf0] }
 0x266   : > { %4623 = vmatmul.bf16.gmra.mxu3 %v6007_v36  ;;  %v5692_v36 = vld [vmem:[%s7933_s6 + $0x150] sm:$0xf0] }
 0x267   : > { %v5695_v44 = vor.u32 %v6609_v35, %v5692_v36  ;;  %v6641_v34 = vld [vmem:[%s7933_s6 + $0x214] sm:$0xf]  ;;  %v5826_v36 = vld [vmem:[%s7933_s6 + $0x218] sm:$0xf] }
 0x268   : > { %v5820_v35 = vld [vmem:[%s7933_s6 + $0x250] sm:$0xf0] }
 0x270   : > { %v4442_v51 = vpop.f32.mrf.mxu0 }
 0x271   : > { %v4491_v52 = vpop.f32.mrf.mxu1 }
 0x272   : > { %v4492_v55 = vadd.f32 %v4491_v52, %v4442_v51  ;;  %v6786_v52 = vld [vmem:[%s7935_s1 + $0x298] sm:$0xff] }
 0x273   : > { %4637 = vmatmul.bf16.vlgmr.msrb.gmra.mxu0 %v5563_v49  ;;  %v5703_v49 = vor.u32 %v6610_v39, %v5700_v40  ;;  %4927 = vmatpush.bf16.msra.mxu2 %v6786_v52  ;;  %v5828_v39 = vld [vmem:[%s7933_s6 + $0x258] sm:$0xf0]  ;;  %v6784_v52 = vld [vmem:[%s7935_s1 + $0x288] sm:$0xff] }
 0x274   : > { %4686 = vmatmul.bf16.vlgmr.msrb.gmra.mxu1 %v5567_v50 }
 0x275   : > { %4735 = vmatmul.bf16.vlgmr.msrb.gmra.mxu2 %v5571_v53  ;;  %v6770_v53 = vld [vmem:[%s7935_s1 + $0x218] sm:$0xff] }
 0x276   : > { %4784 = vmatmul.bf16.vlgmr.msrb.gmra.mxu3 %v5575_v54  ;;  %v6794_v54 = vld [vmem:[%s7935_s1 + $0x2d8] sm:$0xff]  ;;  %4829 = vmatpush.bf16.msra.mxu0 %v6770_v53  ;;  %v6768_v53 = vld [vmem:[%s7935_s1 + $0x208] sm:$0xff] }
 0x277   : > { %4976 = vmatpush.bf16.msra.mxu3 %v6794_v54  ;;  %v6792_v54 = vld [vmem:[%s7935_s1 + $0x2c8] sm:$0xff] }
 0x278   : > { %v4540_v59 = vpop.f32.mrf.mxu2  ;;  %v4444_v62 = vpop.f32.mrf.mxu0 }
 0x279   : > { %v4589_v60 = vpop.f32.mrf.mxu3  ;;  %v4541_v61 = vadd.f32 %v4540_v59, %v4492_v55  ;;  %v4493_v63 = vpop.f32.mrf.mxu1 }
 0x27a   : > { %v4494_v0 = vadd.f32 %v4493_v63, %v4444_v62  ;;  %v6778_v62 = vld [vmem:[%s7935_s1 + $0x258] sm:$0xff]  ;;  %v5754_v63 = vld [vmem:[%s7933_s6 + $0x190] sm:$0xf] }
 0x27b   : > { %v8087_v1 = vadd.f32 %v4589_v60, %v4541_v61  ;;  %4878 = vmatpush.bf16.msra.mxu1 %v6778_v62  ;;  %4977 = vmatpush.bf16.msra.mxu3 %v6793_v22  ;;  %v6783_v22 = vld [vmem:[%s7935_s1 + $0x280] sm:$0xff] }
 0x27f   : > { %4978 = vmatpush.bf16.msra.mxu3 %v6792_v54 }
 0x280   : > { %v4542_v11 = vpop.f32.mrf.mxu2  ;;  %v4447_v16 = vpop.f32.mrf.mxu0 }
 0x281   : > { %v4591_v12 = vpop.f32.mrf.mxu3  ;;  %v4543_v15 = vadd.f32 %v4542_v11, %v4494_v0  ;;  %v4496_v17 = vpop.f32.mrf.mxu1  ;;  %v6633_v0 = vld [vmem:[%s7933_s6 + $0x1cc] sm:$0xf0]  ;;  %v5759_v11 = vor.u32 %v6625_v2, %v5756_v3  ;;  %v6657_v3 = vld [vmem:[%s7933_s6 + $0x294] sm:$0xf] }
 0x282   : > { %v4497_v20 = vadd.f32 %v4496_v17, %v4447_v16  ;;  %v5755_v10 = vor.u32 %v6633_v0, %v5754_v63  ;;  %v5767_v16 = vor.u32 %v6626_v6, %v5764_v7  ;;  %v6776_v63 = vld [vmem:[%s7935_s1 + $0x248] sm:$0xff]  ;;  %v5882_v0 = vld [vmem:[%s7933_s6 + $0x290] sm:$0xf]  ;;  %v6666_v6 = vld [vmem:[%s7933_s6 + $0x2d4] sm:$0xf0] }
 0x283   : > { %v8098_v21 = vadd.f32 %v4591_v12, %v4543_v15  ;;  %4642 = vmatmul.bf16.gmra.mxu0 %v5627_v13  ;;  %v5763_v15 = vor.u32 %v6634_v5, %v5762_v4  ;;  %v6665_v2 = vld [vmem:[%s7933_s6 + $0x2cc] sm:$0xf0]  ;;  %v5884_v4 = vld [vmem:[%s7933_s6 + $0x2d0] sm:$0xf0]  ;;  %v5890_v5 = vld [vmem:[%s7933_s6 + $0x298] sm:$0xf] }
 0x284   : > { %4691 = vmatmul.bf16.gmra.mxu1 %v5631_v14  ;;  %v6658_v7 = vld [vmem:[%s7933_s6 + $0x29c] sm:$0xf] }
 0x285   : > { %4740 = vmatmul.bf16.gmra.mxu2 %v5635_v18 }
 0x286   : > { %4789 = vmatmul.bf16.gmra.mxu3 %v5639_v19  ;;  %v6785_v19 = vld [vmem:[%s7935_s1 + $0x290] sm:$0xff] }
 0x287   : > { %4928 = vmatpush.bf16.msra.mxu2 %v6785_v19 }
 0x288   : > { %v4545_v25 = vpop.f32.mrf.mxu2  ;;  %v4449_v28 = vpop.f32.mrf.mxu0 }
 0x289   : > { %v4594_v26 = vpop.f32.mrf.mxu3  ;;  %v4546_v27 = vadd.f32 %v4545_v25, %v4497_v20  ;;  %v4498_v29 = vpop.f32.mrf.mxu1  ;;  %v6769_v20 = vld [vmem:[%s7935_s1 + $0x210] sm:$0xff] }
 0x28a   : > { %v4499_v30 = vadd.f32 %v4498_v29, %v4449_v28  ;;  %4830 = vmatpush.bf16.msra.mxu0 %v6769_v20 }
 0x28b   : > { %v8103_v31 = vadd.f32 %v4594_v26, %v4546_v27  ;;  %4929 = vmatpush.bf16.msra.mxu2 %v6784_v52 }
 0x28e   : > { %4831 = vmatpush.bf16.msra.mxu0 %v6768_v53 }
 0x28f   : > { %4930 = vmatpush.bf16.msra.mxu2 %v6783_v22 }
 0x290   : > { %v4547_v41 = vpop.f32.mrf.mxu2  ;;  %v4452_v46 = vpop.f32.mrf.mxu0 }
 0x291   : > { %v4596_v42 = vpop.f32.mrf.mxu3  ;;  %v4548_v45 = vadd.f32 %v4547_v41, %v4499_v30  ;;  %v4501_v47 = vpop.f32.mrf.mxu1  ;;  %v6777_v30 = vld [vmem:[%s7935_s1 + $0x250] sm:$0xff] }
 0x292   : > { %v4502_v50 = vadd.f32 %v4501_v47, %v4452_v46  ;;  %4879 = vmatpush.bf16.msra.mxu1 %v6777_v30  ;;  %v5827_v47 = vor.u32 %v6650_v37, %v5826_v36  ;;  %v6681_v36 = vld [vmem:[%s7933_s6 + $0x34c] sm:$0xf0]  ;;  %v6673_v37 = vld [vmem:[%s7933_s6 + $0x314] sm:$0xf] }
 0x293   : > { %v8114_v51 = vadd.f32 %v4596_v42, %v4548_v45  ;;  %4647 = vmatmul.bf16.gmra.mxu0 %v5691_v43  ;;  %v5819_v42 = vor.u32 %v6649_v33, %v5818_v32  ;;  %v5823_v43 = vor.u32 %v6641_v34, %v5820_v35  ;;  %v6775_v34 = vld [vmem:[%s7935_s1 + $0x240] sm:$0xff]  ;;  %v5946_v35 = vld [vmem:[%s7933_s6 + $0x310] sm:$0xf] }
 0x294   : > { %4696 = vmatmul.bf16.gmra.mxu1 %v5695_v44 }
 0x295   : > { %4745 = vmatmul.bf16.gmra.mxu2 %v5699_v48  ;;  %v5831_v48 = vor.u32 %v6642_v38, %v5828_v39  ;;  %v5948_v38 = vld [vmem:[%s7933_s6 + $0x350] sm:$0xf0]  ;;  %v5954_v39 = vld [vmem:[%s7933_s6 + $0x318] sm:$0xf] }
 0x296   : > { %4794 = vmatmul.bf16.gmra.mxu3 %v5703_v49  ;;  %4880 = vmatpush.bf16.msra.mxu1 %v6776_v63 }
 0x298   : > { %v4550_v55 = vpop.f32.mrf.mxu2  ;;  %v4454_v58 = vpop.f32.mrf.mxu0 }
 0x299   : > { %v4599_v56 = vpop.f32.mrf.mxu3  ;;  %v4551_v57 = vadd.f32 %v4550_v55, %v4502_v50  ;;  %v4503_v59 = vpop.f32.mrf.mxu1 }
 0x29a   : > { %v4504_v60 = vadd.f32 %v4503_v59, %v4454_v58  ;;  %4881 = vmatpush.bf16.msra.mxu1 %v6775_v34 }
 0x29b   : > { %v8119_v61 = vadd.f32 %v4599_v56, %v4551_v57 }
 0x2a0   : > { %v4552_v8 = vpop.f32.mrf.mxu2  ;;  %v4457_v13 = vpop.f32.mrf.mxu0 }
 0x2a1   : > { %v4601_v9 = vpop.f32.mrf.mxu3  ;;  %v4553_v12 = vadd.f32 %v4552_v8, %v4504_v60  ;;  %v4506_v14 = vpop.f32.mrf.mxu1  ;;  %v5892_v8 = vld [vmem:[%s7933_s6 + $0x2d8] sm:$0xf0] }
 0x2a2   : > { %v4507_v17 = vadd.f32 %v4506_v14, %v4457_v13 }
 0x2a3   : > { %v8130_v18 = vadd.f32 %v4601_v9, %v4553_v12  ;;  %4652 = vmatmul.bf16.gmra.mxu0 %v5755_v10  ;;  %v5887_v12 = vor.u32 %v6657_v3, %v5884_v4 }
 0x2a4   : > { %4701 = vmatmul.bf16.gmra.mxu1 %v5759_v11  ;;  %v5883_v11 = vor.u32 %v6665_v2, %v5882_v0 }
 0x2a5   : > { %4750 = vmatmul.bf16.gmra.mxu2 %v5763_v15 }
 0x2a6   : > { %4799 = vmatmul.bf16.gmra.mxu3 %v5767_v16  ;;  %v5891_v16 = vor.u32 %v6666_v6, %v5890_v5  ;;  %v6814_v5 = vld [vmem:[%s7935_s1 + $0x378] sm:$0xff]  ;;  %v6010_v6 = vld [vmem:[%s7933_s6 + $0x390] sm:$0xf] }
 0x2a7   : > { %5070 = vmatpush.bf16.msrb.mxu1 %v6814_v5  ;;  %v6820_v5 = vld [vmem:[%s7935_s1 + $0x3a8] sm:$0xff] }
 0x2a8   : > { %v4555_v23 = vpop.f32.mrf.mxu2  ;;  %v4459_v26 = vpop.f32.mrf.mxu0 }
 0x2a9   : > { %v4604_v24 = vpop.f32.mrf.mxu3  ;;  %v4556_v25 = vadd.f32 %v4555_v23, %v4507_v17  ;;  %v4508_v27 = vpop.f32.mrf.mxu1  ;;  %v5895_v17 = vor.u32 %v6658_v7, %v5892_v8  ;;  %v6767_v23 = vld [vmem:[%s7935_s1 + $0x200] sm:$0xff]  ;;  %v6697_v7 = vld [vmem:[%s7933_s6 + $0x3cc] sm:$0xf0]  ;;  %v6689_v8 = vld [vmem:[%s7933_s6 + $0x394] sm:$0xf] }
 0x2aa   : > { %v4509_v28 = vadd.f32 %v4508_v27, %v4459_v26  ;;  %4832 = vmatpush.bf16.msra.mxu0 %v6767_v23 }
 0x2ab   : > { %v8135_v29 = vadd.f32 %v4604_v24, %v4556_v25  ;;  %v6791_v24 = vld [vmem:[%s7935_s1 + $0x2c0] sm:$0xff] }
 0x2ac   : > { %4979 = vmatpush.bf16.msra.mxu3 %v6791_v24 }
 0x2b0   : > { %v4557_v40 = vpop.f32.mrf.mxu2  ;;  %v4462_v45 = vpop.f32.mrf.mxu0 }
 0x2b1   : > { %v4606_v41 = vpop.f32.mrf.mxu3  ;;  %v4558_v44 = vadd.f32 %v4557_v40, %v4509_v28  ;;  %v4511_v46 = vpop.f32.mrf.mxu1  ;;  %v6682_v40 = vld [vmem:[%s7933_s6 + $0x354] sm:$0xf0] }
 0x2b2   : > { %v4512_v49 = vadd.f32 %v4511_v46, %v4462_v45  ;;  %v5947_v45 = vor.u32 %v6681_v36, %v5946_v35  ;;  %v5951_v46 = vor.u32 %v6673_v37, %v5948_v38  ;;  %v5955_v52 = vor.u32 %v6682_v40, %v5954_v39 }
 0x2b3   : > { %v8146_v50 = vadd.f32 %v4606_v41, %v4558_v44  ;;  %4657 = vmatmul.bf16.gmra.mxu0 %v5819_v42  ;;  %v6674_v41 = vld [vmem:[%s7933_s6 + $0x31c] sm:$0xf] }
 0x2b4   : > { %4706 = vmatmul.bf16.gmra.mxu1 %v5823_v43  ;;  %v5956_v42 = vld [vmem:[%s7933_s6 + $0x358] sm:$0xf0] }
 0x2b5   : > { %4755 = vmatmul.bf16.gmra.mxu2 %v5827_v47  ;;  %v5959_v53 = vor.u32 %v6674_v41, %v5956_v42  ;;  %v6813_v41 = vld [vmem:[%s7935_s1 + $0x370] sm:$0xff]  ;;  %v5578_v42 = vld [vmem:[%s7933_s6 + $0x20] sm:$0xf] }
 0x2b6   : > { %4804 = vmatmul.bf16.gmra.mxu3 %v5831_v48  ;;  %5071 = vmatpush.bf16.msrb.mxu1 %v6813_v41 }
 0x2b8   : > { %v4560_v55 = vpop.f32.mrf.mxu2  ;;  %v4464_v58 = vpop.f32.mrf.mxu0 }
 0x2b9   : > { %v4609_v56 = vpop.f32.mrf.mxu3  ;;  %v4561_v57 = vadd.f32 %v4560_v55, %v4512_v49  ;;  %v4513_v59 = vpop.f32.mrf.mxu1 }
 0x2ba   : > { %v4514_v60 = vadd.f32 %v4513_v59, %v4464_v58  ;;  %v6830_v58 = vld [vmem:[%s7935_s1 + $0x3f8] sm:$0xff] }
 0x2bb   : > { %v8151_v62 = vadd.f32 %v4609_v56, %v4561_v57  ;;  %v6822_v56 = vld [vmem:[%s7935_s1 + $0x3b8] sm:$0xff]  ;;  %5168 = vmatpush.bf16.msrb.mxu3 %v6830_v58 }
 0x2bc   : > { %v6806_v57 = vld [vmem:[%s7935_s1 + $0x338] sm:$0xff]  ;;  %5119 = vmatpush.bf16.msrb.mxu2 %v6822_v56 }
 0x2bd   : > { %5021 = vmatpush.bf16.msrb.mxu0 %v6806_v57 }
 0x2c0   : > { %v4562_v9 = vpop.f32.mrf.mxu2  ;;  %v4467_v14 = vpop.f32.mrf.mxu0 }
 0x2c1   : > { %v4611_v10 = vpop.f32.mrf.mxu3  ;;  %v4563_v13 = vadd.f32 %v4562_v9, %v4514_v60  ;;  %v4516_v15 = vpop.f32.mrf.mxu1  ;;  %v6012_v9 = vld [vmem:[%s7933_s6 + $0x3d0] sm:$0xf0] }
 0x2c2   : > { %v4517_v19 = vadd.f32 %v4516_v15, %v4467_v14 }
 0x2c3   : > { %v8162_v20 = vadd.f32 %v4611_v10, %v4563_v13  ;;  %4662 = vmatmul.bf16.gmra.mxu0 %v5883_v11  ;;  %v6018_v10 = vld [vmem:[%s7933_s6 + $0x398] sm:$0xf]  ;;  %v6020_v13 = vld [vmem:[%s7933_s6 + $0x3d8] sm:$0xf0] }
 0x2c4   : > { %4711 = vmatmul.bf16.gmra.mxu1 %v5887_v12  ;;  %v6698_v11 = vld [vmem:[%s7933_s6 + $0x3d4] sm:$0xf0]  ;;  %v6690_v12 = vld [vmem:[%s7933_s6 + $0x39c] sm:$0xf] }
 0x2c5   : > { %4760 = vmatmul.bf16.gmra.mxu2 %v5891_v16  ;;  %v6011_v16 = vor.u32 %v6697_v7, %v6010_v6  ;;  %v6019_v24 = vor.u32 %v6698_v11, %v6018_v10  ;;  %v6804_v6 = vld [vmem:[%s7935_s1 + $0x328] sm:$0xff] }
 0x2c6   : > { %4809 = vmatmul.bf16.gmra.mxu3 %v5895_v17  ;;  %v6015_v17 = vor.u32 %v6689_v8, %v6012_v9  ;;  %v6828_v7 = vld [vmem:[%s7935_s1 + $0x3e8] sm:$0xff] }
 0x2c8   : > { %v4565_v25 = vpop.f32.mrf.mxu2  ;;  %v4469_v28 = vpop.f32.mrf.mxu0 }
 0x2c9   : > { %v4614_v26 = vpop.f32.mrf.mxu3  ;;  %v4566_v27 = vadd.f32 %v4565_v25, %v4517_v19  ;;  %v4518_v30 = vpop.f32.mrf.mxu1  ;;  %v6023_v25 = vor.u32 %v6690_v12, %v6020_v13 }
 0x2ca   : > { %v4519_v32 = vadd.f32 %v4518_v30, %v4469_v28  ;;  %v6821_v28 = vld [vmem:[%s7935_s1 + $0x3b0] sm:$0xff] }
 0x2cb   : > { %v8167_v33 = vadd.f32 %v4614_v26, %v4566_v27  ;;  %v6805_v30 = vld [vmem:[%s7935_s1 + $0x330] sm:$0xff]  ;;  %5120 = vmatpush.bf16.msrb.mxu2 %v6821_v28 }
 0x2cc   : > { %5022 = vmatpush.bf16.msrb.mxu0 %v6805_v30 }
 0x2cf   : > { %5121 = vmatpush.bf16.msrb.mxu2 %v6820_v5  ;;  %v5716_v5 = vld [vmem:[%s7933_s6 + $0x168] sm:$0xf0] }
 0x2d0   : > { %v4567_v43 = vpop.f32.mrf.mxu2  ;;  %v4472_v48 = vpop.f32.mrf.mxu0  ;;  %5023 = vmatpush.bf16.msrb.mxu0 %v6804_v6 }
 0x2d1   : > { %v4616_v44 = vpop.f32.mrf.mxu3  ;;  %v4568_v47 = vadd.f32 %v4567_v43, %v4519_v32  ;;  %v4521_v49 = vpop.f32.mrf.mxu1  ;;  %v6829_v32 = vld [vmem:[%s7935_s1 + $0x3f0] sm:$0xff]  ;;  %v6587_v43 = vld [vmem:[%s7933_s6 + $0x5c] sm:$0xf0] }
 0x2d2   : > { %v4522_v54 = vadd.f32 %v4521_v49, %v4472_v48  ;;  %5169 = vmatpush.bf16.msrb.mxu3 %v6829_v32  ;;  %v6580_v48 = vld [vmem:[%s7933_s6 + $0x2c] sm:$0xf] }
 0x2d3   : > { %v8178_v55 = vadd.f32 %v4616_v44, %v4568_v47  ;;  %4667 = vmatmul.bf16.gmra.mxu0 %v5947_v45  ;;  %v6579_v44 = vld [vmem:[%s7933_s6 + $0x24] sm:$0xf]  ;;  %v6588_v47 = vld [vmem:[%s7933_s6 + $0x64] sm:$0xf0]  ;;  %v5588_v49 = vld [vmem:[%s7933_s6 + $0x68] sm:$0xf0] }
 0x2d4   : > { %4716 = vmatmul.bf16.gmra.mxu1 %v5951_v46  ;;  %v5580_v45 = vld [vmem:[%s7933_s6 + $0x60] sm:$0xf0]  ;;  %v5586_v46 = vld [vmem:[%s7933_s6 + $0x28] sm:$0xf] }
 0x2d5   : > { %4765 = vmatmul.bf16.gmra.mxu2 %v5955_v52  ;;  %v5583_v56 = vor.u32 %v6579_v44, %v5580_v45  ;;  %v6803_v44 = vld [vmem:[%s7935_s1 + $0x320] sm:$0xff] }
 0x2d6   : > { %4814 = vmatmul.bf16.gmra.mxu3 %v5959_v53  ;;  %v6827_v45 = vld [vmem:[%s7935_s1 + $0x3e0] sm:$0xff]  ;;  %5024 = vmatpush.bf16.msrb.mxu0 %v6803_v44 }
 0x2d7   : > { %5170 = vmatpush.bf16.msrb.mxu3 %v6828_v7 }
 0x2d8   : > { %v4570_v59 = vpop.f32.mrf.mxu2  ;;  %v4474_v0 = vpop.f32.mrf.mxu0 }
 0x2d9   : > { %v4619_v60 = vpop.f32.mrf.mxu3  ;;  %v4571_v63 = vadd.f32 %v4570_v59, %v4522_v54  ;;  %v4523_v2 = vpop.f32.mrf.mxu1  ;;  %v5579_v54 = vor.u32 %v6587_v43, %v5578_v42  ;;  %v6819_v43 = vld [vmem:[%s7935_s1 + $0x3a0] sm:$0xff] }
 0x2da   : > { %v4524_v3 = vadd.f32 %v4523_v2, %v4474_v0  ;;  %5122 = vmatpush.bf16.msrb.mxu2 %v6819_v43  ;;  %v5780_v43 = vld [vmem:[%s7933_s6 + $0x1e8] sm:$0xf0] }
 0x2db   : > { %v8183_v4 = vadd.f32 %v4619_v60, %v4571_v63  ;;  %v5587_v60 = vor.u32 %v6588_v47, %v5586_v46  ;;  %v5591_v63 = vor.u32 %v6580_v48, %v5588_v49  ;;  %5171 = vmatpush.bf16.msrb.mxu3 %v6827_v45 }
 0x2e0   : > { %v4572_v14 = vpop.f32.mrf.mxu2  ;;  %v4477_v22 = vpop.f32.mrf.mxu0 }
 0x2e1   : > { %v4621_v15 = vpop.f32.mrf.mxu3  ;;  %v4573_v19 = vadd.f32 %v4572_v14, %v4524_v3  ;;  %v4526_v23 = vpop.f32.mrf.mxu1  ;;  %v6812_v14 = vld [vmem:[%s7935_s1 + $0x368] sm:$0xff] }
 0x2e2   : > { %v4527_v26 = vadd.f32 %v4526_v23, %v4477_v22  ;;  %v5644_v22 = vld [vmem:[%s7933_s6 + $0xe0] sm:$0xf0]  ;;  %v5650_v23 = vld [vmem:[%s7933_s6 + $0xa8] sm:$0xf]  ;;  %5072 = vmatpush.bf16.msrb.mxu1 %v6812_v14 }
 0x2e3   : > { %v8194_v27 = vadd.f32 %v4621_v15, %v4573_v19  ;;  %4672 = vmatmul.bf16.gmra.mxu0 %v6011_v16  ;;  %v5642_v16 = vld [vmem:[%s7933_s6 + $0xa0] sm:$0xf]  ;;  %v6595_v19 = vld [vmem:[%s7933_s6 + $0xa4] sm:$0xf] }
 0x2e4   : > { %4721 = vmatmul.bf16.gmra.mxu1 %v6015_v17  ;;  %v6603_v17 = vld [vmem:[%s7933_s6 + $0xdc] sm:$0xf0] }
 0x2e5   : > { %4770 = vmatmul.bf16.gmra.mxu2 %v6019_v24  ;;  %v6604_v24 = vld [vmem:[%s7933_s6 + $0xe4] sm:$0xf0]  ;;  %v5643_v32 = vor.u32 %v6603_v17, %v5642_v16  ;;  %v6818_v17 = vld [vmem:[%s7935_s1 + $0x398] sm:$0xff] }
 0x2e6   : > { %4819 = vmatmul.bf16.gmra.mxu3 %v6023_v25  ;;  %v6596_v25 = vld [vmem:[%s7933_s6 + $0xac] sm:$0xf]  ;;  %5123 = vmatpush.bf16.msrb.mxu2 %v6818_v17 }
 0x2e7   : > { %v5844_v17 = vld [vmem:[%s7933_s6 + $0x268] sm:$0xf0] }
 0x2e8   : > { %v4575_v34 = vpop.f32.mrf.mxu2  ;;  %v4479_v37 = vpop.f32.mrf.mxu0 }
 0x2e9   : > { %v4624_v35 = vpop.f32.mrf.mxu3  ;;  %v4576_v36 = vadd.f32 %v4575_v34, %v4527_v26  ;;  %v4528_v38 = vpop.f32.mrf.mxu1  ;;  %v5652_v26 = vld [vmem:[%s7933_s6 + $0xe8] sm:$0xf0] }
 0x2ea   : > { %v4529_v39 = vadd.f32 %v4528_v38, %v4479_v37  ;;  %v5651_v37 = vor.u32 %v6604_v24, %v5650_v23  ;;  %v5655_v38 = vor.u32 %v6596_v25, %v5652_v26 }
 0x2eb   : > { %v8199_v40 = vadd.f32 %v4624_v35, %v4576_v36 }
 0x2f0   : > { %v4577_v52 = vpop.f32.mrf.mxu2  ;;  %v4638_v58 = vpop.f32.mrf.mxu0 }
 0x2f1   : > { %v4626_v53 = vpop.f32.mrf.mxu3  ;;  %v4578_v57 = vadd.f32 %v4577_v52, %v4529_v39  ;;  %v4687_v59 = vpop.f32.mrf.mxu1  ;;  %v4639_v0 = vadd.f32 %v4638_v58, %v8087_v1  ;;  %v6619_v58 = vld [vmem:[%s7933_s6 + $0x15c] sm:$0xf0] }
 0x2f3   : > { %v8211_v2 = vadd.f32 %v4626_v53, %v4578_v57  ;;  %v4688_v3 = vadd.f32 %v4687_v59, %v4639_v0  ;;  %4833 = vmatmul.bf16.vlgmr.msra.gmra.mxu0 %v5579_v54  ;;  %v6811_v54 = vld [vmem:[%s7935_s1 + $0x360] sm:$0xff]  ;;  %v6620_v0 = vld [vmem:[%s7933_s6 + $0x164] sm:$0xf0] }
 0x2f4   : > { %4882 = vmatmul.bf16.vlgmr.msra.gmra.mxu1 %v5583_v56  ;;  %v5706_v57 = vld [vmem:[%s7933_s6 + $0x120] sm:$0xf]  ;;  %v6611_v59 = vld [vmem:[%s7933_s6 + $0x124] sm:$0xf] }
 0x2f5   : > { %4931 = vmatmul.bf16.vlgmr.msra.gmra.mxu2 %v5587_v60  ;;  %v5708_v60 = vld [vmem:[%s7933_s6 + $0x160] sm:$0xf0]  ;;  %5073 = vmatpush.bf16.msrb.mxu1 %v6811_v54 }
 0x2f6   : > { %4980 = vmatmul.bf16.vlgmr.msra.gmra.mxu3 %v5591_v63  ;;  %v5714_v63 = vld [vmem:[%s7933_s6 + $0x128] sm:$0xf] }
 0x2f8   : > { %v4736_v8 = vpop.f32.mrf.mxu2  ;;  %v4640_v10 = vpop.f32.mrf.mxu0 }
 0x2f9   : > { %v4785_v1 = vpop.f32.mrf.mxu3  ;;  %v4737_v9 = vadd.f32 %v4736_v8, %v4688_v3  ;;  %v4689_v11 = vpop.f32.mrf.mxu1  ;;  %v4641_v12 = vadd.f32 %v4640_v10, %v8098_v21  ;;  %v5647_v21 = vor.u32 %v6595_v19, %v5644_v22  ;;  %v6612_v3 = vld [vmem:[%s7933_s6 + $0x12c] sm:$0xf]  ;;  %v5707_v8 = vor.u32 %v6619_v58, %v5706_v57  ;;  %v6802_v19 = vld [vmem:[%s7935_s1 + $0x318] sm:$0xff]  ;;  %v6817_v58 = vld [vmem:[%s7935_s1 + $0x390] sm:$0xff] }
 0x2fa   : > { %v6826_v22 = vld [vmem:[%s7935_s1 + $0x3d8] sm:$0xff]  ;;  %5025 = vmatpush.bf16.msrb.mxu0 %v6802_v19  ;;  %5124 = vmatpush.bf16.msrb.mxu2 %v6817_v58  ;;  %v5908_v58 = vld [vmem:[%s7933_s6 + $0x2e8] sm:$0xf0] }
 0x2fb   : > { %v8217_v13 = vadd.f32 %v4785_v1, %v4737_v9  ;;  %v4690_v15 = vadd.f32 %v4689_v11, %v4641_v12  ;;  %v5715_v11 = vor.u32 %v6620_v0, %v5714_v63  ;;  %v5719_v12 = vor.u32 %v6612_v3, %v5716_v5  ;;  %5172 = vmatpush.bf16.msrb.mxu3 %v6826_v22 }
 0x300   : > { %v4738_v28 = vpop.f32.mrf.mxu2  ;;  %v4643_v35 = vpop.f32.mrf.mxu0 }
 0x301   : > { %v4787_v30 = vpop.f32.mrf.mxu3  ;;  %v4739_v34 = vadd.f32 %v4738_v28, %v4690_v15  ;;  %v4692_v36 = vpop.f32.mrf.mxu1  ;;  %v4644_v39 = vadd.f32 %v4643_v35, %v8103_v31  ;;  %v6635_v35 = vld [vmem:[%s7933_s6 + $0x1dc] sm:$0xf0] }
 0x303   : > { %v8229_v41 = vadd.f32 %v4787_v30, %v4739_v34  ;;  %v4693_v42 = vadd.f32 %v4692_v36, %v4644_v39  ;;  %4838 = vmatmul.bf16.gmra.mxu0 %v5643_v32  ;;  %v6810_v32 = vld [vmem:[%s7935_s1 + $0x358] sm:$0xff]  ;;  %v5770_v34 = vld [vmem:[%s7933_s6 + $0x1a0] sm:$0xf]  ;;  %v6627_v36 = vld [vmem:[%s7933_s6 + $0x1a4] sm:$0xf] }
 0x304   : > { %4887 = vmatmul.bf16.gmra.mxu1 %v5647_v21  ;;  %v6636_v39 = vld [vmem:[%s7933_s6 + $0x1e4] sm:$0xf0] }
 0x305   : > { %4936 = vmatmul.bf16.gmra.mxu2 %v5651_v37  ;;  %v5772_v37 = vld [vmem:[%s7933_s6 + $0x1e0] sm:$0xf0]  ;;  %5074 = vmatpush.bf16.msrb.mxu1 %v6810_v32 }
 0x306   : > { %4985 = vmatmul.bf16.gmra.mxu3 %v5655_v38  ;;  %v5778_v38 = vld [vmem:[%s7933_s6 + $0x1a8] sm:$0xf] }
 0x308   : > { %v4741_v46 = vpop.f32.mrf.mxu2  ;;  %v4645_v48 = vpop.f32.mrf.mxu0 }
 0x309   : > { %v4790_v31 = vpop.f32.mrf.mxu3  ;;  %v4742_v47 = vadd.f32 %v4741_v46, %v4693_v42  ;;  %v4694_v49 = vpop.f32.mrf.mxu1  ;;  %v4646_v52 = vadd.f32 %v4645_v48, %v8114_v51  ;;  %v5711_v51 = vor.u32 %v6611_v59, %v5708_v60  ;;  %v6628_v42 = vld [vmem:[%s7933_s6 + $0x1ac] sm:$0xf]  ;;  %v5771_v46 = vor.u32 %v6635_v35, %v5770_v34  ;;  %v6801_v59 = vld [vmem:[%s7935_s1 + $0x310] sm:$0xff] }
 0x30a   : > { %v6825_v60 = vld [vmem:[%s7935_s1 + $0x3d0] sm:$0xff]  ;;  %5026 = vmatpush.bf16.msrb.mxu0 %v6801_v59  ;;  %v6816_v35 = vld [vmem:[%s7935_s1 + $0x388] sm:$0xff] }
 0x30b   : > { %v8235_v53 = vadd.f32 %v4790_v31, %v4742_v47  ;;  %v4695_v56 = vadd.f32 %v4694_v49, %v4646_v52  ;;  %v5779_v49 = vor.u32 %v6636_v39, %v5778_v38  ;;  %v5783_v52 = vor.u32 %v6628_v42, %v5780_v43  ;;  %5173 = vmatpush.bf16.msrb.mxu3 %v6825_v60 }
 0x30c   : > { %5125 = vmatpush.bf16.msrb.mxu2 %v6816_v35  ;;  %v5972_v35 = vld [vmem:[%s7933_s6 + $0x368] sm:$0xf0] }
 0x310   : > { %v4743_v6 = vpop.f32.mrf.mxu2  ;;  %v4648_v9 = vpop.f32.mrf.mxu0 }
 0x311   : > { %v4792_v7 = vpop.f32.mrf.mxu3  ;;  %v4744_v1 = vadd.f32 %v4743_v6, %v4695_v56  ;;  %v4697_v10 = vpop.f32.mrf.mxu1  ;;  %v4649_v14 = vadd.f32 %v4648_v9, %v8119_v61  ;;  %v6651_v9 = vld [vmem:[%s7933_s6 + $0x25c] sm:$0xf0] }
 0x313   : > { %v8247_v15 = vadd.f32 %v4792_v7, %v4744_v1  ;;  %v4698_v16 = vadd.f32 %v4697_v10, %v4649_v14  ;;  %4843 = vmatmul.bf16.gmra.mxu0 %v5707_v8  ;;  %v6809_v8 = vld [vmem:[%s7935_s1 + $0x350] sm:$0xff]  ;;  %v5834_v1 = vld [vmem:[%s7933_s6 + $0x220] sm:$0xf]  ;;  %v6643_v10 = vld [vmem:[%s7933_s6 + $0x224] sm:$0xf] }
 0x314   : > { %4892 = vmatmul.bf16.gmra.mxu1 %v5711_v51  ;;  %v6652_v14 = vld [vmem:[%s7933_s6 + $0x264] sm:$0xf0] }
 0x315   : > { %4941 = vmatmul.bf16.gmra.mxu2 %v5715_v11  ;;  %v5836_v11 = vld [vmem:[%s7933_s6 + $0x260] sm:$0xf0]  ;;  %5075 = vmatpush.bf16.msrb.mxu1 %v6809_v8 }
 0x316   : > { %4990 = vmatmul.bf16.gmra.mxu3 %v5719_v12  ;;  %v5842_v12 = vld [vmem:[%s7933_s6 + $0x228] sm:$0xf] }
 0x318   : > { %v4746_v23 = vpop.f32.mrf.mxu2  ;;  %v4650_v25 = vpop.f32.mrf.mxu0 }
 0x319   : > { %v4795_v61 = vpop.f32.mrf.mxu3  ;;  %v4747_v24 = vadd.f32 %v4746_v23, %v4698_v16  ;;  %v4699_v26 = vpop.f32.mrf.mxu1  ;;  %v4651_v28 = vadd.f32 %v4650_v25, %v8130_v18  ;;  %v5775_v18 = vor.u32 %v6627_v36, %v5772_v37  ;;  %v6644_v16 = vld [vmem:[%s7933_s6 + $0x22c] sm:$0xf]  ;;  %v5835_v23 = vor.u32 %v6651_v9, %v5834_v1  ;;  %v6815_v9 = vld [vmem:[%s7935_s1 + $0x380] sm:$0xff] }
 0x31a   : > { %v6800_v36 = vld [vmem:[%s7935_s1 + $0x308] sm:$0xff]  ;;  %5126 = vmatpush.bf16.msrb.mxu2 %v6815_v9 }
 0x31b   : > { %v8253_v30 = vadd.f32 %v4795_v61, %v4747_v24  ;;  %v4700_v21 = vadd.f32 %v4699_v26, %v4651_v28  ;;  %v5843_v26 = vor.u32 %v6652_v14, %v5842_v12  ;;  %v5847_v28 = vor.u32 %v6644_v16, %v5844_v17  ;;  %v6824_v37 = vld [vmem:[%s7935_s1 + $0x3c8] sm:$0xff]  ;;  %5027 = vmatpush.bf16.msrb.mxu0 %v6800_v36 }
 0x31c   : > { %5174 = vmatpush.bf16.msrb.mxu3 %v6824_v37 }
 0x320   : > { %v4748_v44 = vpop.f32.mrf.mxu2  ;;  %v4653_v47 = vpop.f32.mrf.mxu0 }
 0x321   : > { %v4797_v45 = vpop.f32.mrf.mxu3  ;;  %v4749_v31 = vadd.f32 %v4748_v44, %v4700_v21  ;;  %v4702_v48 = vpop.f32.mrf.mxu1  ;;  %v4654_v54 = vadd.f32 %v4653_v47, %v8135_v29  ;;  %v6667_v47 = vld [vmem:[%s7933_s6 + $0x2dc] sm:$0xf0] }
 0x323   : > { %v8265_v56 = vadd.f32 %v4797_v45, %v4749_v31  ;;  %v4703_v57 = vadd.f32 %v4702_v48, %v4654_v54  ;;  %4848 = vmatmul.bf16.gmra.mxu0 %v5771_v46  ;;  %v6808_v46 = vld [vmem:[%s7935_s1 + $0x348] sm:$0xff]  ;;  %v5898_v31 = vld [vmem:[%s7933_s6 + $0x2a0] sm:$0xf]  ;;  %v6659_v48 = vld [vmem:[%s7933_s6 + $0x2a4] sm:$0xf] }
 0x324   : > { %4897 = vmatmul.bf16.gmra.mxu1 %v5775_v18  ;;  %v6668_v54 = vld [vmem:[%s7933_s6 + $0x2e4] sm:$0xf0] }
 0x325   : > { %4946 = vmatmul.bf16.gmra.mxu2 %v5779_v49  ;;  %v5900_v49 = vld [vmem:[%s7933_s6 + $0x2e0] sm:$0xf0]  ;;  %5076 = vmatpush.bf16.msrb.mxu1 %v6808_v46 }
 0x326   : > { %4995 = vmatmul.bf16.gmra.mxu3 %v5783_v52  ;;  %v5906_v52 = vld [vmem:[%s7933_s6 + $0x2a8] sm:$0xf] }
 0x328   : > { %v4751_v63 = vpop.f32.mrf.mxu2  ;;  %v4655_v3 = vpop.f32.mrf.mxu0 }
 0x329   : > { %v4800_v29 = vpop.f32.mrf.mxu3  ;;  %v4752_v0 = vadd.f32 %v4751_v63, %v4703_v57  ;;  %v4704_v5 = vpop.f32.mrf.mxu1  ;;  %v4656_v6 = vadd.f32 %v4655_v3, %v8146_v50  ;;  %v5839_v50 = vor.u32 %v6643_v10, %v5836_v11  ;;  %v6660_v57 = vld [vmem:[%s7933_s6 + $0x2ac] sm:$0xf]  ;;  %v5899_v63 = vor.u32 %v6667_v47, %v5898_v31  ;;  %v6799_v10 = vld [vmem:[%s7935_s1 + $0x300] sm:$0xff] }
 0x32a   : > { %v6823_v11 = vld [vmem:[%s7935_s1 + $0x3c0] sm:$0xff]  ;;  %5028 = vmatpush.bf16.msrb.mxu0 %v6799_v10 }
 0x32b   : > { %v8271_v7 = vadd.f32 %v4800_v29, %v4752_v0  ;;  %v4705_v51 = vadd.f32 %v4704_v5, %v4656_v6  ;;  %v5907_v5 = vor.u32 %v6668_v54, %v5906_v52  ;;  %v5911_v6 = vor.u32 %v6660_v57, %v5908_v58  ;;  %5175 = vmatpush.bf16.msrb.mxu3 %v6823_v11 }
 0x330   : > { %v4753_v19 = vpop.f32.mrf.mxu2  ;;  %v4658_v24 = vpop.f32.mrf.mxu0 }
 0x331   : > { %v4802_v22 = vpop.f32.mrf.mxu3  ;;  %v4754_v61 = vadd.f32 %v4753_v19, %v4705_v51  ;;  %v4707_v25 = vpop.f32.mrf.mxu1  ;;  %v4659_v32 = vadd.f32 %v4658_v24, %v8151_v62  ;;  %v6683_v24 = vld [vmem:[%s7933_s6 + $0x35c] sm:$0xf0] }
 0x333   : > { %v8283_v21 = vadd.f32 %v4802_v22, %v4754_v61  ;;  %v4708_v34 = vadd.f32 %v4707_v25, %v4659_v32  ;;  %4853 = vmatmul.bf16.gmra.mxu0 %v5835_v23  ;;  %v6807_v23 = vld [vmem:[%s7935_s1 + $0x340] sm:$0xff]  ;;  %v6684_v32 = vld [vmem:[%s7933_s6 + $0x364] sm:$0xf0] }
 0x334   : > { %4902 = vmatmul.bf16.gmra.mxu1 %v5839_v50  ;;  %v5962_v61 = vld [vmem:[%s7933_s6 + $0x320] sm:$0xf]  ;;  %v6675_v25 = vld [vmem:[%s7933_s6 + $0x324] sm:$0xf] }
 0x335   : > { %4951 = vmatmul.bf16.gmra.mxu2 %v5843_v26  ;;  %v5964_v26 = vld [vmem:[%s7933_s6 + $0x360] sm:$0xf0]  ;;  %5077 = vmatpush.bf16.msrb.mxu1 %v6807_v23 }
 0x336   : > { %5000 = vmatmul.bf16.gmra.mxu3 %v5847_v28  ;;  %v5970_v28 = vld [vmem:[%s7933_s6 + $0x328] sm:$0xf] }
 0x338   : > { %v4756_v38 = vpop.f32.mrf.mxu2  ;;  %v4660_v42 = vpop.f32.mrf.mxu0 }
 0x339   : > { %v4805_v62 = vpop.f32.mrf.mxu3  ;;  %v4757_v39 = vadd.f32 %v4756_v38, %v4708_v34  ;;  %v4709_v43 = vpop.f32.mrf.mxu1  ;;  %v4661_v44 = vadd.f32 %v4660_v42, %v8162_v20  ;;  %v5903_v20 = vor.u32 %v6659_v48, %v5900_v49  ;;  %v6676_v34 = vld [vmem:[%s7933_s6 + $0x32c] sm:$0xf]  ;;  %v5963_v38 = vor.u32 %v6683_v24, %v5962_v61 }
 0x33b   : > { %v8289_v45 = vadd.f32 %v4805_v62, %v4757_v39  ;;  %v4710_v18 = vadd.f32 %v4709_v43, %v4661_v44  ;;  %v5967_v62 = vor.u32 %v6675_v25, %v5964_v26  ;;  %v5971_v43 = vor.u32 %v6684_v32, %v5970_v28  ;;  %v5594_v28 = vld [vmem:[%s7933_s6 + $0x30] sm:$0xf] }
 0x33c   : > { %v5975_v44 = vor.u32 %v6676_v34, %v5972_v35  ;;  %v6589_v32 = vld [vmem:[%s7933_s6 + $0x6c] sm:$0xf0]  ;;  %v6581_v34 = vld [vmem:[%s7933_s6 + $0x34] sm:$0xf] }
 0x33d   : > { %v5596_v35 = vld [vmem:[%s7933_s6 + $0x70] sm:$0xf0] }
 0x340   : > { %v4758_v59 = vpop.f32.mrf.mxu2  ;;  %v4663_v0 = vpop.f32.mrf.mxu0 }
 0x341   : > { %v4807_v60 = vpop.f32.mrf.mxu3  ;;  %v4759_v29 = vadd.f32 %v4758_v59, %v4710_v18  ;;  %v4712_v3 = vpop.f32.mrf.mxu1  ;;  %v4664_v8 = vadd.f32 %v4663_v0, %v8167_v33  ;;  %v6026_v59 = vld [vmem:[%s7933_s6 + $0x3a0] sm:$0xf]  ;;  %v6700_v0 = vld [vmem:[%s7933_s6 + $0x3e4] sm:$0xf0] }
 0x343   : > { %v8301_v51 = vadd.f32 %v4807_v60, %v4759_v29  ;;  %v4713_v1 = vadd.f32 %v4712_v3, %v4664_v8  ;;  %4858 = vmatmul.bf16.gmra.mxu0 %v5899_v63  ;;  %v6699_v60 = vld [vmem:[%s7933_s6 + $0x3dc] sm:$0xf0]  ;;  %v6691_v63 = vld [vmem:[%s7933_s6 + $0x3a4] sm:$0xf]  ;;  %v6034_v29 = vld [vmem:[%s7933_s6 + $0x3a8] sm:$0xf] }
 0x344   : > { %4907 = vmatmul.bf16.gmra.mxu1 %v5903_v20  ;;  %v6028_v20 = vld [vmem:[%s7933_s6 + $0x3e0] sm:$0xf0]  ;;  %v6692_v3 = vld [vmem:[%s7933_s6 + $0x3ac] sm:$0xf] }
 0x345   : > { %4956 = vmatmul.bf16.gmra.mxu2 %v5907_v5  ;;  %v6036_v5 = vld [vmem:[%s7933_s6 + $0x3e8] sm:$0xf0]  ;;  %v6031_v9 = vor.u32 %v6691_v63, %v6028_v20 }
 0x346   : > { %5005 = vmatmul.bf16.gmra.mxu3 %v5911_v6 }
 0x348   : > { %v4761_v12 = vpop.f32.mrf.mxu2  ;;  %v4665_v16 = vpop.f32.mrf.mxu0 }
 0x349   : > { %v4810_v33 = vpop.f32.mrf.mxu3  ;;  %v4762_v14 = vadd.f32 %v4761_v12, %v4713_v1  ;;  %v4714_v17 = vpop.f32.mrf.mxu1  ;;  %v4666_v19 = vadd.f32 %v4665_v16, %v8178_v55  ;;  %v6027_v1 = vor.u32 %v6699_v60, %v6026_v59 }
 0x34b   : > { %v8307_v22 = vadd.f32 %v4810_v33, %v4762_v14  ;;  %v4715_v50 = vadd.f32 %v4714_v17, %v4666_v19  ;;  %v6035_v33 = vor.u32 %v6700_v0, %v6034_v29  ;;  %v5658_v29 = vld [vmem:[%s7933_s6 + $0xb0] sm:$0xf] }
 0x34c   : > { %v6605_v0 = vld [vmem:[%s7933_s6 + $0xec] sm:$0xf0] }
 0x350   : > { %v4763_v36 = vpop.f32.mrf.mxu2  ;;  %v4668_v42 = vpop.f32.mrf.mxu0 }
 0x351   : > { %v4812_v37 = vpop.f32.mrf.mxu3  ;;  %v4764_v39 = vadd.f32 %v4763_v36, %v4715_v50  ;;  %v4717_v55 = vpop.f32.mrf.mxu1  ;;  %v4669_v46 = vadd.f32 %v4668_v42, %v8183_v4  ;;  %v5602_v36 = vld [vmem:[%s7933_s6 + $0x38] sm:$0xf] }
 0x353   : > { %v8319_v18 = vadd.f32 %v4812_v37, %v4764_v39  ;;  %v4718_v31 = vadd.f32 %v4717_v55, %v4669_v46  ;;  %4863 = vmatmul.bf16.gmra.mxu0 %v5963_v38  ;;  %v6590_v37 = vld [vmem:[%s7933_s6 + $0x74] sm:$0xf0]  ;;  %v6582_v38 = vld [vmem:[%s7933_s6 + $0x3c] sm:$0xf]  ;;  %v5595_v55 = vor.u32 %v6589_v32, %v5594_v28 }
 0x354   : > { %4912 = vmatmul.bf16.gmra.mxu1 %v5967_v62  ;;  %v5604_v62 = vld [vmem:[%s7933_s6 + $0x78] sm:$0xf0] }
 0x355   : > { %4961 = vmatmul.bf16.gmra.mxu2 %v5971_v43  ;;  %v5599_v43 = vor.u32 %v6581_v34, %v5596_v35 }
 0x356   : > { %5010 = vmatmul.bf16.gmra.mxu3 %v5975_v44 }
 0x358   : > { %v4766_v47 = vpop.f32.mrf.mxu2  ;;  %v4670_v52 = vpop.f32.mrf.mxu0 }
 0x359   : > { %v4815_v48 = vpop.f32.mrf.mxu3  ;;  %v4767_v49 = vadd.f32 %v4766_v47, %v4718_v31  ;;  %v4719_v54 = vpop.f32.mrf.mxu1  ;;  %v4671_v4 = vadd.f32 %v4670_v52, %v8194_v27  ;;  %v6039_v27 = vor.u32 %v6692_v3, %v6036_v5  ;;  %v5603_v47 = vor.u32 %v6590_v37, %v5602_v36  ;;  %v6597_v3 = vld [vmem:[%s7933_s6 + $0xb4] sm:$0xf]  ;;  %v5722_v36 = vld [vmem:[%s7933_s6 + $0x130] sm:$0xf] }
 0x35a   : > { %v5660_v5 = vld [vmem:[%s7933_s6 + $0xf0] sm:$0xf0]  ;;  %v6621_v37 = vld [vmem:[%s7933_s6 + $0x16c] sm:$0xf0] }
 0x35b   : > { %v8322_v57 = vadd.f32 %v4815_v48, %v4767_v49  ;;  %v4720_v58 = vadd.f32 %v4719_v54, %v4671_v4 }
 0x360   : > { %v4768_v6 = vpop.f32.mrf.mxu2  ;;  %v4673_v11 = vpop.f32.mrf.mxu0 }
 0x361   : > { %v4817_v8 = vpop.f32.mrf.mxu3  ;;  %v4769_v10 = vadd.f32 %v4768_v6, %v4720_v58  ;;  %v4722_v12 = vpop.f32.mrf.mxu1  ;;  %v4674_v14 = vadd.f32 %v4673_v11, %v8199_v40  ;;  %v5666_v6 = vld [vmem:[%s7933_s6 + $0xb8] sm:$0xf] }
 0x363   : > { %v8333_v16 = vadd.f32 %v4817_v8, %v4769_v10  ;;  %v4723_v17 = vadd.f32 %v4722_v12, %v4674_v14  ;;  %4868 = vmatmul.bf16.gmra.mxu0 %v6027_v1  ;;  %v6606_v8 = vld [vmem:[%s7933_s6 + $0xf4] sm:$0xf0]  ;;  %v6598_v1 = vld [vmem:[%s7933_s6 + $0xbc] sm:$0xf]  ;;  %v5659_v12 = vor.u32 %v6605_v0, %v5658_v29 }
 0x364   : > { %4917 = vmatmul.bf16.gmra.mxu1 %v6031_v9  ;;  %v5668_v9 = vld [vmem:[%s7933_s6 + $0xf8] sm:$0xf0] }
 0x365   : > { %4966 = vmatmul.bf16.gmra.mxu2 %v6035_v33  ;;  %v5663_v33 = vor.u32 %v6597_v3, %v5660_v5 }
 0x366   : > { %5015 = vmatmul.bf16.gmra.mxu3 %v6039_v27 }
 0x368   : > { %v4771_v19 = vpop.f32.mrf.mxu2  ;;  %v4675_v61 = vpop.f32.mrf.mxu0 }
 0x369   : > { %v4820_v23 = vpop.f32.mrf.mxu3  ;;  %v4772_v50 = vadd.f32 %v4771_v19, %v4723_v17  ;;  %v4724_v24 = vpop.f32.mrf.mxu1  ;;  %v4676_v40 = vadd.f32 %v4675_v61, %v8211_v2  ;;  %v5607_v2 = vor.u32 %v6582_v38, %v5604_v62  ;;  %v5667_v19 = vor.u32 %v6606_v8, %v5666_v6  ;;  %v6613_v38 = vld [vmem:[%s7933_s6 + $0x134] sm:$0xf]  ;;  %v5786_v6 = vld [vmem:[%s7933_s6 + $0x1b0] sm:$0xf] }
 0x36a   : > { %v5724_v62 = vld [vmem:[%s7933_s6 + $0x170] sm:$0xf0]  ;;  %v6637_v8 = vld [vmem:[%s7933_s6 + $0x1ec] sm:$0xf0] }
 0x36b   : > { %v8336_v25 = vadd.f32 %v4820_v23, %v4772_v50  ;;  %v4725_v26 = vadd.f32 %v4724_v24, %v4676_v40 }
 0x370   : > { %v4773_v39 = vpop.f32.mrf.mxu2  ;;  %v4834_v46 = vpop.f32.mrf.mxu0 }
 0x371   : > { %v4822_v42 = vpop.f32.mrf.mxu3  ;;  %v4774_v44 = vadd.f32 %v4773_v39, %v4725_v26  ;;  %v4883_v31 = vpop.f32.mrf.mxu1  ;;  %v4835_v48 = vadd.f32 %v4834_v46, %v8217_v13  ;;  %v5730_v39 = vld [vmem:[%s7933_s6 + $0x138] sm:$0xf] }
 0x373   : > { %v8347_v49 = vadd.f32 %v4822_v42, %v4774_v44  ;;  %v4884_v52 = vadd.f32 %v4883_v31, %v4835_v48  ;;  %5029 = vmatmul.bf16.vlgmr.msrb.gmra.mxu0 %v5595_v55  ;;  %v6622_v42 = vld [vmem:[%s7933_s6 + $0x174] sm:$0xf0]  ;;  %v6614_v55 = vld [vmem:[%s7933_s6 + $0x13c] sm:$0xf]  ;;  %v5723_v31 = vor.u32 %v6621_v37, %v5722_v36 }
 0x374   : > { %5078 = vmatmul.bf16.vlgmr.msrb.gmra.mxu1 %v5599_v43  ;;  %v5732_v43 = vld [vmem:[%s7933_s6 + $0x178] sm:$0xf0] }
 0x375   : > { %5127 = vmatmul.bf16.vlgmr.msrb.gmra.mxu2 %v5603_v47  ;;  %v5727_v47 = vor.u32 %v6613_v38, %v5724_v62 }
 0x376   : > { %5176 = vmatmul.bf16.vlgmr.msrb.gmra.mxu3 %v5607_v2 }
 0x378   : > { %v4932_v54 = vpop.f32.mrf.mxu2  ;;  %v4836_v59 = vpop.f32.mrf.mxu0 }
 0x379   : > { %v4981_v4 = vpop.f32.mrf.mxu3  ;;  %v4933_v58 = vadd.f32 %v4932_v54, %v4884_v52  ;;  %v4885_v60 = vpop.f32.mrf.mxu1  ;;  %v4837_v13 = vadd.f32 %v4836_v59, %v8229_v41  ;;  %v5671_v41 = vor.u32 %v6598_v1, %v5668_v9  ;;  %v5731_v54 = vor.u32 %v6622_v42, %v5730_v39  ;;  %v6629_v1 = vld [vmem:[%s7933_s6 + $0x1b4] sm:$0xf]  ;;  %v5850_v39 = vld [vmem:[%s7933_s6 + $0x230] sm:$0xf] }
 0x37a   : > { %v5788_v9 = vld [vmem:[%s7933_s6 + $0x1f0] sm:$0xf0]  ;;  %v6653_v42 = vld [vmem:[%s7933_s6 + $0x26c] sm:$0xf0] }
 0x37b   : > { %v8350_v63 = vadd.f32 %v4981_v4, %v4933_v58  ;;  %v4886_v20 = vadd.f32 %v4885_v60, %v4837_v13 }
 0x380   : > { %v4934_v10 = vpop.f32.mrf.mxu2  ;;  %v4839_v14 = vpop.f32.mrf.mxu0 }
 0x381   : > { %v4983_v11 = vpop.f32.mrf.mxu3  ;;  %v4935_v27 = vadd.f32 %v4934_v10, %v4886_v20  ;;  %v4888_v17 = vpop.f32.mrf.mxu1  ;;  %v4840_v23 = vadd.f32 %v4839_v14, %v8235_v53  ;;  %v5794_v10 = vld [vmem:[%s7933_s6 + $0x1b8] sm:$0xf] }
 0x383   : > { %v8361_v50 = vadd.f32 %v4983_v11, %v4935_v27  ;;  %v4889_v61 = vadd.f32 %v4888_v17, %v4840_v23  ;;  %5034 = vmatmul.bf16.gmra.mxu0 %v5659_v12  ;;  %v6638_v11 = vld [vmem:[%s7933_s6 + $0x1f4] sm:$0xf0]  ;;  %v6630_v12 = vld [vmem:[%s7933_s6 + $0x1bc] sm:$0xf]  ;;  %v5787_v17 = vor.u32 %v6637_v8, %v5786_v6 }
 0x384   : > { %5083 = vmatmul.bf16.gmra.mxu1 %v5663_v33  ;;  %v5796_v33 = vld [vmem:[%s7933_s6 + $0x1f8] sm:$0xf0] }
 0x385   : > { %5132 = vmatmul.bf16.gmra.mxu2 %v5667_v19  ;;  %v5791_v19 = vor.u32 %v6629_v1, %v5788_v9 }
 0x386   : > { %5181 = vmatmul.bf16.gmra.mxu3 %v5671_v41 }
 0x388   : > { %v4937_v24 = vpop.f32.mrf.mxu2  ;;  %v4841_v28 = vpop.f32.mrf.mxu0 }
 0x389   : > { %v4986_v40 = vpop.f32.mrf.mxu3  ;;  %v4938_v26 = vadd.f32 %v4937_v24, %v4889_v61  ;;  %v4890_v32 = vpop.f32.mrf.mxu1  ;;  %v4842_v53 = vadd.f32 %v4841_v28, %v8247_v15  ;;  %v5735_v15 = vor.u32 %v6614_v55, %v5732_v43  ;;  %v5795_v24 = vor.u32 %v6638_v11, %v5794_v10  ;;  %v6645_v55 = vld [vmem:[%s7933_s6 + $0x234] sm:$0xf]  ;;  %v5914_v10 = vld [vmem:[%s7933_s6 + $0x2b0] sm:$0xf] }
 0x38a   : > { %v5852_v43 = vld [vmem:[%s7933_s6 + $0x270] sm:$0xf0]  ;;  %v6669_v11 = vld [vmem:[%s7933_s6 + $0x2ec] sm:$0xf0] }
 0x38b   : > { %v8364_v34 = vadd.f32 %v4986_v40, %v4938_v26  ;;  %v4891_v35 = vadd.f32 %v4890_v32, %v4842_v53 }
 0x390   : > { %v4939_v44 = vpop.f32.mrf.mxu2  ;;  %v4844_v48 = vpop.f32.mrf.mxu0 }
 0x391   : > { %v4988_v46 = vpop.f32.mrf.mxu3  ;;  %v4940_v2 = vadd.f32 %v4939_v44, %v4891_v35  ;;  %v4893_v52 = vpop.f32.mrf.mxu1  ;;  %v4845_v4 = vadd.f32 %v4844_v48, %v8253_v30  ;;  %v5858_v44 = vld [vmem:[%s7933_s6 + $0x238] sm:$0xf] }
 0x393   : > { %v8375_v58 = vadd.f32 %v4988_v46, %v4940_v2  ;;  %v4894_v59 = vadd.f32 %v4893_v52, %v4845_v4  ;;  %5039 = vmatmul.bf16.gmra.mxu0 %v5723_v31  ;;  %v6654_v46 = vld [vmem:[%s7933_s6 + $0x274] sm:$0xf0]  ;;  %v6646_v31 = vld [vmem:[%s7933_s6 + $0x23c] sm:$0xf]  ;;  %v5851_v52 = vor.u32 %v6653_v42, %v5850_v39 }
 0x394   : > { %5088 = vmatmul.bf16.gmra.mxu1 %v5727_v47  ;;  %v5860_v47 = vld [vmem:[%s7933_s6 + $0x278] sm:$0xf0] }
 0x395   : > { %5137 = vmatmul.bf16.gmra.mxu2 %v5731_v54  ;;  %v5855_v54 = vor.u32 %v6645_v55, %v5852_v43 }
 0x396   : > { %5186 = vmatmul.bf16.gmra.mxu3 %v5735_v15 }
 0x398   : > { %v4942_v60 = vpop.f32.mrf.mxu2  ;;  %v4846_v29 = vpop.f32.mrf.mxu0 }
 0x399   : > { %v4991_v13 = vpop.f32.mrf.mxu3  ;;  %v4943_v20 = vadd.f32 %v4942_v60, %v4894_v59  ;;  %v4895_v0 = vpop.f32.mrf.mxu1  ;;  %v4847_v30 = vadd.f32 %v4846_v29, %v8265_v56  ;;  %v5799_v56 = vor.u32 %v6630_v12, %v5796_v33  ;;  %v5859_v60 = vor.u32 %v6654_v46, %v5858_v44  ;;  %v6661_v12 = vld [vmem:[%s7933_s6 + $0x2b4] sm:$0xf]  ;;  %v5978_v44 = vld [vmem:[%s7933_s6 + $0x330] sm:$0xf] }
 0x39a   : > { %v5916_v33 = vld [vmem:[%s7933_s6 + $0x2f0] sm:$0xf0]  ;;  %v6685_v46 = vld [vmem:[%s7933_s6 + $0x36c] sm:$0xf0] }
 0x39b   : > { %v8378_v3 = vadd.f32 %v4991_v13, %v4943_v20  ;;  %v4896_v5 = vadd.f32 %v4895_v0, %v4847_v30 }
 0x3a0   : > { %v4944_v27 = vpop.f32.mrf.mxu2  ;;  %v4849_v23 = vpop.f32.mrf.mxu0 }
 0x3a1   : > { %v4993_v14 = vpop.f32.mrf.mxu3  ;;  %v4945_v41 = vadd.f32 %v4944_v27, %v4896_v5  ;;  %v4898_v61 = vpop.f32.mrf.mxu1  ;;  %v4850_v40 = vadd.f32 %v4849_v23, %v8271_v7  ;;  %v5922_v27 = vld [vmem:[%s7933_s6 + $0x2b8] sm:$0xf] }
 0x3a3   : > { %v8389_v26 = vadd.f32 %v4993_v14, %v4945_v41  ;;  %v4899_v28 = vadd.f32 %v4898_v61, %v4850_v40  ;;  %5044 = vmatmul.bf16.gmra.mxu0 %v5787_v17  ;;  %v6670_v14 = vld [vmem:[%s7933_s6 + $0x2f4] sm:$0xf0]  ;;  %v6662_v17 = vld [vmem:[%s7933_s6 + $0x2bc] sm:$0xf]  ;;  %v5915_v61 = vor.u32 %v6669_v11, %v5914_v10 }
 0x3a4   : > { %5093 = vmatmul.bf16.gmra.mxu1 %v5791_v19  ;;  %v5924_v19 = vld [vmem:[%s7933_s6 + $0x2f8] sm:$0xf0] }
 0x3a5   : > { %5142 = vmatmul.bf16.gmra.mxu2 %v5795_v24  ;;  %v5919_v24 = vor.u32 %v6661_v12, %v5916_v33 }
 0x3a6   : > { %5191 = vmatmul.bf16.gmra.mxu3 %v5799_v56 }
 0x3a8   : > { %v4947_v32 = vpop.f32.mrf.mxu2  ;;  %v4851_v36 = vpop.f32.mrf.mxu0 }
 0x3a9   : > { %v4996_v53 = vpop.f32.mrf.mxu3  ;;  %v4948_v35 = vadd.f32 %v4947_v32, %v4899_v28  ;;  %v4900_v37 = vpop.f32.mrf.mxu1  ;;  %v4852_v7 = vadd.f32 %v4851_v36, %v8283_v21  ;;  %v5863_v21 = vor.u32 %v6646_v31, %v5860_v47  ;;  %v5923_v32 = vor.u32 %v6670_v14, %v5922_v27  ;;  %v6677_v31 = vld [vmem:[%s7933_s6 + $0x334] sm:$0xf]  ;;  %v6042_v27 = vld [vmem:[%s7933_s6 + $0x3b0] sm:$0xf] }
 0x3aa   : > { %v5980_v47 = vld [vmem:[%s7933_s6 + $0x370] sm:$0xf0]  ;;  %v6701_v14 = vld [vmem:[%s7933_s6 + $0x3ec] sm:$0xf0] }
 0x3ab   : > { %v8392_v38 = vadd.f32 %v4996_v53, %v4948_v35  ;;  %v4901_v62 = vadd.f32 %v4900_v37, %v4852_v7 }
 0x3b0   : > { %v4949_v2 = vpop.f32.mrf.mxu2  ;;  %v4854_v4 = vpop.f32.mrf.mxu0 }
 0x3b1   : > { %v4998_v48 = vpop.f32.mrf.mxu3  ;;  %v4950_v15 = vadd.f32 %v4949_v2, %v4901_v62  ;;  %v4903_v59 = vpop.f32.mrf.mxu1  ;;  %v4855_v13 = vadd.f32 %v4854_v4, %v8289_v45  ;;  %v5986_v2 = vld [vmem:[%s7933_s6 + $0x338] sm:$0xf] }
 0x3b3   : > { %v8403_v20 = vadd.f32 %v4998_v48, %v4950_v15  ;;  %v4904_v29 = vadd.f32 %v4903_v59, %v4855_v13  ;;  %5049 = vmatmul.bf16.gmra.mxu0 %v5851_v52  ;;  %v6686_v48 = vld [vmem:[%s7933_s6 + $0x374] sm:$0xf0]  ;;  %v6678_v52 = vld [vmem:[%s7933_s6 + $0x33c] sm:$0xf]  ;;  %v5979_v59 = vor.u32 %v6685_v46, %v5978_v44 }
 0x3b4   : > { %5098 = vmatmul.bf16.gmra.mxu1 %v5855_v54  ;;  %v5988_v54 = vld [vmem:[%s7933_s6 + $0x378] sm:$0xf0] }
 0x3b5   : > { %5147 = vmatmul.bf16.gmra.mxu2 %v5859_v60  ;;  %v5983_v60 = vor.u32 %v6677_v31, %v5980_v47 }
 0x3b6   : > { %5196 = vmatmul.bf16.gmra.mxu3 %v5863_v21 }
 0x3b8   : > { %v4952_v0 = vpop.f32.mrf.mxu2  ;;  %v4856_v6 = vpop.f32.mrf.mxu0 }
 0x3b9   : > { %v5001_v30 = vpop.f32.mrf.mxu3  ;;  %v4953_v5 = vadd.f32 %v4952_v0, %v4904_v29  ;;  %v4905_v8 = vpop.f32.mrf.mxu1  ;;  %v4857_v45 = vadd.f32 %v4856_v6, %v8301_v51  ;;  %v5927_v51 = vor.u32 %v6662_v17, %v5924_v19  ;;  %v5987_v0 = vor.u32 %v6686_v48, %v5986_v2  ;;  %v6693_v17 = vld [vmem:[%s7933_s6 + $0x3b4] sm:$0xf] }
 0x3ba   : > { %v6044_v19 = vld [vmem:[%s7933_s6 + $0x3f0] sm:$0xf0] }
 0x3bb   : > { %v8406_v1 = vadd.f32 %v5001_v30, %v4953_v5  ;;  %v4906_v9 = vadd.f32 %v4905_v8, %v4857_v45 }
 0x3c0   : > { %v4954_v41 = vpop.f32.mrf.mxu2  ;;  %v4859_v40 = vpop.f32.mrf.mxu0 }
 0x3c1   : > { %v5003_v23 = vpop.f32.mrf.mxu3  ;;  %v4955_v56 = vadd.f32 %v4954_v41, %v4906_v9  ;;  %v4908_v28 = vpop.f32.mrf.mxu1  ;;  %v4860_v53 = vadd.f32 %v4859_v40, %v8307_v22  ;;  %v6050_v41 = vld [vmem:[%s7933_s6 + $0x3b8] sm:$0xf] }
 0x3c3   : > { %v8417_v35 = vadd.f32 %v5003_v23, %v4955_v56  ;;  %v4909_v36 = vadd.f32 %v4908_v28, %v4860_v53  ;;  %5054 = vmatmul.bf16.gmra.mxu0 %v5915_v61  ;;  %v6702_v23 = vld [vmem:[%s7933_s6 + $0x3f4] sm:$0xf0]  ;;  %v6694_v61 = vld [vmem:[%s7933_s6 + $0x3bc] sm:$0xf]  ;;  %v6043_v28 = vor.u32 %v6701_v14, %v6042_v27  ;;  %v2626_v27 = vld [vmem:[#allocation2] sm:$0xff] }
 0x3c4   : > { %5103 = vmatmul.bf16.gmra.mxu1 %v5919_v24  ;;  %v6052_v24 = vld [vmem:[%s7933_s6 + $0x3f8] sm:$0xf0] }
 0x3c5   : > { %5152 = vmatmul.bf16.gmra.mxu2 %v5923_v32  ;;  %v6047_v32 = vor.u32 %v6693_v17, %v6044_v19 }
 0x3c6   : > { %5201 = vmatmul.bf16.gmra.mxu3 %v5927_v51 }
 0x3c8   : > { %v4957_v37 = vpop.f32.mrf.mxu2  ;;  %v4861_v39 = vpop.f32.mrf.mxu0 }
 0x3c9   : > { %v5006_v7 = vpop.f32.mrf.mxu3  ;;  %v4958_v62 = vadd.f32 %v4957_v37, %v4909_v36  ;;  %v4910_v42 = vpop.f32.mrf.mxu1  ;;  %v4862_v22 = vadd.f32 %v4861_v39, %v8319_v18  ;;  %v5991_v18 = vor.u32 %v6678_v52, %v5988_v54  ;;  %v6051_v37 = vor.u32 %v6702_v23, %v6050_v41 }
 0x3cb   : > { %v8420_v55 = vadd.f32 %v5006_v7, %v4958_v62  ;;  %v4911_v43 = vadd.f32 %v4910_v42, %v4862_v22 }
 0x3d0   : > { %v4959_v15 = vpop.f32.mrf.mxu2  ;;  %v4864_v13 = vpop.f32.mrf.mxu0 }
 0x3d1   : > { %v5008_v4 = vpop.f32.mrf.mxu3  ;;  %v4960_v21 = vadd.f32 %v4959_v15, %v4911_v43  ;;  %v4913_v29 = vpop.f32.mrf.mxu1  ;;  %v4865_v30 = vadd.f32 %v4864_v13, %v8322_v57 }
 0x3d3   : > { %v8431_v5 = vadd.f32 %v5008_v4, %v4960_v21  ;;  %v4914_v6 = vadd.f32 %v4913_v29, %v4865_v30  ;;  %5059 = vmatmul.bf16.gmra.mxu0 %v5979_v59  ;;  %v2625_v30 = vld [vmem:[#allocation2 + $0x30] sm:$0xff] }
 0x3d4   : > { %5108 = vmatmul.bf16.gmra.mxu1 %v5983_v60 }
 0x3d5   : > { %5157 = vmatmul.bf16.gmra.mxu2 %v5987_v0 }
 0x3d6   : > { %5206 = vmatmul.bf16.gmra.mxu3 %v5991_v18 }
 0x3d8   : > { %v4962_v8 = vpop.f32.mrf.mxu2  ;;  %v4866_v10 = vpop.f32.mrf.mxu0 }
 0x3d9   : > { %v5011_v45 = vpop.f32.mrf.mxu3  ;;  %v4963_v9 = vadd.f32 %v4962_v8, %v4914_v6  ;;  %v4915_v11 = vpop.f32.mrf.mxu1  ;;  %v4867_v57 = vadd.f32 %v4866_v10, %v8333_v16  ;;  %v6055_v16 = vor.u32 %v6694_v61, %v6052_v24 }
 0x3db   : > { %v8434_v12 = vadd.f32 %v5011_v45, %v4963_v9  ;;  %v4916_v33 = vadd.f32 %v4915_v11, %v4867_v57 }
 0x3e0   : > { %v4964_v56 = vpop.f32.mrf.mxu2  ;;  %v4869_v53 = vpop.f32.mrf.mxu0 }
 0x3e1   : > { %v5013_v40 = vpop.f32.mrf.mxu3  ;;  %v4965_v51 = vadd.f32 %v4964_v56, %v4916_v33  ;;  %v4918_v36 = vpop.f32.mrf.mxu1  ;;  %v4870_v7 = vadd.f32 %v4869_v53, %v8336_v25  ;;  %v2627_v56 = vld [vmem:[#allocation2 + $0x58] sm:$0xff] }
 0x3e3   : > { %v8445_v62 = vadd.f32 %v5013_v40, %v4965_v51  ;;  %v4919_v39 = vadd.f32 %v4918_v36, %v4870_v7  ;;  %5064 = vmatmul.bf16.gmra.mxu0 %v6043_v28  ;;  %v2628_v7 = vld [vmem:[#allocation2 + $0x18] sm:$0xff] }
 0x3e4   : > { %5113 = vmatmul.bf16.gmra.mxu1 %v6047_v32 }
 0x3e5   : > { %5162 = vmatmul.bf16.gmra.mxu2 %v6051_v37 }
 0x3e6   : > { %5211 = vmatmul.bf16.gmra.mxu3 %v6055_v16 }
 0x3e8   : > { %v4967_v42 = vpop.f32.mrf.mxu2  ;;  %v4871_v44 = vpop.f32.mrf.mxu0 }
 0x3e9   : > { %v5016_v22 = vpop.f32.mrf.mxu3  ;;  %v4968_v43 = vadd.f32 %v4967_v42, %v4919_v39  ;;  %v4920_v46 = vpop.f32.mrf.mxu1  ;;  %v4872_v31 = vadd.f32 %v4871_v44, %v8347_v49 }
 0x3eb   : > { %v8448_v47 = vadd.f32 %v5016_v22, %v4968_v43  ;;  %v4921_v2 = vadd.f32 %v4920_v46, %v4872_v31 }
 0x3f0   : > { %v4969_v48 = vpop.f32.mrf.mxu2  ;;  %v5030_v54 = vpop.f32.mrf.mxu0 }
 0x3f1   : > { %v5018_v52 = vpop.f32.mrf.mxu3  ;;  %v4970_v25 = vadd.f32 %v4969_v48, %v4921_v2  ;;  %v5079_v15 = vpop.f32.mrf.mxu1  ;;  %v5031_v59 = vadd.f32 %v5030_v54, %v8350_v63  ;;  %v2629_v48 = vld [vmem:[#allocation2 + $0x50] sm:$0xff] }
 0x3f3   : > { %v8450_v4 = vadd.f32 %v5018_v52, %v4970_v25  ;;  %v5080_v60 = vadd.f32 %v5079_v15, %v5031_v59 }
 0x3f8   : > { %v5128_v21 = vpop.f32.mrf.mxu2  ;;  %v5032_v0 = vpop.f32.mrf.mxu0 }
 0x3f9   : > { %v5177_v13 = vpop.f32.mrf.mxu3  ;;  %v5129_v29 = vadd.f32 %v5128_v21, %v5080_v60  ;;  %v5081_v18 = vpop.f32.mrf.mxu1  ;;  %v5033_v6 = vadd.f32 %v5032_v0, %v8361_v50 }
 0x3fb   : > { %v5178_v49 = vadd.f32 %v5177_v13, %v5129_v29  ;;  %v5082_v45 = vadd.f32 %v5081_v18, %v5033_v6  ;;  %v2630_v29 = vld [vmem:[#allocation2 + $0x68] sm:$0xff] }
 0x3fd   : > { %v5217_v8 = vadd.f32 %v5178_v49, %v2625_v30 }
 0x3ff   : > { %5233 = vst [vmem:[#allocation2 + $0x30] sm:$0xff] %v5217_v8 }
 0x400   : > { %v5130_v9 = vpop.f32.mrf.mxu2  ;;  %v5035_v57 = vpop.f32.mrf.mxu0 }
 0x401   : > { %v5179_v10 = vpop.f32.mrf.mxu3  ;;  %v5131_v11 = vadd.f32 %v5130_v9, %v5082_v45  ;;  %v5084_v33 = vpop.f32.mrf.mxu1  ;;  %v5036_v14 = vadd.f32 %v5035_v57, %v8364_v34 }
 0x403   : > { %v5180_v63 = vadd.f32 %v5179_v10, %v5131_v11  ;;  %v5085_v19 = vadd.f32 %v5084_v33, %v5036_v14  ;;  %v2631_v10 = vld [vmem:[#allocation2 + $0x8] sm:$0xff] }
 0x405   : > { %v5218_v17 = vadd.f32 %v5180_v63, %v2626_v27 }
 0x407   : > { %5234 = vst [vmem:[#allocation2] sm:$0xff] %v5218_v17 }
 0x408   : > { %v5133_v41 = vpop.f32.mrf.mxu2  ;;  %v5037_v24 = vpop.f32.mrf.mxu0 }
 0x409   : > { %v5182_v23 = vpop.f32.mrf.mxu3  ;;  %v5134_v61 = vadd.f32 %v5133_v41, %v5085_v19  ;;  %v5086_v50 = vpop.f32.mrf.mxu1  ;;  %v5038_v28 = vadd.f32 %v5037_v24, %v8375_v58  ;;  %v2632_v41 = vld [vmem:[#allocation2 + $0x48] sm:$0xff] }
 0x40b   : > { %v5183_v40 = vadd.f32 %v5182_v23, %v5134_v61  ;;  %v5087_v51 = vadd.f32 %v5086_v50, %v5038_v28 }
 0x40d   : > { %v5219_v32 = vadd.f32 %v5183_v40, %v2627_v56 }
 0x40f   : > { %5235 = vst [vmem:[#allocation2 + $0x58] sm:$0xff] %v5219_v32 }
 0x410   : > { %v5135_v53 = vpop.f32.mrf.mxu2  ;;  %v5040_v16 = vpop.f32.mrf.mxu0 }
 0x411   : > { %v5184_v36 = vpop.f32.mrf.mxu3  ;;  %v5136_v37 = vadd.f32 %v5135_v53, %v5087_v51  ;;  %v5089_v34 = vpop.f32.mrf.mxu1  ;;  %v5041_v42 = vadd.f32 %v5040_v16, %v8378_v3  ;;  %v2633_v51 = vld [vmem:[#allocation2 + $0x40] sm:$0xff] }
 0x413   : > { %v5185_v39 = vadd.f32 %v5184_v36, %v5136_v37  ;;  %v5090_v43 = vadd.f32 %v5089_v34, %v5041_v42 }
 0x415   : > { %v5220_v22 = vadd.f32 %v5185_v39, %v2628_v7 }
 0x417   : > { %5236 = vst [vmem:[#allocation2 + $0x18] sm:$0xff] %v5220_v22  ;;  %v2634_v22 = vld [vmem:[#allocation2 + $0x20] sm:$0xff] }
 0x418   : > { %v5138_v44 = vpop.f32.mrf.mxu2  ;;  %v5042_v2 = vpop.f32.mrf.mxu0 }
 0x419   : > { %v5187_v46 = vpop.f32.mrf.mxu3  ;;  %v5139_v31 = vadd.f32 %v5138_v44, %v5090_v43  ;;  %v5091_v58 = vpop.f32.mrf.mxu1  ;;  %v5043_v25 = vadd.f32 %v5042_v2, %v8389_v26 }
 0x41b   : > { %v5188_v52 = vadd.f32 %v5187_v46, %v5139_v31  ;;  %v5092_v15 = vadd.f32 %v5091_v58, %v5043_v25  ;;  %v2635_v25 = vld [vmem:[#allocation2 + $0x10] sm:$0xff] }
 0x41d   : > { %v5221_v54 = vadd.f32 %v5188_v52, %v2629_v48 }
 0x41f   : > { %5237 = vst [vmem:[#allocation2 + $0x50] sm:$0xff] %v5221_v54 }
 0x420   : > { %v5140_v59 = vpop.f32.mrf.mxu2  ;;  %v5045_v13 = vpop.f32.mrf.mxu0 }
 0x421   : > { %v5189_v60 = vpop.f32.mrf.mxu3  ;;  %v5141_v21 = vadd.f32 %v5140_v59, %v5092_v15  ;;  %v5094_v3 = vpop.f32.mrf.mxu1  ;;  %v5046_v18 = vadd.f32 %v5045_v13, %v8392_v38 }
 0x423   : > { %v5190_v0 = vadd.f32 %v5189_v60, %v5141_v21  ;;  %v5095_v49 = vadd.f32 %v5094_v3, %v5046_v18 }
 0x425   : > { %v5222_v30 = vadd.f32 %v5190_v0, %v2630_v29  ;;  %v2636_v0 = vld [vmem:[#allocation2 + $0x38] sm:$0xff] }
 0x427   : > { %5238 = vst [vmem:[#allocation2 + $0x68] sm:$0xff] %v5222_v30 }
 0x428   : > { %v5143_v6 = vpop.f32.mrf.mxu2  ;;  %v5047_v9 = vpop.f32.mrf.mxu0 }
 0x429   : > { %v5192_v8 = vpop.f32.mrf.mxu3  ;;  %v5144_v45 = vadd.f32 %v5143_v6, %v5095_v49  ;;  %v5096_v26 = vpop.f32.mrf.mxu1  ;;  %v5048_v57 = vadd.f32 %v5047_v9, %v8403_v20 }
 0x42b   : > { %v5193_v11 = vadd.f32 %v5192_v8, %v5144_v45  ;;  %v5097_v27 = vadd.f32 %v5096_v26, %v5048_v57 }
 0x42d   : > { %v5223_v33 = vadd.f32 %v5193_v11, %v2631_v10 }
 0x42f   : > { %5239 = vst [vmem:[#allocation2 + $0x8] sm:$0xff] %v5223_v33 }
 0x430   : > { %v5145_v63 = vpop.f32.mrf.mxu2  ;;  %v5050_v19 = vpop.f32.mrf.mxu0 }
 0x431   : > { %v5194_v14 = vpop.f32.mrf.mxu3  ;;  %v5146_v17 = vadd.f32 %v5145_v63, %v5097_v27  ;;  %v5099_v38 = vpop.f32.mrf.mxu1  ;;  %v5051_v61 = vadd.f32 %v5050_v19, %v8406_v1 }
 0x433   : > { %v5195_v23 = vadd.f32 %v5194_v14, %v5146_v17  ;;  %v5100_v50 = vadd.f32 %v5099_v38, %v5051_v61 }
 0x435   : > { %v5224_v24 = vadd.f32 %v5195_v23, %v2632_v41 }
 0x437   : > { %5240 = vst [vmem:[#allocation2 + $0x48] sm:$0xff] %v5224_v24 }
 0x438   : > { %v5148_v56 = vpop.f32.mrf.mxu2  ;;  %v5052_v32 = vpop.f32.mrf.mxu0 }
 0x439   : > { %v5197_v40 = vpop.f32.mrf.mxu3  ;;  %v5149_v28 = vadd.f32 %v5148_v56, %v5100_v50  ;;  %v5101_v20 = vpop.f32.mrf.mxu1  ;;  %v5053_v36 = vadd.f32 %v5052_v32, %v8417_v35 }
 0x43b   : > { %v5198_v53 = vadd.f32 %v5197_v40, %v5149_v28  ;;  %v5102_v16 = vadd.f32 %v5101_v20, %v5053_v36 }
 0x43d   : > { %v5225_v37 = vadd.f32 %v5198_v53, %v2633_v51 }
 0x43f   : > { %5241 = vst [vmem:[#allocation2 + $0x40] sm:$0xff] %v5225_v37 }
 0x440   : > { %v5150_v34 = vpop.f32.mrf.mxu2  ;;  %v5055_v42 = vpop.f32.mrf.mxu0 }
 0x441   : > { %v5199_v7 = vpop.f32.mrf.mxu3  ;;  %v5151_v39 = vadd.f32 %v5150_v34, %v5102_v16  ;;  %v5104_v1 = vpop.f32.mrf.mxu1  ;;  %v5056_v44 = vadd.f32 %v5055_v42, %v8420_v55  ;;  %v2640_v34 = vld [vmem:[#allocation2 + $0x28] sm:$0xff] }
 0x443   : > { %v5200_v43 = vadd.f32 %v5199_v7, %v5151_v39  ;;  %v5105_v31 = vadd.f32 %v5104_v1, %v5056_v44 }
 0x445   : > { %v5226_v46 = vadd.f32 %v5200_v43, %v2634_v22 }
 0x447   : > { %5242 = vst [vmem:[#allocation2 + $0x20] sm:$0xff] %v5226_v46 }
 0x448   : > { %v5153_v2 = vpop.f32.mrf.mxu2  ;;  %v5057_v52 = vpop.f32.mrf.mxu0 }
 0x449   : > { %v5202_v58 = vpop.f32.mrf.mxu3  ;;  %v5154_v48 = vadd.f32 %v5153_v2, %v5105_v31  ;;  %v5106_v35 = vpop.f32.mrf.mxu1  ;;  %v5058_v15 = vadd.f32 %v5057_v52, %v8431_v5  ;;  %v2637_v5 = vld [vmem:[#allocation2 + $0x60] sm:$0xff] }
 0x44b   : > { %v5203_v54 = vadd.f32 %v5202_v58, %v5154_v48  ;;  %v5107_v60 = vadd.f32 %v5106_v35, %v5058_v15 }
 0x44d   : > { %v5227_v59 = vadd.f32 %v5203_v54, %v2635_v25 }
 0x44f   : > { %5243 = vst [vmem:[#allocation2 + $0x10] sm:$0xff] %v5227_v59 }
 0x450   : > { %v5155_v21 = vpop.f32.mrf.mxu2  ;;  %v5060_v29 = vpop.f32.mrf.mxu0 }
 0x451   : > { %v5204_v13 = vpop.f32.mrf.mxu3  ;;  %v5156_v3 = vadd.f32 %v5155_v21, %v5107_v60  ;;  %v5109_v55 = vpop.f32.mrf.mxu1  ;;  %v5061_v30 = vadd.f32 %v5060_v29, %v8434_v12  ;;  %v2638_v12 = vld [vmem:[#allocation2 + $0x70] sm:$0xff] }
 0x453   : > { %v5205_v18 = vadd.f32 %v5204_v13, %v5156_v3  ;;  %v5110_v6 = vadd.f32 %v5109_v55, %v5061_v30 }
 0x455   : > { %v5228_v49 = vadd.f32 %v5205_v18, %v2636_v0 }
 0x457   : > { %5244 = vst [vmem:[#allocation2 + $0x38] sm:$0xff] %v5228_v49 }
 0x458   : > { %v5158_v8 = vpop.f32.mrf.mxu2  ;;  %v5062_v26 = vpop.f32.mrf.mxu0 }
 0x459   : > { %v5207_v45 = vpop.f32.mrf.mxu3  ;;  %v5159_v9 = vadd.f32 %v5158_v8, %v5110_v6  ;;  %v5111_v10 = vpop.f32.mrf.mxu1  ;;  %v5063_v57 = vadd.f32 %v5062_v26, %v8445_v62  ;;  %v2639_v62 = vld [vmem:[#allocation2 + $0x78] sm:$0xff] }
 0x45b   : > { %v5208_v11 = vadd.f32 %v5207_v45, %v5159_v9  ;;  %v5112_v27 = vadd.f32 %v5111_v10, %v5063_v57 }
 0x45d   : > { %v5229_v33 = vadd.f32 %v5208_v11, %v2637_v5 }
 0x45f   : > { %5245 = vst [vmem:[#allocation2 + $0x60] sm:$0xff] %v5229_v33 }
 0x460   : > { %v5160_v63 = vpop.f32.mrf.mxu2  ;;  %v5065_v19 = vpop.f32.mrf.mxu0 }
 0x461   : > { %v5209_v14 = vpop.f32.mrf.mxu3  ;;  %v5161_v17 = vadd.f32 %v5160_v63, %v5112_v27  ;;  %v5066_v41 = vadd.f32 %v5065_v19, %v8448_v47  ;;  %v5114_v23 = vpop.f32.mrf.mxu1 }
 0x463   : > { %v5210_v38 = vadd.f32 %v5209_v14, %v5161_v17  ;;  %v5115_v24 = vadd.f32 %v5114_v23, %v5066_v41 }
 0x465   : > { %v5230_v61 = vadd.f32 %v5210_v38, %v2638_v12 }
 0x467   : > { %5246 = vst [vmem:[#allocation2 + $0x70] sm:$0xff] %v5230_v61 }
 0x468   : > { %v5163_v50 = vpop.f32.mrf.mxu2  ;;  %v5067_v28 = vpop.f32.mrf.mxu0 }
 0x469   : > { %v5212_v56 = vpop.f32.mrf.mxu3  ;;  %v5164_v40 = vadd.f32 %v5163_v50, %v5115_v24  ;;  %v5068_v20 = vadd.f32 %v5067_v28, %v8450_v4  ;;  %v5116_v53 = vpop.f32.mrf.mxu1 }
 0x46b   : > { %v5213_v32 = vadd.f32 %v5212_v56, %v5164_v40  ;;  %v5117_v36 = vadd.f32 %v5116_v53, %v5068_v20 }
 0x46d   : > { %v5231_v51 = vadd.f32 %v5213_v32, %v2639_v62 }
 0x46f   : > { %5247 = vst [vmem:[#allocation2 + $0x78] sm:$0xff] %v5231_v51 }
 0x470   : > { %v5165_v37 = vpop.f32.mrf.mxu2 }
 0x471   : > { %v5166_v16 = vadd.f32 %v5165_v37, %v5117_v36  ;;  %v5214_v47 = vpop.f32.mrf.mxu3 }
 0x473   : > { %v5215_v7 = vadd.f32 %v5214_v47, %v5166_v16  ;;  %5252 = sbr.rel (%p6568_p5) target bundleno = 1165 (0x48d), region = 115 }
 0x475   : > { %v5232_v39 = vadd.f32 %v5215_v7, %v2640_v34 }
 0x477   : > { %5248 = vst [vmem:[#allocation2 + $0x28] sm:$0xff] %v5232_v39 }
 0x478   : > { %v5253_v42 = vld [vmem:[#allocation2 + $0x30] sm:$0xff]  ;;  %v6920_v4 = vld [vmem:[%s2604_s4] ss:$0 sm:$0xff]  ;;  %v5255_v22 = vld [vmem:[#allocation2 + $0x58] sm:$0xff] }
 0x479   : > { %v5254_v1 = vld [vmem:[#allocation2] sm:$0xff]  ;;  %v5256_v43 = vld [vmem:[#allocation2 + $0x18] sm:$0xff]  ;;  %v5273_v44 = vadd.f32 %v6920_v4, %v5253_v42  ;;  %v5275_v31 = vadd.f32 %v6920_v4, %v5255_v22  ;;  %v5257_v58 = vld [vmem:[#allocation2 + $0x50] sm:$0xff] }
 0x47a   : > { %v5274_v46 = vadd.f32 %v6920_v4, %v5254_v1  ;;  %v5276_v2 = vadd.f32 %v6920_v4, %v5256_v43  ;;  %v5258_v48 = vld [vmem:[#allocation2 + $0x68] sm:$0xff]  ;;  %v5277_v35 = vadd.f32 %v6920_v4, %v5257_v58  ;;  %v5261_v15 = vld [vmem:[#allocation2 + $0x40] sm:$0xff]  ;;  %v5263_v0 = vld [vmem:[#allocation2 + $0x10] sm:$0xff] }
 0x47b   : > { %v5259_v52 = vld [vmem:[#allocation2 + $0x8] sm:$0xff]  ;;  %v5278_v25 = vadd.f32 %v6920_v4, %v5258_v48  ;;  %v5289_v59 = vmax.f32 %v5273_v44, 0.0  ;;  %v5291_v21 = vmax.f32 %v5275_v31, 0.0  ;;  %v5262_v3 = vld [vmem:[#allocation2 + $0x20] sm:$0xff]  ;;  %v5281_v30 = vadd.f32 %v6920_v4, %v5261_v15  ;;  %v5264_v49 = vld [vmem:[#allocation2 + $0x38] sm:$0xff] }
 0x47c   : > { %v5260_v54 = vld [vmem:[#allocation2 + $0x48] sm:$0xff]  ;;  %v5290_v60 = vmax.f32 %v5274_v46, 0.0  ;;  %v5279_v13 = vadd.f32 %v6920_v4, %v5259_v52  ;;  %v5292_v29 = vmax.f32 %v5276_v2, 0.0  ;;  %v5293_v18 = vmax.f32 %v5277_v35, 0.0  ;;  %v5265_v45 = vld [vmem:[#allocation2 + $0x60] sm:$0xff]  ;;  %v5266_v5 = vld [vmem:[#allocation2 + $0x70] sm:$0xff] }
 0x47d   : > { %v5280_v55 = vadd.f32 %v6920_v4, %v5260_v54  ;;  %5305 = vst [vmem:[%s7937_s25] sm:$0xff] %v5289_v59  ;;  %v5294_v6 = vmax.f32 %v5278_v25, 0.0  ;;  %v5282_v8 = vadd.f32 %v6920_v4, %v5262_v3  ;;  %v5283_v26 = vadd.f32 %v6920_v4, %v5263_v0  ;;  %v5267_v57 = vld [vmem:[#allocation2 + $0x78] sm:$0xff] }
 0x47e   : > { %5306 = vst [vmem:[%s7937_s25 + $0x8] sm:$0xff] %v5290_v60  ;;  %v5295_v9 = vmax.f32 %v5279_v13, 0.0  ;;  %v5284_v11 = vadd.f32 %v6920_v4, %v5264_v49  ;;  %v5297_v33 = vmax.f32 %v5281_v30, 0.0  ;;  %v5285_v27 = vadd.f32 %v6920_v4, %v5265_v45  ;;  %v5268_v63 = vld [vmem:[#allocation2 + $0x28] sm:$0xff] }
 0x47f   : > { %5307 = vst [vmem:[%s7937_s25 + $0x10] sm:$0xff] %v5291_v21  ;;  %v5296_v10 = vmax.f32 %v5280_v55, 0.0  ;;  %v5298_v14 = vmax.f32 %v5282_v8, 0.0  ;;  %v5286_v17 = vadd.f32 %v6920_v4, %v5266_v5  ;;  %v5299_v19 = vmax.f32 %v5283_v26, 0.0 }
 0x480   : > { %5308 = vst [vmem:[%s7937_s25 + $0x18] sm:$0xff] %v5292_v29  ;;  %v5287_v12 = vadd.f32 %v6920_v4, %v5267_v57  ;;  %v5300_v38 = vmax.f32 %v5284_v11, 0.0  ;;  %v5288_v41 = vadd.f32 %v6920_v4, %v5268_v63  ;;  %v5301_v23 = vmax.f32 %v5285_v27, 0.0 }
 0x481   : > { %5309 = vst [vmem:[%s7937_s25 + $0x20] sm:$0xff] %v5293_v18  ;;  %v5302_v61 = vmax.f32 %v5286_v17, 0.0 }
 0x482   : > { %5310 = vst [vmem:[%s7937_s25 + $0x28] sm:$0xff] %v5294_v6  ;;  %v5303_v24 = vmax.f32 %v5287_v12, 0.0  ;;  %v5304_v50 = vmax.f32 %v5288_v41, 0.0 }
 0x483   : > { %5311 = vst [vmem:[%s7937_s25 + $0x30] sm:$0xff] %v5295_v9 }
 0x484   : > { %5312 = vst [vmem:[%s7937_s25 + $0x38] sm:$0xff] %v5296_v10 }
 0x485   : > { %5313 = vst [vmem:[%s7937_s25 + $0x40] sm:$0xff] %v5297_v33 }
 0x486   : > { %5314 = vst [vmem:[%s7937_s25 + $0x48] sm:$0xff] %v5298_v14 }
 0x487   : > { %5315 = vst [vmem:[%s7937_s25 + $0x50] sm:$0xff] %v5299_v19 }
 0x488   : > { %5316 = vst [vmem:[%s7937_s25 + $0x58] sm:$0xff] %v5300_v38 }
 0x489   : > { %5317 = vst [vmem:[%s7937_s25 + $0x60] sm:$0xff] %v5301_v23 }
 0x48a   : > { %5318 = vst [vmem:[%s7937_s25 + $0x68] sm:$0xff] %v5302_v61 }
 0x48b   : > { %5319 = vst [vmem:[%s7937_s25 + $0x70] sm:$0xff] %v5303_v24 }
 0x48c   : > { %5320 = vst [vmem:[%s7937_s25 + $0x78] sm:$0xff] %v5304_v50 }
 0x48d PF: > { %5327 = sbr.rel (!%p7124_p12) target bundleno = 1183 (0x49f), region = 119  ;;  %s6570_s14 = sshll.u32 (%p7124_p12), %s6995_s19, 3  ;;  %v5388_v56 = vld [vmem:[%s7937_s25] sm:$0xff] (%p7124_p12)  ;;  %v5390_v40 = vld [vmem:[%s7937_s25 + $0x8] sm:$0xff] (%p7124_p12)  ;;  %v5392_v28 = vld [vmem:[%s7937_s25 + $0x10] sm:$0xff] (%p7124_p12) }
 0x48e   : > { %s5329_s5 = scalar_lea.vmem (%p7124_p12), %s8548_s3, %s6570_s14  ;;  %v5394_v62 = vld [vmem:[%s7937_s25 + $0x18] sm:$0xff] (%p7124_p12)  ;;  %v5396_v32 = vld [vmem:[%s7937_s25 + $0x20] sm:$0xff] (%p7124_p12)  ;;  %v5398_v20 = vld [vmem:[%s7937_s25 + $0x28] sm:$0xff] (%p7124_p12) }
 0x48f   : > { %5389 = vst [vmem:[%s5329_s5] sm:$0xff] (%p7124_p12), %v5388_v56  ;;  %v5400_v51 = vld [vmem:[%s7937_s25 + $0x30] sm:$0xff] (%p7124_p12)  ;;  %v5402_v53 = vld [vmem:[%s7937_s25 + $0x38] sm:$0xff] (%p7124_p12)  ;;  %v5404_v36 = vld [vmem:[%s7937_s25 + $0x40] sm:$0xff] (%p7124_p12) }
 0x490   : > { %5391 = vst [vmem:[%s5329_s5 + $0x10] sm:$0xff] (%p7124_p12), %v5390_v40  ;;  %v5406_v37 = vld [vmem:[%s7937_s25 + $0x48] sm:$0xff] (%p7124_p12)  ;;  %v5408_v16 = vld [vmem:[%s7937_s25 + $0x50] sm:$0xff] (%p7124_p12)  ;;  %v5410_v34 = vld [vmem:[%s7937_s25 + $0x58] sm:$0xff] (%p7124_p12) }
 0x491   : > { %5393 = vst [vmem:[%s5329_s5 + $0x20] sm:$0xff] (%p7124_p12), %v5392_v28  ;;  %v5412_v47 = vld [vmem:[%s7937_s25 + $0x60] sm:$0xff] (%p7124_p12)  ;;  %v5414_v7 = vld [vmem:[%s7937_s25 + $0x68] sm:$0xff] (%p7124_p12) }
 0x492   : > { %5395 = vst [vmem:[%s5329_s5 + $0x30] sm:$0xff] %v5394_v62  ;;  %v5416_v39 = vld [vmem:[%s7937_s25 + $0x70] sm:$0xff] }
 0x493   : > { %5397 = vst [vmem:[%s5329_s5 + $0x40] sm:$0xff] %v5396_v32  ;;  %v5418_v42 = vld [vmem:[%s7937_s25 + $0x78] sm:$0xff] }
 0x494   : > { %5399 = vst [vmem:[%s5329_s5 + $0x50] sm:$0xff] %v5398_v20 }
 0x495   : > { %5401 = vst [vmem:[%s5329_s5 + $0x60] sm:$0xff] %v5400_v51 }
 0x496   : > { %5403 = vst [vmem:[%s5329_s5 + $0x70] sm:$0xff] %v5402_v53 }
 0x497   : > { %5405 = vst [vmem:[%s5329_s5 + $0x80] sm:$0xff] %v5404_v36 }
 0x498   : > { %5407 = vst [vmem:[%s5329_s5 + $0x90] sm:$0xff] %v5406_v37 }
 0x499   : > { %5409 = vst [vmem:[%s5329_s5 + $0xa0] sm:$0xff] %v5408_v16 }
 0x49a   : > { %5411 = vst [vmem:[%s5329_s5 + $0xb0] sm:$0xff] %v5410_v34 }
 0x49b   : > { %5413 = vst [vmem:[%s5329_s5 + $0xc0] sm:$0xff] %v5412_v47 }
 0x49c   : > { %5415 = vst [vmem:[%s5329_s5 + $0xd0] sm:$0xff] %v5414_v7 }
 0x49d   : > { %5417 = vst [vmem:[%s5329_s5 + $0xe0] sm:$0xff] %v5416_v39 }
 0x49e   : > { %5419 = vst [vmem:[%s5329_s5 + $0xf0] sm:$0xff] %v5418_v42 }
 0x49f PF: > { %s13_s22 = sadd.s32 1, %s7007_s22   ;;  %s8558_s10 = sld [smem:[#allocation6_spill]] }
 0x4a0   : > { %p10_p6 = scmp.ge.s32.totalorder %s13_s22, 12   ;;  %s8559_s12 = smov %s6971_s13 }
 0x4a1   : > { %s8560_s13 = smov %s7122_s9  ;;  %s8561_s14 = smov %s6979_s15 }
 0x4a2   : > { %s8562_s15 = smov %s7119_s8  ;;  %s8563_s16 = smov %s6987_s17 }
 0x4a3   : > { %s8564_s17 = smov %s7105_s30  ;;  %s8565_s18 = smov %s6999_s20 }
 0x4a4   : > { %s8566_s19 = smov %s7003_s21  ;;  %s8567_s20 = smov %s8570_s24 }
 0x4a5   : > { %s8568_s21 = smov %s8558_s10  ;;  %12 = sbr.rel (!%p10_p6) target bundleno = 9 (0x9), region = 203 }

// kernel: furniture_forward.5
= control target key start
LH: loop header
LB: loop body
LE: loop exit
PB: predicated region body
PF: predicated region fallthrough
CT: control target
= control target key end

     0   :  { %s11004_s0 = inlined_call_operand.vmem [shape: f32[2,8,8,256], index: 0, kind: input, shape index: {}]   ;;  %s11005_s1 = inlined_call_operand.vmem [shape: f32[2,4,4,320], index: 1, kind: input, shape index: {}]   ;;  %s11006_s2 = inlined_call_operand.vmem [shape: f32[2,1536], index: 2, kind: input, shape index: {}]   ;;  %s11007_s3 = inlined_call_operand.vmem [shape: f32[1536,256], index: 3, kind: input, shape index: {}]   ;;  %s11008_s4 = inlined_call_operand.vmem [shape: f32[1,256], index: 4, kind: input, shape index: {}]   ;;  %s11009_s5 = inlined_call_operand.vmem [shape: f32[256,256], index: 5, kind: input, shape index: {}]   ;;  %s11010_s6 = inlined_call_operand.vmem [shape: f32[1,256], index: 6, kind: input, shape index: {}]   ;;  %s11011_s7 = inlined_call_operand.vmem [shape: bf16[2304,128], index: 7, kind: input, shape index: {}]   ;;  %s11012_s8 = inlined_call_operand.vmem [shape: f32[1,128], index: 8, kind: input, shape index: {}]   ;;  %s11013_s9 = inlined_call_operand.vmem [shape: bf16[2880,128], index: 9, kind: input, shape index: {}]   ;;  %s11014_s10 = inlined_call_operand.vmem [shape: f32[1,128], index: 10, kind: input, shape index: {}]   ;;  %s11015_s11 = inlined_call_operand.vmem [shape: f32[256,128], index: 11, kind: input, shape index: {}]   ;;  %s11016_s12 = inlined_call_operand.vmem [shape: f32[1,128], index: 12, kind: input, shape index: {}]   ;;  %s11017_s13 = inlined_call_operand.vmem [shape: f32[3,128], index: 13, kind: input, shape index: {}]   ;;  %s11018_s14 = inlined_call_operand.vmem [shape: f32[1,128], index: 14, kind: input, shape index: {}]   ;;  %s11019_s15 = inlined_call_operand.vmem [shape: f32[128,128], index: 15, kind: input, shape index: {}]   ;;  %s11020_s16 = inlined_call_operand.vmem [shape: f32[1,128], index: 16, kind: input, shape index: {}]   ;;  %s11021_s17 = inlined_call_operand.hbm [shape: f32[2,128], index: 17, kind: output, shape index: {}]  }
   0x1   :  { %11039 = sst [smem:[#allocation15_spill]] %s11004_s0 }
   0x2   :  { %11040 = sst [smem:[#allocation16_spill]] %s11005_s1 }
   0x3   :  { %v91_v0 = vld [vmem:[%s11007_s3 + $0xf0] sm:$0xff]  ;;  %v89_v2 = vld [vmem:[%s11007_s3 + $0xe0] sm:$0xff]  ;;  %s11041_s20 = sld [smem:[#allocation16_spill]] }
   0x4   :  { %v155_v1 = vld [vmem:[%s11007_s3 + $0x2f0] sm:$0xff]  ;;  %482 = vmatpush.msra.mxu0 %v91_v0  ;;  %v153_v4 = vld [vmem:[%s11007_s3 + $0x2e0] sm:$0xff] }
   0x5   :  { %522 = vmatpush.msra.mxu2 %v155_v1  ;;  %v123_v3 = vld [vmem:[%s11007_s3 + $0x1f0] sm:$0xff]  ;;  %v121_v7 = vld [vmem:[%s11007_s3 + $0x1e0] sm:$0xff] }
   0x6   :  { %v187_v5 = vld [vmem:[%s11007_s3 + $0x3f0] sm:$0xff]  ;;  %502 = vmatpush.msra.mxu1 %v123_v3  ;;  %483 = vmatpush.msra.mxu0 %v89_v2  ;;  %v185_v9 = vld [vmem:[%s11007_s3 + $0x3e0] sm:$0xff] }
   0x7   :  { %542 = vmatpush.msra.mxu3 %v187_v5  ;;  %v87_v6 = vld [vmem:[%s11007_s3 + $0xd0] sm:$0xff]  ;;  %523 = vmatpush.msra.mxu2 %v153_v4  ;;  %v85_v11 = vld [vmem:[%s11007_s3 + $0xc0] sm:$0xff] }
   0x8   :  { %v151_v8 = vld [vmem:[%s11007_s3 + $0x2d0] sm:$0xff]  ;;  %503 = vmatpush.msra.mxu1 %v121_v7  ;;  %v149_v12 = vld [vmem:[%s11007_s3 + $0x2c0] sm:$0xff]  ;;  %484 = vmatpush.msra.mxu0 %v87_v6 }
   0x9   :  { %v119_v10 = vld [vmem:[%s11007_s3 + $0x1d0] sm:$0xff]  ;;  %543 = vmatpush.msra.mxu3 %v185_v9  ;;  %524 = vmatpush.msra.mxu2 %v151_v8  ;;  %v117_v14 = vld [vmem:[%s11007_s3 + $0x1c0] sm:$0xff] }
   0xa   :  { %v183_v13 = vld [vmem:[%s11007_s3 + $0x3d0] sm:$0xff]  ;;  %v181_v15 = vld [vmem:[%s11007_s3 + $0x3c0] sm:$0xff]  ;;  %504 = vmatpush.msra.mxu1 %v119_v10  ;;  %485 = vmatpush.msra.mxu0 %v85_v11 }
   0xb   :  { %544 = vmatpush.msra.mxu3 %v183_v13  ;;  %v83_v16 = vld [vmem:[%s11007_s3 + $0xb0] sm:$0xff]  ;;  %525 = vmatpush.msra.mxu2 %v149_v12  ;;  %v81_v20 = vld [vmem:[%s11007_s3 + $0xa0] sm:$0xff] }
   0xc   :  { %v147_v17 = vld [vmem:[%s11007_s3 + $0x2b0] sm:$0xff]  ;;  %505 = vmatpush.msra.mxu1 %v117_v14  ;;  %v145_v21 = vld [vmem:[%s11007_s3 + $0x2a0] sm:$0xff]  ;;  %486 = vmatpush.msra.mxu0 %v83_v16 }
   0xd   :  { %v115_v18 = vld [vmem:[%s11007_s3 + $0x1b0] sm:$0xff]  ;;  %545 = vmatpush.msra.mxu3 %v181_v15  ;;  %526 = vmatpush.msra.mxu2 %v147_v17  ;;  %v113_v22 = vld [vmem:[%s11007_s3 + $0x1a0] sm:$0xff] }
   0xe   :  { %v179_v19 = vld [vmem:[%s11007_s3 + $0x3b0] sm:$0xff]  ;;  %v177_v23 = vld [vmem:[%s11007_s3 + $0x3a0] sm:$0xff]  ;;  %506 = vmatpush.msra.mxu1 %v115_v18  ;;  %487 = vmatpush.msra.mxu0 %v81_v20 }
   0xf   :  { %546 = vmatpush.msra.mxu3 %v179_v19  ;;  %v79_v24 = vld [vmem:[%s11007_s3 + $0x90] sm:$0xff]  ;;  %527 = vmatpush.msra.mxu2 %v145_v21  ;;  %v77_v28 = vld [vmem:[%s11007_s3 + $0x80] sm:$0xff] }
  0x10   :  { %v143_v25 = vld [vmem:[%s11007_s3 + $0x290] sm:$0xff]  ;;  %507 = vmatpush.msra.mxu1 %v113_v22  ;;  %v141_v29 = vld [vmem:[%s11007_s3 + $0x280] sm:$0xff]  ;;  %488 = vmatpush.msra.mxu0 %v79_v24 }
  0x11   :  { %v111_v26 = vld [vmem:[%s11007_s3 + $0x190] sm:$0xff]  ;;  %547 = vmatpush.msra.mxu3 %v177_v23  ;;  %528 = vmatpush.msra.mxu2 %v143_v25  ;;  %v109_v30 = vld [vmem:[%s11007_s3 + $0x180] sm:$0xff] }
  0x12   :  { %v175_v27 = vld [vmem:[%s11007_s3 + $0x390] sm:$0xff]  ;;  %v173_v31 = vld [vmem:[%s11007_s3 + $0x380] sm:$0xff]  ;;  %508 = vmatpush.msra.mxu1 %v111_v26  ;;  %489 = vmatpush.msra.mxu0 %v77_v28 }
  0x13   :  { %548 = vmatpush.msra.mxu3 %v175_v27  ;;  %v75_v32 = vld [vmem:[%s11007_s3 + $0x70] sm:$0xff]  ;;  %529 = vmatpush.msra.mxu2 %v141_v29  ;;  %v73_v36 = vld [vmem:[%s11007_s3 + $0x60] sm:$0xff] }
  0x14   :  { %v139_v33 = vld [vmem:[%s11007_s3 + $0x270] sm:$0xff]  ;;  %509 = vmatpush.msra.mxu1 %v109_v30  ;;  %v137_v37 = vld [vmem:[%s11007_s3 + $0x260] sm:$0xff]  ;;  %490 = vmatpush.msra.mxu0 %v75_v32 }
  0x15   :  { %v107_v34 = vld [vmem:[%s11007_s3 + $0x170] sm:$0xff]  ;;  %549 = vmatpush.msra.mxu3 %v173_v31  ;;  %530 = vmatpush.msra.mxu2 %v139_v33  ;;  %v105_v38 = vld [vmem:[%s11007_s3 + $0x160] sm:$0xff] }
  0x16   :  { %v171_v35 = vld [vmem:[%s11007_s3 + $0x370] sm:$0xff]  ;;  %v169_v39 = vld [vmem:[%s11007_s3 + $0x360] sm:$0xff]  ;;  %510 = vmatpush.msra.mxu1 %v107_v34  ;;  %491 = vmatpush.msra.mxu0 %v73_v36 }
  0x17   :  { %550 = vmatpush.msra.mxu3 %v171_v35  ;;  %v71_v40 = vld [vmem:[%s11007_s3 + $0x50] sm:$0xff]  ;;  %531 = vmatpush.msra.mxu2 %v137_v37  ;;  %v69_v44 = vld [vmem:[%s11007_s3 + $0x40] sm:$0xff]  ;;  %v59_v37 = vld [vmem:[%s11006_s2 + $0x8] sm:$0xff] }
  0x18   :  { %v135_v41 = vld [vmem:[%s11007_s3 + $0x250] sm:$0xff]  ;;  %511 = vmatpush.msra.mxu1 %v105_v38  ;;  %v133_v45 = vld [vmem:[%s11007_s3 + $0x240] sm:$0xff]  ;;  %492 = vmatpush.msra.mxu0 %v71_v40  ;;  %456 = vst [vmem:[#allocation1 + $0x20] ss:$4 sm:$0xff] %v59_v37 }
  0x19   :  { %v103_v42 = vld [vmem:[%s11007_s3 + $0x150] sm:$0xff]  ;;  %551 = vmatpush.msra.mxu3 %v169_v39  ;;  %532 = vmatpush.msra.mxu2 %v135_v41  ;;  %v101_v46 = vld [vmem:[%s11007_s3 + $0x140] sm:$0xff] }
  0x1a   :  { %v167_v43 = vld [vmem:[%s11007_s3 + $0x350] sm:$0xff]  ;;  %v165_v47 = vld [vmem:[%s11007_s3 + $0x340] sm:$0xff]  ;;  %512 = vmatpush.msra.mxu1 %v103_v42  ;;  %493 = vmatpush.msra.mxu0 %v69_v44 }
  0x1b   :  { %552 = vmatpush.msra.mxu3 %v167_v43  ;;  %v67_v48 = vld [vmem:[%s11007_s3 + $0x30] sm:$0xff]  ;;  %533 = vmatpush.msra.mxu2 %v133_v45  ;;  %v65_v52 = vld [vmem:[%s11007_s3 + $0x20] sm:$0xff] }
  0x1c   :  { %v131_v49 = vld [vmem:[%s11007_s3 + $0x230] sm:$0xff]  ;;  %513 = vmatpush.msra.mxu1 %v101_v46  ;;  %v129_v53 = vld [vmem:[%s11007_s3 + $0x220] sm:$0xff]  ;;  %494 = vmatpush.msra.mxu0 %v67_v48 }
  0x1d   :  { %v99_v50 = vld [vmem:[%s11007_s3 + $0x130] sm:$0xff]  ;;  %553 = vmatpush.msra.mxu3 %v165_v47  ;;  %534 = vmatpush.msra.mxu2 %v131_v49  ;;  %v97_v54 = vld [vmem:[%s11007_s3 + $0x120] sm:$0xff] }
  0x1e   :  { %v163_v51 = vld [vmem:[%s11007_s3 + $0x330] sm:$0xff]  ;;  %v161_v55 = vld [vmem:[%s11007_s3 + $0x320] sm:$0xff]  ;;  %514 = vmatpush.msra.mxu1 %v99_v50  ;;  %495 = vmatpush.msra.mxu0 %v65_v52 }
  0x1f   :  { %554 = vmatpush.msra.mxu3 %v163_v51  ;;  %v63_v56 = vld [vmem:[%s11007_s3 + $0x10] sm:$0xff]  ;;  %535 = vmatpush.msra.mxu2 %v129_v53  ;;  %v61_v60 = vld [vmem:[%s11007_s3] sm:$0xff] }
  0x20   :  { %v127_v57 = vld [vmem:[%s11007_s3 + $0x210] sm:$0xff]  ;;  %515 = vmatpush.msra.mxu1 %v97_v54  ;;  %v125_v61 = vld [vmem:[%s11007_s3 + $0x200] sm:$0xff]  ;;  %496 = vmatpush.msra.mxu0 %v63_v56 }
  0x21   :  { %v95_v58 = vld [vmem:[%s11007_s3 + $0x110] sm:$0xff]  ;;  %555 = vmatpush.msra.mxu3 %v161_v55  ;;  %536 = vmatpush.msra.mxu2 %v127_v57  ;;  %v93_v0 = vld [vmem:[%s11007_s3 + $0x100] sm:$0xff] }
  0x22   :  { %v159_v59 = vld [vmem:[%s11007_s3 + $0x310] sm:$0xff]  ;;  %516 = vmatpush.msra.mxu1 %v95_v58  ;;  %v157_v1 = vld [vmem:[%s11007_s3 + $0x300] sm:$0xff]  ;;  %497 = vmatpush.msra.mxu0 %v61_v60  ;;  %v7902_v58 = vld.sshfl [vmem:[#allocation1 + $0x28] sm:$0xff pattern:$0x73625140] }
  0x23   :  { %v219_v62 = vld [vmem:[%s11007_s3 + $0x4f0] sm:$0xff]  ;;  %556 = vmatpush.msra.mxu3 %v159_v59  ;;  %537 = vmatpush.msra.mxu2 %v125_v61  ;;  %v217_v2 = vld [vmem:[%s11007_s3 + $0x4e0] sm:$0xff] }
  0x24   :  { %v283_v63 = vld [vmem:[%s11007_s3 + $0x6f0] sm:$0xff]  ;;  %562 = vmatpush.msrb.mxu0 %v219_v62  ;;  %v281_v4 = vld [vmem:[%s11007_s3 + $0x6e0] sm:$0xff]  ;;  %517 = vmatpush.msra.mxu1 %v93_v0 }
  0x25   :  { %v251_v3 = vld [vmem:[%s11007_s3 + $0x5f0] sm:$0xff]  ;;  %602 = vmatpush.msrb.mxu2 %v283_v63  ;;  %557 = vmatpush.msra.mxu3 %v157_v1  ;;  %v249_v7 = vld [vmem:[%s11007_s3 + $0x5e0] sm:$0xff] }
  0x26   :  { %v315_v5 = vld [vmem:[%s11007_s3 + $0x7f0] sm:$0xff]  ;;  %563 = vmatpush.msrb.mxu0 %v217_v2  ;;  %582 = vmatpush.msrb.mxu1 %v251_v3  ;;  %v313_v9 = vld [vmem:[%s11007_s3 + $0x7e0] sm:$0xff] }
  0x27   :  { %v215_v6 = vld [vmem:[%s11007_s3 + $0x4d0] sm:$0xff]  ;;  %603 = vmatpush.msrb.mxu2 %v281_v4  ;;  %622 = vmatpush.msrb.mxu3 %v315_v5  ;;  %v213_v10 = vld [vmem:[%s11007_s3 + $0x4c0] sm:$0xff] }
  0x28   :  { %v279_v8 = vld [vmem:[%s11007_s3 + $0x6d0] sm:$0xff]  ;;  %564 = vmatpush.msrb.mxu0 %v215_v6  ;;  %583 = vmatpush.msrb.mxu1 %v249_v7  ;;  %v277_v12 = vld [vmem:[%s11007_s3 + $0x6c0] sm:$0xff] }
  0x29   :  { %v247_v11 = vld [vmem:[%s11007_s3 + $0x5d0] sm:$0xff]  ;;  %604 = vmatpush.msrb.mxu2 %v279_v8  ;;  %623 = vmatpush.msrb.mxu3 %v313_v9  ;;  %v245_v15 = vld [vmem:[%s11007_s3 + $0x5c0] sm:$0xff] }
  0x2a   :  { %v311_v13 = vld [vmem:[%s11007_s3 + $0x7d0] sm:$0xff]  ;;  %565 = vmatpush.msrb.mxu0 %v213_v10  ;;  %584 = vmatpush.msrb.mxu1 %v247_v11  ;;  %v309_v17 = vld [vmem:[%s11007_s3 + $0x7c0] sm:$0xff] }
  0x2b   :  { %v211_v14 = vld [vmem:[%s11007_s3 + $0x4b0] sm:$0xff]  ;;  %605 = vmatpush.msrb.mxu2 %v277_v12  ;;  %624 = vmatpush.msrb.mxu3 %v311_v13  ;;  %v209_v18 = vld [vmem:[%s11007_s3 + $0x4a0] sm:$0xff] }
  0x2c   :  { %v275_v16 = vld [vmem:[%s11007_s3 + $0x6b0] sm:$0xff]  ;;  %566 = vmatpush.msrb.mxu0 %v211_v14  ;;  %585 = vmatpush.msrb.mxu1 %v245_v15  ;;  %v273_v20 = vld [vmem:[%s11007_s3 + $0x6a0] sm:$0xff] }
  0x2d   :  { %v243_v19 = vld [vmem:[%s11007_s3 + $0x5b0] sm:$0xff]  ;;  %606 = vmatpush.msrb.mxu2 %v275_v16  ;;  %625 = vmatpush.msrb.mxu3 %v309_v17  ;;  %v241_v23 = vld [vmem:[%s11007_s3 + $0x5a0] sm:$0xff] }
  0x2e   :  { %v307_v21 = vld [vmem:[%s11007_s3 + $0x7b0] sm:$0xff]  ;;  %567 = vmatpush.msrb.mxu0 %v209_v18  ;;  %586 = vmatpush.msrb.mxu1 %v243_v19  ;;  %v305_v25 = vld [vmem:[%s11007_s3 + $0x7a0] sm:$0xff] }
  0x2f   :  { %v207_v22 = vld [vmem:[%s11007_s3 + $0x490] sm:$0xff]  ;;  %v58_v26 = vld [vmem:[%s11006_s2] sm:$0xff]  ;;  %607 = vmatpush.msrb.mxu2 %v273_v20  ;;  %626 = vmatpush.msrb.mxu3 %v307_v21 }
  0x30   :  { %v271_v24 = vld [vmem:[%s11007_s3 + $0x690] sm:$0xff]  ;;  %v205_v27 = vld [vmem:[%s11007_s3 + $0x480] sm:$0xff]  ;;  %454 = vst [vmem:[#allocation1] ss:$4 sm:$0xff] %v58_v26  ;;  %568 = vmatpush.msrb.mxu0 %v207_v22  ;;  %587 = vmatpush.msrb.mxu1 %v241_v23 }
  0x31   :  { %v239_v28 = vld [vmem:[%s11007_s3 + $0x590] sm:$0xff]  ;;  %v269_v29 = vld [vmem:[%s11007_s3 + $0x680] sm:$0xff]  ;;  %608 = vmatpush.msrb.mxu2 %v271_v24  ;;  %627 = vmatpush.msrb.mxu3 %v305_v25 }
  0x32   :  { %v303_v30 = vld [vmem:[%s11007_s3 + $0x790] sm:$0xff]  ;;  %v237_v32 = vld [vmem:[%s11007_s3 + $0x580] sm:$0xff]  ;;  %569 = vmatpush.msrb.mxu0 %v205_v27  ;;  %588 = vmatpush.msrb.mxu1 %v239_v28 }
  0x33   :  { %v203_v31 = vld [vmem:[%s11007_s3 + $0x470] sm:$0xff]  ;;  %v301_v34 = vld [vmem:[%s11007_s3 + $0x780] sm:$0xff]  ;;  %609 = vmatpush.msrb.mxu2 %v269_v29  ;;  %628 = vmatpush.msrb.mxu3 %v303_v30 }
  0x34   :  { %v267_v33 = vld [vmem:[%s11007_s3 + $0x670] sm:$0xff]  ;;  %v201_v35 = vld [vmem:[%s11007_s3 + $0x460] sm:$0xff]  ;;  %570 = vmatpush.msrb.mxu0 %v203_v31  ;;  %589 = vmatpush.msrb.mxu1 %v237_v32 }
  0x35   :  { %v235_v36 = vld [vmem:[%s11007_s3 + $0x570] sm:$0xff]  ;;  %v265_v38 = vld [vmem:[%s11007_s3 + $0x660] sm:$0xff]  ;;  %610 = vmatpush.msrb.mxu2 %v267_v33  ;;  %629 = vmatpush.msrb.mxu3 %v301_v34 }
  0x36   :  { %v299_v39 = vld [vmem:[%s11007_s3 + $0x770] sm:$0xff]  ;;  %v233_v41 = vld [vmem:[%s11007_s3 + $0x560] sm:$0xff]  ;;  %571 = vmatpush.msrb.mxu0 %v201_v35  ;;  %590 = vmatpush.msrb.mxu1 %v235_v36 }
  0x37   :  { %v199_v40 = vld [vmem:[%s11007_s3 + $0x450] sm:$0xff]  ;;  %v297_v43 = vld [vmem:[%s11007_s3 + $0x760] sm:$0xff]  ;;  %611 = vmatpush.msrb.mxu2 %v265_v38  ;;  %630 = vmatpush.msrb.mxu3 %v299_v39  ;;  %v7947_v9 = vld.sshfl [vmem:[#allocation1 + $0x8] sm:$0xff pattern:$0x73625140] }
  0x38   :  { %v263_v42 = vld [vmem:[%s11007_s3 + $0x650] sm:$0xff]  ;;  %v197_v44 = vld [vmem:[%s11007_s3 + $0x440] sm:$0xff]  ;;  %572 = vmatpush.msrb.mxu0 %v199_v40  ;;  %591 = vmatpush.msrb.mxu1 %v233_v41  ;;  %v7949_v10 = vld.sshfl [vmem:[#allocation1 + $0x18] sm:$0xff pattern:$0x73625140] }
  0x39   :  { %v231_v45 = vld [vmem:[%s11007_s3 + $0x550] sm:$0xff]  ;;  %v261_v46 = vld [vmem:[%s11007_s3 + $0x640] sm:$0xff]  ;;  %612 = vmatpush.msrb.mxu2 %v263_v42  ;;  %631 = vmatpush.msrb.mxu3 %v297_v43 }
  0x3a   :  { %v295_v47 = vld [vmem:[%s11007_s3 + $0x750] sm:$0xff]  ;;  %v229_v49 = vld [vmem:[%s11007_s3 + $0x540] sm:$0xff]  ;;  %573 = vmatpush.msrb.mxu0 %v197_v44  ;;  %592 = vmatpush.msrb.mxu1 %v231_v45 }
  0x3b   :  { %v195_v48 = vld [vmem:[%s11007_s3 + $0x430] sm:$0xff]  ;;  %v293_v51 = vld [vmem:[%s11007_s3 + $0x740] sm:$0xff]  ;;  %613 = vmatpush.msrb.mxu2 %v261_v46  ;;  %632 = vmatpush.msrb.mxu3 %v295_v47 }
  0x3c   :  { %v259_v50 = vld [vmem:[%s11007_s3 + $0x630] sm:$0xff]  ;;  %v193_v52 = vld [vmem:[%s11007_s3 + $0x420] sm:$0xff]  ;;  %574 = vmatpush.msrb.mxu0 %v195_v48  ;;  %593 = vmatpush.msrb.mxu1 %v229_v49 }
  0x3d   :  { %v7889_v53 = vld [vmem:[%s11041_s20 + $0xc] sm:$0xff]  ;;  %v257_v55 = vld [vmem:[%s11007_s3 + $0x620] sm:$0xff]  ;;  %614 = vmatpush.msrb.mxu2 %v259_v50  ;;  %633 = vmatpush.msrb.mxu3 %v293_v51 }
  0x3e   :  { %v227_v54 = vld [vmem:[%s11007_s3 + $0x530] sm:$0xff]  ;;  %v7900_v57 = vld.sshfl [vmem:[#allocation1 + $0x20] sm:$0xff pattern:$0x73625140]  ;;  %575 = vmatpush.msrb.mxu0 %v193_v52  ;;  %518 = vmatmul.f32.vlgmr.msra.gmra.mxu1 %v7947_v9 }
  0x3f   :  { %v291_v56 = vld [vmem:[%s11007_s3 + $0x730] sm:$0xff]  ;;  %v225_v60 = vld [vmem:[%s11007_s3 + $0x520] sm:$0xff]  ;;  %1679 = vst [vmem:[#allocation1 + $0x20] ss:$2 sm:$0xff] %v7889_v53  ;;  %594 = vmatpush.msrb.mxu1 %v227_v54  ;;  %615 = vmatpush.msrb.mxu2 %v257_v55 }
  0x40   :  { %v191_v59 = vld [vmem:[%s11007_s3 + $0x410] sm:$0xff]  ;;  %v289_v62 = vld [vmem:[%s11007_s3 + $0x720] sm:$0xff]  ;;  %634 = vmatpush.msrb.mxu3 %v291_v56 }
  0x41   :  { %v255_v61 = vld [vmem:[%s11007_s3 + $0x610] sm:$0xff]  ;;  %v189_v63 = vld [vmem:[%s11007_s3 + $0x400] sm:$0xff]  ;;  %576 = vmatpush.msrb.mxu0 %v191_v59  ;;  %595 = vmatpush.msrb.mxu1 %v225_v60 }
  0x42   :  { %v223_v0 = vld [vmem:[%s11007_s3 + $0x510] sm:$0xff]  ;;  %v253_v1 = vld [vmem:[%s11007_s3 + $0x600] sm:$0xff]  ;;  %616 = vmatpush.msrb.mxu2 %v255_v61  ;;  %635 = vmatpush.msrb.mxu3 %v289_v62 }
  0x43   :  { %v287_v2 = vld [vmem:[%s11007_s3 + $0x710] sm:$0xff]  ;;  %v7929_v3 = vld.sshfl [vmem:[#allocation1] sm:$0xff pattern:$0x73625140]  ;;  %577 = vmatpush.msrb.mxu0 %v189_v63  ;;  %596 = vmatpush.msrb.mxu1 %v223_v0 }
  0x44   :  { %v7931_v4 = vld.sshfl [vmem:[#allocation1 + $0x10] sm:$0xff pattern:$0x73625140]  ;;  %617 = vmatpush.msrb.mxu2 %v253_v1  ;;  %636 = vmatpush.msrb.mxu3 %v287_v2  ;;  %v221_v7 = vld [vmem:[%s11007_s3 + $0x500] sm:$0xff] }
  0x45   :  { %v347_v5 = vld [vmem:[%s11007_s3 + $0x8f0] sm:$0xff]  ;;  %v285_v8 = vld [vmem:[%s11007_s3 + $0x700] sm:$0xff]  ;;  %498 = vmatmul.f32.vlgmr.msra.gmra.mxu0 %v7929_v3  ;;  %538 = vmatmul.f32.vlgmr.msra.gmra.mxu2 %v7931_v4 }
  0x46   :  { %v411_v6 = vld [vmem:[%s11007_s3 + $0xaf0] sm:$0xff]  ;;  %642 = vmatpush.msra.mxu0 %v347_v5  ;;  %v345_v11 = vld [vmem:[%s11007_s3 + $0x8e0] sm:$0xff]  ;;  %597 = vmatpush.msrb.mxu1 %v221_v7 }
  0x47   :  { %682 = vmatpush.msra.mxu2 %v411_v6  ;;  %v379_v12 = vld [vmem:[%s11007_s3 + $0x9f0] sm:$0xff]  ;;  %637 = vmatpush.msrb.mxu3 %v285_v8  ;;  %v409_v13 = vld [vmem:[%s11007_s3 + $0xae0] sm:$0xff] }
  0x48   :  { %v443_v14 = vld [vmem:[%s11007_s3 + $0xbf0] sm:$0xff]  ;;  %558 = vmatmul.f32.vlgmr.msra.gmra.mxu3 %v7949_v10  ;;  %v377_v16 = vld [vmem:[%s11007_s3 + $0x9e0] sm:$0xff]  ;;  %643 = vmatpush.msra.mxu0 %v345_v11 }
  0x49   :  { %v343_v15 = vld [vmem:[%s11007_s3 + $0x8d0] sm:$0xff]  ;;  %662 = vmatpush.msra.mxu1 %v379_v12  ;;  %v441_v18 = vld [vmem:[%s11007_s3 + $0xbe0] sm:$0xff]  ;;  %683 = vmatpush.msra.mxu2 %v409_v13 }
  0x4a   :  { %v407_v17 = vld [vmem:[%s11007_s3 + $0xad0] sm:$0xff]  ;;  %702 = vmatpush.msra.mxu3 %v443_v14  ;;  %v341_v20 = vld [vmem:[%s11007_s3 + $0x8c0] sm:$0xff]  ;;  %644 = vmatpush.msra.mxu0 %v343_v15 }
  0x4b   :  { %v60_v19 = vld [vmem:[%s11006_s2 + $0x10] sm:$0xff]  ;;  %v405_v22 = vld [vmem:[%s11007_s3 + $0xac0] sm:$0xff]  ;;  %663 = vmatpush.msra.mxu1 %v377_v16  ;;  %684 = vmatpush.msra.mxu2 %v407_v17 }
  0x4c   :  { %v375_v21 = vld [vmem:[%s11007_s3 + $0x9d0] sm:$0xff]  ;;  %465 = vst [vmem:[#allocation1] ss:$4 sm:$0xff] %v60_v19  ;;  %703 = vmatpush.msra.mxu3 %v441_v18  ;;  %v373_v26 = vld [vmem:[%s11007_s3 + $0x9c0] sm:$0xff]  ;;  %645 = vmatpush.msra.mxu0 %v341_v20 }
  0x4d   :  { %v439_v23 = vld [vmem:[%s11007_s3 + $0xbd0] sm:$0xff]  ;;  %664 = vmatpush.msra.mxu1 %v375_v21  ;;  %v437_v28 = vld [vmem:[%s11007_s3 + $0xbc0] sm:$0xff]  ;;  %685 = vmatpush.msra.mxu2 %v405_v22 }
  0x4e   :  { %v7992_v24 = vld.sshfl [vmem:[#allocation1 + $0x30] sm:$0xff pattern:$0x73625140]  ;;  %704 = vmatpush.msra.mxu3 %v439_v23  ;;  %v337_v29 = vld [vmem:[%s11007_s3 + $0x8a0] sm:$0xff] }
  0x4f   :  { %v339_v25 = vld [vmem:[%s11007_s3 + $0x8b0] sm:$0xff] }
  0x50   :  { %v403_v27 = vld [vmem:[%s11007_s3 + $0xab0] sm:$0xff] }
  0x51   :  { %v371_v30 = vld [vmem:[%s11007_s3 + $0x9b0] sm:$0xff] }
  0x52   :  { %22 = vsyncpa [#allocation3], 0  ;;  %618 = vmatmul.f32.vlgmr.msrb.gmra.mxu2 %v7992_v24  ;;  %646 = vmatpush.msra.mxu0 %v339_v25  ;;  %v8013_v31 = vld.sshfl [vmem:[#allocation1 + $0x38] sm:$0xff pattern:$0x73625140]  ;;  %v401_v32 = vld [vmem:[%s11007_s3 + $0xaa0] sm:$0xff] }
  0x53   :  { %v435_v33 = vld [vmem:[%s11007_s3 + $0xbb0] sm:$0xff]  ;;  %665 = vmatpush.msra.mxu1 %v373_v26  ;;  %686 = vmatpush.msra.mxu2 %v403_v27  ;;  %v369_v35 = vld [vmem:[%s11007_s3 + $0x9a0] sm:$0xff]  ;;  %v8041_v39 = vld [vmem:[%s11041_s20 + $0x8] sm:$0xf]  ;;  %s11042_s19 = sld [smem:[#allocation15_spill]]  ;;  %vm1276_vm0 = vcmask 1046528  }
  0x54   :  { %v335_v34 = vld [vmem:[%s11007_s3 + $0x890] sm:$0xff]  ;;  %v8030_v36 = vld [vmem:[%s11041_s20] sm:$0xff]  ;;  %705 = vmatpush.msra.mxu3 %v437_v28  ;;  %578 = vmatmul.f32.vlgmr.msrb.gmra.mxu0 %v7900_v57  ;;  %v8046_v41 = vld.sshfl [vmem:[#allocation1 + $0x8] sm:$0xff pattern:$0x73625140]  ;;  %vm1723_vm1 = vcmask 1043456  }
  0x55   :  { %v399_v37 = vld [vmem:[%s11007_s3 + $0xa90] sm:$0xff]  ;;  %v8036_v38 = vld.sshfl [vmem:[#allocation1] sm:$0xff pattern:$0x73625140]  ;;  %638 = vmatmul.f32.vlgmr.msrb.gmra.mxu3 %v8013_v31  ;;  %647 = vmatpush.msra.mxu0 %v337_v29  ;;  %v92_v23 = vld [vmem:[%s11007_s3 + $0xf8] sm:$0xff]  ;;  %vm1557_vm2 = vcmask 1041409  }
  0x56   :  { %v8044_v40 = vld.sshfl [vmem:[#allocation1 + $0x10] sm:$0xff pattern:$0x73625140]  ;;  %666 = vmatpush.msra.mxu1 %v371_v30  ;;  %687 = vmatpush.msra.mxu2 %v401_v32  ;;  %v433_v42 = vld [vmem:[%s11007_s3 + $0xba0] sm:$0xff]  ;;  %1672 = vst [vmem:[#allocation1] ss:$2 sm:$0xff] %v8030_v36 }
  0x57   :  { %v8052_v43 = vld.sshfl [vmem:[#allocation1 + $0x18] sm:$0xff pattern:$0x73625140]  ;;  %706 = vmatpush.msra.mxu3 %v435_v33  ;;  %598 = vmatmul.f32.vlgmr.msrb.gmra.mxu1 %v7902_v58  ;;  %v333_v44 = vld [vmem:[%s11007_s3 + $0x880] sm:$0xff]  ;;  %v367_v45 = vld [vmem:[%s11007_s3 + $0x990] sm:$0xff]  ;;  %vm1734_vm3 = vcmask 519168  }
  0x58   :  { %1674 = vst [vmem:[#allocation1 + $0x10] ss:$2 sm:$0xff] %v8041_v39  ;;  %648 = vmatpush.msra.mxu0 %v335_v34  ;;  %667 = vmatpush.msra.mxu1 %v369_v35  ;;  %v397_v46 = vld [vmem:[%s11007_s3 + $0xa80] sm:$0xff]  ;;  %v431_v47 = vld [vmem:[%s11007_s3 + $0xb90] sm:$0xff]  ;;  %v156_v25 = vld [vmem:[%s11007_s3 + $0x2f8] sm:$0xff]  ;;  %vm1949_vm4 = vcmask 1042432  }
  0x59   :  { %688 = vmatpush.msra.mxu2 %v399_v37  ;;  %707 = vmatpush.msra.mxu3 %v433_v42  ;;  %v331_v48 = vld [vmem:[%s11007_s3 + $0x870] sm:$0xff]  ;;  %v365_v49 = vld [vmem:[%s11007_s3 + $0x980] sm:$0xff]  ;;  %v90_v28 = vld [vmem:[%s11007_s3 + $0xe8] sm:$0xff]  ;;  %vm1964_vm5 = vcmask 518144   ;;  %vm2410_vm6 = vcmask 523264  }
  0x5a   :  { %649 = vmatpush.msra.mxu0 %v333_v44  ;;  %668 = vmatpush.msra.mxu1 %v367_v45  ;;  %v395_v50 = vld [vmem:[%s11007_s3 + $0xa70] sm:$0xff]  ;;  %v429_v51 = vld [vmem:[%s11007_s3 + $0xb80] sm:$0xff]  ;;  %v124_v29 = vld [vmem:[%s11007_s3 + $0x1f8] sm:$0xff] }
  0x5b   :  { %689 = vmatpush.msra.mxu2 %v397_v46  ;;  %708 = vmatpush.msra.mxu3 %v431_v47  ;;  %v329_v52 = vld [vmem:[%s11007_s3 + $0x860] sm:$0xff]  ;;  %v363_v54 = vld [vmem:[%s11007_s3 + $0x970] sm:$0xff]  ;;  %v154_v30 = vld [vmem:[%s11007_s3 + $0x2e8] sm:$0xff] }
  0x5c   :  { %650 = vmatpush.msra.mxu0 %v331_v48  ;;  %669 = vmatpush.msra.mxu1 %v365_v49  ;;  %v393_v55 = vld [vmem:[%s11007_s3 + $0xa60] sm:$0xff]  ;;  %v427_v56 = vld [vmem:[%s11007_s3 + $0xb70] sm:$0xff]  ;;  %v188_v32 = vld [vmem:[%s11007_s3 + $0x3f8] sm:$0xff] }
  0x5d   :  { %690 = vmatpush.msra.mxu2 %v395_v50  ;;  %709 = vmatpush.msra.mxu3 %v429_v51  ;;  %v327_v59 = vld [vmem:[%s11007_s3 + $0x850] sm:$0xff]  ;;  %v361_v60 = vld [vmem:[%s11007_s3 + $0x960] sm:$0xff]  ;;  %v88_v33 = vld [vmem:[%s11007_s3 + $0xd8] sm:$0xff] }
  0x5e   :  { %651 = vmatpush.msra.mxu0 %v329_v52  ;;  %670 = vmatpush.msra.mxu1 %v363_v54  ;;  %v391_v61 = vld [vmem:[%s11007_s3 + $0xa50] sm:$0xff]  ;;  %v425_v62 = vld [vmem:[%s11007_s3 + $0xb60] sm:$0xff]  ;;  %v122_v34 = vld [vmem:[%s11007_s3 + $0x1e8] sm:$0xff] }
  0x5f   :  { %691 = vmatpush.msra.mxu2 %v393_v55  ;;  %710 = vmatpush.msra.mxu3 %v427_v56  ;;  %v325_v63 = vld [vmem:[%s11007_s3 + $0x840] sm:$0xff]  ;;  %v359_v0 = vld [vmem:[%s11007_s3 + $0x950] sm:$0xff]  ;;  %v152_v35 = vld [vmem:[%s11007_s3 + $0x2d8] sm:$0xff] }
  0x60   :  { %652 = vmatpush.msra.mxu0 %v327_v59  ;;  %671 = vmatpush.msra.mxu1 %v361_v60  ;;  %v389_v1 = vld [vmem:[%s11007_s3 + $0xa40] sm:$0xff]  ;;  %v423_v2 = vld [vmem:[%s11007_s3 + $0xb50] sm:$0xff]  ;;  %v186_v37 = vld [vmem:[%s11007_s3 + $0x3e8] sm:$0xff] }
  0x61   :  { %692 = vmatpush.msra.mxu2 %v391_v61  ;;  %711 = vmatpush.msra.mxu3 %v425_v62  ;;  %v323_v5 = vld [vmem:[%s11007_s3 + $0x830] sm:$0xff]  ;;  %v357_v6 = vld [vmem:[%s11007_s3 + $0x940] sm:$0xff]  ;;  %v86_v42 = vld [vmem:[%s11007_s3 + $0xc8] sm:$0xff] }
  0x62   :  { %653 = vmatpush.msra.mxu0 %v325_v63  ;;  %672 = vmatpush.msra.mxu1 %v359_v0  ;;  %v387_v7 = vld [vmem:[%s11007_s3 + $0xa30] sm:$0xff]  ;;  %v421_v8 = vld [vmem:[%s11007_s3 + $0xb40] sm:$0xff]  ;;  %v120_v44 = vld [vmem:[%s11007_s3 + $0x1d8] sm:$0xff] }
  0x63   :  { %693 = vmatpush.msra.mxu2 %v389_v1  ;;  %712 = vmatpush.msra.mxu3 %v423_v2  ;;  %v321_v11 = vld [vmem:[%s11007_s3 + $0x820] sm:$0xff]  ;;  %v355_v12 = vld [vmem:[%s11007_s3 + $0x930] sm:$0xff]  ;;  %v150_v45 = vld [vmem:[%s11007_s3 + $0x2c8] sm:$0xff] }
  0x64   :  { %654 = vmatpush.msra.mxu0 %v323_v5  ;;  %673 = vmatpush.msra.mxu1 %v357_v6  ;;  %v385_v13 = vld [vmem:[%s11007_s3 + $0xa20] sm:$0xff]  ;;  %v419_v14 = vld [vmem:[%s11007_s3 + $0xb30] sm:$0xff]  ;;  %v184_v46 = vld [vmem:[%s11007_s3 + $0x3d8] sm:$0xff] }
  0x65   :  { %694 = vmatpush.msra.mxu2 %v387_v7  ;;  %713 = vmatpush.msra.mxu3 %v421_v8  ;;  %v319_v15 = vld [vmem:[%s11007_s3 + $0x810] sm:$0xff]  ;;  %v353_v16 = vld [vmem:[%s11007_s3 + $0x920] sm:$0xff]  ;;  %v84_v47 = vld [vmem:[%s11007_s3 + $0xb8] sm:$0xff] }
  0x66   :  { %655 = vmatpush.msra.mxu0 %v321_v11  ;;  %674 = vmatpush.msra.mxu1 %v355_v12  ;;  %v383_v17 = vld [vmem:[%s11007_s3 + $0xa10] sm:$0xff]  ;;  %v417_v18 = vld [vmem:[%s11007_s3 + $0xb20] sm:$0xff]  ;;  %v118_v48 = vld [vmem:[%s11007_s3 + $0x1c8] sm:$0xff] }
  0x67   :  { %695 = vmatpush.msra.mxu2 %v385_v13  ;;  %714 = vmatpush.msra.mxu3 %v419_v14  ;;  %v317_v19 = vld [vmem:[%s11007_s3 + $0x800] sm:$0xff]  ;;  %v351_v20 = vld [vmem:[%s11007_s3 + $0x910] sm:$0xff]  ;;  %v148_v49 = vld [vmem:[%s11007_s3 + $0x2b8] sm:$0xff] }
  0x68   :  { %656 = vmatpush.msra.mxu0 %v319_v15  ;;  %675 = vmatpush.msra.mxu1 %v353_v16  ;;  %v381_v21 = vld [vmem:[%s11007_s3 + $0xa00] sm:$0xff]  ;;  %v415_v22 = vld [vmem:[%s11007_s3 + $0xb10] sm:$0xff]  ;;  %v182_v50 = vld [vmem:[%s11007_s3 + $0x3c8] sm:$0xff] }
  0x69   :  { %696 = vmatpush.msra.mxu2 %v383_v17  ;;  %715 = vmatpush.msra.mxu3 %v417_v18  ;;  %v349_v26 = vld [vmem:[%s11007_s3 + $0x900] sm:$0xff]  ;;  %v82_v51 = vld [vmem:[%s11007_s3 + $0xa8] sm:$0xff]  ;;  %v116_v52 = vld [vmem:[%s11007_s3 + $0x1b8] sm:$0xff] }
  0x6a   :  { %657 = vmatpush.msra.mxu0 %v317_v19  ;;  %676 = vmatpush.msra.mxu1 %v351_v20  ;;  %v413_v27 = vld [vmem:[%s11007_s3 + $0xb00] sm:$0xff]  ;;  %v146_v54 = vld [vmem:[%s11007_s3 + $0x2a8] sm:$0xff]  ;;  %v180_v55 = vld [vmem:[%s11007_s3 + $0x3b8] sm:$0xff] }
  0x6b   :  { %697 = vmatpush.msra.mxu2 %v381_v21  ;;  %716 = vmatpush.msra.mxu3 %v415_v22  ;;  %v80_v56 = vld [vmem:[%s11007_s3 + $0x98] sm:$0xff]  ;;  %v114_v59 = vld [vmem:[%s11007_s3 + $0x1a8] sm:$0xff] }
  0x6c   :  { %658 = vmatmul.f32.vlgmr.msra.gmra.mxu0 %v8036_v38  ;;  %698 = vmatmul.f32.vlgmr.msra.gmra.mxu2 %v8044_v40  ;;  %v144_v60 = vld [vmem:[%s11007_s3 + $0x298] sm:$0xff]  ;;  %v178_v61 = vld [vmem:[%s11007_s3 + $0x3a8] sm:$0xff] }
  0x6d   :  { %722 = vmatpush.msrb.mxu0 %v92_v23  ;;  %762 = vmatpush.msrb.mxu2 %v156_v25  ;;  %v78_v62 = vld [vmem:[%s11007_s3 + $0x88] sm:$0xff]  ;;  %v112_v63 = vld [vmem:[%s11007_s3 + $0x198] sm:$0xff] }
  0x6e   :  { %677 = vmatpush.msra.mxu1 %v349_v26  ;;  %717 = vmatpush.msra.mxu3 %v413_v27  ;;  %v142_v0 = vld [vmem:[%s11007_s3 + $0x288] sm:$0xff]  ;;  %v176_v1 = vld [vmem:[%s11007_s3 + $0x398] sm:$0xff] }
  0x6f   :  { %678 = vmatmul.f32.vlgmr.msra.gmra.mxu1 %v8046_v41  ;;  %718 = vmatmul.f32.vlgmr.msra.gmra.mxu3 %v8052_v43  ;;  %v76_v2 = vld [vmem:[%s11007_s3 + $0x78] sm:$0xff]  ;;  %v110_v5 = vld [vmem:[%s11007_s3 + $0x188] sm:$0xff] }
  0x70   :  { %723 = vmatpush.msrb.mxu0 %v90_v28  ;;  %742 = vmatpush.msrb.mxu1 %v124_v29  ;;  %v140_v6 = vld [vmem:[%s11007_s3 + $0x278] sm:$0xff]  ;;  %v174_v7 = vld [vmem:[%s11007_s3 + $0x388] sm:$0xff] }
  0x71   :  { %763 = vmatpush.msrb.mxu2 %v154_v30  ;;  %782 = vmatpush.msrb.mxu3 %v188_v32  ;;  %v74_v8 = vld [vmem:[%s11007_s3 + $0x68] sm:$0xff]  ;;  %v108_v11 = vld [vmem:[%s11007_s3 + $0x178] sm:$0xff] }
  0x72   :  { %724 = vmatpush.msrb.mxu0 %v88_v33  ;;  %743 = vmatpush.msrb.mxu1 %v122_v34  ;;  %v138_v12 = vld [vmem:[%s11007_s3 + $0x268] sm:$0xff]  ;;  %v172_v13 = vld [vmem:[%s11007_s3 + $0x378] sm:$0xff] }
  0x73   :  { %764 = vmatpush.msrb.mxu2 %v152_v35  ;;  %783 = vmatpush.msrb.mxu3 %v186_v37  ;;  %v72_v14 = vld [vmem:[%s11007_s3 + $0x58] sm:$0xff]  ;;  %v106_v15 = vld [vmem:[%s11007_s3 + $0x168] sm:$0xff] }
  0x74   :  { %725 = vmatpush.msrb.mxu0 %v86_v42  ;;  %744 = vmatpush.msrb.mxu1 %v120_v44  ;;  %v136_v16 = vld [vmem:[%s11007_s3 + $0x258] sm:$0xff]  ;;  %v170_v17 = vld [vmem:[%s11007_s3 + $0x368] sm:$0xff] }
  0x75   :  { %765 = vmatpush.msrb.mxu2 %v150_v45  ;;  %784 = vmatpush.msrb.mxu3 %v184_v46  ;;  %v70_v18 = vld [vmem:[%s11007_s3 + $0x48] sm:$0xff]  ;;  %v104_v19 = vld [vmem:[%s11007_s3 + $0x158] sm:$0xff] }
  0x76   :  { %726 = vmatpush.msrb.mxu0 %v84_v47  ;;  %745 = vmatpush.msrb.mxu1 %v118_v48  ;;  %v134_v20 = vld [vmem:[%s11007_s3 + $0x248] sm:$0xff]  ;;  %v168_v21 = vld [vmem:[%s11007_s3 + $0x358] sm:$0xff] }
  0x77   :  { %766 = vmatpush.msrb.mxu2 %v148_v49  ;;  %785 = vmatpush.msrb.mxu3 %v182_v50  ;;  %v68_v22 = vld [vmem:[%s11007_s3 + $0x38] sm:$0xff]  ;;  %v102_v23 = vld [vmem:[%s11007_s3 + $0x148] sm:$0xff] }
  0x78   :  { %727 = vmatpush.msrb.mxu0 %v82_v51  ;;  %746 = vmatpush.msrb.mxu1 %v116_v52  ;;  %v132_v25 = vld [vmem:[%s11007_s3 + $0x238] sm:$0xff]  ;;  %v166_v26 = vld [vmem:[%s11007_s3 + $0x348] sm:$0xff] }
  0x79   :  { %767 = vmatpush.msrb.mxu2 %v146_v54  ;;  %786 = vmatpush.msrb.mxu3 %v180_v55  ;;  %v66_v27 = vld [vmem:[%s11007_s3 + $0x28] sm:$0xff]  ;;  %v100_v28 = vld [vmem:[%s11007_s3 + $0x138] sm:$0xff] }
  0x7a   :  { %728 = vmatpush.msrb.mxu0 %v80_v56  ;;  %747 = vmatpush.msrb.mxu1 %v114_v59  ;;  %v130_v29 = vld [vmem:[%s11007_s3 + $0x228] sm:$0xff]  ;;  %v164_v30 = vld [vmem:[%s11007_s3 + $0x338] sm:$0xff] }
  0x7b   :  { %768 = vmatpush.msrb.mxu2 %v144_v60  ;;  %787 = vmatpush.msrb.mxu3 %v178_v61  ;;  %v64_v32 = vld [vmem:[%s11007_s3 + $0x18] sm:$0xff]  ;;  %v98_v33 = vld [vmem:[%s11007_s3 + $0x128] sm:$0xff] }
  0x7c   :  { %729 = vmatpush.msrb.mxu0 %v78_v62  ;;  %748 = vmatpush.msrb.mxu1 %v112_v63  ;;  %v128_v34 = vld [vmem:[%s11007_s3 + $0x218] sm:$0xff]  ;;  %v162_v35 = vld [vmem:[%s11007_s3 + $0x328] sm:$0xff] }
  0x7d   :  { %769 = vmatpush.msrb.mxu2 %v142_v0  ;;  %788 = vmatpush.msrb.mxu3 %v176_v1  ;;  %v62_v37 = vld [vmem:[%s11007_s3 + $0x8] sm:$0xff]  ;;  %v96_v42 = vld [vmem:[%s11007_s3 + $0x118] sm:$0xff] }
  0x7e   :  { %730 = vmatpush.msrb.mxu0 %v76_v2  ;;  %749 = vmatpush.msrb.mxu1 %v110_v5  ;;  %v126_v44 = vld [vmem:[%s11007_s3 + $0x208] sm:$0xff]  ;;  %v160_v45 = vld [vmem:[%s11007_s3 + $0x318] sm:$0xff] }
  0x7f   :  { %770 = vmatpush.msrb.mxu2 %v140_v6  ;;  %789 = vmatpush.msrb.mxu3 %v174_v7  ;;  %v220_v46 = vld [vmem:[%s11007_s3 + $0x4f8] sm:$0xff]  ;;  %v94_v48 = vld [vmem:[%s11007_s3 + $0x108] sm:$0xff] }
  0x80   :  { %731 = vmatpush.msrb.mxu0 %v74_v8  ;;  %750 = vmatpush.msrb.mxu1 %v108_v11  ;;  %v284_v47 = vld [vmem:[%s11007_s3 + $0x6f8] sm:$0xff]  ;;  %v158_v49 = vld [vmem:[%s11007_s3 + $0x308] sm:$0xff] }
  0x81   :  { %771 = vmatpush.msrb.mxu2 %v138_v12  ;;  %790 = vmatpush.msrb.mxu3 %v172_v13  ;;  %v218_v50 = vld [vmem:[%s11007_s3 + $0x4e8] sm:$0xff]  ;;  %v252_v51 = vld [vmem:[%s11007_s3 + $0x5f8] sm:$0xff] }
  0x82   :  { %732 = vmatpush.msrb.mxu0 %v72_v14  ;;  %751 = vmatpush.msrb.mxu1 %v106_v15  ;;  %v282_v52 = vld [vmem:[%s11007_s3 + $0x6e8] sm:$0xff]  ;;  %v316_v54 = vld [vmem:[%s11007_s3 + $0x7f8] sm:$0xff] }
  0x83   :  { %772 = vmatpush.msrb.mxu2 %v136_v16  ;;  %791 = vmatpush.msrb.mxu3 %v170_v17  ;;  %v216_v55 = vld [vmem:[%s11007_s3 + $0x4d8] sm:$0xff]  ;;  %v250_v56 = vld [vmem:[%s11007_s3 + $0x5e8] sm:$0xff] }
  0x84   :  { %733 = vmatpush.msrb.mxu0 %v70_v18  ;;  %752 = vmatpush.msrb.mxu1 %v104_v19  ;;  %v280_v59 = vld [vmem:[%s11007_s3 + $0x6d8] sm:$0xff]  ;;  %v314_v60 = vld [vmem:[%s11007_s3 + $0x7e8] sm:$0xff] }
  0x85   :  { %773 = vmatpush.msrb.mxu2 %v134_v20  ;;  %792 = vmatpush.msrb.mxu3 %v168_v21  ;;  %v214_v61 = vld [vmem:[%s11007_s3 + $0x4c8] sm:$0xff]  ;;  %v248_v62 = vld [vmem:[%s11007_s3 + $0x5d8] sm:$0xff] }
  0x86   :  { %734 = vmatpush.msrb.mxu0 %v68_v22  ;;  %753 = vmatpush.msrb.mxu1 %v102_v23  ;;  %v278_v63 = vld [vmem:[%s11007_s3 + $0x6c8] sm:$0xff]  ;;  %v312_v0 = vld [vmem:[%s11007_s3 + $0x7d8] sm:$0xff] }
  0x87   :  { %774 = vmatpush.msrb.mxu2 %v132_v25  ;;  %793 = vmatpush.msrb.mxu3 %v166_v26  ;;  %v212_v1 = vld [vmem:[%s11007_s3 + $0x4b8] sm:$0xff]  ;;  %v246_v2 = vld [vmem:[%s11007_s3 + $0x5c8] sm:$0xff] }
  0x88   :  { %735 = vmatpush.msrb.mxu0 %v66_v27  ;;  %754 = vmatpush.msrb.mxu1 %v100_v28  ;;  %v276_v5 = vld [vmem:[%s11007_s3 + $0x6b8] sm:$0xff]  ;;  %v310_v6 = vld [vmem:[%s11007_s3 + $0x7c8] sm:$0xff] }
  0x89   :  { %775 = vmatpush.msrb.mxu2 %v130_v29  ;;  %794 = vmatpush.msrb.mxu3 %v164_v30  ;;  %v210_v7 = vld [vmem:[%s11007_s3 + $0x4a8] sm:$0xff]  ;;  %v244_v8 = vld [vmem:[%s11007_s3 + $0x5b8] sm:$0xff] }
  0x8a   :  { %736 = vmatpush.msrb.mxu0 %v64_v32  ;;  %755 = vmatpush.msrb.mxu1 %v98_v33  ;;  %v274_v11 = vld [vmem:[%s11007_s3 + $0x6a8] sm:$0xff]  ;;  %v308_v12 = vld [vmem:[%s11007_s3 + $0x7b8] sm:$0xff] }
  0x8b   :  { %776 = vmatpush.msrb.mxu2 %v128_v34  ;;  %795 = vmatpush.msrb.mxu3 %v162_v35  ;;  %v208_v13 = vld [vmem:[%s11007_s3 + $0x498] sm:$0xff]  ;;  %v242_v14 = vld [vmem:[%s11007_s3 + $0x5a8] sm:$0xff] }
  0x8c   :  { %737 = vmatpush.msrb.mxu0 %v62_v37  ;;  %756 = vmatpush.msrb.mxu1 %v96_v42  ;;  %v272_v15 = vld [vmem:[%s11007_s3 + $0x698] sm:$0xff]  ;;  %v306_v16 = vld [vmem:[%s11007_s3 + $0x7a8] sm:$0xff] }
  0x8d   :  { %777 = vmatpush.msrb.mxu2 %v126_v44  ;;  %796 = vmatpush.msrb.mxu3 %v160_v45  ;;  %v206_v17 = vld [vmem:[%s11007_s3 + $0x488] sm:$0xff]  ;;  %v240_v18 = vld [vmem:[%s11007_s3 + $0x598] sm:$0xff] }
  0x8e   :  { %802 = vmatpush.msra.mxu0 %v220_v46  ;;  %757 = vmatpush.msrb.mxu1 %v94_v48  ;;  %v270_v19 = vld [vmem:[%s11007_s3 + $0x688] sm:$0xff]  ;;  %v304_v20 = vld [vmem:[%s11007_s3 + $0x798] sm:$0xff] }
  0x8f   :  { %842 = vmatpush.msra.mxu2 %v284_v47  ;;  %797 = vmatpush.msrb.mxu3 %v158_v49  ;;  %v204_v21 = vld [vmem:[%s11007_s3 + $0x478] sm:$0xff]  ;;  %v238_v22 = vld [vmem:[%s11007_s3 + $0x588] sm:$0xff] }
  0x90   :  { %803 = vmatpush.msra.mxu0 %v218_v50  ;;  %822 = vmatpush.msra.mxu1 %v252_v51  ;;  %v268_v23 = vld [vmem:[%s11007_s3 + $0x678] sm:$0xff]  ;;  %v302_v25 = vld [vmem:[%s11007_s3 + $0x788] sm:$0xff] }
  0x91   :  { %843 = vmatpush.msra.mxu2 %v282_v52  ;;  %862 = vmatpush.msra.mxu3 %v316_v54  ;;  %v202_v26 = vld [vmem:[%s11007_s3 + $0x468] sm:$0xff]  ;;  %v236_v27 = vld [vmem:[%s11007_s3 + $0x578] sm:$0xff] }
  0x92   :  { %804 = vmatpush.msra.mxu0 %v216_v55  ;;  %823 = vmatpush.msra.mxu1 %v250_v56  ;;  %v266_v28 = vld [vmem:[%s11007_s3 + $0x668] sm:$0xff]  ;;  %v300_v29 = vld [vmem:[%s11007_s3 + $0x778] sm:$0xff] }
  0x93   :  { %844 = vmatpush.msra.mxu2 %v280_v59  ;;  %863 = vmatpush.msra.mxu3 %v314_v60  ;;  %v200_v30 = vld [vmem:[%s11007_s3 + $0x458] sm:$0xff]  ;;  %v234_v32 = vld [vmem:[%s11007_s3 + $0x568] sm:$0xff] }
  0x94   :  { %805 = vmatpush.msra.mxu0 %v214_v61  ;;  %824 = vmatpush.msra.mxu1 %v248_v62  ;;  %v264_v33 = vld [vmem:[%s11007_s3 + $0x658] sm:$0xff]  ;;  %v298_v34 = vld [vmem:[%s11007_s3 + $0x768] sm:$0xff] }
  0x95   :  { %845 = vmatpush.msra.mxu2 %v278_v63  ;;  %864 = vmatpush.msra.mxu3 %v312_v0  ;;  %v198_v35 = vld [vmem:[%s11007_s3 + $0x448] sm:$0xff]  ;;  %v232_v37 = vld [vmem:[%s11007_s3 + $0x558] sm:$0xff] }
  0x96   :  { %806 = vmatpush.msra.mxu0 %v212_v1  ;;  %825 = vmatpush.msra.mxu1 %v246_v2  ;;  %v262_v42 = vld [vmem:[%s11007_s3 + $0x648] sm:$0xff]  ;;  %v296_v44 = vld [vmem:[%s11007_s3 + $0x758] sm:$0xff] }
  0x97   :  { %846 = vmatpush.msra.mxu2 %v276_v5  ;;  %865 = vmatpush.msra.mxu3 %v310_v6  ;;  %v196_v45 = vld [vmem:[%s11007_s3 + $0x438] sm:$0xff]  ;;  %v230_v46 = vld [vmem:[%s11007_s3 + $0x548] sm:$0xff] }
  0x98   :  { %807 = vmatpush.msra.mxu0 %v210_v7  ;;  %826 = vmatpush.msra.mxu1 %v244_v8  ;;  %v260_v47 = vld [vmem:[%s11007_s3 + $0x638] sm:$0xff]  ;;  %v294_v48 = vld [vmem:[%s11007_s3 + $0x748] sm:$0xff] }
  0x99   :  { %847 = vmatpush.msra.mxu2 %v274_v11  ;;  %866 = vmatpush.msra.mxu3 %v308_v12  ;;  %v194_v49 = vld [vmem:[%s11007_s3 + $0x428] sm:$0xff]  ;;  %v228_v50 = vld [vmem:[%s11007_s3 + $0x538] sm:$0xff] }
  0x9a   :  { %808 = vmatpush.msra.mxu0 %v208_v13  ;;  %827 = vmatpush.msra.mxu1 %v242_v14  ;;  %v258_v51 = vld [vmem:[%s11007_s3 + $0x628] sm:$0xff]  ;;  %v292_v52 = vld [vmem:[%s11007_s3 + $0x738] sm:$0xff] }
  0x9b   :  { %848 = vmatpush.msra.mxu2 %v272_v15  ;;  %867 = vmatpush.msra.mxu3 %v306_v16  ;;  %v192_v54 = vld [vmem:[%s11007_s3 + $0x418] sm:$0xff]  ;;  %v226_v55 = vld [vmem:[%s11007_s3 + $0x528] sm:$0xff] }
  0x9c   :  { %809 = vmatpush.msra.mxu0 %v206_v17  ;;  %828 = vmatpush.msra.mxu1 %v240_v18  ;;  %v256_v56 = vld [vmem:[%s11007_s3 + $0x618] sm:$0xff]  ;;  %v290_v59 = vld [vmem:[%s11007_s3 + $0x728] sm:$0xff] }
  0x9d   :  { %849 = vmatpush.msra.mxu2 %v270_v19  ;;  %868 = vmatpush.msra.mxu3 %v304_v20  ;;  %v190_v60 = vld [vmem:[%s11007_s3 + $0x408] sm:$0xff]  ;;  %v224_v61 = vld [vmem:[%s11007_s3 + $0x518] sm:$0xff] }
  0x9e   :  { %810 = vmatpush.msra.mxu0 %v204_v21  ;;  %829 = vmatpush.msra.mxu1 %v238_v22  ;;  %v254_v62 = vld [vmem:[%s11007_s3 + $0x608] sm:$0xff]  ;;  %v288_v63 = vld [vmem:[%s11007_s3 + $0x718] sm:$0xff] }
  0x9f   :  { %850 = vmatpush.msra.mxu2 %v268_v23  ;;  %869 = vmatpush.msra.mxu3 %v302_v25  ;;  %v348_v0 = vld [vmem:[%s11007_s3 + $0x8f8] sm:$0xff]  ;;  %v222_v2 = vld [vmem:[%s11007_s3 + $0x508] sm:$0xff] }
  0xa0   :  { %811 = vmatpush.msra.mxu0 %v202_v26  ;;  %830 = vmatpush.msra.mxu1 %v236_v27  ;;  %v412_v1 = vld [vmem:[%s11007_s3 + $0xaf8] sm:$0xff]  ;;  %v286_v5 = vld [vmem:[%s11007_s3 + $0x708] sm:$0xff] }
  0xa1   :  { %851 = vmatpush.msra.mxu2 %v266_v28  ;;  %870 = vmatpush.msra.mxu3 %v300_v29  ;;  %v346_v6 = vld [vmem:[%s11007_s3 + $0x8e8] sm:$0xff]  ;;  %v380_v7 = vld [vmem:[%s11007_s3 + $0x9f8] sm:$0xff] }
  0xa2   :  { %812 = vmatpush.msra.mxu0 %v200_v30  ;;  %831 = vmatpush.msra.mxu1 %v234_v32  ;;  %v410_v8 = vld [vmem:[%s11007_s3 + $0xae8] sm:$0xff]  ;;  %v408_v12 = vld [vmem:[%s11007_s3 + $0xad8] sm:$0xff] }
  0xa3   :  { %852 = vmatpush.msra.mxu2 %v264_v33  ;;  %871 = vmatpush.msra.mxu3 %v298_v34  ;;  %v378_v11 = vld [vmem:[%s11007_s3 + $0x9e8] sm:$0xff]  ;;  %v376_v13 = vld [vmem:[%s11007_s3 + $0x9d8] sm:$0xff] }
  0xa4   :  { %813 = vmatpush.msra.mxu0 %v198_v35  ;;  %832 = vmatpush.msra.mxu1 %v232_v37  ;;  %v406_v14 = vld [vmem:[%s11007_s3 + $0xac8] sm:$0xff]  ;;  %v440_v15 = vld [vmem:[%s11007_s3 + $0xbd8] sm:$0xff] }
  0xa5   :  { %853 = vmatpush.msra.mxu2 %v262_v42  ;;  %872 = vmatpush.msra.mxu3 %v296_v44  ;;  %v340_v16 = vld [vmem:[%s11007_s3 + $0x8b8] sm:$0xff]  ;;  %v374_v17 = vld [vmem:[%s11007_s3 + $0x9c8] sm:$0xff] }
  0xa6   :  { %814 = vmatpush.msra.mxu0 %v196_v45  ;;  %833 = vmatpush.msra.mxu1 %v230_v46  ;;  %v404_v18 = vld [vmem:[%s11007_s3 + $0xab8] sm:$0xff]  ;;  %v438_v19 = vld [vmem:[%s11007_s3 + $0xbc8] sm:$0xff] }
  0xa7   :  { %854 = vmatpush.msra.mxu2 %v260_v47  ;;  %873 = vmatpush.msra.mxu3 %v294_v48  ;;  %v338_v20 = vld [vmem:[%s11007_s3 + $0x8a8] sm:$0xff]  ;;  %v372_v21 = vld [vmem:[%s11007_s3 + $0x9b8] sm:$0xff] }
  0xa8   :  { %815 = vmatpush.msra.mxu0 %v194_v49  ;;  %834 = vmatpush.msra.mxu1 %v228_v50  ;;  %v402_v22 = vld [vmem:[%s11007_s3 + $0xaa8] sm:$0xff]  ;;  %v336_v23 = vld [vmem:[%s11007_s3 + $0x898] sm:$0xff]  ;;  %v8701_v50 = vld [vmem:[%s11008_s4] sm:$0x3] }
  0xa9   :  { %855 = vmatpush.msra.mxu2 %v258_v51  ;;  %874 = vmatpush.msra.mxu3 %v292_v52  ;;  %v370_v25 = vld [vmem:[%s11007_s3 + $0x9a8] sm:$0xff]  ;;  %v368_v27 = vld [vmem:[%s11007_s3 + $0x998] sm:$0xff] }
  0xaa   :  { %816 = vmatpush.msra.mxu0 %v192_v54  ;;  %835 = vmatpush.msra.mxu1 %v226_v55  ;;  %v434_v26 = vld [vmem:[%s11007_s3 + $0xba8] sm:$0xff]  ;;  %v432_v29 = vld [vmem:[%s11007_s3 + $0xb98] sm:$0xff] }
  0xab   :  { %856 = vmatpush.msra.mxu2 %v256_v56  ;;  %875 = vmatpush.msra.mxu3 %v290_v59  ;;  %v398_v28 = vld [vmem:[%s11007_s3 + $0xa88] sm:$0xff]  ;;  %v396_v32 = vld [vmem:[%s11007_s3 + $0xa78] sm:$0xff] }
  0xac   :  { %817 = vmatpush.msra.mxu0 %v190_v60  ;;  %836 = vmatpush.msra.mxu1 %v224_v61  ;;  %v366_v30 = vld [vmem:[%s11007_s3 + $0x988] sm:$0xff]  ;;  %v364_v35 = vld [vmem:[%s11007_s3 + $0x978] sm:$0xff]  ;;  %v447_v60 = vperm.slane %v8701_v50, 0 }
  0xad   :  { %857 = vmatpush.msra.mxu2 %v254_v62  ;;  %876 = vmatpush.msra.mxu3 %v288_v63  ;;  %v430_v33 = vld [vmem:[%s11007_s3 + $0xb88] sm:$0xff]  ;;  %v428_v42 = vld [vmem:[%s11007_s3 + $0xb78] sm:$0xff] }
  0xae   :  { %738 = vmatmul.f32.vlgmr.msrb.gmra.mxu0 %v7929_v3  ;;  %778 = vmatmul.f32.vlgmr.msrb.gmra.mxu2 %v7931_v4  ;;  %v444_v3 = vld [vmem:[%s11007_s3 + $0xbf8] sm:$0xff]  ;;  %v330_v34 = vld [vmem:[%s11007_s3 + $0x868] sm:$0xff] }
  0xaf   :  { %882 = vmatpush.msrb.mxu0 %v348_v0  ;;  %922 = vmatpush.msrb.mxu2 %v412_v1  ;;  %v344_v4 = vld [vmem:[%s11007_s3 + $0x8d8] sm:$0xff]  ;;  %v394_v37 = vld [vmem:[%s11007_s3 + $0xa68] sm:$0xff] }
  0xb0   :  { %837 = vmatpush.msra.mxu1 %v222_v2  ;;  %877 = vmatpush.msra.mxu3 %v286_v5  ;;  %v328_v44 = vld [vmem:[%s11007_s3 + $0x858] sm:$0xff]  ;;  %v362_v45 = vld [vmem:[%s11007_s3 + $0x968] sm:$0xff] }
  0xb1   :  { %758 = vmatmul.f32.vlgmr.msrb.gmra.mxu1 %v7947_v9  ;;  %798 = vmatmul.f32.vlgmr.msrb.gmra.mxu3 %v7949_v10  ;;  %v442_v9 = vld [vmem:[%s11007_s3 + $0xbe8] sm:$0xff]  ;;  %v392_v46 = vld [vmem:[%s11007_s3 + $0xa58] sm:$0xff] }
  0xb2   :  { %883 = vmatpush.msrb.mxu0 %v346_v6  ;;  %902 = vmatpush.msrb.mxu1 %v380_v7  ;;  %v342_v10 = vld [vmem:[%s11007_s3 + $0x8c8] sm:$0xff]  ;;  %v360_v49 = vld [vmem:[%s11007_s3 + $0x958] sm:$0xff] }
  0xb3   :  { %923 = vmatpush.msrb.mxu2 %v410_v8  ;;  %942 = vmatpush.msrb.mxu3 %v444_v3  ;;  %v426_v47 = vld [vmem:[%s11007_s3 + $0xb68] sm:$0xff]  ;;  %v424_v52 = vld [vmem:[%s11007_s3 + $0xb58] sm:$0xff] }
  0xb4   :  { %884 = vmatpush.msrb.mxu0 %v344_v4  ;;  %903 = vmatpush.msrb.mxu1 %v378_v11  ;;  %v326_v48 = vld [vmem:[%s11007_s3 + $0x848] sm:$0xff]  ;;  %v324_v54 = vld [vmem:[%s11007_s3 + $0x838] sm:$0xff] }
  0xb5   :  { %924 = vmatpush.msrb.mxu2 %v408_v12  ;;  %943 = vmatpush.msrb.mxu3 %v442_v9  ;;  %v390_v51 = vld [vmem:[%s11007_s3 + $0xa48] sm:$0xff]  ;;  %v388_v56 = vld [vmem:[%s11007_s3 + $0xa38] sm:$0xff] }
  0xb6   :  { %885 = vmatpush.msrb.mxu0 %v342_v10  ;;  %904 = vmatpush.msrb.mxu1 %v376_v13  ;;  %v358_v55 = vld [vmem:[%s11007_s3 + $0x948] sm:$0xff]  ;;  %v356_v62 = vld [vmem:[%s11007_s3 + $0x938] sm:$0xff] }
  0xb7   :  { %925 = vmatpush.msrb.mxu2 %v406_v14  ;;  %944 = vmatpush.msrb.mxu3 %v440_v15  ;;  %v422_v59 = vld [vmem:[%s11007_s3 + $0xb48] sm:$0xff]  ;;  %v420_v1 = vld [vmem:[%s11007_s3 + $0xb38] sm:$0xff] }
  0xb8   :  { %858 = vmatmul.f32.vlgmr.msra.gmra.mxu2 %v7992_v24  ;;  %886 = vmatpush.msrb.mxu0 %v340_v16  ;;  %v436_v24 = vld [vmem:[%s11007_s3 + $0xbb8] sm:$0xff]  ;;  %v322_v61 = vld [vmem:[%s11007_s3 + $0x828] sm:$0xff]  ;;  %v994_v16 = vld [vmem:[%s11009_s5 + $0xf0] sm:$0xff] }
  0xb9   :  { %905 = vmatpush.msrb.mxu1 %v374_v17  ;;  %926 = vmatpush.msrb.mxu2 %v404_v18  ;;  %v386_v0 = vld [vmem:[%s11007_s3 + $0xa28] sm:$0xff]  ;;  %v320_v2 = vld [vmem:[%s11007_s3 + $0x818] sm:$0xff] }
  0xba   :  { %945 = vmatpush.msrb.mxu3 %v438_v19  ;;  %818 = vmatmul.f32.vlgmr.msra.gmra.mxu0 %v7900_v57  ;;  %v400_v57 = vld [vmem:[%s11007_s3 + $0xa98] sm:$0xff]  ;;  %v354_v5 = vld [vmem:[%s11007_s3 + $0x928] sm:$0xff] }
  0xbb   :  { %878 = vmatmul.f32.vlgmr.msra.gmra.mxu3 %v8013_v31  ;;  %887 = vmatpush.msrb.mxu0 %v338_v20  ;;  %v334_v31 = vld [vmem:[%s11007_s3 + $0x888] sm:$0xff]  ;;  %v384_v6 = vld [vmem:[%s11007_s3 + $0xa18] sm:$0xff]  ;;  %v519_v11 = vpop.f32.mrf.mxu1  ;;  %v990_v20 = vld [vmem:[%s11009_s5 + $0xd0] sm:$0xff] }
  0xbc   :  { %906 = vmatpush.msrb.mxu1 %v372_v21  ;;  %927 = vmatpush.msrb.mxu2 %v402_v22  ;;  %v418_v7 = vld [vmem:[%s11007_s3 + $0xb28] sm:$0xff]  ;;  %v352_v4 = vld [vmem:[%s11007_s3 + $0x918] sm:$0xff]  ;;  %v988_v21 = vld [vmem:[%s11009_s5 + $0xc0] sm:$0xff] }
  0xbd   :  { %946 = vmatpush.msrb.mxu3 %v436_v24  ;;  %838 = vmatmul.f32.vlgmr.msra.gmra.mxu1 %v7902_v58  ;;  %v332_v58 = vld [vmem:[%s11007_s3 + $0x878] sm:$0xff]  ;;  %v318_v3 = vld [vmem:[%s11007_s3 + $0x808] sm:$0xff] }
  0xbe   :  { %888 = vmatpush.msrb.mxu0 %v336_v23  ;;  %907 = vmatpush.msrb.mxu1 %v370_v25  ;;  %v382_v12 = vld [vmem:[%s11007_s3 + $0xa08] sm:$0xff]  ;;  %v416_v9 = vld [vmem:[%s11007_s3 + $0xb18] sm:$0xff]  ;;  %v986_v23 = vld [vmem:[%s11009_s5 + $0xb0] sm:$0xff] }
  0xbf   :  { %928 = vmatpush.msrb.mxu2 %v400_v57  ;;  %947 = vmatpush.msrb.mxu3 %v434_v26  ;;  %v350_v10 = vld [vmem:[%s11007_s3 + $0x908] sm:$0xff]  ;;  %v995_v17 = vld [vmem:[%s11009_s5 + $0xf8] sm:$0xff]  ;;  %v984_v26 = vld [vmem:[%s11009_s5 + $0xa0] sm:$0xff] }
  0xc0   :  { %889 = vmatpush.msrb.mxu0 %v334_v31  ;;  %908 = vmatpush.msrb.mxu1 %v368_v27  ;;  %v414_v13 = vld [vmem:[%s11007_s3 + $0xb08] sm:$0xff]  ;;  %v987_v25 = vld [vmem:[%s11009_s5 + $0xb8] sm:$0xff] }
  0xc1   :  { %929 = vmatpush.msrb.mxu2 %v398_v28  ;;  %948 = vmatpush.msrb.mxu3 %v432_v29  ;;  %v989_v22 = vld [vmem:[%s11009_s5 + $0xc8] sm:$0xff]  ;;  %v982_v28 = vld [vmem:[%s11009_s5 + $0x90] sm:$0xff]  ;;  %v983_v29 = vld [vmem:[%s11009_s5 + $0x98] sm:$0xff] }
  0xc2   :  { %890 = vmatpush.msrb.mxu0 %v332_v58  ;;  %909 = vmatpush.msrb.mxu1 %v366_v30  ;;  %v499_v63 = vpop.f32.mrf.mxu0  ;;  %v985_v31 = vld [vmem:[%s11009_s5 + $0xa8] sm:$0xff]  ;;  %v980_v30 = vld [vmem:[%s11009_s5 + $0x80] sm:$0xff] }
  0xc3   :  { %930 = vmatpush.msrb.mxu2 %v396_v32  ;;  %949 = vmatpush.msrb.mxu3 %v430_v33  ;;  %v500_v8 = vadd.f32 %v499_v63, %v447_v60  ;;  %v981_v32 = vld [vmem:[%s11009_s5 + $0x88] sm:$0xff]  ;;  %v968_v60 = vld [vmem:[%s11009_s5 + $0x20] sm:$0xff]  ;;  %v966_v63 = vld [vmem:[%s11009_s5 + $0x10] sm:$0xff] }
  0xc4   :  { %891 = vmatpush.msrb.mxu0 %v330_v34  ;;  %910 = vmatpush.msrb.mxu1 %v364_v35  ;;  %v978_v34 = vld [vmem:[%s11009_s5 + $0x70] sm:$0xff]  ;;  %v979_v35 = vld [vmem:[%s11009_s5 + $0x78] sm:$0xff] }
  0xc5   :  { %931 = vmatpush.msrb.mxu2 %v394_v37  ;;  %950 = vmatpush.msrb.mxu3 %v428_v42  ;;  %v520_v14 = vadd.f32 %v519_v11, %v500_v8  ;;  %v976_v42 = vld [vmem:[%s11009_s5 + $0x60] sm:$0xff]  ;;  %v1027_v11 = vld [vmem:[%s11009_s5 + $0x1f8] sm:$0xff] }
  0xc6   :  { %892 = vmatpush.msrb.mxu0 %v328_v44  ;;  %911 = vmatpush.msrb.mxu1 %v362_v45  ;;  %v977_v44 = vld [vmem:[%s11009_s5 + $0x68] sm:$0xff] }
  0xc7   :  { %932 = vmatpush.msrb.mxu2 %v392_v46  ;;  %951 = vmatpush.msrb.mxu3 %v426_v47  ;;  %v974_v46 = vld [vmem:[%s11009_s5 + $0x50] sm:$0xff]  ;;  %v975_v47 = vld [vmem:[%s11009_s5 + $0x58] sm:$0xff] }
  0xc8   :  { %893 = vmatpush.msrb.mxu0 %v326_v48  ;;  %912 = vmatpush.msrb.mxu1 %v360_v49  ;;  %v539_v15 = vpop.f32.mrf.mxu2  ;;  %v972_v49 = vld [vmem:[%s11009_s5 + $0x40] sm:$0xff] }
  0xc9   :  { %933 = vmatpush.msrb.mxu2 %v390_v51  ;;  %952 = vmatpush.msrb.mxu3 %v424_v52  ;;  %v540_v18 = vadd.f32 %v539_v15, %v520_v14  ;;  %v973_v51 = vld [vmem:[%s11009_s5 + $0x48] sm:$0xff]  ;;  %v1020_v14 = vld [vmem:[%s11009_s5 + $0x1c0] sm:$0xff] }
  0xca   :  { %894 = vmatpush.msrb.mxu0 %v324_v54  ;;  %913 = vmatpush.msrb.mxu1 %v358_v55  ;;  %v970_v55 = vld [vmem:[%s11009_s5 + $0x30] sm:$0xff]  ;;  %v1021_v15 = vld [vmem:[%s11009_s5 + $0x1c8] sm:$0xff] }
  0xcb   :  { %934 = vmatpush.msrb.mxu2 %v388_v56  ;;  %953 = vmatpush.msrb.mxu3 %v422_v59  ;;  %v559_v19 = vpop.f32.mrf.mxu3  ;;  %v971_v56 = vld [vmem:[%s11009_s5 + $0x38] sm:$0xff] }
  0xcc   :  { %895 = vmatpush.msrb.mxu0 %v322_v61  ;;  %914 = vmatpush.msrb.mxu1 %v356_v62  ;;  %v969_v61 = vld [vmem:[%s11009_s5 + $0x28] sm:$0xff] }
  0xcd   :  { %935 = vmatpush.msrb.mxu2 %v386_v0  ;;  %954 = vmatpush.msrb.mxu3 %v420_v1  ;;  %v967_v0 = vld [vmem:[%s11009_s5 + $0x18] sm:$0xff] }
  0xce   :  { %896 = vmatpush.msrb.mxu0 %v320_v2  ;;  %915 = vmatpush.msrb.mxu1 %v354_v5  ;;  %v964_v5 = vld [vmem:[%s11009_s5] sm:$0xff] }
  0xcf   :  { %936 = vmatpush.msrb.mxu2 %v384_v6  ;;  %955 = vmatpush.msrb.mxu3 %v418_v7  ;;  %v965_v6 = vld [vmem:[%s11009_s5 + $0x8] sm:$0xff] }
  0xd0   :  { %897 = vmatpush.msrb.mxu0 %v318_v3  ;;  %916 = vmatpush.msrb.mxu1 %v352_v4  ;;  %v1026_v4 = vld [vmem:[%s11009_s5 + $0x1f0] sm:$0xff] }
  0xd1   :  { %937 = vmatpush.msrb.mxu2 %v382_v12  ;;  %956 = vmatpush.msrb.mxu3 %v416_v9  ;;  %v579_v24 = vpop.f32.mrf.mxu0  ;;  %v1024_v12 = vld [vmem:[%s11009_s5 + $0x1e0] sm:$0xff]  ;;  %v1025_v9 = vld [vmem:[%s11009_s5 + $0x1e8] sm:$0xff] }
  0xd2   :  { %898 = vmatmul.f32.vlgmr.msrb.gmra.mxu0 %v8036_v38  ;;  %938 = vmatmul.f32.vlgmr.msrb.gmra.mxu2 %v8044_v40  ;;  %v992_v38 = vld [vmem:[%s11009_s5 + $0xe0] sm:$0xff]  ;;  %v993_v40 = vld [vmem:[%s11009_s5 + $0xe8] sm:$0xff] }
  0xd3   :  { %917 = vmatpush.msrb.mxu1 %v350_v10  ;;  %957 = vmatpush.msrb.mxu3 %v414_v13  ;;  %v1022_v10 = vld [vmem:[%s11009_s5 + $0x1d0] sm:$0xff]  ;;  %v1023_v13 = vld [vmem:[%s11009_s5 + $0x1d8] sm:$0xff] }
  0xd4   :  { %918 = vmatmul.f32.vlgmr.msrb.gmra.mxu1 %v8046_v41  ;;  %958 = vmatmul.f32.vlgmr.msrb.gmra.mxu3 %v8052_v43  ;;  %v991_v41 = vld [vmem:[%s11009_s5 + $0xd8] sm:$0xff]  ;;  %v560_v43 = vadd.f32 %v559_v19, %v540_v18  ;;  %v599_v27 = vpop.f32.mrf.mxu1  ;;  %v1016_v18 = vld [vmem:[%s11009_s5 + $0x1a0] sm:$0xff] }
  0xd5   :  { %1034 = vmatpush.msra.mxu0 %v994_v16  ;;  %1074 = vmatpush.msra.mxu2 %v995_v17  ;;  %v619_v33 = vpop.f32.mrf.mxu2  ;;  %v1018_v16 = vld [vmem:[%s11009_s5 + $0x1b0] sm:$0xff]  ;;  %v1019_v17 = vld [vmem:[%s11009_s5 + $0x1b8] sm:$0xff] }
  0xd6   :  { %v580_v57 = vadd.f32 %v579_v24, %v560_v43  ;;  %1054 = vmatpush.msra.mxu1 %v1026_v4  ;;  %1094 = vmatpush.msra.mxu3 %v1027_v11  ;;  %v1015_v19 = vld [vmem:[%s11009_s5 + $0x198] sm:$0xff]  ;;  %v1010_v43 = vld [vmem:[%s11009_s5 + $0x170] sm:$0xff]  ;;  %v1008_v24 = vld [vmem:[%s11009_s5 + $0x160] sm:$0xff] }
  0xd7   :  { %1035 = vmatpush.msra.mxu0 %v992_v38  ;;  %1075 = vmatpush.msra.mxu2 %v993_v40  ;;  %v1017_v38 = vld [vmem:[%s11009_s5 + $0x1a8] sm:$0xff]  ;;  %v1014_v40 = vld [vmem:[%s11009_s5 + $0x190] sm:$0xff]  ;;  %v1147_v4 = vld [vmem:[%s11015_s11 + $0xf8] sm:$0xff] }
  0xd8   :  { %v600_v58 = vadd.f32 %v599_v27, %v580_v57  ;;  %v639_v45 = vpop.f32.mrf.mxu3  ;;  %1055 = vmatpush.msra.mxu1 %v1024_v12  ;;  %1095 = vmatpush.msra.mxu3 %v1025_v9  ;;  %v1006_v57 = vld [vmem:[%s11009_s5 + $0x150] sm:$0xff]  ;;  %v1005_v27 = vld [vmem:[%s11009_s5 + $0x148] sm:$0xff]  ;;  %v7073_v11 = vld [vmem:[%s11011_s7 + $0x78] sm:$0xff] }
  0xd9   :  { %1036 = vmatpush.msra.mxu0 %v990_v20  ;;  %1076 = vmatpush.msra.mxu2 %v991_v41  ;;  %v1012_v20 = vld [vmem:[%s11009_s5 + $0x180] sm:$0xff]  ;;  %v1013_v41 = vld [vmem:[%s11009_s5 + $0x188] sm:$0xff]  ;;  %v1146_v12 = vld [vmem:[%s11015_s11 + $0xf0] sm:$0xff] }
  0xda   :  { %v620_v37 = vadd.f32 %v619_v33, %v600_v58  ;;  %1056 = vmatpush.msra.mxu1 %v1022_v10  ;;  %1096 = vmatpush.msra.mxu3 %v1023_v13  ;;  %v1003_v58 = vld [vmem:[%s11009_s5 + $0x138] sm:$0xff]  ;;  %v1001_v33 = vld [vmem:[%s11009_s5 + $0x128] sm:$0xff]  ;;  %v7064_v10 = vld [vmem:[%s11011_s7 + $0x30] sm:$0xff] }
  0xdb   :  { %1037 = vmatpush.msra.mxu0 %v988_v21  ;;  %1077 = vmatpush.msra.mxu2 %v989_v22  ;;  %v1011_v21 = vld [vmem:[%s11009_s5 + $0x178] sm:$0xff]  ;;  %v448_v22 = vperm.slane %v8701_v50, 1  ;;  %v1129_v9 = vld [vmem:[%s11015_s11 + $0x68] sm:$0xff] }
  0xdc   :  { %v640_v48 = vadd.f32 %v639_v45, %v620_v37  ;;  %1057 = vmatpush.msra.mxu1 %v1020_v14  ;;  %1097 = vmatpush.msra.mxu3 %v1021_v15  ;;  %v999_v37 = vld [vmem:[%s11009_s5 + $0x118] sm:$0xff]  ;;  %v997_v45 = vld [vmem:[%s11009_s5 + $0x108] sm:$0xff]  ;;  %v7072_v14 = vld [vmem:[%s11011_s7 + $0x70] sm:$0xff] }
  0xdd   :  { %1038 = vmatpush.msra.mxu0 %v986_v23  ;;  %1078 = vmatpush.msra.mxu2 %v987_v25  ;;  %v1009_v23 = vld [vmem:[%s11009_s5 + $0x168] sm:$0xff]  ;;  %v1128_v15 = vld [vmem:[%s11015_s11 + $0x60] sm:$0xff] }
  0xde   :  { %1058 = vmatpush.msra.mxu1 %v1018_v16  ;;  %1098 = vmatpush.msra.mxu3 %v1019_v17  ;;  %v1145_v13 = vld [vmem:[%s11015_s11 + $0xe8] sm:$0xff]  ;;  %v1144_v16 = vld [vmem:[%s11015_s11 + $0xe0] sm:$0xff]  ;;  %v1127_v17 = vld [vmem:[%s11015_s11 + $0x58] sm:$0xff] }
  0xdf   :  { %1039 = vmatpush.msra.mxu0 %v984_v26  ;;  %1079 = vmatpush.msra.mxu2 %v985_v31  ;;  %v1007_v26 = vld [vmem:[%s11009_s5 + $0x158] sm:$0xff]  ;;  %v1004_v31 = vld [vmem:[%s11009_s5 + $0x140] sm:$0xff] }
  0xe0   :  { %1059 = vmatpush.msra.mxu1 %v1016_v18  ;;  %1099 = vmatpush.msra.mxu3 %v1017_v38  ;;  %v7063_v18 = vld [vmem:[%s11011_s7 + $0x28] sm:$0xff]  ;;  %v1143_v38 = vld [vmem:[%s11015_s11 + $0xd8] sm:$0xff] }
  0xe1   :  { %1040 = vmatpush.msra.mxu0 %v982_v28  ;;  %1080 = vmatpush.msra.mxu2 %v983_v29  ;;  %v1002_v29 = vld [vmem:[%s11009_s5 + $0x130] sm:$0xff] }
  0xe2   :  { %1060 = vmatpush.msra.mxu1 %v1014_v40  ;;  %1100 = vmatpush.msra.mxu3 %v1015_v19  ;;  %v7071_v40 = vld [vmem:[%s11011_s7 + $0x68] sm:$0xff]  ;;  %v1126_v19 = vld [vmem:[%s11015_s11 + $0x50] sm:$0xff] }
  0xe3   :  { %1041 = vmatpush.msra.mxu0 %v980_v30  ;;  %1081 = vmatpush.msra.mxu2 %v981_v32  ;;  %v1000_v32 = vld [vmem:[%s11009_s5 + $0x120] sm:$0xff] }
  0xe4   :  { %1061 = vmatpush.msra.mxu1 %v1012_v20  ;;  %1101 = vmatpush.msra.mxu3 %v1013_v41  ;;  %v1142_v20 = vld [vmem:[%s11015_s11 + $0xd0] sm:$0xff]  ;;  %v1125_v41 = vld [vmem:[%s11015_s11 + $0x48] sm:$0xff] }
  0xe5   :  { %1042 = vmatpush.msra.mxu0 %v978_v34  ;;  %1082 = vmatpush.msra.mxu2 %v979_v35  ;;  %v998_v35 = vld [vmem:[%s11009_s5 + $0x110] sm:$0xff] }
  0xe6   :  { %1062 = vmatpush.msra.mxu1 %v1010_v43  ;;  %1102 = vmatpush.msra.mxu3 %v1011_v21  ;;  %v7062_v43 = vld [vmem:[%s11011_s7 + $0x20] sm:$0xff]  ;;  %v1141_v21 = vld [vmem:[%s11015_s11 + $0xc8] sm:$0xff] }
  0xe7   :  { %1043 = vmatpush.msra.mxu0 %v976_v42  ;;  %1083 = vmatpush.msra.mxu2 %v977_v44  ;;  %v996_v44 = vld [vmem:[%s11009_s5 + $0x100] sm:$0xff] }
  0xe8   :  { %1063 = vmatpush.msra.mxu1 %v1008_v24  ;;  %1103 = vmatpush.msra.mxu3 %v1009_v23  ;;  %v1124_v24 = vld [vmem:[%s11015_s11 + $0x40] sm:$0xff] }
  0xe9   :  { %v659_v52 = vpop.f32.mrf.mxu0  ;;  %1044 = vmatpush.msra.mxu0 %v974_v46  ;;  %1084 = vmatpush.msra.mxu2 %v975_v47  ;;  %v1140_v23 = vld [vmem:[%s11015_s11 + $0xc0] sm:$0xff] }
  0xea   :  { %v660_v54 = vadd.f32 %v659_v52, %v640_v48  ;;  %1064 = vmatpush.msra.mxu1 %v1006_v57  ;;  %1104 = vmatpush.msra.mxu3 %v1007_v26  ;;  %v7061_v57 = vld [vmem:[%s11011_s7 + $0x18] sm:$0xff] }
  0xeb   :  { %1045 = vmatpush.msra.mxu0 %v972_v49  ;;  %1085 = vmatpush.msra.mxu2 %v973_v51  ;;  %v1139_v26 = vld [vmem:[%s11015_s11 + $0xb8] sm:$0xff] }
  0xec   :  { %v679_v59 = vpop.f32.mrf.mxu1  ;;  %1065 = vmatpush.msra.mxu1 %v1004_v31  ;;  %1105 = vmatpush.msra.mxu3 %v1005_v27  ;;  %v1122_v31 = vld [vmem:[%s11015_s11 + $0x30] sm:$0xff] }
  0xed   :  { %1046 = vmatpush.msra.mxu0 %v970_v55  ;;  %1086 = vmatpush.msra.mxu2 %v971_v56  ;;  %v680_v62 = vadd.f32 %v679_v59, %v660_v54  ;;  %v1138_v27 = vld [vmem:[%s11015_s11 + $0xb0] sm:$0xff] }
  0xee   :  { %1066 = vmatpush.msra.mxu1 %v1002_v29  ;;  %1106 = vmatpush.msra.mxu3 %v1003_v58  ;;  %v7060_v29 = vld [vmem:[%s11011_s7 + $0x10] sm:$0xff]  ;;  %v1137_v58 = vld [vmem:[%s11015_s11 + $0xa8] sm:$0xff] }
  0xef   :  { %v699_v1 = vpop.f32.mrf.mxu2  ;;  %1047 = vmatpush.msra.mxu0 %v968_v60  ;;  %1087 = vmatpush.msra.mxu2 %v969_v61 }
  0xf0   :  { %v700_v2 = vadd.f32 %v699_v1, %v680_v62  ;;  %1067 = vmatpush.msra.mxu1 %v1000_v32  ;;  %1107 = vmatpush.msra.mxu3 %v1001_v33  ;;  %v1120_v32 = vld [vmem:[%s11015_s11 + $0x20] sm:$0xff] }
  0xf1   :  { %1048 = vmatpush.msra.mxu0 %v966_v63  ;;  %1088 = vmatpush.msra.mxu2 %v967_v0  ;;  %v1136_v33 = vld [vmem:[%s11015_s11 + $0xa0] sm:$0xff] }
  0xf2   :  { %v719_v7 = vpop.f32.mrf.mxu3  ;;  %1068 = vmatpush.msra.mxu1 %v998_v35  ;;  %1108 = vmatpush.msra.mxu3 %v999_v37  ;;  %v7059_v35 = vld [vmem:[%s11011_s7 + $0x8] sm:$0xff]  ;;  %v1135_v37 = vld [vmem:[%s11015_s11 + $0x98] sm:$0xff] }
  0xf3   :  { %v720_v8 = vadd.f32 %v719_v7, %v700_v2  ;;  %1049 = vmatpush.msra.mxu0 %v964_v5  ;;  %1089 = vmatpush.msra.mxu2 %v965_v6  ;;  %v1131_v7 = vld [vmem:[%s11015_s11 + $0x78] sm:$0xff] }
  0xf4   :  { %1069 = vmatpush.msra.mxu1 %v996_v44  ;;  %1109 = vmatpush.msra.mxu3 %v997_v45  ;;  %v1118_v44 = vld [vmem:[%s11015_s11 + $0x10] sm:$0xff] }
  0xf5   :  { %v962_v3 = vmax.f32 %v720_v8, 0.0  ;;  %v1130_v8 = vld [vmem:[%s11015_s11 + $0x70] sm:$0xff]  ;;  %1152 = vmatpush.msrb.mxu0 %v1131_v7  ;;  %v7078_v7 = vld [vmem:[%s11011_s7 + $0xa0] sm:$0xff] }
  0xf6   :  { %1172 = vmatpush.msrb.mxu1 %v1147_v4  ;;  %3721 = vmatpush.bf16.msrb.mxu3 %v7073_v11  ;;  %v1134_v45 = vld [vmem:[%s11015_s11 + $0x90] sm:$0xff]  ;;  %v7093_v4 = vld [vmem:[%s11011_s7 + $0x118] sm:$0xff] }
  0xf7   :  { %1050 = vmatmul.f32.vlgmr.msra.gmra.mxu0 %v962_v3  ;;  %1090 = vmatmul.f32.vlgmr.msra.gmra.mxu2 %v962_v3  ;;  %v7065_v3 = vld [vmem:[%s11011_s7 + $0x38] sm:$0xff] }
  0xf8   :  { %3708 = vmatpush.bf16.msrb.mxu2 %v7065_v3  ;;  %1153 = vmatpush.msrb.mxu0 %v1130_v8  ;;  %v7102_v8 = vld [vmem:[%s11011_s7 + $0x160] sm:$0xff]  ;;  %v7077_v11 = vld [vmem:[%s11011_s7 + $0x98] sm:$0xff] }
  0xf9   :  { %1173 = vmatpush.msrb.mxu1 %v1146_v12  ;;  %v7086_v3 = vld [vmem:[%s11011_s7 + $0xe0] sm:$0xff]  ;;  %v7101_v12 = vld [vmem:[%s11011_s7 + $0x158] sm:$0xff] }
  0xfa   :  { %1154 = vmatpush.msrb.mxu0 %v1129_v9  ;;  %3722 = vmatpush.bf16.msrb.mxu3 %v7072_v14  ;;  %v7085_v9 = vld [vmem:[%s11011_s7 + $0xd8] sm:$0xff] }
  0xfb   :  { %1174 = vmatpush.msrb.mxu1 %v1145_v13  ;;  %v7076_v13 = vld [vmem:[%s11011_s7 + $0x90] sm:$0xff]  ;;  %v9174_v14 = vld [vmem:[%s11041_s20 + $0x18] sm:$0xff] }
  0xfc   :  { %3709 = vmatpush.bf16.msrb.mxu2 %v7064_v10  ;;  %1155 = vmatpush.msrb.mxu0 %v1128_v15  ;;  %v7092_v10 = vld [vmem:[%s11011_s7 + $0x110] sm:$0xff]  ;;  %v9176_v15 = vld.sshfl [vmem:[#allocation1] sm:$0xff pattern:$0x75316420] }
  0xfd   :  { %1175 = vmatpush.msrb.mxu1 %v1144_v16  ;;  %v1192_v16 = vld [vmem:[%s11042_s19] sm:$0xff] }
  0xfe   :  { %1156 = vmatpush.msrb.mxu0 %v1127_v17  ;;  %3723 = vmatpush.bf16.msrb.mxu3 %v7071_v40  ;;  %v9184_v17 = vld [vmem:[%s11042_s19 + $0x10] sm:$0xff] }
  0xff   :  { %1176 = vmatpush.msrb.mxu1 %v1143_v38  ;;  %v1210_v38 = vld [vmem:[%s11042_s19 + $0x90] sm:$0xff]  ;;  %v1224_v40 = vadd.f32 %v9184_v17, %v1192_v16 }
 0x100   :  { %3710 = vmatpush.bf16.msrb.mxu2 %v7063_v18  ;;  %1157 = vmatpush.msrb.mxu0 %v1126_v19  ;;  %v1208_v18 = vld [vmem:[%s11042_s19 + $0x80] sm:$0xff]  ;;  %v9193_v19 = vld.sshfl [vmem:[#allocation1 + $0x8] sm:$0xff pattern:$0x75316420] }
 0x101   :  { %1177 = vmatpush.msrb.mxu1 %v1142_v20  ;;  %v9198_v20 = vld [vmem:[%s11042_s19 + $0x20] sm:$0xff]  ;;  %1685 = vst [vmem:[#allocation1] ss:$2 sm:$0xff] %v9174_v14 }
 0x102   :  { %1158 = vmatpush.msrb.mxu0 %v1125_v41  ;;  %v9203_v41 = vld [vmem:[%s11042_s19 + $0xa0] sm:$0xff] }
 0x103   :  { %1178 = vmatpush.msrb.mxu1 %v1141_v21  ;;  %v1193_v21 = vld [vmem:[%s11042_s19 + $0x8] sm:$0xff] }
 0x104   :  { %3711 = vmatpush.bf16.msrb.mxu2 %v7062_v43  ;;  %1159 = vmatpush.msrb.mxu0 %v1124_v24  ;;  %v1236_v43 = vadd.f32 %v1210_v38, %v1208_v18  ;;  %v9213_v24 = vld [vmem:[%s11042_s19 + $0x18] sm:$0xff] }
 0x105   :  { %1179 = vmatpush.msrb.mxu1 %v1140_v23  ;;  %v1209_v23 = vld [vmem:[%s11042_s19 + $0x88] sm:$0xff] }
 0x107   :  { %1180 = vmatpush.msrb.mxu1 %v1139_v26  ;;  %v1214_v26 = vld [vmem:[%s11042_s19 + $0xb0] sm:$0xff] }
 0x108   :  { %3712 = vmatpush.bf16.msrb.mxu2 %v7061_v57  ;;  %v9224_v57 = vld [vmem:[%s11042_s19 + $0x30] sm:$0xff] }
 0x109   :  { %1181 = vmatpush.msrb.mxu1 %v1138_v27  ;;  %v1230_v27 = vadd.f32 %v9213_v24, %v1193_v21 }
 0x10b   :  { %1182 = vmatpush.msrb.mxu1 %v1137_v58  ;;  %v1213_v58 = vld [vmem:[%s11042_s19 + $0xa8] sm:$0xff] }
 0x10c   :  { %3713 = vmatpush.bf16.msrb.mxu2 %v7060_v29 }
 0x10d   :  { %1183 = vmatpush.msrb.mxu1 %v1136_v33  ;;  %v9250_v33 = vld [vmem:[%s11042_s19 + $0x40] sm:$0xff] }
 0x10f   :  { %1184 = vmatpush.msrb.mxu1 %v1135_v37  ;;  %v9258_v37 = vld [vmem:[%s11042_s19 + $0x38] sm:$0xff] }
 0x110   :  { %3714 = vmatpush.bf16.msrb.mxu2 %v7059_v35 }
 0x111   :  { %1185 = vmatpush.msrb.mxu1 %v1134_v45 }
 0x12b   :  { %v739_v25 = vpop.f32.mrf.mxu0 }
 0x12c   :  { %v740_v50 = vadd.f32 %v739_v25, %v448_v22  ;;  %v7070_v22 = vld [vmem:[%s11011_s7 + $0x60] sm:$0xff]  ;;  %v1123_v25 = vld [vmem:[%s11015_s11 + $0x38] sm:$0xff] }
 0x12d   :  { %3724 = vmatpush.bf16.msrb.mxu3 %v7070_v22  ;;  %1160 = vmatpush.msrb.mxu0 %v1123_v25  ;;  %v1225_v22 = vadd.f32 %v1224_v40, %v9198_v20  ;;  %v1211_v25 = vld [vmem:[%s11042_s19 + $0x98] sm:$0xff]  ;;  %v9327_v40 = vld [vmem:[%s11041_s20 + $0x48] sm:$0xff] }
 0x12e   :  { %v759_v28 = vpop.f32.mrf.mxu1  ;;  %11044 = vst [vmem:[#allocation6_spill] sm:$0xff] %v9327_v40 }
 0x12f   :  { %v760_v30 = vadd.f32 %v759_v28, %v740_v50  ;;  %v7069_v50 = vld [vmem:[%s11011_s7 + $0x58] sm:$0xff]  ;;  %v1121_v28 = vld [vmem:[%s11015_s11 + $0x28] sm:$0xff]  ;;  %1161 = vmatpush.msrb.mxu0 %v1122_v31  ;;  %v1226_v29 = vadd.f32 %v1225_v22, %v9224_v57 }
 0x130   :  { %v9233_v31 = vld [vmem:[%s11042_s19 + $0x28] sm:$0xff] }
 0x131   :  { %v779_v34 = vpop.f32.mrf.mxu2  ;;  %3725 = vmatpush.bf16.msrb.mxu3 %v7069_v50  ;;  %1162 = vmatpush.msrb.mxu0 %v1121_v28  ;;  %v1237_v50 = vadd.f32 %v1236_v43, %v9203_v41  ;;  %v1242_v28 = vadd.f32 %v1211_v25, %v1209_v23  ;;  %v1227_v45 = vadd.f32 %v1226_v29, %v9250_v33  ;;  %v9339_v29 = vld [vmem:[%s11041_s20 + $0x14] sm:$0xf] }
 0x132   :  { %v780_v42 = vadd.f32 %v779_v34, %v760_v30  ;;  %v7068_v30 = vld [vmem:[%s11011_s7 + $0x50] sm:$0xff]  ;;  %v1119_v34 = vld [vmem:[%s11015_s11 + $0x18] sm:$0xff]  ;;  %1681 = vst [vmem:[#allocation1 + $0x30] ss:$2 sm:$0xff] %v9339_v29 }
 0x133   :  { %1163 = vmatpush.msrb.mxu0 %v1120_v32  ;;  %v9245_v32 = vld.sshfl [vmem:[#allocation1 + $0x20] sm:$0xff pattern:$0x75316420]  ;;  %v1238_v35 = vadd.f32 %v1237_v50, %v1214_v26 }
 0x134   :  { %v799_v46 = vpop.f32.mrf.mxu3 }
 0x135   :  { %v800_v47 = vadd.f32 %v799_v46, %v780_v42  ;;  %3726 = vmatpush.bf16.msrb.mxu3 %v7068_v30  ;;  %v7067_v42 = vld [vmem:[%s11011_s7 + $0x48] sm:$0xff]  ;;  %1164 = vmatpush.msrb.mxu0 %v1119_v34  ;;  %v9243_v30 = vld [vmem:[%s11041_s20 + $0x30] sm:$0xff]  ;;  %v1216_v34 = vld [vmem:[%s11042_s19 + $0xc0] sm:$0xff] }
 0x136   :  { %v1117_v46 = vld [vmem:[%s11015_s11 + $0x8] sm:$0xff] }
 0x137   :  { %v819_v48 = vpop.f32.mrf.mxu0  ;;  %1165 = vmatpush.msrb.mxu0 %v1118_v44  ;;  %v1243_v44 = vadd.f32 %v1242_v28, %v1213_v58 }
 0x138   :  { %v820_v49 = vadd.f32 %v819_v48, %v800_v47  ;;  %v7058_v47 = vld [vmem:[%s11011_s7] sm:$0xff]  ;;  %v7097_v48 = vld [vmem:[%s11011_s7 + $0x138] sm:$0xff] }
 0x139   :  { %3727 = vmatpush.bf16.msrb.mxu3 %v7067_v42  ;;  %1166 = vmatpush.msrb.mxu0 %v1117_v46  ;;  %v1231_v42 = vadd.f32 %v1230_v27, %v9233_v31  ;;  %v1215_v46 = vld [vmem:[%s11042_s19 + $0xb8] sm:$0xff] }
 0x13a   :  { %v839_v51 = vpop.f32.mrf.mxu1  ;;  %3715 = vmatpush.bf16.msrb.mxu2 %v7058_v47  ;;  %v9265_v47 = vld.sshfl [vmem:[#allocation1 + $0x28] sm:$0xff pattern:$0x75316420] }
 0x13b   :  { %v840_v52 = vadd.f32 %v839_v51, %v820_v49  ;;  %v859_v54 = vpop.f32.mrf.mxu2  ;;  %v1133_v49 = vld [vmem:[%s11015_s11 + $0x88] sm:$0xff]  ;;  %v1116_v51 = vld [vmem:[%s11015_s11] sm:$0xff]  ;;  %1690 = vst [vmem:[#allocation1 + $0x20] ss:$2 sm:$0xff] %v9243_v30 }
 0x13c   :  { %1186 = vmatpush.msrb.mxu1 %v1133_v49  ;;  %1167 = vmatpush.msrb.mxu0 %v1116_v51  ;;  %v1218_v49 = vld [vmem:[%s11042_s19 + $0xd0] sm:$0xff]  ;;  %v1239_v51 = vadd.f32 %v1238_v35, %v1216_v34 }
 0x13d   :  { %v860_v55 = vadd.f32 %v859_v54, %v840_v52  ;;  %v7081_v52 = vld [vmem:[%s11011_s7 + $0xb8] sm:$0xff]  ;;  %v7066_v54 = vld [vmem:[%s11011_s7 + $0x40] sm:$0xff] }
 0x13e   :  { %v879_v56 = vpop.f32.mrf.mxu3  ;;  %3760 = vmatpush.bf16.msra.mxu2 %v7097_v48  ;;  %3734 = vmatpush.bf16.msra.mxu0 %v7081_v52  ;;  %v9270_v48 = vld [vmem:[%s11042_s19 + $0x50] sm:$0xff]  ;;  %v1201_v52 = vld [vmem:[%s11042_s19 + $0x48] sm:$0xff] }
 0x13f   :  { %v880_v59 = vadd.f32 %v879_v56, %v860_v55  ;;  %v7105_v55 = vld [vmem:[%s11011_s7 + $0x178] sm:$0xff]  ;;  %v1132_v56 = vld [vmem:[%s11015_s11 + $0x80] sm:$0xff]  ;;  %3728 = vmatpush.bf16.msrb.mxu3 %v7066_v54  ;;  %v1232_v54 = vadd.f32 %v1231_v42, %v9258_v37  ;;  %s5752_s11 = sshll.u32 %s11021_s17, 4  ;;  %s5753_s11 = int_to_ptr.hbm [resolvable:$true] %s5752_s11 }
 0x140   :  { %1187 = vmatpush.msrb.mxu1 %v1132_v56  ;;  %v1228_v56 = vadd.f32 %v1227_v45, %v9270_v48  ;;  %v7075_v45 = vld [vmem:[%s11011_s7 + $0x88] sm:$0xff] }
 0x142   :  { %v1692_v21 = vld.sshfl [vmem:[#allocation1 + $0x20] sm:$0xff pattern:$0x75316420]  ;;  %v9333_v26 = vld.sshfl [vmem:[#allocation1 + $0x28] sm:$0xff pattern:$0x75316420] }
 0x143   :  { %1700 = vst [vmem:[#allocation1 + $0x20] ss:$2 sm:$0xff] %v9327_v40 }
 0x14f   :  { %v899_v60 = vpop.f32.mrf.mxu0 }
 0x150   :  { %v900_v61 = vadd.f32 %v899_v60, %v880_v59  ;;  %v7089_v59 = vld [vmem:[%s11011_s7 + $0xf8] sm:$0xff]  ;;  %v7096_v60 = vld [vmem:[%s11011_s7 + $0x130] sm:$0xff] }
 0x151   :  { %v919_v62 = vpop.f32.mrf.mxu1  ;;  %3761 = vmatpush.bf16.msra.mxu2 %v7096_v60  ;;  %v9287_v60 = vld [vmem:[%s11041_s20 + $0x3c] sm:$0xff] }
 0x152   :  { %v920_v63 = vadd.f32 %v919_v62, %v900_v61  ;;  %v7080_v61 = vld [vmem:[%s11011_s7 + $0xb0] sm:$0xff]  ;;  %11043 = vst [vmem:[#allocation5_spill] sm:$0xff] %v9287_v60 }
 0x153   :  { %v7104_v62 = vld [vmem:[%s11011_s7 + $0x170] sm:$0xff]  ;;  %3735 = vmatpush.bf16.msra.mxu0 %v7080_v61  ;;  %v9289_v61 = vld.sshfl [vmem:[#allocation1] sm:$0xff pattern:$0x75316420] }
 0x155   :  { %v939_v0 = vpop.f32.mrf.mxu2 }
 0x156   :  { %v940_v1 = vadd.f32 %v939_v0, %v920_v63  ;;  %v7088_v63 = vld [vmem:[%s11011_s7 + $0xf0] sm:$0xff]  ;;  %v7095_v0 = vld [vmem:[%s11011_s7 + $0x128] sm:$0xff] }
 0x157   :  { %v959_v2 = vpop.f32.mrf.mxu3  ;;  %3762 = vmatpush.bf16.msra.mxu2 %v7095_v0  ;;  %v1240_v0 = vadd.f32 %v1239_v51, %v1218_v49 }
 0x158   :  { %v960_v5 = vadd.f32 %v959_v2, %v940_v1  ;;  %v7079_v1 = vld [vmem:[%s11011_s7 + $0xa8] sm:$0xff] }
 0x159   :  { %v7103_v2 = vld [vmem:[%s11011_s7 + $0x168] sm:$0xff]  ;;  %3736 = vmatpush.bf16.msra.mxu0 %v7079_v1  ;;  %v1203_v1 = vld [vmem:[%s11042_s19 + $0x58] sm:$0xff] }
 0x15a   :  { %v963_v6 = vmax.f32 %v960_v5, 0.0  ;;  %v7087_v5 = vld [vmem:[%s11011_s7 + $0xe8] sm:$0xff] }
 0x15c   :  { %1070 = vmatmul.f32.vlgmr.msra.gmra.mxu1 %v963_v6  ;;  %1110 = vmatmul.f32.vlgmr.msra.gmra.mxu3 %v963_v6  ;;  %v7094_v6 = vld [vmem:[%s11011_s7 + $0x120] sm:$0xff] }
 0x15d   :  { %3773 = vmatpush.bf16.msra.mxu3 %v7105_v55  ;;  %3747 = vmatpush.bf16.msra.mxu1 %v7089_v59  ;;  %v1244_v55 = vadd.f32 %v1243_v44, %v1215_v46  ;;  %v1217_v59 = vld [vmem:[%s11042_s19 + $0xc8] sm:$0xff]  ;;  %v7100_v46 = vld [vmem:[%s11011_s7 + $0x150] sm:$0xff] }
 0x15e   :  { %3763 = vmatpush.bf16.msra.mxu2 %v7094_v6  ;;  %3737 = vmatpush.bf16.msra.mxu0 %v7078_v7  ;;  %v1219_v7 = vld [vmem:[%s11042_s19 + $0xd8] sm:$0xff] }
 0x161   :  { %3774 = vmatpush.bf16.msra.mxu3 %v7104_v62  ;;  %3748 = vmatpush.bf16.msra.mxu1 %v7088_v63  ;;  %v1204_v62 = vld [vmem:[%s11042_s19 + $0x60] sm:$0xff] }
 0x162   :  { %3764 = vmatpush.bf16.msra.mxu2 %v7093_v4  ;;  %3738 = vmatpush.bf16.msra.mxu0 %v7077_v11  ;;  %v1220_v63 = vld [vmem:[%s11042_s19 + $0xe0] sm:$0xff]  ;;  %v9300_v6 = vadd.f32 %v1228_v56, %v1204_v62  ;;  %v1205_v4 = vld [vmem:[%s11042_s19 + $0x68] sm:$0xff] }
 0x163   :  { %v1221_v11 = vld [vmem:[%s11042_s19 + $0xe8] sm:$0xff] }
 0x164   :  { %v7091_v62 = vld [vmem:[%s11011_s7 + $0x108] sm:$0xff] }
 0x165   :  { %3775 = vmatpush.bf16.msra.mxu3 %v7103_v2  ;;  %3749 = vmatpush.bf16.msra.mxu1 %v7087_v5  ;;  %v1233_v2 = vadd.f32 %v1232_v54, %v1201_v52  ;;  %v1245_v5 = vadd.f32 %v1244_v55, %v1217_v59  ;;  %v9353_v52 = vld [vmem:[%s11010_s6] sm:$0x3]  ;;  %v7084_v59 = vld [vmem:[%s11011_s7 + $0xd0] sm:$0xff]  ;;  %s7443_s6 = smov 64  }
 0x166   :  { %3765 = vmatpush.bf16.msra.mxu2 %v7092_v10  ;;  %3739 = vmatpush.bf16.msra.mxu0 %v7076_v13  ;;  %v1277_v10 = vsel %vm1276_vm0, %v9300_v6, 0.0 }
 0x167   :  { %v1278_v13 = vrot.slane %v1277_v10, 4 }
 0x169   :  { %3776 = vmatpush.bf16.msra.mxu3 %v7102_v8  ;;  %3750 = vmatpush.bf16.msra.mxu1 %v7086_v3  ;;  %v9305_v8 = vld.sshfl [vmem:[#allocation1 + $0x8] sm:$0xff pattern:$0x75316420]  ;;  %v9307_v3 = vadd.f32 %v1240_v0, %v1220_v63  ;;  %v1279_v22 = vadd.f32 %v1278_v13, %v1277_v10 }
 0x16a   :  { %1695 = vst [vmem:[#allocation1] ss:$2 sm:$0xff] %v9287_v60  ;;  %3740 = vmatpush.bf16.msra.mxu0 %v7075_v45  ;;  %3766 = vmatpush.bf16.msra.mxu2 %v7091_v62  ;;  %v1333_v45 = vrot.slane %v9300_v6, 1 }
 0x16b   :  { %v1291_v16 = vsel %vm1276_vm0, %v9307_v3, 0.0  ;;  %v1280_v58 = vrot.slane %v1279_v22, 2 }
 0x16c   :  { %v1292_v43 = vrot.slane %v1291_v16, 4 }
 0x16d   :  { %3777 = vmatpush.bf16.msra.mxu3 %v7101_v12  ;;  %3751 = vmatpush.bf16.msra.mxu1 %v7085_v9  ;;  %v1234_v12 = vadd.f32 %v1233_v2, %v1203_v1  ;;  %v1246_v9 = vadd.f32 %v1245_v5, %v1219_v7  ;;  %v1281_v49 = vadd.f32 %v1280_v58, %v1279_v22  ;;  %v1727_v22 = vsel %vm1723_vm1, %v9289_v61, 0.0  ;;  %v9390_v58 = vld.sshfl [vmem:[#allocation1 + $0x28] sm:$0xff pattern:$0x75316420] }
 0x16e   :  { %v1293_v50 = vadd.f32 %v1292_v43, %v1291_v16  ;;  %v1702_v16 = vld.sshfl [vmem:[#allocation1 + $0x20] sm:$0xff pattern:$0x75316420]  ;;  %v1725_v43 = vsel %vm1723_vm1, %v9245_v32, 0.0 }
 0x16f   :  { %v9320_v18 = vadd.f32 %v1234_v12, %v1205_v4  ;;  %v9322_v38 = vadd.f32 %v1246_v9, %v1221_v11  ;;  %v1282_v63 = vrot.slane %v1281_v49, 1  ;;  %v7099_v4 = vld [vmem:[%s11011_s7 + $0x148] sm:$0xff]  ;;  %v1724_v12 = vsel %vm1723_vm1, %v9176_v15, 0.0  ;;  %v9381_v15 = vld [vmem:[%s11041_s20 + $0x20] sm:$0xf] }
 0x170   :  { %v1294_v34 = vrot.slane %v1293_v50, 2  ;;  %v7090_v32 = vld [vmem:[%s11011_s7 + $0x100] sm:$0xff]  ;;  %1766 = vst [vmem:[#allocation1 + $0x20] ss:$2 sm:$0xff] %v7889_v53 }
 0x171   :  { %v1284_v23 = vsel %vm1276_vm0, %v9320_v18, 0.0  ;;  %v1298_v25 = vsel %vm1276_vm0, %v9322_v38, 0.0  ;;  %v1697_v44 = vld.sshfl [vmem:[#allocation1] sm:$0xff pattern:$0x75316420]  ;;  %3778 = vmatpush.bf16.msra.mxu3 %v7100_v46  ;;  %3752 = vmatpush.bf16.msra.mxu1 %v7084_v59  ;;  %v1283_v11 = vadd.f32 %v1282_v63, %v1281_v49  ;;  %v7137_v63 = vld [vmem:[%s11011_s7 + $0x278] sm:$0xff] }
 0x172   :  { %v1285_v27 = vrot.slane %v1284_v23, 4  ;;  %v1299_v28 = vrot.slane %v1298_v25, 4  ;;  %v9348_v51 = vld.sshfl [vmem:[#allocation1 + $0x8] sm:$0xff pattern:$0x75316420]  ;;  %v1295_v54 = vadd.f32 %v1294_v34, %v1293_v50  ;;  %3767 = vmatpush.bf16.msra.mxu2 %v7090_v32  ;;  %v7098_v49 = vld [vmem:[%s11011_s7 + $0x140] sm:$0xff] }
 0x173   :  { %1759 = vst [vmem:[#allocation1] ss:$2 sm:$0xff] %v8030_v36  ;;  %v7074_v36 = vld [vmem:[%s11011_s7 + $0x80] sm:$0xff]  ;;  %v9406_v59 = vld.sshfl [vmem:[#allocation1 + $0x10] sm:$0xff pattern:$0x75316420] }
 0x174   :  { %v1286_v35 = vadd.f32 %v1285_v27, %v1284_v23  ;;  %v1300_v42 = vadd.f32 %v1299_v28, %v1298_v25  ;;  %v1296_v0 = vrot.slane %v1295_v54, 1  ;;  %3741 = vmatpush.bf16.msra.mxu0 %v7074_v36  ;;  %v1740_v23 = vsel %vm1723_vm1, %v1692_v21, 0.0  ;;  %v7083_v27 = vld [vmem:[%s11011_s7 + $0xc8] sm:$0xff]  ;;  %1686 = vst [vmem:[#allocation1 + $0x10] ss:$2 sm:$0xff] %v9381_v15  ;;  %v7082_v36 = vld [vmem:[%s11011_s7 + $0xc0] sm:$0xff] }
 0x175   :  { %3779 = vmatpush.bf16.msra.mxu3 %v7099_v4  ;;  %v1741_v25 = vsel %vm1723_vm1, %v1697_v44, 0.0  ;;  %v1726_v21 = vadd.f32 %v1725_v43, %v1724_v12  ;;  %v1743_v44 = vsel %vm1723_vm1, %v1702_v16, 0.0  ;;  %3753 = vmatpush.bf16.msra.mxu1 %v7083_v27  ;;  %v7136_v32 = vld [vmem:[%s11011_s7 + $0x270] sm:$0xff] }
 0x176   :  { %v1287_v55 = vrot.slane %v1286_v35, 2  ;;  %v1301_v56 = vrot.slane %v1300_v42, 2  ;;  %v1297_v9 = vadd.f32 %v1296_v0, %v1295_v54 }
 0x177   :  { %v9402_v54 = vadd.f32 %v1727_v22, %v1726_v21 }
 0x178   :  { %v1288_v1 = vadd.f32 %v1287_v55, %v1286_v35  ;;  %v1302_v2 = vadd.f32 %v1301_v56, %v1300_v42  ;;  %v1558_v50 = vsel %vm1557_vm2, %v1297_v9, %v1283_v11  ;;  %v7129_v35 = vld [vmem:[%s11011_s7 + $0x238] sm:$0xff]  ;;  %v1742_v42 = vadd.f32 %v1741_v25, %v1740_v23 }
 0x179   :  { %v1626_v34 = vpack.c.bf16 %v1558_v50, %v1558_v50  ;;  %11045 = vst [vmem:[#allocation7_spill] sm:$0xff] %v9402_v54  ;;  %v1335_v55 = vrot.slane %v9307_v3, 1  ;;  %v1334_v56 = vrot.slane %v9320_v18, 1  ;;  %3780 = vmatpush.bf16.msra.mxu3 %v7098_v49  ;;  %v1993_v4 = vsel %vm1723_vm1, %v9402_v54, 0.0  ;;  %3754 = vmatpush.bf16.msra.mxu1 %v7082_v36  ;;  %v9444_v49 = vld [vmem:[%s11041_s20 + $0x44] sm:$0xf] }
 0x17a   :  { %v1289_v10 = vrot.slane %v1288_v1, 1  ;;  %v1303_v13 = vrot.slane %v1302_v2, 1  ;;  %v9411_v0 = vadd.f32 %v1743_v44, %v1742_v42  ;;  %v1341_v11 = vsel %vm1276_vm0, %v1333_v45, 0.0 }
 0x17b   :  { %3716 = vmatmul.bf16.vlgmr.msrb.gmra.mxu2 %v1626_v34  ;;  %v1355_v12 = vsel %vm1276_vm0, %v1335_v55, 0.0  ;;  %v1336_v9 = vrot.slane %v9322_v38, 1  ;;  %v1342_v25 = vrot.slane %v1341_v11, 4  ;;  %v1348_v27 = vsel %vm1276_vm0, %v1334_v56, 0.0  ;;  %v7127_v55 = vld [vmem:[%s11011_s7 + $0x228] sm:$0xff] }
 0x17c   :  { %v1290_v61 = vadd.f32 %v1289_v10, %v1288_v1  ;;  %v1304_v28 = vadd.f32 %v1303_v13, %v1302_v2  ;;  %11046 = vst [vmem:[#allocation8_spill] sm:$0xff] %v9411_v0  ;;  %v1305_v1 = vrot.slane %v9300_v6, 4  ;;  %v1317_v2 = vrot.slane %v9307_v3, 4  ;;  %3812 = vmatpush.bf16.msrb.mxu2 %v7129_v35  ;;  %v7128_v10 = vld [vmem:[%s11011_s7 + $0x230] sm:$0xff]  ;;  %v9438_v35 = vld [vmem:[%s11041_s20 + $0x38] sm:$0xf] }
 0x17d   :  { %v1994_v13 = vrot.slane %v1993_v4, 4  ;;  %v2014_v16 = vsel %vm1723_vm1, %v9411_v0, 0.0  ;;  %v1356_v50 = vrot.slane %v1355_v12, 4  ;;  %v1349_v34 = vrot.slane %v1348_v27, 4 }
 0x17e   :  { %v1559_v46 = vsel %vm1557_vm2, %v1304_v28, %v1290_v61  ;;  %v1306_v43 = vadd.f32 %v1305_v1, %v9300_v6  ;;  %v1318_v22 = vadd.f32 %v1317_v2, %v9307_v3  ;;  %v2015_v23 = vrot.slane %v2014_v16, 4  ;;  %v9449_v2 = vld.sshfl [vmem:[#allocation1 + $0x30] sm:$0xff pattern:$0x75316420] }
 0x17f   :  { %v1627_v62 = vpack.c.bf16 %v1559_v46, %v1559_v46  ;;  %v1995_v61 = vadd.f32 %v1994_v13, %v1993_v4  ;;  %v1343_v44 = vadd.f32 %v1342_v25, %v1341_v11  ;;  %v1357_v45 = vadd.f32 %v1356_v50, %v1355_v12  ;;  %1691 = vst [vmem:[#allocation1 + $0x30] ss:$2 sm:$0xff] %v9438_v35 }
 0x180   :  { %v1307_v28 = vrot.slane %v1306_v43, 2  ;;  %v1319_v21 = vrot.slane %v1318_v22, 2  ;;  %3813 = vmatpush.bf16.msrb.mxu2 %v7128_v10  ;;  %v2016_v42 = vadd.f32 %v2015_v23, %v2014_v16  ;;  %v1362_v46 = vsel %vm1276_vm0, %v1336_v9, 0.0  ;;  %v7135_v9 = vld [vmem:[%s11011_s7 + $0x268] sm:$0xff] }
 0x181   :  { %3729 = vmatmul.bf16.vlgmr.msrb.gmra.mxu3 %v1627_v62  ;;  %v1996_v56 = vrot.slane %v1995_v61, 2  ;;  %v1350_v1 = vadd.f32 %v1349_v34, %v1348_v27  ;;  %v1344_v4 = vrot.slane %v1343_v44, 2  ;;  %v1358_v11 = vrot.slane %v1357_v45, 2 }
 0x182   :  { %3825 = vmatpush.bf16.msrb.mxu3 %v7137_v63  ;;  %v1308_v62 = vadd.f32 %v1307_v28, %v1306_v43  ;;  %v1320_v63 = vadd.f32 %v1319_v21, %v1318_v22  ;;  %v2017_v36 = vrot.slane %v2016_v42, 2  ;;  %v1363_v12 = vrot.slane %v1362_v46, 4  ;;  %v1051_v43 = vpop.f32.mrf.mxu0  ;;  %v1091_v22 = vpop.f32.mrf.mxu2  ;;  %v9455_v28 = vld.sshfl [vmem:[#allocation1 + $0x10] sm:$0xff pattern:$0x75316420]  ;;  %v7126_v21 = vld [vmem:[%s11011_s7 + $0x220] sm:$0xff] }
 0x183   :  { %v1997_v10 = vadd.f32 %v1996_v56, %v1995_v61  ;;  %v1351_v23 = vrot.slane %v1350_v1, 2  ;;  %v1345_v50 = vadd.f32 %v1344_v4, %v1343_v44  ;;  %v1359_v27 = vadd.f32 %v1358_v11, %v1357_v45  ;;  %1696 = vst [vmem:[#allocation1 + $0x10] ss:$2 sm:$0xff] %v9444_v49  ;;  %v7111_v11 = vld [vmem:[%s11011_s7 + $0x1a8] sm:$0xff] }
 0x184   :  { %v1309_v13 = vrot.slane %v1308_v62, 1  ;;  %v1321_v16 = vrot.slane %v1320_v63, 1  ;;  %3814 = vmatpush.bf16.msrb.mxu2 %v7127_v55  ;;  %v2018_v25 = vadd.f32 %v2017_v36, %v2016_v42  ;;  %v11047_v44 = vperm.slane %v9353_v52, 0 }
 0x185   :  { %v1998_v34 = vrot.slane %v1997_v10, 1  ;;  %v1352_v61 = vadd.f32 %v1351_v23, %v1350_v1  ;;  %v1346_v0 = vrot.slane %v1345_v50, 1  ;;  %v1360_v55 = vrot.slane %v1359_v27, 1 }
 0x186   :  { %3826 = vmatpush.bf16.msrb.mxu3 %v7136_v32  ;;  %v1364_v32 = vadd.f32 %v1363_v12, %v1362_v46  ;;  %v1310_v7 = vadd.f32 %v1309_v13, %v1308_v62  ;;  %v1322_v5 = vadd.f32 %v1321_v16, %v1320_v63  ;;  %v2019_v56 = vrot.slane %v2018_v25, 1  ;;  %v7134_v62 = vld [vmem:[%s11011_s7 + $0x260] sm:$0xff] }
 0x187   :  { %v9463_v45 = vadd.f32 %v1051_v43, %v11047_v44  ;;  %v11048_v46 = vperm.slane %v9353_v52, 1  ;;  %v1999_v4 = vadd.f32 %v1998_v34, %v1997_v10  ;;  %v1347_v12 = vadd.f32 %v1346_v0, %v1345_v50  ;;  %v9480_v52 = vld [vmem:[%s11041_s20 + $0x50] sm:$0xf]  ;;  %v7125_v10 = vld [vmem:[%s11011_s7 + $0x218] sm:$0xff] }
 0x188   :  { %v1365_v42 = vrot.slane %v1364_v32, 2  ;;  %v9473_v63 = vsel %vm1557_vm2, %v1322_v5, %v1310_v7  ;;  %3815 = vmatpush.bf16.msrb.mxu2 %v7126_v21  ;;  %v2020_v1 = vadd.f32 %v2019_v56, %v2018_v25  ;;  %v1353_v13 = vrot.slane %v1352_v61, 1  ;;  %v1694_v25 = vld.sshfl [vmem:[#allocation1 + $0x30] sm:$0xff pattern:$0x75316420]  ;;  %v7133_v56 = vld [vmem:[%s11011_s7 + $0x258] sm:$0xff] }
 0x189   :  { %v9467_v36 = vadd.f32 %v1091_v22, %v11048_v46  ;;  %v1311_v5 = vrot.slane %v9320_v18, 4  ;;  %v1323_v7 = vrot.slane %v9322_v38, 4  ;;  %v1729_v43 = vsel %vm1723_vm1, %v9193_v19, 0.0  ;;  %v9493_v50 = vld.sshfl [vmem:[#allocation1] sm:$0xff pattern:$0x75316420] }
 0x18a   :  { %3827 = vmatpush.bf16.msrb.mxu3 %v7135_v9  ;;  %v1361_v9 = vadd.f32 %v1360_v55, %v1359_v27  ;;  %v1366_v16 = vadd.f32 %v1365_v42, %v1364_v32  ;;  %v2401_v23 = vsel %vm1557_vm2, %v2020_v1, %v1999_v4  ;;  %v1730_v22 = vsel %vm1723_vm1, %v9265_v47, 0.0  ;;  %v9495_v27 = vld.sshfl [vmem:[#allocation1 + $0x8] sm:$0xff pattern:$0x75316420]  ;;  %1701 = vst [vmem:[#allocation1 + $0x30] ss:$2 sm:$0xff] %v9480_v52 }
 0x18b   :  { %2404 = vrot.lane.b32.xlu0 %v2401_v23, %s7443_s6  ;;  %v1354_v21 = vadd.f32 %v1353_v13, %v1352_v61  ;;  %v1312_v19 = vadd.f32 %v1311_v5, %v9320_v18  ;;  %v1324_v47 = vadd.f32 %v1323_v7, %v9322_v38  ;;  %v1731_v55 = vadd.f32 %v1730_v22, %v1729_v43  ;;  %v1699_v61 = vld.sshfl [vmem:[#allocation1 + $0x10] sm:$0xff pattern:$0x75316420]  ;;  %v9538_v22 = vld.sshfl [vmem:[#allocation1 + $0x20] sm:$0xff pattern:$0x75316420] }
 0x18c   :  { %v1574_v0 = vsel %vm1557_vm2, %v1361_v9, %v1347_v12  ;;  %v1367_v34 = vrot.slane %v1366_v16, 1  ;;  %3816 = vmatpush.bf16.msrb.mxu2 %v7125_v10  ;;  %v1732_v42 = vsel %vm1723_vm1, %v9305_v8, 0.0  ;;  %v1745_v44 = vsel %vm1723_vm1, %v9333_v26, 0.0  ;;  %1761 = vst [vmem:[#allocation1 + $0x10] ss:$2 sm:$0xff] %v8041_v39  ;;  %v9531_v7 = vld [vmem:[%s11042_s19 + $0x70] sm:$0xff] }
 0x18d   :  { %v1630_v32 = vpack.c.bf16 %v1574_v0, %v1574_v0  ;;  %v1313_v4 = vrot.slane %v1312_v19, 2  ;;  %v1746_v1 = vsel %vm1723_vm1, %v9348_v51, 0.0  ;;  %v1748_v12 = vsel %vm1723_vm1, %v9390_v58, 0.0  ;;  %v7132_v51 = vld [vmem:[%s11011_s7 + $0x250] sm:$0xff]  ;;  %1772 = vst [vmem:[#allocation1] ss:$2 sm:$0xff] %v9174_v14 }
 0x18e   :  { %3828 = vmatpush.bf16.msrb.mxu3 %v7134_v62  ;;  %v1368_v46 = vadd.f32 %v1367_v34, %v1366_v16  ;;  %v7124_v62 = vld [vmem:[%s11011_s7 + $0x210] sm:$0xff]  ;;  %v1325_v9 = vrot.slane %v1324_v47, 2  ;;  %v9515_v8 = vadd.f32 %v1732_v42, %v1731_v55  ;;  %v1747_v10 = vadd.f32 %v1746_v1, %v1745_v44  ;;  %v9519_v16 = vld.sshfl [vmem:[#allocation1 + $0x28] sm:$0xff pattern:$0x75316420] }
 0x18f   :  { %3768 = vmatmul.bf16.vlgmr.msra.gmra.mxu2 %v1630_v32  ;;  %v1314_v13 = vadd.f32 %v1313_v4, %v1312_v19  ;;  %v1735_v58 = vsel %vm1734_vm3, %v9406_v59, 0.0  ;;  %v1736_v5 = vsel %vm1734_vm3, %v9449_v2, 0.0  ;;  %v7123_v2 = vld [vmem:[%s11011_s7 + $0x208] sm:$0xff]  ;;  %v1738_v34 = vsel %vm1734_vm3, %v9455_v28, 0.0 }
 0x190   :  { %11049 = vst [vmem:[#allocation9_spill] sm:$0xff] %v9515_v8  ;;  %v1575_v26 = vsel %vm1557_vm2, %v1368_v46, %v1354_v21  ;;  %v1326_v23 = vadd.f32 %v1325_v9, %v1324_v47  ;;  %3817 = vmatpush.bf16.msrb.mxu2 %v7124_v62  ;;  %v9534_v0 = vadd.f32 %v1748_v12, %v1747_v10  ;;  %v2000_v43 = vsel %vm1723_vm1, %v9515_v8, 0.0  ;;  %v7131_v1 = vld [vmem:[%s11011_s7 + $0x248] sm:$0xff] }
 0x191   :  { %v1631_v39 = vpack.c.bf16 %v1575_v26, %v1575_v26  ;;  %v1315_v59 = vrot.slane %v1314_v13, 1  ;;  %v2001_v32 = vrot.slane %v2000_v43, 4  ;;  %v1737_v21 = vadd.f32 %v1736_v5, %v1735_v58  ;;  %v1704_v55 = vld.sshfl [vmem:[#allocation1 + $0x30] sm:$0xff pattern:$0x75316420]  ;;  %v7122_v5 = vld [vmem:[%s11011_s7 + $0x200] sm:$0xff] }
 0x192   :  { %3829 = vmatpush.bf16.msrb.mxu3 %v7133_v56  ;;  %11050 = vst [vmem:[#allocation10_spill] sm:$0xff] %v9534_v0  ;;  %v9548_v56 = vld [vmem:[%s11041_s20 + $0x24] sm:$0xff]  ;;  %v1327_v19 = vrot.slane %v1326_v23, 1  ;;  %v2021_v47 = vsel %vm1723_vm1, %v9534_v0, 0.0  ;;  %v1750_v42 = vsel %vm1734_vm3, %v1694_v25, 0.0  ;;  %v9555_v44 = vadd.f32 %v9300_v6, %v9531_v7  ;;  %v9566_v25 = vld [vmem:[%s11042_s19 + $0xf0] sm:$0xff] }
 0x193   :  { %3781 = vmatmul.bf16.vlgmr.msra.gmra.mxu3 %v1631_v39  ;;  %v1316_v4 = vadd.f32 %v1315_v59, %v1314_v13  ;;  %v2002_v28 = vadd.f32 %v2001_v32, %v2000_v43  ;;  %v2022_v62 = vrot.slane %v2021_v47, 4  ;;  %v9560_v12 = vadd.f32 %v1738_v34, %v1737_v21  ;;  %1768 = vst [vmem:[#allocation1 + $0x30] ss:$2 sm:$0xff] %v9339_v29  ;;  %v7113_v13 = vld [vmem:[%s11011_s7 + $0x1b8] sm:$0xff] }
 0x194   :  { %v1328_v9 = vadd.f32 %v1327_v19, %v1326_v23  ;;  %3818 = vmatpush.bf16.msrb.mxu2 %v7123_v2  ;;  %v1751_v10 = vsel %vm1734_vm3, %v1699_v61, 0.0  ;;  %v1753_v26 = vsel %vm1734_vm3, %v1704_v55, 0.0  ;;  %1777 = vst [vmem:[#allocation1 + $0x20] ss:$2 sm:$0xff] %v9548_v56  ;;  %v7161_v59 = vld [vmem:[%s11011_s7 + $0x338] sm:$0xff]  ;;  %v9588_v32 = vadd.f32 %v9307_v3, %v9566_v25  ;;  %v7130_v55 = vld [vmem:[%s11011_s7 + $0x240] sm:$0xff] }
 0x195   :  { %11051 = vst [vmem:[#allocation11_spill] sm:$0xff] %v9560_v12  ;;  %v2023_v58 = vadd.f32 %v2022_v62, %v2021_v47  ;;  %v1752_v39 = vadd.f32 %v1751_v10, %v1750_v42  ;;  %v9590_v2 = vld.sshfl [vmem:[#allocation1] sm:$0xff pattern:$0x75316420]  ;;  %v7169_v62 = vld [vmem:[%s11011_s7 + $0x378] sm:$0xff] }
 0x196   :  { %3830 = vmatpush.bf16.msrb.mxu3 %v7132_v51  ;;  %v2003_v51 = vrot.slane %v2002_v28, 2  ;;  %v9581_v61 = vsel %vm1557_vm2, %v1328_v9, %v1316_v4  ;;  %v9599_v42 = vld.sshfl [vmem:[#allocation1 + $0x8] sm:$0xff pattern:$0x75316420]  ;;  %v1383_v4 = vsel %vm1276_vm0, %v9588_v32, 0.0 }
 0x197   :  { %v2024_v19 = vrot.slane %v2023_v58, 2  ;;  %v9594_v47 = vadd.f32 %v1753_v26, %v1752_v39  ;;  %1782 = vst [vmem:[#allocation1] ss:$2 sm:$0xff] %v9243_v30  ;;  %v9626_v30 = vld [vmem:[%s11042_s19 + $0x78] sm:$0xff] }
 0x198   :  { %v2004_v34 = vadd.f32 %v2003_v51, %v2002_v28  ;;  %3819 = vmatpush.bf16.msrb.mxu2 %v7122_v5  ;;  %v1397_v28 = vrot.slane %v9555_v44, 4 }
 0x199   :  { %11052 = vst [vmem:[#allocation12_spill] sm:$0xff] %v9594_v47  ;;  %v2025_v10 = vadd.f32 %v2024_v19, %v2023_v58  ;;  %v2028_v26 = vsel %vm1734_vm3, %v9594_v47, 0.0  ;;  %v7121_v58 = vld [vmem:[%s11011_s7 + $0x1f8] sm:$0xff] }
 0x19a   :  { %3831 = vmatpush.bf16.msrb.mxu3 %v7131_v1  ;;  %v2005_v9 = vrot.slane %v2004_v34, 1  ;;  %v1398_v21 = vadd.f32 %v1397_v28, %v9555_v44 }
 0x19b   :  { %v2026_v19 = vrot.slane %v2025_v10, 1 }
 0x19c   :  { %3864 = vmatpush.bf16.msra.mxu2 %v7161_v59 }
 0x19e   :  { %3832 = vmatpush.bf16.msrb.mxu3 %v7130_v55  ;;  %v9633_v55 = vld.sshfl [vmem:[#allocation1 + $0x28] sm:$0xff pattern:$0x75316420] }
 0x1a2   :  { %3877 = vmatpush.bf16.msra.mxu3 %v7169_v62  ;;  %v9643_v62 = vld [vmem:[%s11042_s19 + $0xf8] sm:$0xff] }
 0x1a3   :  { %v9671_v47 = vadd.f32 %v9322_v38, %v9643_v62  ;;  %v7109_v38 = vld [vmem:[%s11011_s7 + $0x198] sm:$0xff] }
 0x1d9   :  { %v1071_v46 = vpop.f32.mrf.mxu1 }
 0x1da   :  { %v1072_v6 = vadd.f32 %v1071_v46, %v9463_v45  ;;  %v2007_v45 = vsel %vm1734_vm3, %v9560_v12, 0.0  ;;  %v1369_v46 = vsel %vm1276_vm0, %v9555_v44, 0.0 }
 0x1db   :  { %v2008_v43 = vrot.slane %v2007_v45, 4  ;;  %v1370_v51 = vrot.slane %v1369_v46, 4 }
 0x1dc   :  { %v1114_v23 = vmax.f32 %v1072_v6, 0.0  ;;  %v7112_v6 = vld [vmem:[%s11011_s7 + $0x1b0] sm:$0xff] }
 0x1dd   :  { %v2009_v3 = vadd.f32 %v2008_v43, %v2007_v45  ;;  %v2029_v45 = vrot.slane %v2028_v26, 4  ;;  %v2006_v43 = vadd.f32 %v2005_v9, %v2004_v34  ;;  %v1371_v59 = vadd.f32 %v1370_v51, %v1369_v46 }
 0x1de   :  { %1168 = vmatmul.f32.vlgmr.msrb.gmra.mxu0 %v1114_v23  ;;  %v1384_v23 = vrot.slane %v1383_v4, 4  ;;  %v2027_v46 = vadd.f32 %v2026_v19, %v2025_v10  ;;  %v1399_v9 = vrot.slane %v1398_v21, 2  ;;  %v1409_v51 = vrot.slane %v9588_v32, 4  ;;  %v7120_v10 = vld [vmem:[%s11011_s7 + $0x1f0] sm:$0xff]  ;;  %v7159_v19 = vld [vmem:[%s11011_s7 + $0x328] sm:$0xff] }
 0x1df   :  { %3786 = vmatpush.bf16.msrb.mxu0 %v7113_v13  ;;  %v1111_v1 = vpop.f32.mrf.mxu3  ;;  %v2010_v39 = vrot.slane %v2009_v3, 2  ;;  %v7160_v13 = vld [vmem:[%s11011_s7 + $0x330] sm:$0xff]  ;;  %v2030_v8 = vadd.f32 %v2029_v45, %v2028_v26  ;;  %v1372_v28 = vrot.slane %v1371_v59, 2 }
 0x1e0   :  { %v1112_v5 = vadd.f32 %v1111_v1, %v9467_v36  ;;  %v9628_v36 = vld.sshfl [vmem:[#allocation1 + $0x20] sm:$0xff pattern:$0x75316420]  ;;  %v1385_v34 = vadd.f32 %v1384_v23, %v1383_v4  ;;  %3865 = vmatpush.bf16.msra.mxu2 %v7160_v13  ;;  %v1400_v23 = vadd.f32 %v1399_v9, %v1398_v21  ;;  %v1410_v13 = vadd.f32 %v1409_v51, %v9588_v32 }
 0x1e1   :  { %v2011_v0 = vadd.f32 %v2010_v39, %v2009_v3  ;;  %1787 = vst [vmem:[#allocation1 + $0x20] ss:$2 sm:$0xff] %v9287_v60  ;;  %v2031_v26 = vrot.slane %v2030_v8, 2  ;;  %v2402_v39 = vsel %vm1557_vm2, %v2027_v46, %v2006_v43  ;;  %v1373_v45 = vadd.f32 %v1372_v28, %v1371_v59  ;;  %v9667_v28 = vld.sshfl [vmem:[#allocation1] sm:$0xff pattern:$0x75316420] }
 0x1e2   :  { %v1115_v1 = vmax.f32 %v1112_v5, 0.0  ;;  %v7168_v5 = vld [vmem:[%s11011_s7 + $0x370] sm:$0xff]  ;;  %v1386_v4 = vrot.slane %v1385_v34, 2  ;;  %2406 = vrot.lane.b32.xlu0 %v2402_v39, %s7443_s6  ;;  %v1401_v51 = vrot.slane %v1400_v23, 1  ;;  %v1411_v54 = vrot.slane %v1410_v13, 2  ;;  %v7166_v60 = vld [vmem:[%s11011_s7 + $0x360] sm:$0xff] }
 0x1e3   :  { %3787 = vmatpush.bf16.msrb.mxu0 %v7112_v6  ;;  %v2012_v3 = vrot.slane %v2011_v0, 1  ;;  %v9647_v6 = vadd.f32 %v9320_v18, %v9626_v30  ;;  %v7110_v18 = vld [vmem:[%s11011_s7 + $0x1a0] sm:$0xff]  ;;  %v2032_v21 = vadd.f32 %v2031_v26, %v2030_v8  ;;  %v1374_v9 = vrot.slane %v1373_v45, 1  ;;  %3878 = vmatpush.bf16.msra.mxu3 %v7168_v5  ;;  %v7119_v8 = vld [vmem:[%s11011_s7 + $0x1e8] sm:$0xff] }
 0x1e4   :  { %1188 = vmatmul.f32.vlgmr.msrb.gmra.mxu1 %v1115_v1  ;;  %v9657_v1 = vld.sshfl [vmem:[#allocation1 + $0x10] sm:$0xff pattern:$0x75316420]  ;;  %v1387_v59 = vadd.f32 %v1386_v4, %v1385_v34  ;;  %3866 = vmatpush.bf16.msra.mxu2 %v7159_v19  ;;  %v1402_v26 = vadd.f32 %v1401_v51, %v1400_v23  ;;  %v1412_v4 = vadd.f32 %v1411_v54, %v1410_v13  ;;  %v1415_v39 = vrot.slane %v9671_v47, 4  ;;  %v7158_v54 = vld [vmem:[%s11011_s7 + $0x320] sm:$0xff] }
 0x1e5   :  { %3799 = vmatpush.bf16.msrb.mxu1 %v7121_v58  ;;  %v11053_v58 = vpack.c.bf16 %v9473_v63, %v9473_v63  ;;  %v2013_v43 = vadd.f32 %v2012_v3, %v2011_v0  ;;  %v1403_v46 = vrot.slane %v9647_v6, 4  ;;  %v9673_v63 = vld.sshfl [vmem:[#allocation1 + $0x8] sm:$0xff pattern:$0x75316420]  ;;  %v2033_v0 = vrot.slane %v2032_v21, 1 }
 0x1e6   :  { %v1388_v34 = vrot.slane %v1387_v59, 1  ;;  %1792 = vst [vmem:[#allocation1] ss:$2 sm:$0xff] %v9327_v40  ;;  %v1375_v5 = vadd.f32 %v1374_v9, %v1373_v45  ;;  %v1413_v23 = vrot.slane %v1412_v4, 1  ;;  %v1416_v13 = vadd.f32 %v1415_v39, %v9671_v47 }
 0x1e7   :  { %3742 = vmatmul.bf16.vlgmr.msra.gmra.mxu0 %v11053_v58  ;;  %v1404_v3 = vadd.f32 %v1403_v46, %v9647_v6  ;;  %v9689_v58 = vld [vmem:[%s11041_s20 + $0x54] sm:$0xff]  ;;  %v7167_v46 = vld [vmem:[%s11011_s7 + $0x368] sm:$0xff]  ;;  %1773 = vst [vmem:[#allocation1 + $0x10] ss:$2 sm:$0xff] %v9381_v15  ;;  %v1390_v9 = vsel %vm1276_vm0, %v9671_v47, 0.0 }
 0x1e8   :  { %3788 = vmatpush.bf16.msrb.mxu0 %v7111_v11  ;;  %v1376_v11 = vsel %vm1276_vm0, %v9647_v6, 0.0  ;;  %11054 = vst [vmem:[#allocation13_spill] sm:$0xff] %v9689_v58  ;;  %v1389_v19 = vadd.f32 %v1388_v34, %v1387_v59  ;;  %v1789_v45 = vld.sshfl [vmem:[#allocation1 + $0x20] sm:$0xff pattern:$0x75316420]  ;;  %3879 = vmatpush.bf16.msra.mxu3 %v7167_v46  ;;  %v11056_v59 = vpack.c.bf16 %v9581_v61, %v9581_v61 }
 0x1e9   :  { %3800 = vmatpush.bf16.msrb.mxu1 %v7120_v10  ;;  %v2034_v10 = vadd.f32 %v2033_v0, %v2032_v21  ;;  %v1405_v12 = vrot.slane %v1404_v3, 2  ;;  %v1377_v40 = vrot.slane %v1376_v11, 4  ;;  %v9701_v51 = vld.sshfl [vmem:[#allocation1 + $0x28] sm:$0xff pattern:$0x75316420]  ;;  %v1826_v21 = vsel %vm1723_vm1, %v9493_v50, 0.0  ;;  %3867 = vmatpush.bf16.msra.mxu2 %v7158_v54 }
 0x1ea   :  { %11055 = vst [vmem:[#allocation14_spill] sm:$0xff] %v9701_v51  ;;  %v9715_v51 = vld.sshfl [vmem:[#allocation1 + $0x30] sm:$0xff pattern:$0x75316420]  ;;  %v7118_v50 = vld [vmem:[%s11011_s7 + $0x1e0] sm:$0xff]  ;;  %v1831_v54 = vsel %vm1723_vm1, %v9628_v36, 0.0 }
 0x1eb   :  { %v2403_v0 = vsel %vm1557_vm2, %v2034_v10, %v2013_v43  ;;  %v1406_v34 = vadd.f32 %v1405_v12, %v1404_v3  ;;  %v1378_v39 = vadd.f32 %v1377_v40, %v1376_v11  ;;  %v1414_v43 = vadd.f32 %v1413_v23, %v1412_v4  ;;  %1797 = vst [vmem:[#allocation1 + $0x20] ss:$2 sm:$0xff] %v9689_v58  ;;  %v9731_v46 = vld [vmem:[%s11041_s20 + $0x2c] sm:$0xf]  ;;  %v7108_v4 = vld [vmem:[%s11011_s7 + $0x190] sm:$0xff]  ;;  %v7165_v58 = vld [vmem:[%s11011_s7 + $0x358] sm:$0xff] }
 0x1ec   :  { %3789 = vmatpush.bf16.msrb.mxu0 %v7110_v18  ;;  %3755 = vmatmul.bf16.vlgmr.msra.gmra.mxu1 %v11056_v59  ;;  %v9710_v18 = vsel %vm1557_vm2, %v1389_v19, %v1375_v5  ;;  %v1417_v5 = vrot.slane %v1416_v13, 2  ;;  %v1391_v12 = vrot.slane %v1390_v9, 4  ;;  %v1827_v11 = vsel %vm1723_vm1, %v9538_v22, 0.0  ;;  %1778 = vst [vmem:[#allocation1 + $0x30] ss:$2 sm:$0xff] %v9731_v46 }
 0x1ed   :  { %3801 = vmatpush.bf16.msrb.mxu1 %v7119_v8  ;;  %2408 = vrot.lane.b32.xlu1 %v2403_v0, %s7443_s6  ;;  %v1407_v40 = vrot.slane %v1406_v34, 1  ;;  %v1379_v3 = vrot.slane %v1378_v39, 2  ;;  %v1829_v8 = vsel %vm1723_vm1, %v9590_v2, 0.0  ;;  %v1590_v10 = vsel %vm1557_vm2, %v1414_v43, %v1402_v26  ;;  %v1794_v59 = vld.sshfl [vmem:[#allocation1] sm:$0xff pattern:$0x75316420] }
 0x1ee   :  { %v1418_v19 = vadd.f32 %v1417_v5, %v1416_v13  ;;  %v1392_v23 = vadd.f32 %v1391_v12, %v1390_v9  ;;  %v1828_v22 = vadd.f32 %v1827_v11, %v1826_v21  ;;  %v1634_v0 = vpack.c.bf16 %v1590_v10, %v1590_v10  ;;  %3880 = vmatpush.bf16.msra.mxu3 %v7166_v60  ;;  %v7117_v26 = vld [vmem:[%s11011_s7 + $0x1d8] sm:$0xff] }
 0x1ef   :  { %v1408_v61 = vadd.f32 %v1407_v40, %v1406_v34  ;;  %v1380_v2 = vadd.f32 %v1379_v3, %v1378_v39  ;;  %v1847_v36 = vsel %vm1723_vm1, %v9667_v28, 0.0  ;;  %v1848_v34 = vsel %vm1723_vm1, %v1789_v45, 0.0  ;;  %v9758_v28 = vld.sshfl [vmem:[#allocation1 + $0x10] sm:$0xff pattern:$0x75316420] }
 0x1f0   :  { %3790 = vmatpush.bf16.msrb.mxu0 %v7109_v38  ;;  %v7157_v38 = vld [vmem:[%s11011_s7 + $0x318] sm:$0xff]  ;;  %v1419_v13 = vrot.slane %v1418_v19, 1  ;;  %v1393_v9 = vrot.slane %v1392_v23, 2  ;;  %v1830_v21 = vadd.f32 %v1829_v8, %v1828_v22  ;;  %3820 = vmatmul.bf16.vlgmr.msrb.gmra.mxu2 %v1634_v0  ;;  %v1850_v39 = vsel %vm1723_vm1, %v1794_v59, 0.0  ;;  %v7156_v45 = vld [vmem:[%s11011_s7 + $0x310] sm:$0xff] }
 0x1f1   :  { %3802 = vmatpush.bf16.msrb.mxu1 %v7118_v50  ;;  %v1381_v60 = vrot.slane %v1380_v2, 1  ;;  %v7107_v50 = vld [vmem:[%s11011_s7 + $0x188] sm:$0xff]  ;;  %v1849_v40 = vadd.f32 %v1848_v34, %v1847_v36  ;;  %3868 = vmatpush.bf16.msra.mxu2 %v7157_v38  ;;  %v1425_v8 = vrot.slane %v9555_v44, 1  ;;  %v1252_v10 = vadd.f32 %v9198_v20, %v9184_v17  ;;  %v7164_v44 = vld [vmem:[%s11011_s7 + $0x350] sm:$0xff]  ;;  %1783 = vst [vmem:[#allocation1 + $0x10] ss:$2 sm:$0xff] %v9438_v35 }
 0x1f2   :  { %v1420_v43 = vadd.f32 %v1419_v13, %v1418_v19  ;;  %v1394_v5 = vadd.f32 %v1393_v9, %v1392_v23  ;;  %v9756_v12 = vadd.f32 %v1831_v54, %v1830_v21  ;;  %v1799_v11 = vld.sshfl [vmem:[#allocation1 + $0x20] sm:$0xff pattern:$0x75316420]  ;;  %3881 = vmatpush.bf16.msra.mxu3 %v7165_v58  ;;  %v7116_v19 = vld [vmem:[%s11011_s7 + $0x1d0] sm:$0xff]  ;;  %v7145_v13 = vld [vmem:[%s11011_s7 + $0x2b8] sm:$0xff]  ;;  %v1258_v34 = vadd.f32 %v9233_v31, %v9213_v24 }
 0x1f3   :  { %v1382_v3 = vadd.f32 %v1381_v60, %v1380_v2  ;;  %v1851_v58 = vadd.f32 %v1850_v39, %v1849_v40  ;;  %v1852_v22 = vsel %vm1723_vm1, %v1799_v11, 0.0  ;;  %v1433_v17 = vsel %vm1276_vm0, %v1425_v8, 0.0  ;;  %v7155_v35 = vld [vmem:[%s11011_s7 + $0x308] sm:$0xff]  ;;  %v7402_v36 = vld [vmem:[%s11042_s19 + $0x90] sm:$0xff] }
 0x1f4   :  { %3791 = vmatpush.bf16.msrb.mxu0 %v7108_v4  ;;  %v1427_v4 = vrot.slane %v9588_v32, 1  ;;  %v1591_v23 = vsel %vm1557_vm2, %v1420_v43, %v1408_v61  ;;  %v1395_v59 = vrot.slane %v1394_v5, 1  ;;  %v2095_v32 = vsel %vm1949_vm4, %v9756_v12, 0.0  ;;  %v7106_v61 = vld [vmem:[%s11011_s7 + $0x180] sm:$0xff] }
 0x1f5   :  { %3803 = vmatpush.bf16.msrb.mxu1 %v7117_v26  ;;  %v1635_v0 = vpack.c.bf16 %v1591_v23, %v1591_v23  ;;  %v9783_v54 = vadd.f32 %v1852_v22, %v1851_v58  ;;  %v2096_v38 = vrot.slane %v2095_v32, 4  ;;  %v1434_v26 = vrot.slane %v1433_v17, 4  ;;  %3869 = vmatpush.bf16.msra.mxu2 %v7156_v45  ;;  %v9798_v39 = vld.sshfl [vmem:[#allocation1 + $0x30] sm:$0xff pattern:$0x75316420] }
 0x1f6   :  { %v1447_v20 = vsel %vm1276_vm0, %v1427_v4, 0.0  ;;  %v1396_v2 = vadd.f32 %v1395_v59, %v1394_v5  ;;  %v1253_v21 = vadd.f32 %v1252_v10, %v9224_v57  ;;  %v1264_v60 = vadd.f32 %v7402_v36, %v9203_v41  ;;  %3882 = vmatpush.bf16.msra.mxu3 %v7164_v44  ;;  %v7163_v41 = vld [vmem:[%s11011_s7 + $0x348] sm:$0xff]  ;;  %1788 = vst [vmem:[#allocation1 + $0x30] ss:$2 sm:$0xff] %v9444_v49  ;;  %v7403_v4 = vld [vmem:[%s11042_s19 + $0xb0] sm:$0xff]  ;;  %v7404_v44 = vld [vmem:[%s11042_s19 + $0x98] sm:$0xff] }
 0x1f7   :  { %3833 = vmatmul.bf16.vlgmr.msrb.gmra.mxu3 %v1635_v0  ;;  %v1448_v9 = vrot.slane %v1447_v20, 4  ;;  %v2097_v57 = vadd.f32 %v2096_v38, %v2095_v32  ;;  %v2116_v5 = vsel %vm1949_vm4, %v9783_v54, 0.0  ;;  %v1435_v24 = vadd.f32 %v1434_v26, %v1433_v17  ;;  %v7144_v23 = vld [vmem:[%s11011_s7 + $0x2b0] sm:$0xff]  ;;  %v7114_v32 = vld [vmem:[%s11011_s7 + $0x1c0] sm:$0xff] }
 0x1f8   :  { %3792 = vmatpush.bf16.msrb.mxu0 %v7107_v50  ;;  %v7115_v50 = vld [vmem:[%s11011_s7 + $0x1c8] sm:$0xff]  ;;  %v9804_v43 = vsel %vm1557_vm2, %v1396_v2, %v1382_v3  ;;  %v2117_v40 = vrot.slane %v2116_v5, 4  ;;  %v1254_v45 = vadd.f32 %v1253_v21, %v9250_v33  ;;  %v1265_v10 = vadd.f32 %v7403_v4, %v1264_v60  ;;  %v7154_v33 = vld [vmem:[%s11011_s7 + $0x300] sm:$0xff]  ;;  %v9842_v26 = vld.sshfl [vmem:[#allocation1 + $0x10] sm:$0xff pattern:$0x75316420] }
 0x1f9   :  { %3804 = vmatpush.bf16.msrb.mxu1 %v7116_v19  ;;  %v1633_v31 = vpack.c.bf16 %v9804_v43, %v9804_v43  ;;  %v1449_v11 = vadd.f32 %v1448_v9, %v1447_v20  ;;  %v2098_v3 = vrot.slane %v2097_v57, 2  ;;  %v1436_v8 = vrot.slane %v1435_v24, 2  ;;  %3870 = vmatpush.bf16.msra.mxu2 %v7155_v35  ;;  %v7153_v35 = vld [vmem:[%s11011_s7 + $0x2f8] sm:$0xff]  ;;  %v7162_v36 = vld [vmem:[%s11011_s7 + $0x340] sm:$0xff]  ;;  %1793 = vst [vmem:[#allocation1 + $0x10] ss:$2 sm:$0xff] %v9480_v52 }
 0x1fa   :  { %v1259_v19 = vadd.f32 %v1258_v34, %v9258_v37  ;;  %v2118_v59 = vadd.f32 %v2117_v40, %v2116_v5  ;;  %v1255_v22 = vadd.f32 %v1254_v45, %v9270_v48  ;;  %v7405_v37 = vld [vmem:[%s11042_s19 + $0xa8] sm:$0xff]  ;;  %3883 = vmatpush.bf16.msra.mxu3 %v7163_v41  ;;  %v7193_v48 = vld [vmem:[%s11011_s7 + $0x438] sm:$0xff]  ;;  %v1426_v38 = vrot.slane %v9647_v6, 1  ;;  %v7407_v6 = vld [vmem:[%s11042_s19 + $0x60] sm:$0xff] }
 0x1fb   :  { %v1450_v58 = vrot.slane %v1449_v11, 2  ;;  %v1270_v0 = vadd.f32 %v7405_v37, %v7404_v44  ;;  %v2099_v17 = vadd.f32 %v2098_v3, %v2097_v57  ;;  %v1437_v20 = vadd.f32 %v1436_v8, %v1435_v24  ;;  %v7409_v5 = vld [vmem:[%s11042_s19 + $0xd0] sm:$0xff]  ;;  %v7201_v24 = vld [vmem:[%s11011_s7 + $0x478] sm:$0xff]  ;;  %v7143_v3 = vld [vmem:[%s11011_s7 + $0x2a8] sm:$0xff] }
 0x1fc   :  { %3793 = vmatpush.bf16.msrb.mxu0 %v7106_v61  ;;  %v7406_v61 = vld [vmem:[%s11042_s19 + $0xc0] sm:$0xff]  ;;  %v2119_v9 = vrot.slane %v2118_v59, 2  ;;  %v1256_v60 = vadd.f32 %v7407_v6, %v1255_v22  ;;  %v7410_v40 = vld [vmem:[%s11042_s19 + $0xb8] sm:$0xff]  ;;  %v9883_v22 = vld.sshfl [vmem:[#allocation1 + $0x8] sm:$0xff pattern:$0x75316420] }
 0x1fd   :  { %3805 = vmatpush.bf16.msrb.mxu1 %v7115_v50  ;;  %v1266_v2 = vadd.f32 %v7406_v61, %v1265_v10  ;;  %v1451_v21 = vadd.f32 %v1450_v58, %v1449_v11  ;;  %v2100_v50 = vrot.slane %v2099_v17, 1  ;;  %v1438_v57 = vrot.slane %v1437_v20, 1  ;;  %v9872_v45 = vld [vmem:[%s11041_s20 + $0x5c] sm:$0xf]  ;;  %3871 = vmatpush.bf16.msra.mxu2 %v7154_v33  ;;  %1868 = vst [vmem:[#allocation1] ss:$2 sm:$0xff] %v7889_v53 }
 0x1fe   :  { %v1271_v11 = vadd.f32 %v7410_v40, %v1270_v0  ;;  %v2120_v8 = vadd.f32 %v2119_v9, %v2118_v59  ;;  %v9878_v10 = vadd.f32 %v1256_v60, %v9531_v7  ;;  %v7412_v59 = vld [vmem:[%s11042_s19 + $0xe0] sm:$0xff]  ;;  %v7192_v7 = vld [vmem:[%s11011_s7 + $0x430] sm:$0xff]  ;;  %v1428_v37 = vrot.slane %v9671_v47, 1  ;;  %3884 = vmatpush.bf16.msra.mxu3 %v7162_v36  ;;  %s7444_s20 = smov [#allocation2]  }
 0x1ff   :  { %v1267_v41 = vadd.f32 %v7409_v5, %v1266_v2  ;;  %v1452_v4 = vrot.slane %v1451_v21, 1  ;;  %v2101_v44 = vadd.f32 %v2100_v50, %v2099_v17  ;;  %v9892_v0 = vld.sshfl [vmem:[#allocation1 + $0x30] sm:$0xff pattern:$0x75316420]  ;;  %v7142_v6 = vld [vmem:[%s11011_s7 + $0x2a0] sm:$0xff]  ;;  %v7415_v50 = vld [vmem:[%s11042_s19 + $0xd8] sm:$0xff] }
 0x200   :  { %3838 = vmatpush.bf16.msra.mxu0 %v7145_v13  ;;  %v11057_v13 = vpack.c.bf16 %v9710_v18, %v9710_v18  ;;  %v7408_v18 = vld [vmem:[%s11042_s19 + $0x48] sm:$0xff]  ;;  %v2121_v61 = vrot.slane %v2120_v8, 1  ;;  %1798 = vst [vmem:[#allocation1 + $0x30] ss:$2 sm:$0xff] %v9872_v45  ;;  %v7200_v36 = vld [vmem:[%s11011_s7 + $0x470] sm:$0xff]  ;;  %s5750_s1 = sshll.u32 %s7444_s20, 4  ;;  %s5751_s1 = int_to_ptr.vmem [resolvable:$true] %s5750_s1 }
 0x201   :  { %v1260_v34 = vadd.f32 %v7408_v18, %v1259_v19  ;;  %v7411_v19 = vld [vmem:[%s11042_s19 + $0x58] sm:$0xff]  ;;  %3806 = vmatpush.bf16.msrb.mxu1 %v7114_v32  ;;  %3916 = vmatpush.bf16.msrb.mxu2 %v7193_v48  ;;  %v1268_v33 = vadd.f32 %v7412_v59, %v1267_v41  ;;  %v7152_v32 = vld [vmem:[%s11011_s7 + $0x2f0] sm:$0xff]  ;;  %v1453_v17 = vadd.f32 %v1452_v4, %v1451_v21  ;;  %v7413_v48 = vld [vmem:[%s11042_s19 + $0x68] sm:$0xff]  ;;  %v1440_v21 = vsel %vm1276_vm0, %v1426_v38, 0.0 }
 0x202   :  { %3794 = vmatmul.bf16.vlgmr.msrb.gmra.mxu0 %v11057_v13  ;;  %3929 = vmatpush.bf16.msrb.mxu3 %v7201_v24  ;;  %v1441_v18 = vrot.slane %v1440_v21, 4  ;;  %v9938_v5 = vld.sshfl [vmem:[#allocation1 + $0x10] sm:$0xff pattern:$0x75316420]  ;;  %v7151_v24 = vld [vmem:[%s11011_s7 + $0x2e8] sm:$0xff] }
 0x203   :  { %v1261_v58 = vadd.f32 %v7411_v19, %v1260_v34  ;;  %v9904_v47 = vadd.f32 %v1268_v33, %v9566_v25  ;;  %v2122_v25 = vadd.f32 %v2121_v61, %v2120_v8  ;;  %v9926_v34 = vld.sshfl [vmem:[#allocation1 + $0x28] sm:$0xff pattern:$0x75316420]  ;;  %1870 = vst [vmem:[#allocation1 + $0x10] ss:$2 sm:$0xff] %v9339_v29  ;;  %v7141_v29 = vld [vmem:[%s11011_s7 + $0x298] sm:$0xff] }
 0x204   :  { %3839 = vmatpush.bf16.msra.mxu0 %v7144_v23  ;;  %v1439_v23 = vadd.f32 %v1438_v57, %v1437_v20  ;;  %v1461_v20 = vsel %vm1276_vm0, %v9878_v10, 0.0  ;;  %3807 = vmatmul.bf16.vlgmr.msrb.gmra.mxu1 %v1633_v31  ;;  %v7416_v4 = vld [vmem:[%s11042_s19 + $0xe8] sm:$0xff]  ;;  %1875 = vst [vmem:[#allocation1 + $0x20] ss:$2 sm:$0xff] %v9174_v14  ;;  %v1833_v61 = vsel %vm1723_vm1, %v9495_v27, 0.0  ;;  %v7190_v14 = vld [vmem:[%s11011_s7 + $0x420] sm:$0xff] }
 0x205   :  { %3851 = vmatpush.bf16.msra.mxu1 %v7153_v35  ;;  %v1262_v2 = vadd.f32 %v7413_v48, %v1261_v58  ;;  %v1462_v13 = vrot.slane %v1461_v20, 4  ;;  %v7414_v35 = vld [vmem:[%s11042_s19 + $0xc8] sm:$0xff]  ;;  %v1475_v31 = vsel %vm1276_vm0, %v9904_v47, 0.0  ;;  %3917 = vmatpush.bf16.msrb.mxu2 %v7192_v7  ;;  %v2434_v41 = vsel %vm1557_vm2, %v2122_v25, %v2101_v44  ;;  %v7150_v27 = vld [vmem:[%s11011_s7 + $0x2e0] sm:$0xff] }
 0x206   :  { %v1272_v9 = vadd.f32 %v7414_v35, %v1271_v11  ;;  %v9921_v60 = vsel %vm1557_vm2, %v1453_v17, %v1439_v23  ;;  %v1476_v40 = vrot.slane %v1475_v31, 4  ;;  %2437 = vrot.lane.b32.xlu1 %v2434_v41, %s7443_s6  ;;  %v1454_v44 = vsel %vm1276_vm0, %v1428_v37, 0.0  ;;  %3930 = vmatpush.bf16.msrb.mxu3 %v7200_v36  ;;  %v7199_v23 = vld [vmem:[%s11011_s7 + $0x468] sm:$0xff] }
 0x207   :  { %v9924_v38 = vadd.f32 %v1262_v2, %v9626_v30  ;;  %v1636_v53 = vpack.c.bf16 %v9921_v60, %v9921_v60  ;;  %v1463_v43 = vadd.f32 %v1462_v13, %v1461_v20  ;;  %v7191_v30 = vld [vmem:[%s11011_s7 + $0x428] sm:$0xff]  ;;  %v1455_v7 = vrot.slane %v1454_v44, 4  ;;  %v9967_v20 = vld.sshfl [vmem:[#allocation1 + $0x30] sm:$0xff pattern:$0x75316420] }
 0x208   :  { %3840 = vmatpush.bf16.msra.mxu0 %v7143_v3  ;;  %v1273_v57 = vadd.f32 %v7415_v50, %v1272_v9  ;;  %v1442_v3 = vadd.f32 %v1441_v18, %v1440_v21  ;;  %v1477_v59 = vadd.f32 %v1476_v40, %v1475_v31  ;;  %v1834_v48 = vsel %vm1723_vm1, %v9519_v16, 0.0  ;;  %1877 = vst [vmem:[#allocation1 + $0x30] ss:$2 sm:$0xff] %v9381_v15  ;;  %v7198_v16 = vld [vmem:[%s11011_s7 + $0x460] sm:$0xff] }
 0x209   :  { %3852 = vmatpush.bf16.msra.mxu1 %v7152_v32  ;;  %v1468_v11 = vsel %vm1276_vm0, %v9924_v38, 0.0  ;;  %v1464_v8 = vrot.slane %v1463_v43, 2  ;;  %3918 = vmatpush.bf16.msrb.mxu2 %v7191_v30  ;;  %v1835_v35 = vadd.f32 %v1834_v48, %v1833_v61  ;;  %v1836_v25 = vsel %vm1723_vm1, %v9599_v42, 0.0  ;;  %v7189_v30 = vld [vmem:[%s11011_s7 + $0x418] sm:$0xff]  ;;  %v7148_v48 = vld [vmem:[%s11011_s7 + $0x2d0] sm:$0xff] }
 0x20a   :  { %v1274_v19 = vadd.f32 %v7416_v4, %v1273_v57  ;;  %v1469_v58 = vrot.slane %v1468_v11, 4  ;;  %v1443_v33 = vrot.slane %v1442_v3, 2  ;;  %v1478_v2 = vrot.slane %v1477_v59, 2  ;;  %3931 = vmatpush.bf16.msrb.mxu3 %v7199_v23  ;;  %v9993_v4 = vld.sshfl [vmem:[#allocation1] sm:$0xff pattern:$0x75316420] }
 0x20b   :  { %v1465_v32 = vadd.f32 %v1464_v8, %v1463_v43  ;;  %v1837_v41 = vadd.f32 %v1836_v25, %v1835_v35  ;;  %v1838_v42 = vsel %vm1723_vm1, %v9633_v55, 0.0  ;;  %v1840_v55 = vsel %vm1734_vm3, %v9657_v1, 0.0 }
 0x20c   :  { %3841 = vmatpush.bf16.msra.mxu0 %v7142_v6  ;;  %v9962_v37 = vadd.f32 %v1274_v19, %v9643_v62  ;;  %v1470_v17 = vadd.f32 %v1469_v58, %v1468_v11  ;;  %v1444_v13 = vadd.f32 %v1443_v33, %v1442_v3  ;;  %v1456_v62 = vadd.f32 %v1455_v7, %v1454_v44  ;;  %v7140_v6 = vld [vmem:[%s11011_s7 + $0x290] sm:$0xff]  ;;  %v7197_v58 = vld [vmem:[%s11011_s7 + $0x458] sm:$0xff] }
 0x20d   :  { %3853 = vmatpush.bf16.msra.mxu1 %v7151_v24  ;;  %v1466_v9 = vrot.slane %v1465_v32, 1  ;;  %v1479_v18 = vadd.f32 %v1478_v2, %v1477_v59  ;;  %3919 = vmatpush.bf16.msrb.mxu2 %v7190_v14  ;;  %v7149_v24 = vld [vmem:[%s11011_s7 + $0x2d8] sm:$0xff]  ;;  %v9998_v44 = vadd.f32 %v1838_v42, %v1837_v41  ;;  %v1841_v23 = vsel %vm1734_vm3, %v9715_v51, 0.0  ;;  %v7147_v41 = vld [vmem:[%s11011_s7 + $0x2c8] sm:$0xff] }
 0x20e   :  { %v1471_v21 = vrot.slane %v1470_v17, 2  ;;  %v1482_v36 = vsel %vm1276_vm0, %v9962_v37, 0.0  ;;  %v1445_v43 = vrot.slane %v1444_v13, 1  ;;  %v1457_v31 = vrot.slane %v1456_v62, 2  ;;  %3932 = vmatpush.bf16.msrb.mxu3 %v7198_v16  ;;  %v7138_v16 = vld [vmem:[%s11011_s7 + $0x280] sm:$0xff] }
 0x20f   :  { %v1483_v15 = vrot.slane %v1482_v36, 4  ;;  %v1467_v50 = vadd.f32 %v1466_v9, %v1465_v32  ;;  %v1480_v40 = vrot.slane %v1479_v18, 1  ;;  %v1842_v61 = vadd.f32 %v1841_v23, %v1840_v55  ;;  %v10007_v32 = vld.sshfl [vmem:[#allocation1 + $0x8] sm:$0xff pattern:$0x75316420]  ;;  %v7176_v23 = vld [vmem:[%s11011_s7 + $0x3b0] sm:$0xff] }
 0x210   :  { %3842 = vmatpush.bf16.msra.mxu0 %v7141_v29  ;;  %v1472_v57 = vadd.f32 %v1471_v21, %v1470_v17  ;;  %v1446_v3 = vadd.f32 %v1445_v43, %v1444_v13  ;;  %v1458_v8 = vadd.f32 %v1457_v31, %v1456_v62  ;;  %v7139_v29 = vld [vmem:[%s11011_s7 + $0x288] sm:$0xff]  ;;  %v1843_v14 = vsel %vm1734_vm3, %v9758_v28, 0.0  ;;  %1881 = vst [vmem:[#allocation1] ss:$2 sm:$0xff] %v9548_v56  ;;  %v7188_v28 = vld [vmem:[%s11011_s7 + $0x410] sm:$0xff] }
 0x211   :  { %3854 = vmatpush.bf16.msra.mxu1 %v7150_v27  ;;  %v1484_v11 = vadd.f32 %v1483_v15, %v1482_v36  ;;  %v1481_v59 = vadd.f32 %v1480_v40, %v1479_v18  ;;  %3920 = vmatpush.bf16.msrb.mxu2 %v7189_v30  ;;  %v1845_v1 = vsel %vm1734_vm3, %v9798_v39, 0.0  ;;  %v1854_v51 = vsel %vm1723_vm1, %v9673_v63, 0.0  ;;  %v10023_v39 = vld.sshfl [vmem:[#allocation1 + $0x20] sm:$0xff pattern:$0x75316420]  ;;  %v11058_v63 = vld [vmem:[#allocation14_spill] sm:$0xff] }
 0x212   :  { %v1473_v19 = vrot.slane %v1472_v57, 1  ;;  %v1459_v7 = vrot.slane %v1458_v8, 1  ;;  %v1844_v62 = vadd.f32 %v1843_v14, %v1842_v61  ;;  %3933 = vmatpush.bf16.msrb.mxu3 %v7197_v58  ;;  %v1855_v56 = vsel %vm1723_vm1, %v11058_v63, 0.0  ;;  %v7196_v36 = vld [vmem:[%s11011_s7 + $0x450] sm:$0xff]  ;;  %v7195_v55 = vld [vmem:[%s11011_s7 + $0x448] sm:$0xff] }
 0x213   :  { %v1485_v33 = vrot.slane %v1484_v11, 2  ;;  %v1606_v27 = vsel %vm1557_vm2, %v1481_v59, %v1467_v50  ;;  %v1857_v9 = vsel %vm1723_vm1, %v9883_v22, 0.0  ;;  %v1859_v21 = vsel %vm1723_vm1, %v9926_v34, 0.0  ;;  %v10042_v22 = vld.sshfl [vmem:[#allocation1 + $0x28] sm:$0xff pattern:$0x75316420] }
 0x214   :  { %3843 = vmatpush.bf16.msra.mxu0 %v7140_v6  ;;  %v1474_v17 = vadd.f32 %v1473_v19, %v1472_v57  ;;  %v1460_v13 = vadd.f32 %v1459_v7, %v1458_v8  ;;  %v1638_v35 = vpack.c.bf16 %v1606_v27, %v1606_v27  ;;  %v10040_v18 = vadd.f32 %v1845_v1, %v1844_v62  ;;  %v7177_v34 = vld [vmem:[%s11011_s7 + $0x3b8] sm:$0xff]  ;;  %v11059_v30 = vld [vmem:[#allocation5_spill] sm:$0xff]  ;;  %v7186_v27 = vld [vmem:[%s11011_s7 + $0x400] sm:$0xff] }
 0x215   :  { %3855 = vmatpush.bf16.msra.mxu1 %v7149_v24  ;;  %v1486_v2 = vadd.f32 %v1485_v33, %v1484_v11  ;;  %v1856_v15 = vadd.f32 %v1855_v56, %v1854_v51  ;;  %v1861_v31 = vsel %vm1734_vm3, %v9842_v26, 0.0  ;;  %v1862_v50 = vsel %vm1734_vm3, %v9892_v0, 0.0  ;;  %1886 = vst [vmem:[#allocation1 + $0x20] ss:$2 sm:$0xff] %v11059_v30  ;;  %3921 = vmatpush.bf16.msrb.mxu2 %v7188_v28  ;;  %v7187_v26 = vld [vmem:[%s11011_s7 + $0x408] sm:$0xff]  ;;  %v7185_v33 = vld [vmem:[%s11011_s7 + $0x3f8] sm:$0xff] }
 0x216   :  { %v10038_v6 = vsel %vm1557_vm2, %v1460_v13, %v1446_v3  ;;  %3872 = vmatmul.bf16.vlgmr.msra.gmra.mxu2 %v1638_v35  ;;  %v1864_v57 = vsel %vm1734_vm3, %v9938_v5, 0.0  ;;  %v1863_v40 = vadd.f32 %v1862_v50, %v1861_v31  ;;  %v1866_v11 = vsel %vm1734_vm3, %v9967_v20, 0.0  ;;  %3934 = vmatpush.bf16.msrb.mxu3 %v7196_v36  ;;  %v7225_v56 = vld [vmem:[%s11013_s9 + $0xb8] sm:$0xff]  ;;  %v7184_v30 = vld [vmem:[%s11011_s7 + $0x3f0] sm:$0xff] }
 0x217   :  { %v1487_v25 = vrot.slane %v1486_v2, 1  ;;  %v1637_v43 = vpack.c.bf16 %v10038_v6, %v10038_v6  ;;  %v1858_v24 = vadd.f32 %v1857_v9, %v1856_v15  ;;  %v2102_v0 = vsel %vm1949_vm4, %v9998_v44, 0.0  ;;  %v10096_v13 = vld.sshfl [vmem:[#allocation1 + $0x8] sm:$0xff pattern:$0x75316420]  ;;  %v7194_v9 = vld [vmem:[%s11011_s7 + $0x440] sm:$0xff] }
 0x218   :  { %3844 = vmatpush.bf16.msra.mxu0 %v7139_v29  ;;  %v2185_v5 = vrot.slane %v9756_v12, 1  ;;  %v2188_v3 = vrot.slane %v9783_v54, 1  ;;  %v1865_v20 = vadd.f32 %v1864_v57, %v1863_v40  ;;  %v2103_v58 = vrot.slane %v2102_v0, 4  ;;  %v7146_v29 = vld [vmem:[%s11011_s7 + $0x2c0] sm:$0xff]  ;;  %v7183_v6 = vld [vmem:[%s11011_s7 + $0x3e8] sm:$0xff] }
 0x219   :  { %3856 = vmatpush.bf16.msra.mxu1 %v7148_v48  ;;  %v1488_v42 = vadd.f32 %v1487_v25, %v1486_v2  ;;  %v10069_v19 = vadd.f32 %v1859_v21, %v1858_v24  ;;  %v2109_v7 = vsel %vm1964_vm5, %v10040_v18, 0.0  ;;  %3922 = vmatpush.bf16.msrb.mxu2 %v7187_v26  ;;  %v10094_v2 = vld.sshfl [vmem:[#allocation1] sm:$0xff pattern:$0x75316420]  ;;  %v1489_v63 = vrot.slane %v9878_v10, 4  ;;  %v7175_v25 = vld [vmem:[%s11011_s7 + $0x3a8] sm:$0xff] }
 0x21a   :  { %v2197_v61 = vsel %vm1949_vm4, %v2185_v5, 0.0  ;;  %v10087_v14 = vadd.f32 %v1866_v11, %v1865_v20  ;;  %v2104_v1 = vadd.f32 %v2103_v58, %v2102_v0  ;;  %v2110_v51 = vrot.slane %v2109_v7, 4  ;;  %3935 = vmatpush.bf16.msrb.mxu3 %v7195_v55  ;;  %v7233_v11 = vld [vmem:[%s11013_s9 + $0xf8] sm:$0xff] }
 0x21b   :  { %v1607_v8 = vsel %vm1557_vm2, %v1488_v42, %v1474_v17  ;;  %v2218_v17 = vsel %vm1949_vm4, %v2188_v3, 0.0  ;;  %v2123_v48 = vsel %vm1949_vm4, %v10069_v19, 0.0  ;;  %v2198_v28 = vrot.slane %v2197_v61, 4  ;;  %v11060_v20 = vld [vmem:[#allocation6_spill] sm:$0xff] }
 0x21c   :  { %3845 = vmatpush.bf16.msra.mxu0 %v7138_v16  ;;  %v1639_v59 = vpack.c.bf16 %v1607_v8, %v1607_v8  ;;  %v2124_v62 = vrot.slane %v2123_v48, 4  ;;  %v2219_v35 = vrot.slane %v2218_v17, 4  ;;  %v2105_v21 = vrot.slane %v2104_v1, 2  ;;  %v10111_v16 = vld.sshfl [vmem:[#allocation1 + $0x20] sm:$0xff pattern:$0x75316420] }
 0x21d   :  { %3857 = vmatpush.bf16.msra.mxu1 %v7147_v41  ;;  %v2111_v36 = vadd.f32 %v2110_v51, %v2109_v7  ;;  %v2130_v60 = vsel %vm1964_vm5, %v10087_v14, 0.0  ;;  %v2199_v31 = vadd.f32 %v2198_v28, %v2197_v61  ;;  %v10116_v57 = vld.sshfl [vmem:[#allocation1 + $0x28] sm:$0xff pattern:$0x75316420]  ;;  %3923 = vmatpush.bf16.msrb.mxu2 %v7186_v27  ;;  %v1490_v24 = vadd.f32 %v1489_v63, %v9878_v10  ;;  %v7224_v8 = vld [vmem:[%s11013_s9 + $0xb0] sm:$0xff] }
 0x21e   :  { %3885 = vmatmul.bf16.vlgmr.msra.gmra.mxu3 %v1639_v59  ;;  %v2125_v15 = vadd.f32 %v2124_v62, %v2123_v48  ;;  %v2220_v50 = vadd.f32 %v2219_v35, %v2218_v17  ;;  %v2106_v41 = vadd.f32 %v2105_v21, %v2104_v1  ;;  %1891 = vst [vmem:[#allocation1] ss:$2 sm:$0xff] %v11060_v20  ;;  %v11061_v59 = vld [vmem:[#allocation13_spill] sm:$0xff]  ;;  %v1518_v20 = vrot.slane %v9924_v38, 1 }
 0x21f   :  { %3846 = vmatmul.bf16.vlgmr.msra.gmra.mxu0 %v1636_v53  ;;  %v1501_v53 = vrot.slane %v9904_v47, 4  ;;  %v2112_v42 = vrot.slane %v2111_v36, 2  ;;  %v2200_v5 = vrot.slane %v2199_v31, 2  ;;  %3936 = vmatpush.bf16.msrb.mxu3 %v7194_v9  ;;  %1896 = vst [vmem:[#allocation1 + $0x20] ss:$2 sm:$0xff] %v11061_v59  ;;  %v7232_v28 = vld [vmem:[%s11013_s9 + $0xf0] sm:$0xff] }
 0x220   :  { %3890 = vmatpush.bf16.msrb.mxu0 %v7177_v34  ;;  %v2131_v34 = vrot.slane %v2130_v60, 4  ;;  %v2126_v26 = vrot.slane %v2125_v15, 2  ;;  %v2221_v3 = vrot.slane %v2220_v50, 2  ;;  %v2107_v58 = vrot.slane %v2106_v41, 1  ;;  %v7223_v9 = vld [vmem:[%s11013_s9 + $0xa8] sm:$0xff] }
 0x221   :  { %3858 = vmatpush.bf16.msra.mxu1 %v7146_v29  ;;  %v1502_v40 = vadd.f32 %v1501_v53, %v9904_v47  ;;  %5416 = vmatpush.bf16.msra.mxu2 %v7225_v56  ;;  %v2113_v55 = vadd.f32 %v2112_v42, %v2111_v36  ;;  %v2201_v17 = vadd.f32 %v2200_v5, %v2199_v31  ;;  %v1517_v53 = vrot.slane %v9878_v10, 1  ;;  %v7231_v10 = vld [vmem:[%s11013_s9 + $0xe8] sm:$0xff] }
 0x222   :  { %v2132_v0 = vadd.f32 %v2131_v34, %v2130_v60  ;;  %v2127_v7 = vadd.f32 %v2126_v26, %v2125_v15  ;;  %v2222_v1 = vadd.f32 %v2221_v3, %v2220_v50  ;;  %v2108_v51 = vadd.f32 %v2107_v58, %v2106_v41 }
 0x223   :  { %v1503_v29 = vrot.slane %v1502_v40, 2  ;;  %v2114_v48 = vrot.slane %v2113_v55, 1  ;;  %5429 = vmatpush.bf16.msra.mxu3 %v7233_v11  ;;  %v2202_v63 = vrot.slane %v2201_v17, 1  ;;  %v1519_v42 = vrot.slane %v9904_v47, 1  ;;  %v7222_v47 = vld [vmem:[%s11013_s9 + $0xa0] sm:$0xff] }
 0x224   :  { %3891 = vmatpush.bf16.msrb.mxu0 %v7176_v23  ;;  %v1491_v23 = vrot.slane %v1490_v24, 2  ;;  %3859 = vmatmul.bf16.vlgmr.msra.gmra.mxu1 %v1637_v43  ;;  %v2133_v61 = vrot.slane %v2132_v0, 2  ;;  %v2128_v43 = vrot.slane %v2127_v7, 1  ;;  %v2223_v56 = vrot.slane %v2222_v1, 1 }
 0x225   :  { %3903 = vmatpush.bf16.msrb.mxu1 %v7185_v33  ;;  %v7174_v33 = vld [vmem:[%s11011_s7 + $0x3a0] sm:$0xff]  ;;  %v1504_v62 = vadd.f32 %v1503_v29, %v1502_v40  ;;  %5417 = vmatpush.bf16.msra.mxu2 %v7224_v8  ;;  %v2115_v21 = vadd.f32 %v2114_v48, %v2113_v55  ;;  %v2203_v31 = vadd.f32 %v2202_v63, %v2201_v17  ;;  %v1539_v8 = vsel %vm1276_vm0, %v1519_v42, 0.0  ;;  %v7172_v55 = vld [vmem:[%s11011_s7 + $0x390] sm:$0xff]  ;;  %v7181_v48 = vld [vmem:[%s11011_s7 + $0x3d8] sm:$0xff] }
 0x226   :  { %v1492_v27 = vadd.f32 %v1491_v23, %v1490_v24  ;;  %v2134_v35 = vadd.f32 %v2133_v61, %v2132_v0  ;;  %v2129_v15 = vadd.f32 %v2128_v43, %v2127_v7  ;;  %v2224_v50 = vadd.f32 %v2223_v56, %v2222_v1  ;;  %v7182_v40 = vld [vmem:[%s11011_s7 + $0x3e0] sm:$0xff]  ;;  %v7221_v43 = vld [vmem:[%s11013_s9 + $0x98] sm:$0xff] }
 0x227   :  { %v1505_v60 = vrot.slane %v1504_v62, 1  ;;  %v1525_v24 = vsel %vm1276_vm0, %v1517_v53, 0.0  ;;  %5430 = vmatpush.bf16.msra.mxu3 %v7232_v28  ;;  %v1520_v58 = vrot.slane %v9962_v37, 1  ;;  %v1532_v61 = vsel %vm1276_vm0, %v1518_v20, 0.0 }
 0x228   :  { %3892 = vmatpush.bf16.msrb.mxu0 %v7175_v25  ;;  %v1493_v36 = vrot.slane %v1492_v27, 1  ;;  %v7173_v25 = vld [vmem:[%s11011_s7 + $0x398] sm:$0xff]  ;;  %v2135_v34 = vrot.slane %v2134_v35, 1  ;;  %v2435_v26 = vsel %vm1557_vm2, %v2129_v15, %v2108_v51  ;;  %v2466_v0 = vsel %vm1557_vm2, %v2224_v50, %v2203_v31  ;;  %v7230_v51 = vld [vmem:[%s11013_s9 + $0xe0] sm:$0xff] }
 0x229   :  { %3904 = vmatpush.bf16.msrb.mxu1 %v7184_v30  ;;  %v1506_v41 = vadd.f32 %v1505_v60, %v1504_v62  ;;  %v1526_v5 = vrot.slane %v1525_v24, 4  ;;  %5418 = vmatpush.bf16.msra.mxu2 %v7223_v9  ;;  %v1546_v17 = vsel %vm1276_vm0, %v1520_v58, 0.0  ;;  %v1495_v1 = vrot.slane %v9924_v38, 4 }
 0x22a   :  { %v1494_v30 = vadd.f32 %v1493_v36, %v1492_v27  ;;  %v2136_v11 = vadd.f32 %v2135_v34, %v2134_v35  ;;  %2469 = vrot.lane.b32.xlu0 %v2466_v0, %s7443_s6  ;;  %v1533_v28 = vrot.slane %v1532_v61, 4  ;;  %v1507_v63 = vrot.slane %v9962_v37, 4 }
 0x22b   :  { %v1527_v59 = vadd.f32 %v1526_v5, %v1525_v24  ;;  %5431 = vmatpush.bf16.msra.mxu3 %v7231_v10  ;;  %v1496_v35 = vadd.f32 %v1495_v1, %v9924_v38  ;;  %v2186_v56 = vrot.slane %v9998_v44, 1  ;;  %v2187_v9 = vrot.slane %v10040_v18, 1  ;;  %v7229_v38 = vld [vmem:[%s11013_s9 + $0xd8] sm:$0xff]  ;;  %v7170_v5 = vld [vmem:[%s11011_s7 + $0x380] sm:$0xff]  ;;  %v7179_v1 = vld [vmem:[%s11011_s7 + $0x3c8] sm:$0xff] }
 0x22c   :  { %3893 = vmatpush.bf16.msrb.mxu0 %v7174_v33  ;;  %v10165_v3 = vsel %vm1557_vm2, %v1506_v41, %v1494_v30  ;;  %v2436_v23 = vsel %vm1557_vm2, %v2136_v11, %v2115_v21  ;;  %v1540_v33 = vrot.slane %v1539_v8, 4  ;;  %v7171_v21 = vld [vmem:[%s11011_s7 + $0x388] sm:$0xff]  ;;  %v1534_v53 = vadd.f32 %v1533_v28, %v1532_v61  ;;  %v7180_v30 = vld [vmem:[%s11011_s7 + $0x3d0] sm:$0xff] }
 0x22d   :  { %3905 = vmatpush.bf16.msrb.mxu1 %v7183_v6  ;;  %v1640_v29 = vpack.c.bf16 %v10165_v3, %v10165_v3  ;;  %v7384_v7 = vpack.i.bf16 %v2436_v23, %v2435_v26  ;;  %v1528_v27 = vrot.slane %v1527_v59, 2  ;;  %v1547_v6 = vrot.slane %v1546_v17, 4  ;;  %5419 = vmatpush.bf16.msra.mxu2 %v7222_v47  ;;  %v7209_v47 = vld [vmem:[%s11013_s9 + $0x38] sm:$0xff]  ;;  %v10216_v23 = vld.sshfl [vmem:[#allocation1 + $0x10] sm:$0xff pattern:$0x75316420] }
 0x22e   :  { %v1541_v62 = vadd.f32 %v1540_v33, %v1539_v8  ;;  %v1497_v15 = vrot.slane %v1496_v35, 2  ;;  %v1508_v34 = vadd.f32 %v1507_v63, %v9962_v37  ;;  %v2189_v31 = vrot.slane %v10069_v19, 1  ;;  %v7220_v37 = vld [vmem:[%s11013_s9 + $0x90] sm:$0xff]  ;;  %1882 = vst [vmem:[#allocation1 + $0x10] ss:$2 sm:$0xff] %v9731_v46  ;;  %v7219_v28 = vld [vmem:[%s11013_s9 + $0x88] sm:$0xff] }
 0x22f   :  { %7385 = vrot.lane.b32.xlu2 %v7384_v7, %s7443_s6  ;;  %v1529_v36 = vadd.f32 %v1528_v27, %v1527_v59  ;;  %5432 = vmatpush.bf16.msra.mxu3 %v7230_v51  ;;  %v2190_v50 = vrot.slane %v10087_v14, 1  ;;  %v1535_v24 = vrot.slane %v1534_v53, 2  ;;  %v2204_v26 = vsel %vm1949_vm4, %v2186_v56, 0.0  ;;  %v1898_v3 = vld.sshfl [vmem:[#allocation1 + $0x20] sm:$0xff pattern:$0x75316420] }
 0x230   :  { %3894 = vmatpush.bf16.msrb.mxu0 %v7173_v25  ;;  %v1542_v60 = vrot.slane %v1541_v62, 2  ;;  %v1548_v25 = vadd.f32 %v1547_v6, %v1546_v17  ;;  %v1509_v11 = vrot.slane %v1508_v34, 2  ;;  %v2211_v0 = vsel %vm1964_vm5, %v2187_v9, 0.0  ;;  %v7228_v17 = vld [vmem:[%s11013_s9 + $0xd0] sm:$0xff] }
 0x231   :  { %3906 = vmatpush.bf16.msrb.mxu1 %v7182_v40  ;;  %v1530_v41 = vrot.slane %v1529_v36, 1  ;;  %5420 = vmatpush.bf16.msra.mxu2 %v7221_v43  ;;  %v1498_v40 = vadd.f32 %v1497_v15, %v1496_v35  ;;  %v1536_v58 = vadd.f32 %v1535_v24, %v1534_v53  ;;  %v2205_v7 = vrot.slane %v2204_v26, 4  ;;  %v7208_v53 = vld [vmem:[%s11013_s9 + $0x30] sm:$0xff] }
 0x232   :  { %v1543_v42 = vadd.f32 %v1542_v60, %v1541_v62  ;;  %v1549_v10 = vrot.slane %v1548_v25, 2  ;;  %v1510_v33 = vadd.f32 %v1509_v11, %v1508_v34  ;;  %v2212_v61 = vrot.slane %v2211_v0, 4  ;;  %v7218_v11 = vld [vmem:[%s11013_s9 + $0x80] sm:$0xff] }
 0x233   :  { %v1531_v8 = vadd.f32 %v1530_v41, %v1529_v36  ;;  %v1499_v59 = vrot.slane %v1498_v40, 1  ;;  %5433 = vmatpush.bf16.msra.mxu3 %v7229_v38  ;;  %v2225_v62 = vsel %vm1949_vm4, %v2189_v31, 0.0  ;;  %v2206_v35 = vadd.f32 %v2205_v7, %v2204_v26  ;;  %v10230_v36 = vld.sshfl [vmem:[#allocation1 + $0x30] sm:$0xff pattern:$0x75316420]  ;;  %v7178_v38 = vld [vmem:[%s11011_s7 + $0x3c0] sm:$0xff] }
 0x234   :  { %3895 = vmatpush.bf16.msrb.mxu0 %v7172_v55  ;;  %v1544_v20 = vrot.slane %v1543_v42, 1  ;;  %v1550_v55 = vadd.f32 %v1549_v10, %v1548_v25  ;;  %v1511_v43 = vrot.slane %v1510_v33, 1  ;;  %v2213_v63 = vadd.f32 %v2212_v61, %v2211_v0  ;;  %1887 = vst [vmem:[#allocation1 + $0x30] ss:$2 sm:$0xff] %v9444_v49  ;;  %v7217_v10 = vld [vmem:[%s11013_s9 + $0x78] sm:$0xff] }
 0x235   :  { %3907 = vmatpush.bf16.msrb.mxu1 %v7181_v48  ;;  %v1537_v48 = vrot.slane %v1536_v58, 1  ;;  %5421 = vmatpush.bf16.msra.mxu2 %v7220_v37  ;;  %v1500_v6 = vadd.f32 %v1499_v59, %v1498_v40  ;;  %v2207_v15 = vrot.slane %v2206_v35, 2  ;;  %v2232_v41 = vsel %vm1964_vm5, %v2190_v50, 0.0  ;;  %v1894_v59 = vld.sshfl [vmem:[#allocation1 + $0x8] sm:$0xff pattern:$0x75316420] }
 0x236   :  { %v1545_v51 = vadd.f32 %v1544_v20, %v1543_v42  ;;  %v1551_v27 = vrot.slane %v1550_v55, 1  ;;  %v1512_v25 = vadd.f32 %v1511_v43, %v1510_v33  ;;  %v2214_v34 = vrot.slane %v2213_v63, 2  ;;  %v7227_v42 = vld [vmem:[%s11013_s9 + $0xc8] sm:$0xff] }
 0x237   :  { %v1538_v56 = vadd.f32 %v1537_v48, %v1536_v58  ;;  %5434 = vmatpush.bf16.msra.mxu3 %v7228_v17  ;;  %v1919_v24 = vsel %vm1723_vm1, %v9993_v4, 0.0  ;;  %v2208_v37 = vadd.f32 %v2207_v15, %v2206_v35  ;;  %v2233_v40 = vrot.slane %v2232_v41, 4  ;;  %v7207_v20 = vld [vmem:[%s11013_s9 + $0x28] sm:$0xff] }
 0x238   :  { %3896 = vmatpush.bf16.msrb.mxu0 %v7171_v21  ;;  %v1622_v46 = vsel %vm1557_vm2, %v1545_v51, %v1531_v8  ;;  %v1552_v9 = vadd.f32 %v1551_v27, %v1550_v55  ;;  %v2226_v21 = vrot.slane %v2225_v62, 4  ;;  %v1615_v50 = vsel %vm1557_vm2, %v1512_v25, %v1500_v6  ;;  %v10261_v8 = vld.sshfl [vmem:[#allocation1 + $0x10] sm:$0xff pattern:$0x75316420]  ;;  %v7226_v51 = vld [vmem:[%s11013_s9 + $0xc0] sm:$0xff] }
 0x239   :  { %3908 = vmatpush.bf16.msrb.mxu1 %v7180_v30  ;;  %v1642_v60 = vpack.c.bf16 %v1622_v46, %v1622_v46  ;;  %5422 = vmatpush.bf16.msra.mxu2 %v7219_v28  ;;  %v1641_v26 = vpack.c.bf16 %v1615_v50, %v1615_v50  ;;  %v2215_v4 = vadd.f32 %v2214_v34, %v2213_v63  ;;  %v2209_v58 = vrot.slane %v2208_v37, 1  ;;  %v1899_v27 = vld.sshfl [vmem:[#allocation1 + $0x28] sm:$0xff pattern:$0x75316420]  ;;  %v7256_v63 = vld [vmem:[%s11013_s9 + $0x1b0] sm:$0xff]  ;;  %v7206_v46 = vld [vmem:[%s11013_s9 + $0x20] sm:$0xff] }
 0x23a   :  { %v1623_v31 = vsel %vm1557_vm2, %v1552_v9, %v1538_v56  ;;  %v2227_v30 = vadd.f32 %v2226_v21, %v2225_v62  ;;  %v2234_v55 = vadd.f32 %v2233_v40, %v2232_v41  ;;  %v1922_v7 = vsel %vm1723_vm1, %v10094_v2, 0.0  ;;  %1892 = vst [vmem:[#allocation1 + $0x10] ss:$2 sm:$0xff] %v9480_v52  ;;  %v7216_v2 = vld [vmem:[%s11013_s9 + $0x70] sm:$0xff]  ;;  %v7215_v34 = vld [vmem:[%s11013_s9 + $0x68] sm:$0xff] }
 0x23b   :  { %3924 = vmatmul.bf16.vlgmr.msrb.gmra.mxu2 %v1642_v60  ;;  %v1643_v49 = vpack.c.bf16 %v1623_v31, %v1623_v31  ;;  %5435 = vmatpush.bf16.msra.mxu3 %v7227_v42  ;;  %v1924_v17 = vsel %vm1723_vm1, %v10007_v32, 0.0  ;;  %v2210_v52 = vadd.f32 %v2209_v58, %v2208_v37  ;;  %v7265_v32 = vld [vmem:[%s11013_s9 + $0x1f8] sm:$0xff]  ;;  %v1927_v43 = vsel %vm1723_vm1, %v10096_v13, 0.0  ;;  %v10298_v60 = vld.sshfl [vmem:[#allocation1 + $0x30] sm:$0xff pattern:$0x75316420]  ;;  %v3717_v58 = vpop.f32.mrf.mxu2 }
 0x23c   :  { %3897 = vmatpush.bf16.msrb.mxu0 %v7170_v5  ;;  %v2228_v0 = vrot.slane %v2227_v30, 2  ;;  %v1893_v5 = vld.sshfl [vmem:[#allocation1] sm:$0xff pattern:$0x75316420]  ;;  %v2235_v48 = vrot.slane %v2234_v55, 2  ;;  %v1934_v35 = vsel %vm1723_vm1, %v10111_v16, 0.0 }
 0x23d   :  { %3909 = vmatpush.bf16.msrb.mxu1 %v7179_v1  ;;  %3937 = vmatmul.bf16.vlgmr.msrb.gmra.mxu3 %v1643_v49  ;;  %v1925_v1 = vsel %vm1723_vm1, %v10042_v22, 0.0  ;;  %v1935_v21 = vsel %vm1723_vm1, %v1893_v5, 0.0  ;;  %v1937_v13 = vsel %vm1723_vm1, %v1898_v3, 0.0  ;;  %v1939_v25 = vsel %vm1723_vm1, %v10116_v57, 0.0  ;;  %1897 = vst [vmem:[#allocation1 + $0x30] ss:$2 sm:$0xff] %v9872_v45 }
 0x23e   :  { %v2229_v61 = vadd.f32 %v2228_v0, %v2227_v30  ;;  %v1926_v28 = vadd.f32 %v1925_v1, %v1924_v17  ;;  %5423 = vmatpush.bf16.msra.mxu2 %v7218_v11  ;;  %v2236_v56 = vadd.f32 %v2235_v48, %v2234_v55  ;;  %v1940_v15 = vsel %vm1723_vm1, %v1894_v59, 0.0  ;;  %v7264_v57 = vld [vmem:[%s11013_s9 + $0x1f0] sm:$0xff]  ;;  %v7255_v49 = vld [vmem:[%s11013_s9 + $0x1a8] sm:$0xff]  ;;  %v7214_v0 = vld [vmem:[%s11013_s9 + $0x60] sm:$0xff]  ;;  %v3730_v48 = vpop.f32.mrf.mxu3 }
 0x23f   :  { %3898 = vmatmul.bf16.vlgmr.msrb.gmra.mxu0 %v1640_v29  ;;  %v1920_v29 = vsel %vm1723_vm1, %v10023_v39, 0.0  ;;  %v2216_v39 = vrot.slane %v2215_v4, 1  ;;  %5436 = vmatpush.bf16.msra.mxu3 %v7226_v51  ;;  %v1941_v31 = vadd.f32 %v1940_v15, %v1939_v25  ;;  %v1942_v30 = vsel %vm1723_vm1, %v1899_v27, 0.0  ;;  %v11062_v1 = vld [vmem:[#allocation11_spill] sm:$0xff]  ;;  %v7203_v25 = vld [vmem:[%s11013_s9 + $0x8] sm:$0xff] }
 0x240   :  { %5390 = vmatpush.bf16.msra.mxu0 %v7209_v47  ;;  %v7257_v47 = vld [vmem:[%s11013_s9 + $0x1b8] sm:$0xff]  ;;  %v1921_v33 = vadd.f32 %v1920_v29, %v1919_v24  ;;  %v2230_v6 = vrot.slane %v2229_v61, 1  ;;  %v10294_v9 = vadd.f32 %v1927_v43, %v1926_v28  ;;  %v1965_v51 = vsel %vm1964_vm5, %v11062_v1, 0.0 }
 0x241   :  { %3910 = vmatpush.bf16.msrb.mxu1 %v7178_v38  ;;  %v2217_v22 = vadd.f32 %v2216_v39, %v2215_v4  ;;  %v2237_v38 = vrot.slane %v2236_v56, 1  ;;  %v10324_v40 = vadd.f32 %v1942_v30, %v1941_v31  ;;  %v7204_v39 = vld [vmem:[%s11013_s9 + $0x10] sm:$0xff]  ;;  %v7213_v43 = vld [vmem:[%s11013_s9 + $0x58] sm:$0xff] }
 0x242   :  { %v10279_v62 = vadd.f32 %v1922_v7, %v1921_v33  ;;  %5468 = vmatpush.bf16.msrb.mxu2 %v7257_v47  ;;  %v2231_v16 = vadd.f32 %v2230_v6, %v2229_v61  ;;  %v2288_v24 = vsel %vm1723_vm1, %v10294_v9, 0.0  ;;  %v7254_v7 = vld [vmem:[%s11013_s9 + $0x1a0] sm:$0xff] }
 0x243   :  { %5481 = vmatpush.bf16.msrb.mxu3 %v7265_v32  ;;  %v2238_v50 = vadd.f32 %v2237_v38, %v2236_v56  ;;  %v2289_v11 = vrot.slane %v2288_v24, 4  ;;  %v2309_v47 = vsel %vm1723_vm1, %v10324_v40, 0.0  ;;  %v1966_v32 = vrot.slane %v1965_v51, 4  ;;  %v2839_v6 = vld [vmem:[%s11012_s8] sm:$0x1] }
 0x244   :  { %5391 = vmatpush.bf16.msra.mxu0 %v7208_v53  ;;  %3911 = vmatmul.bf16.vlgmr.msrb.gmra.mxu1 %v1641_v26  ;;  %v1936_v53 = vadd.f32 %v1935_v21, %v1934_v35  ;;  %v2281_v41 = vsel %vm1723_vm1, %v10279_v62, 0.0  ;;  %v2467_v37 = vsel %vm1557_vm2, %v2231_v16, %v2210_v52  ;;  %v2310_v33 = vrot.slane %v2309_v47, 4  ;;  %v11064_v31 = vld [vmem:[#allocation7_spill] sm:$0xff] }
 0x245   :  { %5403 = vmatpush.bf16.msra.mxu1 %v7217_v10  ;;  %v2282_v45 = vrot.slane %v2281_v41, 4  ;;  %v7205_v10 = vld [vmem:[%s11013_s9 + $0x18] sm:$0xff]  ;;  %v2468_v5 = vsel %vm1557_vm2, %v2238_v50, %v2217_v22  ;;  %v2290_v3 = vadd.f32 %v2289_v11, %v2288_v24  ;;  %v2840_v38 = vmul.f32 64.0, %v2839_v6 }
 0x246   :  { %v10313_v42 = vadd.f32 %v1937_v13, %v1936_v53  ;;  %5469 = vmatpush.bf16.msrb.mxu2 %v7256_v63  ;;  %v7389_v55 = vpack.i.bf16 %v2468_v5, %v2467_v37  ;;  %v2311_v28 = vadd.f32 %v2310_v33, %v2309_v47  ;;  %v1967_v13 = vadd.f32 %v1966_v32, %v1965_v51  ;;  %v7253_v53 = vld [vmem:[%s11013_s9 + $0x198] sm:$0xff]  ;;  %v11065_v47 = vld [vmem:[#allocation8_spill] sm:$0xff]  ;;  %v10379_v33 = vpop.permute.xlu0 %2404  ;;  %v11066_v32 = vld [vmem:[#allocation9_spill] sm:$0xff] }
 0x247   :  { %v2283_v26 = vadd.f32 %v2282_v45, %v2281_v41  ;;  %5482 = vmatpush.bf16.msrb.mxu3 %v7264_v57  ;;  %v2291_v61 = vrot.slane %v2290_v3, 2  ;;  %v1950_v30 = vsel %vm1949_vm4, %v11064_v31, 0.0  ;;  %v2842_v37 = vperm.slane %v2840_v38, 0  ;;  %v7261_v11 = vld [vmem:[%s11013_s9 + $0x1d8] sm:$0xff] }
 0x248   :  { %5392 = vmatpush.bf16.msra.mxu0 %v7207_v20  ;;  %v2302_v4 = vsel %vm1723_vm1, %v10313_v42, 0.0  ;;  %v7263_v20 = vld [vmem:[%s11013_s9 + $0x1e8] sm:$0xff]  ;;  %7390 = vrot.lane.b32.xlu2 %v7389_v55, %s7443_s6  ;;  %v2312_v21 = vrot.slane %v2311_v28, 2  ;;  %v1968_v45 = vrot.slane %v1967_v13, 2  ;;  %v7202_v55 = vld [vmem:[%s11013_s9] sm:$0xff] }
 0x249   :  { %5404 = vmatpush.bf16.msra.mxu1 %v7216_v2  ;;  %v2303_v29 = vrot.slane %v2302_v4, 4  ;;  %v2284_v59 = vrot.slane %v2283_v26, 2  ;;  %v11063_v2 = vld [vmem:[#allocation12_spill] sm:$0xff]  ;;  %v2292_v35 = vadd.f32 %v2291_v61, %v2290_v3 }
 0x24a   :  { %5470 = vmatpush.bf16.msrb.mxu2 %v7255_v49  ;;  %v1986_v52 = vsel %vm1964_vm5, %v11063_v2, 0.0  ;;  %v2313_v57 = vadd.f32 %v2312_v21, %v2311_v28  ;;  %v7212_v49 = vld [vmem:[%s11013_s9 + $0x50] sm:$0xff]  ;;  %v1969_v5 = vadd.f32 %v1968_v45, %v1967_v13 }
 0x24b   :  { %v2304_v17 = vadd.f32 %v2303_v29, %v2302_v4  ;;  %v2285_v27 = vadd.f32 %v2284_v59, %v2283_v26  ;;  %v1987_v22 = vrot.slane %v1986_v52, 4  ;;  %5483 = vmatpush.bf16.msrb.mxu3 %v7263_v20  ;;  %v2293_v15 = vrot.slane %v2292_v35, 1  ;;  %v3719_v26 = vpop.f32.mrf.mxu2  ;;  %v7252_v29 = vld [vmem:[%s11013_s9 + $0x190] sm:$0xff] }
 0x24c   :  { %5393 = vmatpush.bf16.msra.mxu0 %v7206_v46  ;;  %v7262_v46 = vld [vmem:[%s11013_s9 + $0x1e0] sm:$0xff]  ;;  %v1951_v4 = vrot.slane %v1950_v30, 4  ;;  %v1972_v20 = vsel %vm1949_vm4, %v11065_v47, 0.0  ;;  %v7260_v13 = vld [vmem:[%s11013_s9 + $0x1d0] sm:$0xff]  ;;  %v1930_v26 = vsel %vm1734_vm3, %v10230_v36, 0.0  ;;  %v1932_v36 = vsel %vm1734_vm3, %v10261_v8, 0.0 }
 0x24d   :  { %5405 = vmatpush.bf16.msra.mxu1 %v7215_v34  ;;  %v2305_v63 = vrot.slane %v2304_v17, 2  ;;  %v2286_v56 = vrot.slane %v2285_v27, 1  ;;  %v1988_v16 = vadd.f32 %v1987_v22, %v1986_v52  ;;  %v1973_v61 = vrot.slane %v1972_v20, 4  ;;  %v7241_v52 = vld [vmem:[%s11013_s9 + $0x138] sm:$0xff] }
 0x24e   :  { %5471 = vmatpush.bf16.msrb.mxu2 %v7254_v7  ;;  %v3718_v7 = vadd.f32 %v3717_v58, %v2842_v37  ;;  %v1957_v22 = vsel %vm1949_vm4, %v11066_v32, 0.0  ;;  %v7211_v58 = vld [vmem:[%s11013_s9 + $0x48] sm:$0xff] }
 0x24f   :  { %v2306_v34 = vadd.f32 %v2305_v63, %v2304_v17  ;;  %v2287_v41 = vadd.f32 %v2286_v56, %v2285_v27  ;;  %v1989_v24 = vrot.slane %v1988_v16, 2  ;;  %5484 = vmatpush.bf16.msrb.mxu3 %v7262_v46  ;;  %v3732_v17 = vpop.f32.mrf.mxu3  ;;  %v1970_v27 = vrot.slane %v1969_v5, 1 }
 0x250   :  { %5394 = vmatpush.bf16.msra.mxu0 %v7205_v10  ;;  %v2294_v10 = vadd.f32 %v2293_v15, %v2292_v35  ;;  %v1974_v63 = vadd.f32 %v1973_v61, %v1972_v20  ;;  %v7259_v20 = vld [vmem:[%s11013_s9 + $0x1c8] sm:$0xff] }
 0x251   :  { %5406 = vmatpush.bf16.msra.mxu1 %v7214_v0  ;;  %v2307_v50 = vrot.slane %v2306_v34, 1  ;;  %v2314_v0 = vrot.slane %v2313_v57, 1  ;;  %v1990_v3 = vadd.f32 %v1989_v24, %v1988_v16  ;;  %v1971_v56 = vadd.f32 %v1970_v27, %v1969_v5  ;;  %v7251_v16 = vld [vmem:[%s11013_s9 + $0x188] sm:$0xff] }
 0x252   :  { %5472 = vmatpush.bf16.msrb.mxu2 %v7253_v53  ;;  %v1958_v53 = vrot.slane %v1957_v22, 4  ;;  %v1975_v15 = vrot.slane %v1974_v63, 2  ;;  %v1929_v24 = vsel %vm1734_vm3, %v10216_v23, 0.0  ;;  %v7249_v23 = vld [vmem:[%s11013_s9 + $0x178] sm:$0xff]  ;;  %v7239_v17 = vld [vmem:[%s11013_s9 + $0x128] sm:$0xff] }
 0x253   :  { %v2308_v59 = vadd.f32 %v2307_v50, %v2306_v34  ;;  %v2315_v51 = vadd.f32 %v2314_v0, %v2313_v57  ;;  %v1991_v28 = vrot.slane %v1990_v3, 1  ;;  %5485 = vmatpush.bf16.msrb.mxu3 %v7261_v11  ;;  %v11067_v34 = vld [vmem:[#allocation10_spill] sm:$0xff]  ;;  %v10428_v61 = vpop.f32.mrf.mxu2 }
 0x254   :  { %5395 = vmatpush.bf16.msra.mxu0 %v7204_v39  ;;  %v1952_v39 = vadd.f32 %v1951_v4, %v1950_v30  ;;  %v1979_v38 = vsel %vm1949_vm4, %v11067_v34, 0.0  ;;  %v7240_v30 = vld [vmem:[%s11013_s9 + $0x130] sm:$0xff]  ;;  %v1959_v57 = vadd.f32 %v1958_v53, %v1957_v22  ;;  %v1976_v37 = vadd.f32 %v1975_v15, %v1974_v63 }
 0x255   :  { %5407 = vmatpush.bf16.msra.mxu1 %v7213_v43  ;;  %v2498_v6 = vsel %vm1557_vm2, %v2308_v59, %v2287_v41  ;;  %v10390_v43 = vadd.f32 %v3730_v48, %v3718_v7  ;;  %v2499_v46 = vsel %vm1557_vm2, %v2315_v51, %v2294_v10  ;;  %v1992_v21 = vadd.f32 %v1991_v28, %v1990_v3  ;;  %v1895_v11 = vld.sshfl [vmem:[#allocation1 + $0x10] sm:$0xff pattern:$0x75316420]  ;;  %v10439_v28 = vpop.permute.xlu0 %2406 }
 0x256   :  { %v1953_v35 = vrot.slane %v1952_v39, 2  ;;  %5473 = vmatpush.bf16.msrb.mxu2 %v7252_v29  ;;  %v7394_v48 = vpack.i.bf16 %v2499_v46, %v2498_v6  ;;  %v1980_v45 = vrot.slane %v1979_v38, 4  ;;  %v1960_v0 = vrot.slane %v1959_v57, 2  ;;  %v1900_v3 = vld.sshfl [vmem:[#allocation1 + $0x30] sm:$0xff pattern:$0x75316420] }
 0x257   :  { %v2391_v41 = vsel %vm1557_vm2, %v1992_v21, %v1971_v56  ;;  %5486 = vmatpush.bf16.msrb.mxu3 %v7260_v13  ;;  %v1931_v29 = vadd.f32 %v1930_v26, %v1929_v24  ;;  %v1977_v59 = vrot.slane %v1976_v37, 1  ;;  %v1944_v7 = vsel %vm1734_vm3, %v10298_v60, 0.0  ;;  %v7289_v60 = vld [vmem:[%s11013_s9 + $0x2b8] sm:$0xff]  ;;  %v7248_v63 = vld [vmem:[%s11013_s9 + $0x170] sm:$0xff]  ;;  %v7399_v24 = vld [vmem:[%s11016_s12] ss:$0 sm:$0xff] }
 0x258   :  { %5396 = vmatpush.bf16.msra.mxu0 %v7203_v25  ;;  %v1954_v25 = vadd.f32 %v1953_v35, %v1952_v39  ;;  %7395 = vrot.lane.b32.xlu1 %v7394_v48, %s7443_s6  ;;  %v2524_v10 = vsel %vm2410_vm6, %v2391_v41, %v10379_v33  ;;  %v1981_v5 = vadd.f32 %v1980_v45, %v1979_v38  ;;  %v7250_v39 = vld [vmem:[%s11013_s9 + $0x180] sm:$0xff]  ;;  %v1945_v8 = vsel %vm1734_vm3, %v1895_v11, 0.0  ;;  %v10463_v45 = vpop.f32.mrf.mxu3 }
 0x259   :  { %5408 = vmatpush.bf16.msra.mxu1 %v7212_v49  ;;  %v7210_v49 = vld [vmem:[%s11013_s9 + $0x40] sm:$0xff]  ;;  %v2530_v4 = vpack.c.bf16 %v2524_v10, %v2524_v10  ;;  %v1961_v51 = vadd.f32 %v1960_v0, %v1959_v57  ;;  %v10433_v27 = vadd.f32 %v1932_v36, %v1931_v29  ;;  %v1978_v22 = vadd.f32 %v1977_v59, %v1976_v37  ;;  %v7297_v57 = vld [vmem:[%s11013_s9 + $0x2f8] sm:$0xff]  ;;  %v7247_v37 = vld [vmem:[%s11013_s9 + $0x168] sm:$0xff] }
 0x25a   :  { %v1955_v50 = vrot.slane %v1954_v25, 1  ;;  %5474 = vmatpush.bf16.msrb.mxu2 %v7251_v16  ;;  %v1946_v6 = vadd.f32 %v1945_v8, %v1944_v7  ;;  %v2043_v35 = vrot.slane %v11062_v1, 1  ;;  %v2411_v46 = vsel %vm2410_vm6, %v10379_v33, %v10439_v28  ;;  %v7238_v33 = vld [vmem:[%s11013_s9 + $0x120] sm:$0xff]  ;;  %v7296_v59 = vld [vmem:[%s11013_s9 + $0x2f0] sm:$0xff] }
 0x25b   :  { %5424 = vmatmul.bf16.vlgmr.msra.gmra.mxu2 %v2530_v4  ;;  %v1962_v56 = vrot.slane %v1961_v51, 1  ;;  %v2295_v13 = vsel %vm1734_vm3, %v10433_v27, 0.0  ;;  %5487 = vmatpush.bf16.msrb.mxu3 %v7259_v20  ;;  %v2531_v16 = vpack.c.bf16 %v2411_v46, %v2411_v46  ;;  %v1169_v15 = vpop.f32.mrf.mxu0  ;;  %v2046_v4 = vrot.slane %v11063_v2, 1 }
 0x25c   :  { %5397 = vmatpush.bf16.msra.mxu0 %v7202_v55  ;;  %v1956_v55 = vadd.f32 %v1955_v50, %v1954_v25  ;;  %v2296_v1 = vrot.slane %v2295_v13, 4  ;;  %v7258_v25 = vld [vmem:[%s11013_s9 + $0x1c0] sm:$0xff]  ;;  %v7288_v50 = vld [vmem:[%s11013_s9 + $0x2b0] sm:$0xff]  ;;  %v2067_v0 = vsel %vm1964_vm5, %v2043_v35, 0.0  ;;  %v1170_v36 = vadd.f32 %v7399_v24, %v1169_v15  ;;  %v7235_v24 = vld [vmem:[%s11013_s9 + $0x108] sm:$0xff] }
 0x25d   :  { %5409 = vmatpush.bf16.msra.mxu1 %v7211_v58  ;;  %v1947_v58 = vsel %vm1734_vm3, %v1900_v3, 0.0  ;;  %5437 = vmatmul.bf16.vlgmr.msra.gmra.mxu3 %v2531_v16  ;;  %v7237_v3 = vld [vmem:[%s11013_s9 + $0x118] sm:$0xff]  ;;  %v2088_v35 = vsel %vm1964_vm5, %v2046_v4, 0.0 }
 0x25e   :  { %v2389_v53 = vsel %vm1557_vm2, %v1978_v22, %v1956_v55  ;;  %v10452_v48 = vadd.f32 %v1947_v58, %v1946_v6  ;;  %5475 = vmatpush.bf16.msrb.mxu2 %v7250_v39  ;;  %v2068_v55 = vrot.slane %v2067_v0, 4  ;;  %v7287_v39 = vld [vmem:[%s11013_s9 + $0x2a8] sm:$0xff]  ;;  %v2044_v22 = vrot.slane %v11065_v47, 1 }
 0x25f   :  { %v2528_v38 = vpack.c.bf16 %v2389_v53, %v2389_v53  ;;  %5488 = vmatpush.bf16.msrb.mxu3 %v7258_v25  ;;  %v2042_v53 = vrot.slane %v11066_v32, 1  ;;  %v7245_v25 = vld [vmem:[%s11013_s9 + $0x158] sm:$0xff] }
 0x260   :  { %5442 = vmatpush.bf16.msrb.mxu0 %v7241_v52  ;;  %v1982_v52 = vrot.slane %v1981_v5, 2  ;;  %v2316_v10 = vsel %vm1734_vm3, %v10452_v48, 0.0  ;;  %v3784_v47 = vpop.f32.mrf.mxu3  ;;  %v2074_v32 = vsel %vm1949_vm4, %v2044_v22, 0.0  ;;  %v7273_v22 = vld [vmem:[%s11013_s9 + $0x238] sm:$0xff] }
 0x261   :  { %5410 = vmatpush.bf16.msra.mxu1 %v7210_v49  ;;  %v2297_v49 = vadd.f32 %v2296_v1, %v2295_v13  ;;  %5398 = vmatmul.bf16.vlgmr.msra.gmra.mxu0 %v2528_v38  ;;  %v2317_v26 = vrot.slane %v2316_v10, 4  ;;  %v7286_v1 = vld [vmem:[%s11013_s9 + $0x2a0] sm:$0xff] }
 0x262   :  { %v1983_v21 = vadd.f32 %v1982_v52, %v1981_v5  ;;  %5520 = vmatpush.bf16.msra.mxu2 %v7289_v60  ;;  %v3771_v5 = vpop.f32.mrf.mxu2  ;;  %v7246_v52 = vld [vmem:[%s11013_s9 + $0x160] sm:$0xff]  ;;  %v2069_v60 = vadd.f32 %v2068_v55, %v2067_v0  ;;  %v7244_v0 = vld [vmem:[%s11013_s9 + $0x150] sm:$0xff] }
 0x263   :  { %v2318_v20 = vadd.f32 %v2317_v26, %v2316_v10  ;;  %5533 = vmatpush.bf16.msra.mxu3 %v7297_v57  ;;  %v2137_v57 = vsel %vm1723_vm1, %v9756_v12, 0.0  ;;  %v7285_v12 = vld [vmem:[%s11013_s9 + $0x298] sm:$0xff] }
 0x264   :  { %5443 = vmatpush.bf16.msrb.mxu0 %v7240_v30  ;;  %v1963_v30 = vadd.f32 %v1962_v56, %v1961_v51  ;;  %v1984_v41 = vrot.slane %v1983_v21, 1  ;;  %v1189_v51 = vpop.f32.mrf.mxu1  ;;  %v2089_v56 = vrot.slane %v2088_v35, 4  ;;  %v2070_v16 = vrot.slane %v2069_v60, 2 }
 0x265   :  { %5455 = vmatpush.bf16.msrb.mxu1 %v7249_v23  ;;  %v2298_v23 = vrot.slane %v2297_v49, 2  ;;  %v2319_v8 = vrot.slane %v2318_v20, 2  ;;  %v10493_v6 = vadd.f32 %v1189_v51, %v1170_v36  ;;  %v2138_v4 = vrot.slane %v2137_v57, 4 }
 0x266   :  { %v1985_v11 = vadd.f32 %v1984_v41, %v1983_v21  ;;  %5521 = vmatpush.bf16.msra.mxu2 %v7288_v50  ;;  %v7295_v21 = vld [vmem:[%s11013_s9 + $0x2e8] sm:$0xff]  ;;  %v2090_v38 = vadd.f32 %v2089_v56, %v2088_v35 }
 0x267   :  { %v2299_v2 = vadd.f32 %v2298_v23, %v2297_v49  ;;  %v2320_v46 = vadd.f32 %v2319_v8, %v2318_v20  ;;  %5534 = vmatpush.bf16.msra.mxu3 %v7296_v59  ;;  %v2075_v23 = vrot.slane %v2074_v32, 4  ;;  %v2071_v20 = vadd.f32 %v2070_v16, %v2069_v60 }
 0x268   :  { %5444 = vmatpush.bf16.msrb.mxu0 %v7239_v17  ;;  %v2390_v29 = vsel %vm1557_vm2, %v1985_v11, %v1963_v30  ;;  %v2041_v17 = vrot.slane %v11064_v31, 1  ;;  %v7236_v31 = vld [vmem:[%s11013_s9 + $0x110] sm:$0xff]  ;;  %v2045_v30 = vrot.slane %v11067_v34, 1  ;;  %v2091_v10 = vrot.slane %v2090_v38, 2  ;;  %v7294_v34 = vld [vmem:[%s11013_s9 + $0x2e0] sm:$0xff] }
 0x269   :  { %5456 = vmatpush.bf16.msrb.mxu1 %v7248_v63  ;;  %v2529_v7 = vpack.c.bf16 %v2390_v29, %v2390_v29  ;;  %v2300_v58 = vrot.slane %v2299_v2, 1  ;;  %v3743_v63 = vpop.f32.mrf.mxu0  ;;  %v2139_v8 = vadd.f32 %v2138_v4, %v2137_v57  ;;  %v2158_v60 = vsel %vm1723_vm1, %v9783_v54, 0.0  ;;  %v7243_v54 = vld [vmem:[%s11013_s9 + $0x148] sm:$0xff] }
 0x26a   :  { %v3744_v13 = vadd.f32 %v3743_v63, %v10390_v43  ;;  %5522 = vmatpush.bf16.msra.mxu2 %v7287_v39  ;;  %v2060_v43 = vsel %vm1949_vm4, %v2042_v53, 0.0  ;;  %v2053_v41 = vsel %vm1949_vm4, %v2041_v17, 0.0  ;;  %v2081_v11 = vsel %vm1949_vm4, %v2045_v30, 0.0  ;;  %v7234_v39 = vld [vmem:[%s11013_s9 + $0x100] sm:$0xff]  ;;  %v7283_v57 = vld [vmem:[%s11013_s9 + $0x288] sm:$0xff] }
 0x26b   :  { %5411 = vmatmul.bf16.vlgmr.msra.gmra.mxu1 %v2529_v7  ;;  %v2301_v15 = vadd.f32 %v2300_v58, %v2299_v2  ;;  %v2061_v50 = vrot.slane %v2060_v43, 4  ;;  %5535 = vmatpush.bf16.msra.mxu3 %v7295_v21  ;;  %v2054_v26 = vrot.slane %v2053_v41, 4  ;;  %v2082_v36 = vrot.slane %v2081_v11, 4 }
 0x26c   :  { %5445 = vmatpush.bf16.msrb.mxu0 %v7238_v33  ;;  %v2321_v33 = vrot.slane %v2320_v46, 1  ;;  %v3756_v29 = vpop.f32.mrf.mxu1  ;;  %v2076_v2 = vadd.f32 %v2075_v23, %v2074_v32  ;;  %v2092_v51 = vadd.f32 %v2091_v10, %v2090_v38  ;;  %v2072_v21 = vrot.slane %v2071_v20, 1 }
 0x26d   :  { %5457 = vmatpush.bf16.msrb.mxu1 %v7247_v37  ;;  %v2409_v37 = vpop.permute.xlu1 %2408  ;;  %v2062_v55 = vadd.f32 %v2061_v50, %v2060_v43  ;;  %v3757_v59 = vadd.f32 %v3756_v29, %v3744_v13  ;;  %v2055_v7 = vadd.f32 %v2054_v26, %v2053_v41  ;;  %v2083_v35 = vadd.f32 %v2082_v36, %v2081_v11  ;;  %v7272_v43 = vld [vmem:[%s11013_s9 + $0x230] sm:$0xff]  ;;  %v7281_v11 = vld [vmem:[%s11013_s9 + $0x278] sm:$0xff] }
 0x26e   :  { %v2322_v49 = vadd.f32 %v2321_v33, %v2320_v46  ;;  %5523 = vmatpush.bf16.msra.mxu2 %v7286_v1  ;;  %v2077_v63 = vrot.slane %v2076_v2, 2  ;;  %v7284_v46 = vld [vmem:[%s11013_s9 + $0x290] sm:$0xff]  ;;  %v2159_v13 = vrot.slane %v2158_v60, 4  ;;  %v2140_v38 = vrot.slane %v2139_v8, 2 }
 0x26f   :  { %5536 = vmatpush.bf16.msra.mxu3 %v7294_v34  ;;  %v3770_v58 = vadd.f32 %v10428_v61, %v3757_v59  ;;  %v2084_v61 = vrot.slane %v2083_v35, 2  ;;  %v7292_v33 = vld [vmem:[%s11013_s9 + $0x2d0] sm:$0xff]  ;;  %v2073_v4 = vadd.f32 %v2072_v21, %v2071_v20 }
 0x270   :  { %5446 = vmatpush.bf16.msrb.mxu0 %v7237_v3  ;;  %v2500_v5 = vsel %vm1557_vm2, %v2322_v49, %v2301_v15  ;;  %v2412_v3 = vsel %vm2410_vm6, %v10439_v28, %v2409_v37  ;;  %v7293_v28 = vld [vmem:[%s11013_s9 + $0x2d8] sm:$0xff]  ;;  %v2078_v1 = vadd.f32 %v2077_v63, %v2076_v2  ;;  %v2160_v30 = vadd.f32 %v2159_v13, %v2158_v60  ;;  %v7242_v49 = vld [vmem:[%s11013_s9 + $0x140] sm:$0xff] }
 0x271   :  { %5458 = vmatpush.bf16.msrb.mxu1 %v7246_v52  ;;  %2505 = vrot.lane.b32.xlu2 %v2500_v5, %s7443_s6  ;;  %v3745_v17 = vpop.f32.mrf.mxu0  ;;  %v2063_v52 = vrot.slane %v2062_v55, 2  ;;  %v2532_v56 = vpack.c.bf16 %v2412_v3, %v2412_v3  ;;  %v10552_v16 = vadd.f32 %v10463_v45, %v3770_v58  ;;  %v2085_v45 = vadd.f32 %v2084_v61, %v2083_v35  ;;  %v7291_v5 = vld [vmem:[%s11013_s9 + $0x2c8] sm:$0xff]  ;;  %v7290_v58 = vld [vmem:[%s11013_s9 + $0x2c0] sm:$0xff]  ;;  %v7329_v13 = vld [vmem:[%s11013_s9 + $0x3f8] sm:$0xff] }
 0x272   :  { %5524 = vmatpush.bf16.msra.mxu2 %v7285_v12  ;;  %v2079_v32 = vrot.slane %v2078_v1, 1  ;;  %v2161_v34 = vrot.slane %v2160_v30, 2 }
 0x273   :  { %v2064_v47 = vadd.f32 %v2063_v52, %v2062_v55  ;;  %5537 = vmatpush.bf16.msra.mxu3 %v7293_v28  ;;  %v2086_v26 = vrot.slane %v2085_v45, 1  ;;  %v7271_v55 = vld [vmem:[%s11013_s9 + $0x228] sm:$0xff]  ;;  %v10580_v20 = vpop.f32.mrf.mxu2  ;;  %v7280_v52 = vld [vmem:[%s11013_s9 + $0x270] sm:$0xff]  ;;  %v7282_v28 = vld [vmem:[%s11013_s9 + $0x280] sm:$0xff] }
 0x274   :  { %5447 = vmatpush.bf16.msrb.mxu0 %v7236_v31  ;;  %v2056_v31 = vrot.slane %v2055_v7, 2  ;;  %v3758_v10 = vpop.f32.mrf.mxu1  ;;  %v2080_v12 = vadd.f32 %v2079_v32, %v2078_v1  ;;  %v2162_v2 = vadd.f32 %v2161_v34, %v2160_v30  ;;  %v7278_v32 = vld [vmem:[%s11013_s9 + $0x260] sm:$0xff] }
 0x275   :  { %5459 = vmatpush.bf16.msrb.mxu1 %v7245_v25  ;;  %v2093_v25 = vrot.slane %v2092_v51, 1  ;;  %v2065_v15 = vrot.slane %v2064_v47, 1  ;;  %v2087_v59 = vadd.f32 %v2086_v26, %v2085_v45 }
 0x276   :  { %v2057_v53 = vadd.f32 %v2056_v31, %v2055_v7  ;;  %5525 = vmatpush.bf16.msra.mxu2 %v7284_v46  ;;  %v2141_v7 = vadd.f32 %v2140_v38, %v2139_v8  ;;  %v7270_v31 = vld [vmem:[%s11013_s9 + $0x220] sm:$0xff]  ;;  %v7269_v38 = vld [vmem:[%s11013_s9 + $0x218] sm:$0xff] }
 0x277   :  { %v2066_v50 = vadd.f32 %v2065_v15, %v2064_v47  ;;  %5538 = vmatpush.bf16.msra.mxu3 %v7292_v33  ;;  %v7279_v47 = vld [vmem:[%s11013_s9 + $0x268] sm:$0xff]  ;;  %v7320_v15 = vld [vmem:[%s11013_s9 + $0x3b0] sm:$0xff] }
 0x278   :  { %5448 = vmatpush.bf16.msrb.mxu0 %v7235_v24  ;;  %v2058_v41 = vrot.slane %v2057_v53, 1  ;;  %v2144_v24 = vsel %vm1723_vm1, %v9998_v44, 0.0  ;;  %v2165_v44 = vsel %vm1723_vm1, %v10069_v19, 0.0  ;;  %v10599_v63 = vpop.permute.xlu1 %2437  ;;  %v2142_v46 = vrot.slane %v2141_v7, 1 }
 0x279   :  { %5460 = vmatpush.bf16.msrb.mxu1 %v7244_v0  ;;  %v2145_v37 = vrot.slane %v2144_v24, 4  ;;  %v2094_v0 = vadd.f32 %v2093_v25, %v2092_v51  ;;  %v2166_v29 = vrot.slane %v2165_v44, 4  ;;  %v2423_v51 = vsel %vm1557_vm2, %v2087_v59, %v2066_v50  ;;  %v7267_v59 = vld [vmem:[%s11013_s9 + $0x208] sm:$0xff] }
 0x27a   :  { %v2059_v23 = vadd.f32 %v2058_v41, %v2057_v53  ;;  %5526 = vmatpush.bf16.msra.mxu2 %v7283_v57  ;;  %v2534_v60 = vpack.c.bf16 %v2423_v51, %v2423_v51  ;;  %v3834_v25 = vpop.f32.mrf.mxu3  ;;  %v2143_v30 = vadd.f32 %v2142_v46, %v2141_v7  ;;  %v7276_v51 = vld [vmem:[%s11013_s9 + $0x250] sm:$0xff] }
 0x27b   :  { %v2146_v3 = vadd.f32 %v2145_v37, %v2144_v24  ;;  %v2167_v17 = vadd.f32 %v2166_v29, %v2165_v44  ;;  %v2424_v8 = vsel %vm1557_vm2, %v2094_v0, %v2073_v4  ;;  %5539 = vmatpush.bf16.msra.mxu3 %v7291_v5  ;;  %v3823_v41 = vpop.f32.mrf.mxu2  ;;  %v7319_v24 = vld [vmem:[%s11013_s9 + $0x3a8] sm:$0xff]  ;;  %v2239_v37 = vsel %vm1949_vm4, %v10279_v62, 0.0  ;;  %v7318_v29 = vld [vmem:[%s11013_s9 + $0x3a0] sm:$0xff] }
 0x27c   :  { %5449 = vmatpush.bf16.msrb.mxu0 %v7234_v39  ;;  %v2422_v36 = vsel %vm1557_vm2, %v2080_v12, %v2059_v23  ;;  %5476 = vmatmul.bf16.vlgmr.msrb.gmra.mxu2 %v2534_v60  ;;  %v2525_v21 = vsel %vm2410_vm6, %v2424_v8, %v10599_v63  ;;  %v7277_v23 = vld [vmem:[%s11013_s9 + $0x258] sm:$0xff]  ;;  %v7327_v44 = vld [vmem:[%s11013_s9 + $0x3e8] sm:$0xff]  ;;  %v2240_v4 = vrot.slane %v2239_v37, 4 }
 0x27d   :  { %5461 = vmatpush.bf16.msrb.mxu1 %v7243_v54  ;;  %v2533_v19 = vpack.c.bf16 %v2422_v36, %v2422_v36  ;;  %v2147_v39 = vrot.slane %v2146_v3, 2  ;;  %v2168_v35 = vrot.slane %v2167_v17, 2  ;;  %v2535_v53 = vpack.c.bf16 %v2525_v21, %v2525_v21 }
 0x27e   :  { %5527 = vmatpush.bf16.msra.mxu2 %v7282_v28  ;;  %v2241_v36 = vadd.f32 %v2240_v4, %v2239_v37 }
 0x27f   :  { %5450 = vmatmul.bf16.vlgmr.msrb.gmra.mxu0 %v2532_v56  ;;  %v2163_v56 = vrot.slane %v2162_v2, 1  ;;  %v2148_v54 = vadd.f32 %v2147_v39, %v2146_v3  ;;  %v2169_v61 = vadd.f32 %v2168_v35, %v2167_v17  ;;  %v3795_v1 = vpop.f32.mrf.mxu0  ;;  %5540 = vmatpush.bf16.msra.mxu3 %v7290_v58  ;;  %v7266_v58 = vld [vmem:[%s11013_s9 + $0x200] sm:$0xff] }
 0x280   :  { %5494 = vmatpush.bf16.msra.mxu0 %v7273_v22  ;;  %v7321_v22 = vld [vmem:[%s11013_s9 + $0x3b8] sm:$0xff]  ;;  %v3796_v33 = vadd.f32 %v3795_v1, %v10552_v16  ;;  %5489 = vmatmul.bf16.vlgmr.msrb.gmra.mxu3 %v2535_v53  ;;  %v7328_v16 = vld [vmem:[%s11013_s9 + $0x3f0] sm:$0xff]  ;;  %v2242_v28 = vrot.slane %v2241_v36, 2 }
 0x281   :  { %5462 = vmatpush.bf16.msrb.mxu1 %v7242_v49  ;;  %v2149_v45 = vrot.slane %v2148_v54, 1  ;;  %v2170_v57 = vrot.slane %v2169_v61, 1  ;;  %v7268_v49 = vld [vmem:[%s11013_s9 + $0x210] sm:$0xff]  ;;  %v3808_v10 = vpop.f32.mrf.mxu1 }
 0x282   :  { %5572 = vmatpush.bf16.msrb.mxu2 %v7321_v22  ;;  %v3809_v26 = vadd.f32 %v3808_v10, %v3796_v33  ;;  %v3836_v3 = vpop.f32.mrf.mxu3  ;;  %v2172_v22 = vsel %vm1734_vm3, %v10087_v14, 0.0  ;;  %v7275_v14 = vld [vmem:[%s11013_s9 + $0x248] sm:$0xff]  ;;  %v7316_v1 = vld [vmem:[%s11013_s9 + $0x390] sm:$0xff] }
 0x283   :  { %5585 = vmatpush.bf16.msrb.mxu3 %v7329_v13  ;;  %v2150_v34 = vadd.f32 %v2149_v45, %v2148_v54  ;;  %v2171_v12 = vadd.f32 %v2170_v57, %v2169_v61  ;;  %v2243_v13 = vadd.f32 %v2242_v28, %v2241_v36  ;;  %v7315_v57 = vld [vmem:[%s11013_s9 + $0x388] sm:$0xff]  ;;  %v7352_v36 = vld [vmem:[%s11013_s9 + $0x4b0] sm:$0xff] }
 0x284   :  { %5495 = vmatpush.bf16.msra.mxu0 %v7272_v43  ;;  %5463 = vmatmul.bf16.vlgmr.msrb.gmra.mxu1 %v2533_v19  ;;  %v2164_v43 = vadd.f32 %v2163_v56, %v2162_v2  ;;  %v2151_v2 = vsel %vm1734_vm3, %v10040_v18, 0.0  ;;  %v7317_v18 = vld [vmem:[%s11013_s9 + $0x398] sm:$0xff]  ;;  %v7311_v3 = vld [vmem:[%s11013_s9 + $0x368] sm:$0xff]  ;;  %v7300_v28 = vld [vmem:[%s11013_s9 + $0x310] sm:$0xff] }
 0x285   :  { %5507 = vmatpush.bf16.msra.mxu1 %v7281_v11  ;;  %v2260_v11 = vsel %vm1949_vm4, %v10313_v42, 0.0  ;;  %v2152_v54 = vrot.slane %v2151_v2, 4  ;;  %v2244_v45 = vrot.slane %v2243_v13, 1 }
 0x286   :  { %5573 = vmatpush.bf16.msrb.mxu2 %v7320_v15  ;;  %v2454_v50 = vsel %vm1557_vm2, %v2164_v43, %v2143_v30  ;;  %v2261_v0 = vrot.slane %v2260_v11, 4  ;;  %v7324_v30 = vld [vmem:[%s11013_s9 + $0x3d0] sm:$0xff] }
 0x287   :  { %5586 = vmatpush.bf16.msrb.mxu3 %v7328_v16  ;;  %v3797_v5 = vpop.f32.mrf.mxu0  ;;  %v2538_v19 = vpack.c.bf16 %v2454_v50, %v2454_v50  ;;  %v2153_v15 = vadd.f32 %v2152_v54, %v2151_v2  ;;  %v7323_v50 = vld [vmem:[%s11013_s9 + $0x3c8] sm:$0xff]  ;;  %v7350_v54 = vld [vmem:[%s11013_s9 + $0x4a0] sm:$0xff] }
 0x288   :  { %5496 = vmatpush.bf16.msra.mxu0 %v7271_v55  ;;  %v3822_v55 = vadd.f32 %v10580_v20, %v3809_v26  ;;  %v2262_v7 = vadd.f32 %v2261_v0, %v2260_v11  ;;  %v2455_v20 = vsel %vm1557_vm2, %v2171_v12, %v2150_v34  ;;  %v2245_v34 = vadd.f32 %v2244_v45, %v2243_v13  ;;  %v7312_v11 = vld [vmem:[%s11013_s9 + $0x370] sm:$0xff]  ;;  %v7314_v26 = vld [vmem:[%s11013_s9 + $0x380] sm:$0xff] }
 0x289   :  { %5508 = vmatpush.bf16.msra.mxu1 %v7280_v52  ;;  %v7386_v17 = vpop.permute.xlu2 %7385  ;;  %v7326_v52 = vld [vmem:[%s11013_s9 + $0x3e0] sm:$0xff]  ;;  %v2539_v46 = vpack.c.bf16 %v2455_v20, %v2455_v20  ;;  %v3810_v56 = vpop.f32.mrf.mxu1 }
 0x28a   :  { %5574 = vmatpush.bf16.msrb.mxu2 %v7319_v24  ;;  %v10648_v39 = vadd.f32 %v3834_v25, %v3822_v55  ;;  %v2263_v8 = vrot.slane %v2262_v7, 2  ;;  %v7387_v60 = vunpack.i.l.bf16 %v7386_v17  ;;  %v7388_v21 = vunpack.i.h.bf16 %v7386_v17  ;;  %v7304_v25 = vld [vmem:[%s11013_s9 + $0x330] sm:$0xff]  ;;  %v7303_v24 = vld [vmem:[%s11013_s9 + $0x328] sm:$0xff]  ;;  %v7302_v12 = vld [vmem:[%s11013_s9 + $0x320] sm:$0xff] }
 0x28b   :  { %5587 = vmatpush.bf16.msrb.mxu3 %v7327_v44  ;;  %v7322_v0 = vld [vmem:[%s11013_s9 + $0x3c0] sm:$0xff] }
 0x28c   :  { %5497 = vmatpush.bf16.msra.mxu0 %v7270_v31  ;;  %v2443_v35 = vsel %vm2410_vm6, %v10599_v63, %v7387_v60  ;;  %v7305_v31 = vld [vmem:[%s11013_s9 + $0x338] sm:$0xff]  ;;  %5528 = vmatmul.bf16.vlgmr.msra.gmra.mxu2 %v2538_v19  ;;  %v2173_v63 = vrot.slane %v2172_v22, 4  ;;  %v2264_v61 = vadd.f32 %v2263_v8, %v2262_v7  ;;  %v2444_v33 = vsel %vm2410_vm6, %v7387_v60, %v7388_v21  ;;  %v7310_v20 = vld [vmem:[%s11013_s9 + $0x360] sm:$0xff] }
 0x28d   :  { %5509 = vmatpush.bf16.msra.mxu1 %v7279_v47  ;;  %v7325_v47 = vld [vmem:[%s11013_s9 + $0x3d8] sm:$0xff]  ;;  %v2536_v53 = vpack.c.bf16 %v2443_v35, %v2443_v35  ;;  %v2537_v16 = vpack.c.bf16 %v2444_v33, %v2444_v33  ;;  %v7358_v33 = vld [vmem:[%s11013_s9 + $0x4e0] sm:$0xff] }
 0x28e   :  { %5575 = vmatpush.bf16.msrb.mxu2 %v7318_v29  ;;  %v2174_v43 = vadd.f32 %v2173_v63, %v2172_v22  ;;  %v2265_v41 = vrot.slane %v2264_v61, 1  ;;  %v7361_v29 = vld [vmem:[%s11013_s9 + $0x4f8] sm:$0xff]  ;;  %v7298_v45 = vld [vmem:[%s11013_s9 + $0x300] sm:$0xff] }
 0x28f   :  { %5588 = vmatpush.bf16.msrb.mxu3 %v7326_v52  ;;  %v7301_v19 = vld [vmem:[%s11013_s9 + $0x318] sm:$0xff]  ;;  %v7360_v52 = vld [vmem:[%s11013_s9 + $0x4f0] sm:$0xff] }
 0x290   :  { %5498 = vmatpush.bf16.msra.mxu0 %v7269_v38  ;;  %5541 = vmatmul.bf16.vlgmr.msra.gmra.mxu3 %v2539_v46  ;;  %v7274_v38 = vld [vmem:[%s11013_s9 + $0x240] sm:$0xff]  ;;  %v2175_v10 = vrot.slane %v2174_v43, 2  ;;  %v2266_v37 = vadd.f32 %v2265_v41, %v2264_v61  ;;  %v7309_v35 = vld [vmem:[%s11013_s9 + $0x358] sm:$0xff] }
 0x291   :  { %5510 = vmatpush.bf16.msra.mxu1 %v7278_v32  ;;  %v7313_v32 = vld [vmem:[%s11013_s9 + $0x378] sm:$0xff] }
 0x292   :  { %5576 = vmatpush.bf16.msrb.mxu2 %v7317_v18  ;;  %v2176_v4 = vadd.f32 %v2175_v10, %v2174_v43  ;;  %v2486_v5 = vsel %vm1557_vm2, %v2266_v37, %v2245_v34  ;;  %v7337_v41 = vld [vmem:[%s11013_s9 + $0x438] sm:$0xff]  ;;  %v7348_v34 = vld [vmem:[%s11013_s9 + $0x490] sm:$0xff] }
 0x293   :  { %5589 = vmatpush.bf16.msrb.mxu3 %v7325_v47  ;;  %v2543_v2 = vpack.c.bf16 %v2486_v5, %v2486_v5  ;;  %v7356_v5 = vld [vmem:[%s11013_s9 + $0x4d0] sm:$0xff] }
 0x294   :  { %5499 = vmatpush.bf16.msra.mxu0 %v7268_v49  ;;  %v2154_v49 = vrot.slane %v2153_v15, 2 }
 0x295   :  { %5511 = vmatpush.bf16.msra.mxu1 %v7277_v23  ;;  %v7353_v23 = vld [vmem:[%s11013_s9 + $0x4b8] sm:$0xff] }
 0x296   :  { %5577 = vmatpush.bf16.msrb.mxu2 %v7316_v1  ;;  %v2155_v44 = vadd.f32 %v2154_v49, %v2153_v15  ;;  %v2267_v49 = vsel %vm1949_vm4, %v10324_v40, 0.0 }
 0x297   :  { %5590 = vmatpush.bf16.msrb.mxu3 %v7324_v30 }
 0x298   :  { %5500 = vmatpush.bf16.msra.mxu0 %v7267_v59  ;;  %v2156_v17 = vrot.slane %v2155_v44, 1 }
 0x299   :  { %5512 = vmatpush.bf16.msra.mxu1 %v7276_v51  ;;  %v3873_v59 = vpop.f32.mrf.mxu2  ;;  %v2177_v51 = vrot.slane %v2176_v4, 1 }
 0x29a   :  { %5578 = vmatpush.bf16.msrb.mxu2 %v7315_v57  ;;  %v2157_v18 = vadd.f32 %v2156_v17, %v2155_v44  ;;  %v2253_v44 = vsel %vm1964_vm5, %v10433_v27, 0.0  ;;  %v7355_v17 = vld [vmem:[%s11013_s9 + $0x4c8] sm:$0xff] }
 0x29b   :  { %5591 = vmatpush.bf16.msrb.mxu3 %v7323_v50  ;;  %v2178_v22 = vadd.f32 %v2177_v51, %v2176_v4  ;;  %v7357_v50 = vld [vmem:[%s11013_s9 + $0x4d8] sm:$0xff]  ;;  %v2274_v4 = vsel %vm1964_vm5, %v10452_v48, 0.0  ;;  %v7346_v51 = vld [vmem:[%s11013_s9 + $0x480] sm:$0xff] }
 0x29c   :  { %5501 = vmatpush.bf16.msra.mxu0 %v7266_v58  ;;  %v3847_v55 = vpop.f32.mrf.mxu0 }
 0x29d   :  { %5513 = vmatpush.bf16.msra.mxu1 %v7275_v14  ;;  %v3848_v7 = vadd.f32 %v3847_v55, %v10648_v39  ;;  %v7351_v39 = vld [vmem:[%s11013_s9 + $0x4a8] sm:$0xff]  ;;  %v2456_v61 = vsel %vm1557_vm2, %v2178_v22, %v2157_v18  ;;  %v7354_v22 = vld [vmem:[%s11013_s9 + $0x4c0] sm:$0xff] }
 0x29e   :  { %5579 = vmatpush.bf16.msrb.mxu2 %v7314_v26  ;;  %v7299_v14 = vld [vmem:[%s11013_s9 + $0x308] sm:$0xff]  ;;  %v2268_v26 = vrot.slane %v2267_v49, 4 }
 0x29f   :  { %5502 = vmatmul.bf16.vlgmr.msra.gmra.mxu0 %v2536_v53  ;;  %5592 = vmatpush.bf16.msrb.mxu3 %v7322_v0  ;;  %v2470_v53 = vpop.permute.xlu0 %2469  ;;  %v7345_v0 = vld [vmem:[%s11013_s9 + $0x478] sm:$0xff]  ;;  %v7343_v18 = vld [vmem:[%s11013_s9 + $0x468] sm:$0xff] }
 0x2a0   :  { %5546 = vmatpush.bf16.msrb.mxu0 %v7305_v31  ;;  %v7359_v31 = vld [vmem:[%s11013_s9 + $0x4e8] sm:$0xff]  ;;  %v2526_v43 = vsel %vm2410_vm6, %v2456_v61, %v2470_v53 }
 0x2a1   :  { %5514 = vmatpush.bf16.msra.mxu1 %v7274_v38  ;;  %v3860_v8 = vpop.f32.mrf.mxu1  ;;  %v3886_v60 = vpop.f32.mrf.mxu3  ;;  %v7349_v38 = vld [vmem:[%s11013_s9 + $0x498] sm:$0xff]  ;;  %v2540_v10 = vpack.c.bf16 %v2526_v43, %v2526_v43 }
 0x2a2   :  { %5624 = vmatpush.bf16.msra.mxu2 %v7353_v23  ;;  %5593 = vmatmul.bf16.vlgmr.msrb.gmra.mxu3 %v2543_v2  ;;  %v3861_v58 = vadd.f32 %v3860_v8, %v3848_v7  ;;  %v3875_v56 = vpop.f32.mrf.mxu2  ;;  %v7391_v47 = vpop.permute.xlu2 %7390  ;;  %v2275_v7 = vrot.slane %v2274_v4, 4  ;;  %v7344_v2 = vld [vmem:[%s11013_s9 + $0x470] sm:$0xff] }
 0x2a3   :  { %5637 = vmatpush.bf16.msra.mxu3 %v7361_v29  ;;  %v7393_v63 = vunpack.i.h.bf16 %v7391_v47  ;;  %v7392_v13 = vunpack.i.l.bf16 %v7391_v47 }
 0x2a4   :  { %5547 = vmatpush.bf16.msrb.mxu0 %v7304_v25  ;;  %5515 = vmatmul.bf16.vlgmr.msra.gmra.mxu1 %v2537_v16  ;;  %v3849_v46 = vpop.f32.mrf.mxu0  ;;  %v3874_v21 = vadd.f32 %v3873_v59, %v3861_v58  ;;  %v7308_v25 = vld [vmem:[%s11013_s9 + $0x350] sm:$0xff]  ;;  %v2246_v16 = vsel %vm1949_vm4, %v10294_v9, 0.0  ;;  %v7335_v59 = vld [vmem:[%s11013_s9 + $0x428] sm:$0xff]  ;;  %v2331_v58 = vrot.slane %v10433_v27, 1 }
 0x2a5   :  { %5559 = vmatpush.bf16.msrb.mxu1 %v7313_v32  ;;  %v2476_v15 = vsel %vm2410_vm6, %v7392_v13, %v7393_v63  ;;  %v2247_v37 = vrot.slane %v2246_v16, 4  ;;  %v2475_v23 = vsel %vm2410_vm6, %v2470_v53, %v7392_v13  ;;  %v7380_v27 = vld [vmem:[%s11013_s9 + $0x590] sm:$0xff] }
 0x2a6   :  { %5625 = vmatpush.bf16.msra.mxu2 %v7352_v36  ;;  %v10755_v1 = vadd.f32 %v3886_v60, %v3874_v21  ;;  %v2542_v30 = vpack.c.bf16 %v2476_v15, %v2476_v15  ;;  %v2541_v55 = vpack.c.bf16 %v2475_v23, %v2475_v23  ;;  %v2254_v36 = vrot.slane %v2253_v44, 4  ;;  %v7381_v60 = vld [vmem:[%s11013_s9 + $0x598] sm:$0xff]  ;;  %v7332_v53 = vld [vmem:[%s11013_s9 + $0x410] sm:$0xff] }
 0x2a7   :  { %5638 = vmatpush.bf16.msra.mxu3 %v7360_v52  ;;  %v2248_v29 = vadd.f32 %v2247_v37, %v2246_v16  ;;  %v7334_v52 = vld [vmem:[%s11013_s9 + $0x420] sm:$0xff]  ;;  %v2355_v63 = vsel %vm1964_vm5, %v2331_v58, 0.0  ;;  %v2332_v23 = vrot.slane %v10313_v42, 1  ;;  %v7369_v42 = vld [vmem:[%s11013_s9 + $0x538] sm:$0xff]  ;;  %v7368_v58 = vld [vmem:[%s11013_s9 + $0x530] sm:$0xff] }
 0x2a8   :  { %5548 = vmatpush.bf16.msrb.mxu0 %v7303_v24  ;;  %v7307_v24 = vld [vmem:[%s11013_s9 + $0x348] sm:$0xff]  ;;  %5580 = vmatmul.bf16.vlgmr.msrb.gmra.mxu2 %v2542_v30  ;;  %v2356_v43 = vrot.slane %v2355_v63, 4 }
 0x2a9   :  { %5560 = vmatpush.bf16.msrb.mxu1 %v7312_v11  ;;  %v3862_v32 = vpop.f32.mrf.mxu1  ;;  %v3888_v57 = vpop.f32.mrf.mxu3  ;;  %v7336_v11 = vld [vmem:[%s11013_s9 + $0x430] sm:$0xff] }
 0x2aa   :  { %5626 = vmatpush.bf16.msra.mxu2 %v7351_v39  ;;  %v2255_v39 = vadd.f32 %v2254_v36, %v2253_v44 }
 0x2ab   :  { %5639 = vmatpush.bf16.msra.mxu3 %v7359_v31 }
 0x2ac   :  { %5549 = vmatpush.bf16.msrb.mxu0 %v7302_v12  ;;  %v7306_v12 = vld [vmem:[%s11013_s9 + $0x340] sm:$0xff]  ;;  %v2256_v21 = vrot.slane %v2255_v39, 2 }
 0x2ad   :  { %5561 = vmatpush.bf16.msrb.mxu1 %v7311_v3  ;;  %v7347_v3 = vld [vmem:[%s11013_s9 + $0x488] sm:$0xff] }
 0x2ae   :  { %5627 = vmatpush.bf16.msra.mxu2 %v7350_v54  ;;  %v7333_v54 = vld [vmem:[%s11013_s9 + $0x418] sm:$0xff] }
 0x2af   :  { %5640 = vmatpush.bf16.msra.mxu3 %v7358_v33  ;;  %v7379_v33 = vld [vmem:[%s11013_s9 + $0x588] sm:$0xff] }
 0x2b0   :  { %5550 = vmatpush.bf16.msrb.mxu0 %v7301_v19  ;;  %v2269_v19 = vadd.f32 %v2268_v26, %v2267_v49  ;;  %v2329_v26 = vrot.slane %v10279_v62, 1 }
 0x2b1   :  { %5562 = vmatpush.bf16.msrb.mxu1 %v7310_v20  ;;  %v2249_v20 = vrot.slane %v2248_v29, 2 }
 0x2b2   :  { %5628 = vmatpush.bf16.msra.mxu2 %v7349_v38  ;;  %v2270_v8 = vrot.slane %v2269_v19, 2 }
 0x2b3   :  { %5641 = vmatpush.bf16.msra.mxu3 %v7357_v50  ;;  %v2250_v46 = vadd.f32 %v2249_v20, %v2248_v29  ;;  %v7330_v29 = vld [vmem:[%s11013_s9 + $0x400] sm:$0xff] }
 0x2b4   :  { %5551 = vmatpush.bf16.msrb.mxu0 %v7300_v28  ;;  %v2276_v28 = vadd.f32 %v2275_v7, %v2274_v4  ;;  %v2271_v47 = vadd.f32 %v2270_v8, %v2269_v19  ;;  %v7340_v4 = vld [vmem:[%s11013_s9 + $0x450] sm:$0xff]  ;;  %v7339_v7 = vld [vmem:[%s11013_s9 + $0x448] sm:$0xff]  ;;  %v2341_v19 = vsel %vm1949_vm4, %v2329_v26, 0.0  ;;  %v7374_v26 = vld [vmem:[%s11013_s9 + $0x560] sm:$0xff] }
 0x2b5   :  { %5563 = vmatpush.bf16.msrb.mxu1 %v7309_v35  ;;  %v2334_v35 = vrot.slane %v10452_v48, 1  ;;  %v7342_v48 = vld [vmem:[%s11013_s9 + $0x460] sm:$0xff]  ;;  %v2251_v13 = vrot.slane %v2250_v46, 1 }
 0x2b6   :  { %5629 = vmatpush.bf16.msra.mxu2 %v7348_v34  ;;  %v2272_v15 = vrot.slane %v2271_v47, 1 }
 0x2b7   :  { %5642 = vmatpush.bf16.msra.mxu3 %v7356_v5  ;;  %v2376_v61 = vsel %vm1964_vm5, %v2334_v35, 0.0  ;;  %v2252_v16 = vadd.f32 %v2251_v13, %v2250_v46  ;;  %v2342_v35 = vrot.slane %v2341_v19, 4 }
 0x2b8   :  { %5552 = vmatpush.bf16.msrb.mxu0 %v7299_v14  ;;  %v2277_v14 = vrot.slane %v2276_v28, 2  ;;  %v2377_v32 = vrot.slane %v2376_v61, 4  ;;  %v2273_v37 = vadd.f32 %v2272_v15, %v2271_v47 }
 0x2b9   :  { %5564 = vmatpush.bf16.msrb.mxu1 %v7308_v25 }
 0x2ba   :  { %5630 = vmatpush.bf16.msra.mxu2 %v7347_v3  ;;  %v2278_v25 = vadd.f32 %v2277_v14, %v2276_v28  ;;  %v2487_v62 = vsel %vm1557_vm2, %v2273_v37, %v2252_v16 }
 0x2bb   :  { %5643 = vmatpush.bf16.msra.mxu3 %v7355_v17 }
 0x2bc   :  { %5553 = vmatpush.bf16.msrb.mxu0 %v7298_v45  ;;  %v3899_v31 = vpop.f32.mrf.mxu0  ;;  %v2279_v34 = vrot.slane %v2278_v25, 1 }
 0x2bd   :  { %5565 = vmatpush.bf16.msrb.mxu1 %v7307_v24  ;;  %v3900_v56 = vadd.f32 %v3899_v31, %v10755_v1  ;;  %v2257_v1 = vadd.f32 %v2256_v21, %v2255_v39  ;;  %v2333_v39 = vrot.slane %v10324_v40, 1  ;;  %v7377_v21 = vld [vmem:[%s11013_s9 + $0x578] sm:$0xff] }
 0x2be   :  { %5631 = vmatpush.bf16.msra.mxu2 %v7346_v51  ;;  %v3925_v30 = vpop.f32.mrf.mxu2  ;;  %v2280_v3 = vadd.f32 %v2279_v34, %v2278_v25  ;;  %v2544_v51 = vpack.c.bf16 %v2487_v62, %v2487_v62  ;;  %v7376_v25 = vld [vmem:[%s11013_s9 + $0x570] sm:$0xff] }
 0x2bf   :  { %5554 = vmatmul.bf16.vlgmr.msrb.gmra.mxu0 %v2540_v10  ;;  %5644 = vmatpush.bf16.msra.mxu3 %v7354_v22  ;;  %v7331_v10 = vld [vmem:[%s11013_s9 + $0x408] sm:$0xff]  ;;  %v2258_v50 = vrot.slane %v2257_v1, 1 }
 0x2c0   :  { %5598 = vmatpush.bf16.msra.mxu0 %v7337_v41  ;;  %v7341_v41 = vld [vmem:[%s11013_s9 + $0x458] sm:$0xff]  ;;  %v3938_v57 = vpop.f32.mrf.mxu3 }
 0x2c1   :  { %5566 = vmatpush.bf16.msrb.mxu1 %v7306_v12  ;;  %v3912_v38 = vpop.f32.mrf.mxu1  ;;  %v2357_v12 = vadd.f32 %v2356_v43, %v2355_v63  ;;  %v2259_v5 = vadd.f32 %v2258_v50, %v2257_v1  ;;  %v2369_v63 = vsel %vm1949_vm4, %v2333_v39, 0.0  ;;  %v7366_v43 = vld [vmem:[%s11013_s9 + $0x520] sm:$0xff]  ;;  %v7365_v50 = vld [vmem:[%s11013_s9 + $0x518] sm:$0xff] }
 0x2c2   :  { %5680 = vmatpush.bf16.msrb.mxu2 %v7381_v60  ;;  %v3913_v45 = vadd.f32 %v3912_v38, %v3900_v56 }
 0x2c3   :  { %v2358_v36 = vrot.slane %v2357_v12, 2  ;;  %v2488_v28 = vsel %vm1557_vm2, %v2280_v3, %v2259_v5 }
 0x2c4   :  { %5599 = vmatpush.bf16.msra.mxu0 %v7336_v11  ;;  %5567 = vmatmul.bf16.vlgmr.msrb.gmra.mxu1 %v2541_v55  ;;  %v3901_v24 = vpop.f32.mrf.mxu0  ;;  %v3926_v49 = vadd.f32 %v3925_v30, %v3913_v45  ;;  %v7378_v11 = vld [vmem:[%s11013_s9 + $0x580] sm:$0xff]  ;;  %v2370_v30 = vrot.slane %v2369_v63, 4 }
 0x2c5   :  { %5611 = vmatpush.bf16.msra.mxu1 %v7345_v0  ;;  %v2378_v0 = vadd.f32 %v2377_v32, %v2376_v61  ;;  %v2359_v40 = vadd.f32 %v2358_v36, %v2357_v12  ;;  %v7367_v61 = vld [vmem:[%s11013_s9 + $0x528] sm:$0xff]  ;;  %v4302_v24 = vld [vmem:[%s11014_s10] sm:$0x1] }
 0x2c6   :  { %5681 = vmatpush.bf16.msrb.mxu2 %v7380_v27  ;;  %v10862_v44 = vadd.f32 %v3938_v57, %v3926_v49  ;;  %v7375_v32 = vld [vmem:[%s11013_s9 + $0x568] sm:$0xff] }
 0x2c7   :  { %v2379_v17 = vrot.slane %v2378_v0, 2  ;;  %v2360_v15 = vrot.slane %v2359_v40, 1 }
 0x2c8   :  { %5600 = vmatpush.bf16.msra.mxu0 %v7335_v59  ;;  %v3927_v59 = vpop.f32.mrf.mxu2  ;;  %v3940_v20 = vpop.f32.mrf.mxu3 }
 0x2c9   :  { %5612 = vmatpush.bf16.msra.mxu1 %v7344_v2  ;;  %v3914_v55 = vpop.f32.mrf.mxu1  ;;  %v2362_v2 = vsel %vm1949_vm4, %v2332_v23, 0.0  ;;  %v2380_v14 = vadd.f32 %v2379_v17, %v2378_v0  ;;  %v2361_v57 = vadd.f32 %v2360_v15, %v2359_v40  ;;  %v7364_v0 = vld [vmem:[%s11013_s9 + $0x510] sm:$0xff] }
 0x2ca   :  { %5682 = vmatpush.bf16.msrb.mxu2 %v7379_v33  ;;  %v7396_v8 = vpop.permute.xlu1 %7395  ;;  %v2363_v31 = vrot.slane %v2362_v2, 4  ;;  %v7372_v20 = vld [vmem:[%s11013_s9 + $0x550] sm:$0xff] }
 0x2cb   :  { %v2506_v60 = vpop.permute.xlu2 %2505  ;;  %v7397_v22 = vunpack.i.l.bf16 %v7396_v8  ;;  %v2381_v33 = vrot.slane %v2380_v14, 1 }
 0x2cc   :  { %5601 = vmatpush.bf16.msra.mxu0 %v7334_v52  ;;  %v2330_v52 = vrot.slane %v10294_v9, 1  ;;  %v7338_v9 = vld [vmem:[%s11013_s9 + $0x440] sm:$0xff]  ;;  %v2364_v1 = vadd.f32 %v2363_v31, %v2362_v2 }
 0x2cd   :  { %5613 = vmatpush.bf16.msra.mxu1 %v7343_v18  ;;  %v7398_v18 = vunpack.i.h.bf16 %v7396_v8  ;;  %v2527_v56 = vsel %vm2410_vm6, %v2488_v28, %v7397_v22  ;;  %v2382_v16 = vadd.f32 %v2381_v33, %v2380_v14  ;;  %v7362_v28 = vld [vmem:[%s11013_s9 + $0x500] sm:$0xff] }
 0x2ce   :  { %5683 = vmatpush.bf16.msrb.mxu2 %v7378_v11  ;;  %v2545_v13 = vpack.c.bf16 %v2527_v56, %v2527_v56  ;;  %v4303_v11 = vmul.f32 16.0, %v4302_v24 }
 0x2cf   :  { %v2507_v46 = vsel %vm2410_vm6, %v7397_v22, %v7398_v18  ;;  %v2520_v23 = vsel %vm1557_vm2, %v2382_v16, %v2361_v57 }
 0x2d0   :  { %5602 = vmatpush.bf16.msra.mxu0 %v7333_v54  ;;  %v2508_v54 = vsel %vm2410_vm6, %v7398_v18, %v2506_v60  ;;  %v2546_v47 = vpack.c.bf16 %v2507_v46, %v2507_v46  ;;  %v4305_v62 = vperm.slane %v4303_v11, 0 }
 0x2d1   :  { %5614 = vmatpush.bf16.msra.mxu1 %v7342_v48  ;;  %v2547_v27 = vpack.c.bf16 %v2508_v54, %v2508_v54  ;;  %v2348_v48 = vsel %vm1949_vm4, %v2330_v52, 0.0 }
 0x2d2   :  { %5632 = vmatmul.bf16.vlgmr.msra.gmra.mxu2 %v2546_v47  ;;  %v2349_v38 = vrot.slane %v2348_v48, 4 }
 0x2d3   :  { %5645 = vmatmul.bf16.vlgmr.msra.gmra.mxu3 %v2547_v27 }
 0x2d4   :  { %5603 = vmatpush.bf16.msra.mxu0 %v7332_v53  ;;  %v2343_v53 = vadd.f32 %v2342_v35, %v2341_v19  ;;  %v2350_v49 = vadd.f32 %v2349_v38, %v2348_v48  ;;  %v7363_v19 = vld [vmem:[%s11013_s9 + $0x508] sm:$0xff] }
 0x2d5   :  { %5615 = vmatpush.bf16.msra.mxu1 %v7341_v41  ;;  %v2365_v41 = vrot.slane %v2364_v1, 2 }
 0x2d6   :  { %v2344_v45 = vrot.slane %v2343_v53, 2  ;;  %v2351_v12 = vrot.slane %v2350_v49, 2 }
 0x2d7   :  { %v2366_v37 = vadd.f32 %v2365_v41, %v2364_v1 }
 0x2d8   :  { %5604 = vmatpush.bf16.msra.mxu0 %v7331_v10  ;;  %v2371_v10 = vadd.f32 %v2370_v30, %v2369_v63  ;;  %v2345_v34 = vadd.f32 %v2344_v45, %v2343_v53  ;;  %v2352_v55 = vadd.f32 %v2351_v12, %v2350_v49 }
 0x2d9   :  { %5616 = vmatpush.bf16.msra.mxu1 %v7340_v4  ;;  %v2367_v3 = vrot.slane %v2366_v37, 1 }
 0x2da   :  { %v2372_v4 = vrot.slane %v2371_v10, 2  ;;  %v2346_v5 = vrot.slane %v2345_v34, 1  ;;  %v2353_v52 = vrot.slane %v2352_v55, 1 }
 0x2db   :  { %v2368_v17 = vadd.f32 %v2367_v3, %v2366_v37 }
 0x2dc   :  { %5605 = vmatpush.bf16.msra.mxu0 %v7330_v29  ;;  %v2550_v29 = vpack.c.bf16 %v2520_v23, %v2520_v23  ;;  %v2373_v59 = vadd.f32 %v2372_v4, %v2371_v10  ;;  %v2347_v2 = vadd.f32 %v2346_v5, %v2345_v34  ;;  %v2354_v35 = vadd.f32 %v2353_v52, %v2352_v55  ;;  %v5718_v55 = vld [vmem:[%s11019_s15 + $0x70] sm:$0xff] }
 0x2dd   :  { %5617 = vmatpush.bf16.msra.mxu1 %v7339_v7  ;;  %v5710_v52 = vld [vmem:[%s11019_s15 + $0x30] sm:$0xff] }
 0x2de   :  { %v5399_v36 = vpop.f32.mrf.mxu0  ;;  %v5425_v7 = vpop.f32.mrf.mxu2  ;;  %v2374_v39 = vrot.slane %v2373_v59, 1  ;;  %v2518_v8 = vsel %vm1557_vm2, %v2368_v17, %v2347_v2  ;;  %v5713_v2 = vld [vmem:[%s11019_s15 + $0x48] sm:$0xff]  ;;  %v5712_v17 = vld [vmem:[%s11019_s15 + $0x40] sm:$0xff] }
 0x2df   :  { %5606 = vmatmul.bf16.vlgmr.msra.gmra.mxu0 %v2544_v51  ;;  %v5400_v51 = vadd.f32 %v5399_v36, %v4305_v62  ;;  %v5719_v62 = vld [vmem:[%s11019_s15 + $0x78] sm:$0xff]  ;;  %v5716_v36 = vld [vmem:[%s11019_s15 + $0x60] sm:$0xff] }
 0x2e0   :  { %5650 = vmatpush.bf16.msrb.mxu0 %v7369_v42  ;;  %v7373_v42 = vld [vmem:[%s11013_s9 + $0x558] sm:$0xff]  ;;  %v5438_v18 = vpop.f32.mrf.mxu3  ;;  %v2375_v31 = vadd.f32 %v2374_v39, %v2373_v59  ;;  %5724 = vmatpush.msrb.mxu3 %v5719_v62  ;;  %v5717_v59 = vld [vmem:[%s11019_s15 + $0x68] sm:$0xff] }
 0x2e1   :  { %5618 = vmatpush.bf16.msra.mxu1 %v7338_v9  ;;  %v2548_v9 = vpack.c.bf16 %v2518_v8, %v2518_v8 }
 0x2e2   :  { %7057 = vmatmul.msk.bf16.vlgmr.msrb.gmra.mxu2 %vm2410_vm6, %v2550_v29  ;;  %v2519_v14 = vsel %vm1557_vm2, %v2375_v31, %v2354_v35  ;;  %5725 = vmatpush.msrb.mxu3 %v5718_v55  ;;  %v5707_v35 = vld [vmem:[%s11019_s15 + $0x18] sm:$0xff] }
 0x2e3   :  { %v2549_v48 = vpack.c.bf16 %v2519_v14, %v2519_v14 }
 0x2e4   :  { %5651 = vmatpush.bf16.msrb.mxu0 %v7368_v58  ;;  %5619 = vmatmul.bf16.vlgmr.msra.gmra.mxu1 %v2545_v13  ;;  %v7371_v58 = vld [vmem:[%s11013_s9 + $0x548] sm:$0xff] }
 0x2e5   :  { %5663 = vmatpush.bf16.msrb.mxu1 %v7377_v21  ;;  %v7370_v21 = vld [vmem:[%s11013_s9 + $0x540] sm:$0xff]  ;;  %5726 = vmatpush.msrb.mxu3 %v5717_v59 }
 0x2e6   :  { %v5401_v46 = vpop.f32.mrf.mxu0  ;;  %v5427_v56 = vpop.f32.mrf.mxu2 }
 0x2e7   :  { %5727 = vmatpush.msrb.mxu3 %v5716_v36  ;;  %v5705_v46 = vld [vmem:[%s11019_s15 + $0x8] sm:$0xff] }
 0x2e8   :  { %5652 = vmatpush.bf16.msrb.mxu0 %v7367_v61  ;;  %v5412_v60 = vpop.f32.mrf.mxu1  ;;  %v5440_v27 = vpop.f32.mrf.mxu3 }
 0x2e9   :  { %5664 = vmatpush.bf16.msrb.mxu1 %v7376_v25  ;;  %v5413_v22 = vadd.f32 %v5412_v60, %v5400_v51 }
 0x2eb   :  { %v5426_v40 = vadd.f32 %v5425_v7, %v5413_v22  ;;  %v5715_v7 = vld [vmem:[%s11019_s15 + $0x58] sm:$0xff] }
 0x2ec   :  { %5653 = vmatpush.bf16.msrb.mxu0 %v7366_v43  ;;  %5728 = vmatpush.msrb.mxu3 %v5715_v7 }
 0x2ed   :  { %5665 = vmatpush.bf16.msrb.mxu1 %v7375_v32  ;;  %v5439_v54 = vadd.f32 %v5438_v18, %v5426_v40  ;;  %v5708_v18 = vld [vmem:[%s11019_s15 + $0x20] sm:$0xff] }
 0x2f0   :  { %5654 = vmatpush.bf16.msrb.mxu0 %v7365_v50  ;;  %v5414_v47 = vpop.f32.mrf.mxu1 }
 0x2f1   :  { %5666 = vmatpush.bf16.msrb.mxu1 %v7374_v26 }
 0x2f4   :  { %5655 = vmatpush.bf16.msrb.mxu0 %v7364_v0 }
 0x2f5   :  { %5667 = vmatpush.bf16.msrb.mxu1 %v7373_v42 }
 0x2f8   :  { %5656 = vmatpush.bf16.msrb.mxu0 %v7363_v19  ;;  %v5714_v19 = vld [vmem:[%s11019_s15 + $0x50] sm:$0xff] }
 0x2f9   :  { %5668 = vmatpush.bf16.msrb.mxu1 %v7372_v20  ;;  %5729 = vmatpush.msrb.mxu3 %v5714_v19  ;;  %v5711_v20 = vld [vmem:[%s11019_s15 + $0x38] sm:$0xff] }
 0x2fb   :  { %5730 = vmatpush.msrb.mxu3 %v5713_v2 }
 0x2fc   :  { %5657 = vmatpush.bf16.msrb.mxu0 %v7362_v28  ;;  %v5451_v63 = vpop.f32.mrf.mxu0  ;;  %v5709_v28 = vld [vmem:[%s11019_s15 + $0x28] sm:$0xff] }
 0x2fd   :  { %5669 = vmatpush.bf16.msrb.mxu1 %v7371_v58  ;;  %v5452_v13 = vadd.f32 %v5451_v63, %v5439_v54  ;;  %5731 = vmatpush.msrb.mxu3 %v5712_v17  ;;  %v5704_v54 = vld [vmem:[%s11019_s15] sm:$0xff] }
 0x2ff   :  { %5658 = vmatmul.bf16.vlgmr.msrb.gmra.mxu0 %v2548_v9  ;;  %v5477_v25 = vpop.f32.mrf.mxu2  ;;  %5732 = vmatpush.msrb.mxu3 %v5711_v20  ;;  %v5706_v9 = vld [vmem:[%s11019_s15 + $0x10] sm:$0xff] }
 0x301   :  { %5670 = vmatpush.bf16.msrb.mxu1 %v7370_v21  ;;  %v5464_v61 = vpop.f32.mrf.mxu1  ;;  %5733 = vmatpush.msrb.mxu3 %v5710_v52 }
 0x302   :  { %v5465_v53 = vadd.f32 %v5464_v61, %v5452_v13 }
 0x303   :  { %v5490_v38 = vpop.f32.mrf.mxu3  ;;  %5734 = vmatpush.msrb.mxu3 %v5709_v28 }
 0x304   :  { %5671 = vmatmul.bf16.vlgmr.msrb.gmra.mxu1 %v2549_v48  ;;  %v5453_v1 = vpop.f32.mrf.mxu0  ;;  %v5478_v15 = vadd.f32 %v5477_v25, %v5465_v53 }
 0x305   :  { %5735 = vmatpush.msrb.mxu3 %v5708_v18 }
 0x306   :  { %v5491_v30 = vadd.f32 %v5490_v38, %v5478_v15  ;;  %v5689_v15 = vld [vmem:[%s11017_s13] sm:$0x7] }
 0x307   :  { %v5479_v43 = vpop.f32.mrf.mxu2  ;;  %5736 = vmatpush.msrb.mxu3 %v5707_v35  ;;  %v5690_v38 = vperm.slane %v5689_v15, 0 }
 0x308   :  { %v5692_v43 = vperm.slane %v5689_v15, 1 }
 0x309   :  { %v5466_v33 = vpop.f32.mrf.mxu1  ;;  %5737 = vmatpush.msrb.mxu3 %v5706_v9 }
 0x30b   :  { %v5492_v45 = vpop.f32.mrf.mxu3  ;;  %5738 = vmatpush.msrb.mxu3 %v5705_v46 }
 0x30d   :  { %5739 = vmatpush.msrb.mxu3 %v5704_v54 }
 0x30f   :  { %v5529_v32 = vpop.f32.mrf.mxu2 }
 0x313   :  { %v5542_v16 = vpop.f32.mrf.mxu3 }
 0x317   :  { %v5531_v50 = vpop.f32.mrf.mxu2 }
 0x31b   :  { %v5544_v11 = vpop.f32.mrf.mxu3 }
 0x31c   :  { %v5503_v41 = vpop.f32.mrf.mxu0 }
 0x31d   :  { %v5504_v57 = vadd.f32 %v5503_v41, %v5491_v30  ;;  %v5695_v41 = vperm.slane %v5689_v15, 2 }
 0x321   :  { %v5516_v24 = vpop.f32.mrf.mxu1 }
 0x322   :  { %v5517_v49 = vadd.f32 %v5516_v24, %v5504_v57  ;;  %v5691_v57 = vmul.f32 %v5690_v38, %v10862_v44  ;;  %v5696_v24 = vmul.f32 %v5695_v41, %v10493_v6 }
 0x324   :  { %v5505_v10 = vpop.f32.mrf.mxu0  ;;  %v5530_v34 = vadd.f32 %v5529_v32, %v5517_v49 }
 0x325   :  { %v5594_v23 = vpop.f32.mrf.mxu3  ;;  %v7400_v10 = vld [vmem:[%s11018_s14] ss:$0 sm:$0xff] }
 0x326   :  { %v5543_v37 = vadd.f32 %v5542_v16, %v5530_v34 }
 0x329   :  { %v5518_v26 = vpop.f32.mrf.mxu1 }
 0x32a   :  { %v7401_v26 = vld [vmem:[%s11020_s16] ss:$0 sm:$0xff] }
 0x32b   :  { %v5581_v0 = vpop.f32.mrf.mxu2 }
 0x32d   :  { %v5596_v12 = vpop.f32.mrf.mxu3 }
 0x333   :  { %v5583_v29 = vpop.f32.mrf.mxu2 }
 0x33c   :  { %v5555_v4 = vpop.f32.mrf.mxu0 }
 0x33d   :  { %v5556_v22 = vadd.f32 %v5555_v4, %v5543_v37 }
 0x341   :  { %v5568_v5 = vpop.f32.mrf.mxu1 }
 0x342   :  { %v5569_v31 = vadd.f32 %v5568_v5, %v5556_v22 }
 0x344   :  { %v5557_v3 = vpop.f32.mrf.mxu0  ;;  %v5582_v56 = vadd.f32 %v5581_v0, %v5569_v31 }
 0x346   :  { %v5595_v47 = vadd.f32 %v5594_v23, %v5582_v56 }
 0x349   :  { %v5570_v42 = vpop.f32.mrf.mxu1 }
 0x355   :  { %v5633_v60 = vpop.f32.mrf.mxu2 }
 0x356   :  { %v5646_v58 = vpop.f32.mrf.mxu3 }
 0x35c   :  { %v5607_v51 = vpop.f32.mrf.mxu0 }
 0x35d   :  { %v5635_v21 = vpop.f32.mrf.mxu2  ;;  %v5608_v27 = vadd.f32 %v5607_v51, %v5595_v47 }
 0x35e   :  { %v5648_v14 = vpop.f32.mrf.mxu3 }
 0x361   :  { %v5620_v39 = vpop.f32.mrf.mxu1 }
 0x362   :  { %v5621_v48 = vadd.f32 %v5620_v39, %v5608_v27 }
 0x364   :  { %v5609_v8 = vpop.f32.mrf.mxu0  ;;  %v5634_v13 = vadd.f32 %v5633_v60, %v5621_v48 }
 0x365   :  { %v5685_v63 = vpop.f32.mrf.mxu2 }
 0x366   :  { %v5647_v53 = vadd.f32 %v5646_v58, %v5634_v13 }
 0x369   :  { %v5622_v40 = vpop.f32.mrf.mxu1 }
 0x36d   :  { %v5687_v1 = vpop.f32.mrf.mxu2 }
 0x37c   :  { %v5659_v61 = vpop.f32.mrf.mxu0 }
 0x37d   :  { %v5660_v25 = vadd.f32 %v5659_v61, %v5647_v53 }
 0x381   :  { %v5672_v33 = vpop.f32.mrf.mxu1 }
 0x382   :  { %v5673_v30 = vadd.f32 %v5672_v33, %v5660_v25 }
 0x384   :  { %v5661_v45 = vpop.f32.mrf.mxu0  ;;  %v5686_v32 = vadd.f32 %v5685_v63, %v5673_v30 }
 0x386   :  { %v5693_v16 = vmul.f32 %v5692_v43, %v5686_v32 }
 0x388   :  { %v5694_v49 = vadd.f32 %v5693_v16, %v5691_v57 }
 0x389   :  { %v5674_v50 = vpop.f32.mrf.mxu1 }
 0x38a   :  { %v5697_v34 = vadd.f32 %v5696_v24, %v5694_v49 }
 0x38c   :  { %v5702_v37 = vadd.f32 %v7400_v10, %v5697_v34 }
 0x38e   :  { %v5703_v11 = vmax.f32 %v5702_v37, 0.0 }
 0x390   :  { %5740 = vmatmul.f32.vlgmr.msrb.gmra.mxu3 %v5703_v11 }
 0x413   :  { %v5741_v6 = vpop.f32.mrf.mxu3 }
 0x414   :  { %v5742_v44 = vadd.f32 %v7401_v26, %v5741_v6 }
 0x416   :  { %5744 = vst [vmem:[#allocation2] sm:$0x3] %v5742_v44 }
 0x417   :  { %5755 = dma.vmem_to_hbm [thread:$0]  %s5751_s1, 32, %s5753_s11, [#allocation3]  }
 0x418   :  { %7441 = dma.done.wait [#allocation3], 32  }
 0x419   :  { %7442 = vsyncadd [#allocation3], 4294967264 }
 0x41a   :  { %5760 = vsyncpa [#allocation3], 1 }

</bundles_post_ra>
